<compile_context>
chip_gen: v7x
topology: tpu7x:2x2x1
jax: 0.10.0
libtpu: 0.0.40
codegen_flags: <defaults>
</compile_context>

<pallas_src>
import functools
import math

import jax
import jax.numpy as jnp
import jax.scipy.linalg as jsl
import numpy as np
from jax.experimental import pallas as pl
from jax.experimental.pallas import tpu as pltpu


def _round_up(x, m):
    return (x + m - 1) // m * m


# ---------------------------------------------------------------------------
# Tiled matmul kernel: (M,K) @ (K,N) + bias, optional ReLU, optional per-N
# scale.  Single-K-block fast path has no scratch / no phases.
# ---------------------------------------------------------------------------

def _matmul_kernel(*refs, apply_relu, has_scale, multi_k):
    if multi_k:
        acc_ref = refs[-1]
        o_ref = refs[-2]
    else:
        acc_ref = None
        o_ref = refs[-1]
    a_ref, b_ref, bias_ref = refs[0], refs[1], refs[2]
    scale_ref = refs[3] if has_scale else None

    def epilogue(acc):
        r = acc + bias_ref[...]
        if apply_relu:
            r = jnp.maximum(r, 0.0)
        if has_scale:
            r = r * scale_ref[...]
        return r.astype(o_ref.dtype)

    if multi_k:
        k = pl.program_id(2)

        @pl.when(k == 0)
        def _():
            acc_ref[...] = jnp.zeros_like(acc_ref)

        acc_ref[...] += jnp.dot(a_ref[...], b_ref[...],
                                preferred_element_type=jnp.float32)

        @pl.when(k == pl.num_programs(2) - 1)
        def _():
            o_ref[...] = epilogue(acc_ref[...])
    else:
        o_ref[...] = epilogue(jnp.dot(a_ref[...], b_ref[...],
                                      preferred_element_type=jnp.float32))


def matmul_bias(a, b, bias, *, scale=None, apply_relu=False,
                out_dtype=jnp.float32, operand_dtype=jnp.bfloat16,
                tm_max=256, tn_max=512, tk_max=1024):
    """(M,K) @ (K,N) + bias[N] (* scale[N]) with fused ReLU, on the MXU."""
    M, K = a.shape
    K2, N = b.shape
    assert K == K2
    has_scale = scale is not None

    # --- N tiling: always lane-dense (pad to 128), full-N resident if small.
    Np = _round_up(N, 128)
    if Np <= tn_max:
        tn = Np
    elif Np % tn_max == 0:
        tn = tn_max
    elif Np % 256 == 0:
        tn = 256
    else:
        tn = 128

    # --- K tiling: single block when it fits (the common case here).
    if K <= tk_max:
        tk, Kp = K, K
    else:
        tk = tk_max
        Kp = _round_up(K, tk)

    # --- M tiling: aim for >= 2 blocks so both v7x TensorCores get work.
    sub = 32 // jnp.dtype(operand_dtype).itemsize      # 16 for bf16, 8 for f32
    if _round_up(M, sub) <= tm_max:
        tm = _round_up(-(-M // 2), sub) if M >= 2 * sub else _round_up(M, sub)
    else:
        tm = tm_max
    Mp = _round_up(M, tm)

    nm, nn, nk = Mp // tm, Np // tn, Kp // tk
    multi_k = nk > 1

    # --- operand prep ------------------------------------------------------
    a_p = a.astype(operand_dtype)
    if (Mp, Kp) != (M, K):
        a_p = jnp.pad(a_p, ((0, Mp - M), (0, Kp - K)))
    b_p = b.astype(operand_dtype)
    if (Kp, Np) != (K, N):
        b_p = jnp.pad(b_p, ((0, Kp - K), (0, Np - N)))
    bias_p = bias.astype(jnp.float32).reshape(1, N)
    if Np != N:
        bias_p = jnp.pad(bias_p, ((0, 0), (0, Np - N)))

    inputs = [a_p, b_p, bias_p]
    in_specs = [
        pl.BlockSpec((tm, tk), lambda i, j, k: (i, k)),
        pl.BlockSpec((tk, tn), lambda i, j, k: (k, j)),
        pl.BlockSpec((1, tn), lambda i, j, k: (0, j)),
    ]
    if has_scale:
        scale_p = scale.astype(jnp.float32).reshape(1, N)
        if Np != N:
            scale_p = jnp.pad(scale_p, ((0, 0), (0, Np - N)))
        inputs.append(scale_p)
        in_specs.append(pl.BlockSpec((1, tn), lambda i, j, k: (0, j)))

    kernel = functools.partial(_matmul_kernel, apply_relu=apply_relu,
                               has_scale=has_scale, multi_k=multi_k)
    scratch = [pltpu.VMEM((tm, tn), jnp.float32)] if multi_k else []

    out = pl.pallas_call(
        kernel,
        out_shape=jax.ShapeDtypeStruct((Mp, Np), out_dtype),
        grid_spec=pltpu.PrefetchScalarGridSpec(
            num_scalar_prefetch=0,
            grid=(nm, nn, nk),
            in_specs=in_specs,
            out_specs=pl.BlockSpec((tm, tn), lambda i, j, k: (i, j)),
            scratch_shapes=scratch,
        ),
        compiler_params=pltpu.CompilerParams(
            dimension_semantics=("parallel", "parallel", "arbitrary"),
            vmem_limit_bytes=32 * 1024 * 1024,
        ),
    )(*inputs)

    if (Mp, Np) != (M, N):
        out = out[:M, :N]
    return out


# ---------------------------------------------------------------------------
# Direct 9-tap 3x3 conv kernel (padding=1 semantics), bias/ReLU/scale fused.
# One grid step per batch element; weights fully VMEM-resident.
# ---------------------------------------------------------------------------

def _conv3x3_kernel(*refs, Wp, C, apply_relu, has_scale):
    o_ref = refs[-1]
    x_ref, w_ref, bias_ref = refs[0], refs[1], refs[2]
    scale_ref = refs[3] if has_scale else None

    M, Np = o_ref.shape
    acc = jnp.zeros((M, Np), jnp.float32)
    for kh in range(3):
        for kw in range(3):
            off = kh * Wp + kw
            patch = x_ref[off:off + M, :]                       # shifted window
            tap = w_ref[(3 * kh + kw) * C:(3 * kh + kw + 1) * C, :]
            acc = acc + jnp.dot(patch, tap,
                                preferred_element_type=jnp.float32)
    r = acc + bias_ref[...]
    if apply_relu:
        r = jnp.maximum(r, 0.0)
    if has_scale:
        r = r * scale_ref[...]
    o_ref[...] = r.astype(o_ref.dtype)


def conv3x3_direct(x_nhwc, w_oihw, b, *, pad_value=0.0, apply_relu=False,
                   scale=None, out_dtype=jnp.float32,
                   operand_dtype=jnp.bfloat16):
    """Direct 3x3 conv (stride 1, pad 1).  No im2col slab in HBM.

    The kernel computes H*(W+2) output rows per batch (two wrap-around junk
    columns per row, sliced off afterwards) so every tap is a *contiguous*
    shifted window of the flattened padded image.
    """
    B, H, W, C = x_nhwc.shape
    Cout = w_oihw.shape[0]
    Wp = W + 2
    Lrows = (H + 3) * Wp     # 1 top pad row + 2 bottom pad rows (tap overrun)
    M = H * Wp               # output rows per batch (incl. junk columns)
    Np = _round_up(Cout, 128)   # lane-dense stores; N-padding is MXU-free
    has_scale = scale is not None

    xp = jnp.pad(x_nhwc.astype(operand_dtype),
                 ((0, 0), (1, 2), (1, 1), (0, 0)),
                 constant_values=pad_value)
    xf = xp.reshape(B, Lrows, C)

    wmat = jnp.transpose(w_oihw, (2, 3, 1, 0)).reshape(9 * C, Cout)
    wmat = wmat.astype(operand_dtype)
    bias_p = b.astype(jnp.float32).reshape(1, Cout)
    if Np != Cout:
        wmat = jnp.pad(wmat, ((0, 0), (0, Np - Cout)))
        bias_p = jnp.pad(bias_p, ((0, 0), (0, Np - Cout)))

    inputs = [xf, wmat, bias_p]
    in_specs = [
        pl.BlockSpec((None, Lrows, C), lambda bi: (bi, 0, 0)),
        pl.BlockSpec((9 * C, Np), lambda bi: (0, 0)),    # resident weights
        pl.BlockSpec((1, Np), lambda bi: (0, 0)),
    ]
    if has_scale:
        scale_p = scale.astype(jnp.float32).reshape(1, Cout)
        if Np != Cout:
            scale_p = jnp.pad(scale_p, ((0, 0), (0, Np - Cout)))
        inputs.append(scale_p)
        in_specs.append(pl.BlockSpec((1, Np), lambda bi: (0, 0)))

    kernel = functools.partial(_conv3x3_kernel, Wp=Wp, C=C,
                               apply_relu=apply_relu, has_scale=has_scale)
    out = pl.pallas_call(
        kernel,
        out_shape=jax.ShapeDtypeStruct((B, M, Np), out_dtype),
        grid_spec=pltpu.PrefetchScalarGridSpec(
            num_scalar_prefetch=0,
            grid=(B,),
            in_specs=in_specs,
            out_specs=pl.BlockSpec((None, M, Np), lambda bi: (bi, 0, 0)),
        ),
        compiler_params=pltpu.CompilerParams(
            dimension_semantics=("parallel",),
            vmem_limit_bytes=32 * 1024 * 1024,
        ),
    )(*inputs)

    # (B, H, Wp, Np): drop the 2 junk columns per row and the lane padding.
    return out.reshape(B, H, Wp, Np)[:, :, :W, :Cout]


# ---------------------------------------------------------------------------
# Lane-dense element-wise kernels with fused per-sample reductions.
# ---------------------------------------------------------------------------

def _coupling_kernel(in_b_ref, log_s_ref, t_ref, out_ref, sum_ref, *,
                     valid, need_mask):
    z = log_s_ref[...] + 2.0
    e = jnp.exp(-jnp.abs(z))                       # one exp feeds both paths
    s = jnp.where(z >= 0.0, 1.0, e) / (1.0 + e)    # sigmoid(z), stable
    out_ref[...] = (in_b_ref[...] + t_ref[...]) * s
    log_sig = jnp.minimum(z, 0.0) - jnp.log(1.0 + e)   # log(sigmoid(z)), stable
    if need_mask:
        r, l = log_sig.shape
        idx = (jax.lax.broadcasted_iota(jnp.int32, (r, l), 0) * l
               + jax.lax.broadcasted_iota(jnp.int32, (r, l), 1))
        log_sig = jnp.where(idx < valid, log_sig, 0.0)
    sum_ref[...] = jnp.sum(log_sig, keepdims=True)


def coupling_affine_fused(in_b, log_s, t):
    """in_b/log_s/t: (B, S).  Returns out_b (B, S) and per-sample logdet (B,)."""
    B, S = in_b.shape
    Sp = _round_up(S, 128)
    R = Sp // 128
    need_mask = Sp != S

    def prep(a):
        a = a.astype(jnp.float32)
        if need_mask:
            a = jnp.pad(a, ((0, 0), (0, Sp - S)))
        return a.reshape(B, R, 128)

    spec = pl.BlockSpec((None, R, 128), lambda bi: (bi, 0, 0))
    kernel = functools.partial(_coupling_kernel, valid=S, need_mask=need_mask)
    out_b, lsum = pl.pallas_call(
        kernel,
        out_shape=(jax.ShapeDtypeStruct((B, R, 128), jnp.float32),
                   jax.ShapeDtypeStruct((B, 1, 1), jnp.float32)),
        grid_spec=pltpu.PrefetchScalarGridSpec(
            num_scalar_prefetch=0, grid=(B,),
            in_specs=[spec, spec, spec],
            out_specs=[spec, pl.BlockSpec((None, 1, 1), lambda bi: (bi, 0, 0))]),
        compiler_params=pltpu.CompilerParams(
            dimension_semantics=("parallel",)),
    )(prep(in_b), prep(log_s), prep(t))

    out_b = out_b.reshape(B, Sp)
    if need_mask:
        out_b = out_b[:, :S]
    return out_b, lsum.reshape(B)


def _glogp_kernel(x_ref, m_ref, ls_ref, sum_ref, *, valid, need_mask):
    ls = ls_ref[...]
    d = x_ref[...] - m_ref[...]
    lp = (-0.5 * math.log(2.0 * math.pi)) - ls - 0.5 * d * d * jnp.exp(-2.0 * ls)
    if need_mask:
        r, l = lp.shape
        idx = (jax.lax.broadcasted_iota(jnp.int32, (r, l), 0) * l
               + jax.lax.broadcasted_iota(jnp.int32, (r, l), 1))
        lp = jnp.where(idx < valid, lp, 0.0)
    sum_ref[...] = jnp.sum(lp, keepdims=True)


def gaussian_logp_sum(x, mean, log_sd):
    """x/mean/log_sd: (B, S).  Returns the per-sample sum of gaussian_log_p."""
    B, S = x.shape
    Sp = _round_up(S, 128)
    R = Sp // 128
    need_mask = Sp != S

    def prep(a):
        a = a.astype(jnp.float32)
        if need_mask:
            a = jnp.pad(a, ((0, 0), (0, Sp - S)))
        return a.reshape(B, R, 128)

    spec = pl.BlockSpec((None, R, 128), lambda bi: (bi, 0, 0))
    kernel = functools.partial(_glogp_kernel, valid=S, need_mask=need_mask)
    out = pl.pallas_call(
        kernel,
        out_shape=jax.ShapeDtypeStruct((B, 1, 1), jnp.float32),
        grid_spec=pltpu.PrefetchScalarGridSpec(
            num_scalar_prefetch=0, grid=(B,),
            in_specs=[spec, spec, spec],
            out_specs=pl.BlockSpec((None, 1, 1), lambda bi: (bi, 0, 0))),
        compiler_params=pltpu.CompilerParams(
            dimension_semantics=("parallel",)),
    )(prep(x), prep(mean), prep(log_sd))
    return out.reshape(B)


# ---------------------------------------------------------------------------
# Parameter initialization (deterministic, mirrors module __init__)
# ---------------------------------------------------------------------------

def init_block_params(key, in_channel, n_flow, *, filter_size=512, split=True):
    sq = in_channel * 4
    flows = []
    for _ in range(n_flow):
        key, k1, k2, k3, k4, k5 = jax.random.split(key, 6)
        # InvConv2dLU: random -> QR -> LU (setup-time, plain JAX)
        w = jax.random.normal(k1, (sq, sq), jnp.float32)
        q, _ = jnp.linalg.qr(w)
        w_p, w_l, w_u_full = jsl.lu(q)
        w_s = jnp.diag(w_u_full)
        w_u = jnp.triu(w_u_full, 1)
        u_mask = jnp.triu(jnp.ones((sq, sq), jnp.float32), 1)
        l_mask = u_mask.T
        # Coupling net: Conv(3x3) -> ReLU -> Conv(1x1) -> ReLU -> ZeroConv2d
        cin = sq // 2
        fan1 = cin * 9
        w1 = jax.random.uniform(k2, (filter_size, cin, 3, 3), jnp.float32,
                                -1.0 / np.sqrt(fan1), 1.0 / np.sqrt(fan1))
        b1 = jax.random.uniform(k3, (filter_size,), jnp.float32,
                                -1.0 / np.sqrt(fan1), 1.0 / np.sqrt(fan1))
        fan2 = filter_size
        w2 = jax.random.uniform(k4, (filter_size, filter_size), jnp.float32,
                                -1.0 / np.sqrt(fan2), 1.0 / np.sqrt(fan2))
        b2 = jax.random.uniform(k5, (filter_size,), jnp.float32,
                                -1.0 / np.sqrt(fan2), 1.0 / np.sqrt(fan2))
        flows.append(dict(
            w_p=w_p.astype(jnp.float32), w_l=w_l.astype(jnp.float32),
            w_u=w_u.astype(jnp.float32),
            log_w_s=jnp.log(jnp.abs(w_s)).astype(jnp.float32),
            s_sign=jnp.sign(w_s).astype(jnp.float32),
            u_mask=u_mask, l_mask=l_mask,
            w1=w1, b1=b1, w2=w2, b2=b2,
            wz=jnp.zeros((sq, filter_size, 3, 3), jnp.float32),
            bz=jnp.zeros((sq,), jnp.float32),
            scale_z=jnp.zeros((sq,), jnp.float32),
        ))
    if split:
        prior = dict(w=jnp.zeros((in_channel * 4, in_channel * 2, 3, 3), jnp.float32),
                     b=jnp.zeros((in_channel * 4,), jnp.float32),
                     scale=jnp.zeros((in_channel * 4,), jnp.float32))
    else:
        prior = dict(w=jnp.zeros((in_channel * 8, in_channel * 4, 3, 3), jnp.float32),
                     b=jnp.zeros((in_channel * 8,), jnp.float32),
                     scale=jnp.zeros((in_channel * 8,), jnp.float32))
    return dict(flows=flows, prior=prior)


# ---------------------------------------------------------------------------
# Flow / Block forward
# ---------------------------------------------------------------------------

def flow_forward(h_nhwc, fp):
    B, H, W, C = h_nhwc.shape
    P = B * H * W
    x = h_nhwc.reshape(P, C)

    # --- ActNorm: data-dependent init, matches the *first* PyTorch forward.
    # TODO(synk): PyTorch's stored-parameter (post-init) behaviour is stateful
    # and not reproduced here (first-call semantics only).
    mean = jnp.mean(x, axis=0)
    std = jnp.std(x, axis=0, ddof=1)             # torch .std() is unbiased
    loc = -mean
    scale = 1.0 / (std + 1e-6)
    det_act = H * W * jnp.sum(jnp.log(jnp.abs(scale)))

    # --- InvConv2dLU with ActNorm folded into the matmul (exact, f32):
    #   y = (scale*(x+loc)) @ W^T = x @ (diag(scale) @ W^T) + (loc*scale) @ W^T
    eye = jnp.eye(C, dtype=jnp.float32)
    weight = fp["w_p"] @ (fp["w_l"] * fp["l_mask"] + eye) \
        @ (fp["w_u"] * fp["u_mask"] + jnp.diag(fp["s_sign"] * jnp.exp(fp["log_w_s"])))
    w_eff = weight.T * scale[:, None]
    b_eff = (loc * scale) @ weight.T
    x = matmul_bias(x, w_eff, b_eff, operand_dtype=jnp.float32)
    det_inv = H * W * jnp.sum(fp["log_w_s"])

    # --- Affine coupling ---
    half = C // 2
    in_a_flat = x[:, :half]
    in_b_flat = x[:, half:]
    in_a = in_a_flat.reshape(B, H, W, half)

    # coupling net: conv3x3 -> ReLU -> conv1x1 -> ReLU -> ZeroConv2d*exp(3s)
    # TODO(synk): fuse the 1x1 conv into the 3x3 conv kernel epilogue to save
    # one HBM round trip of the (P, 512) activation.
    net = conv3x3_direct(in_a, fp["w1"], fp["b1"], pad_value=0.0,
                         apply_relu=True, out_dtype=jnp.bfloat16)
    net = matmul_bias(net.reshape(P, -1), jnp.transpose(fp["w2"]), fp["b2"],
                      apply_relu=True, out_dtype=jnp.bfloat16)
    net = conv3x3_direct(net.reshape(B, H, W, -1), fp["wz"], fp["bz"],
                         pad_value=1.0, scale=jnp.exp(3.0 * fp["scale_z"]),
                         out_dtype=jnp.float32)
    net_flat = net.reshape(P, C)
    log_s = net_flat[:, :half]
    t = net_flat[:, half:]

    out_b, det_cpl = coupling_affine_fused(in_b_flat.reshape(B, -1),
                                           log_s.reshape(B, -1),
                                           t.reshape(B, -1))

    out = jnp.concatenate([in_a_flat, out_b.reshape(P, half)], axis=1)
    out = out.reshape(B, H, W, C)
    return out, det_act + det_inv + det_cpl


@functools.partial(jax.jit, static_argnames=("split",))
def block_forward(x_nchw, params, split=True):
    B, C, H, W = x_nchw.shape
    # squeeze: (B,C,H,W) -> (B,4C,H/2,W/2), channel order c*4 + hp*2 + wp
    sqz = x_nchw.reshape(B, C, H // 2, 2, W // 2, 2)
    sqz = jnp.transpose(sqz, (0, 1, 3, 5, 2, 4)).reshape(B, C * 4, H // 2, W // 2)
    h = jnp.transpose(sqz, (0, 2, 3, 1))  # NHWC

    logdet = jnp.zeros((B,), jnp.float32)
    for fp in params["flows"]:
        h, det = flow_forward(h, fp)
        logdet = logdet + det

    _, H2, W2, Csq = h.shape
    prior_scale = jnp.exp(3.0 * params["prior"]["scale"])
    if split:
        half = Csq // 2
        out = h[..., :half]
        z_new = h[..., half:]
        prior_out = conv3x3_direct(out, params["prior"]["w"],
                                   params["prior"]["b"], pad_value=1.0,
                                   scale=prior_scale, out_dtype=jnp.float32)
        target = z_new
    else:
        out = h
        z_new = h
        prior_out = conv3x3_direct(jnp.zeros_like(h), params["prior"]["w"],
                                   params["prior"]["b"], pad_value=1.0,
                                   scale=prior_scale, out_dtype=jnp.float32)
        target = out

    pc = prior_out.shape[-1] // 2
    mean = prior_out[..., :pc]
    log_sd = prior_out[..., pc:]
    log_p = gaussian_logp_sum(target.reshape(B, -1),
                              mean.reshape(B, -1),
                              log_sd.reshape(B, -1))

    out_nchw = jnp.transpose(out, (0, 3, 1, 2))
    z_new_nchw = jnp.transpose(z_new, (0, 3, 1, 2))
    return out_nchw, logdet, log_p, z_new_nchw


# ---------------------------------------------------------------------------
# Demo
# ---------------------------------------------------------------------------

if __name__ == "__main__":
    key = jax.random.PRNGKey(0)
    kx, kp = jax.random.split(key)

    in_channel, n_flow = 4, 2
    x = jax.random.normal(kx, (2, in_channel, 16, 16), jnp.float32)

    params = init_block_params(kp, in_channel, n_flow, filter_size=512, split=True)

    out, logdet, log_p, z_new = block_forward(x, params, split=True)
    jax.block_until_ready((out, logdet, log_p, z_new))

    assert out.shape == (2, 2 * in_channel, 8, 8)
    assert z_new.shape == (2, 2 * in_channel, 8, 8)
    assert logdet.shape == (2,) and log_p.shape == (2,)
    assert bool(jnp.all(jnp.isfinite(out)))
    assert bool(jnp.all(jnp.isfinite(logdet)))
    assert bool(jnp.all(jnp.isfinite(log_p)))

    print("KERNEL_OK")
</pallas_src>

<mosaic_0001>
module attributes {stable_mosaic.version = 11 : i64} {
  func.func @_matmul_kernel(%arg0: i32, %arg1: i32, %arg2: i32, %arg3: memref<64x16xf32, #tpu.memory_space<vmem>>, %arg4: memref<16x128xf32, #tpu.memory_space<vmem>>, %arg5: memref<1x128xf32, #tpu.memory_space<vmem>>, %arg6: memref<64x128xf32, #tpu.memory_space<vmem>>) attributes {dimension_semantics = [#tpu.dimension_semantics<parallel>, #tpu.dimension_semantics<parallel>, #tpu.dimension_semantics<arbitrary>], iteration_bounds = array<i64: 2, 1, 1>, scalar_prefetch = 0 : i64, scratch_operands = 0 : i64, tpu.core_type = #tpu.core_type<tc>, window_params = [{transform_indices = @transform_0, window_bounds = array<i64: 64, 16>}, {transform_indices = @transform_1, window_bounds = array<i64: 16, 128>}, {transform_indices = @transform_2, window_bounds = array<i64: 1, 128>}, {transform_indices = @transform_3, window_bounds = array<i64: 64, 128>}]} {
    %c0 = arith.constant 0 : index
    %c0_0 = arith.constant 0 : index
    %0 = vector.load %arg3[%c0, %c0_0] : memref<64x16xf32, #tpu.memory_space<vmem>>, vector<64x16xf32>
    %c0_1 = arith.constant 0 : index
    %c0_2 = arith.constant 0 : index
    %1 = vector.load %arg4[%c0_1, %c0_2] : memref<16x128xf32, #tpu.memory_space<vmem>>, vector<16x128xf32>
    %cst = arith.constant dense<0.000000e+00> : vector<64x128xf32>
    %2 = tpu.matmul %0, %1, %cst {dimension_numbers = #tpu.dot_dimension_numbers<[1], [0], [0], [1], [0, 0, 1, 1], [], []>} : vector<64x16xf32>, vector<16x128xf32>, vector<64x128xf32> -> vector<64x128xf32>
    %c0_3 = arith.constant 0 : index
    %c0_4 = arith.constant 0 : index
    %3 = vector.load %arg5[%c0_3, %c0_4] : memref<1x128xf32, #tpu.memory_space<vmem>>, vector<1x128xf32>
    %4 = vector.broadcast %3 : vector<1x128xf32> to vector<64x128xf32>
    %5 = arith.addf %2, %4 : vector<64x128xf32>
    %c0_5 = arith.constant 0 : index
    %c0_6 = arith.constant 0 : index
    %6 = vector.load %arg6[%c0_5, %c0_6] : memref<64x128xf32, #tpu.memory_space<vmem>>, vector<64x128xf32>
    tpu.vector_store %arg6[%c0_5, %c0_6], %5 {strides = array<i32>} : memref<64x128xf32, #tpu.memory_space<vmem>>, vector<64x128xf32>,
    return
  }
  func.func @transform_0(%arg0: i32, %arg1: i32, %arg2: i32) -> (i32, i32) {
    %c0_i32 = arith.constant 0 : i32
    return %arg0, %arg2 : i32, i32
  }
  func.func @transform_1(%arg0: i32, %arg1: i32, %arg2: i32) -> (i32, i32) {
    %c0_i32 = arith.constant 0 : i32
    return %arg2, %arg1 : i32, i32
  }
  func.func @transform_2(%arg0: i32, %arg1: i32, %arg2: i32) -> (i32, i32) {
    %c0_i32 = arith.constant 0 : i32
    %c0_i32_0 = arith.constant 0 : i32
    return %c0_i32, %arg1 : i32, i32
  }
  func.func @transform_3(%arg0: i32, %arg1: i32, %arg2: i32) -> (i32, i32) {
    %c0_i32 = arith.constant 0 : i32
    return %arg0, %arg1 : i32, i32
  }
}

module attributes {stable_mosaic.version = 11 : i64} {
  func.func @_conv3x3_kernel(%arg0: i32, %arg1: memref<1x110x8xbf16, #tpu.memory_space<vmem>>, %arg2: memref<72x512xbf16, #tpu.memory_space<vmem>>, %arg3: memref<1x512xf32, #tpu.memory_space<vmem>>, %arg4: memref<1x80x512xbf16, #tpu.memory_space<vmem>>) attributes {dimension_semantics = [#tpu.dimension_semantics<parallel>], iteration_bounds = array<i64: 2>, scalar_prefetch = 0 : i64, scratch_operands = 0 : i64, tpu.core_type = #tpu.core_type<tc>, window_params = [{transform_indices = @transform_0, window_bounds = array<i64: 1, 110, 8>}, {pipeline_mode = #tpu.pipeline_mode<synchronous>, transform_indices = @transform_1, window_bounds = array<i64: 72, 512>}, {pipeline_mode = #tpu.pipeline_mode<synchronous>, transform_indices = @transform_2, window_bounds = array<i64: 1, 512>}, {transform_indices = @transform_3, window_bounds = array<i64: 1, 80, 512>}]} {
    %cst = arith.constant 0.000000e+00 : f32
    %0 = vector.broadcast %cst : f32 to vector<80x512xf32>
    %c0 = arith.constant 0 : index
    %c0_0 = arith.constant 0 : index
    %c0_1 = arith.constant 0 : index
    %1 = vector.load %arg1[%c0, %c0_0, %c0_1] : memref<1x110x8xbf16, #tpu.memory_space<vmem>>, vector<1x80x8xbf16>
    %2 = vector.shape_cast %1 : vector<1x80x8xbf16> to vector<80x8xbf16>
    %c0_2 = arith.constant 0 : index
    %c0_3 = arith.constant 0 : index
    %3 = vector.load %arg2[%c0_2, %c0_3] : memref<72x512xbf16, #tpu.memory_space<vmem>>, vector<8x512xbf16>
    %cst_4 = arith.constant dense<0.000000e+00> : vector<80x512xf32>
    %4 = tpu.matmul %2, %3, %cst_4 {dimension_numbers = #tpu.dot_dimension_numbers<[1], [0], [0], [1], [0, 0, 1, 1], [], []>} : vector<80x8xbf16>, vector<8x512xbf16>, vector<80x512xf32> -> vector<80x512xf32>
    %5 = arith.addf %0, %4 : vector<80x512xf32>
    %c0_5 = arith.constant 0 : index
    %c1 = arith.constant 1 : index
    %c0_6 = arith.constant 0 : index
    %6 = vector.load %arg1[%c0_5, %c1, %c0_6] : memref<1x110x8xbf16, #tpu.memory_space<vmem>>, vector<1x80x8xbf16>
    %7 = vector.shape_cast %6 : vector<1x80x8xbf16> to vector<80x8xbf16>
    %c8 = arith.constant 8 : index
    %c0_7 = arith.constant 0 : index
    %8 = vector.load %arg2[%c8, %c0_7] : memref<72x512xbf16, #tpu.memory_space<vmem>>, vector<8x512xbf16>
    %cst_8 = arith.constant dense<0.000000e+00> : vector<80x512xf32>
    %9 = tpu.matmul %7, %8, %cst_8 {dimension_numbers = #tpu.dot_dimension_numbers<[1], [0], [0], [1], [0, 0, 1, 1], [], []>} : vector<80x8xbf16>, vector<8x512xbf16>, vector<80x512xf32> -> vector<80x512xf32>
    %10 = arith.addf %5, %9 : vector<80x512xf32>
    %c0_9 = arith.constant 0 : index
    %c2 = arith.constant 2 : index
    %c0_10 = arith.constant 0 : index
    %11 = vector.load %arg1[%c0_9, %c2, %c0_10] : memref<1x110x8xbf16, #tpu.memory_space<vmem>>, vector<1x80x8xbf16>
    %12 = vector.shape_cast %11 : vector<1x80x8xbf16> to vector<80x8xbf16>
    %c16 = arith.constant 16 : index
    %c0_11 = arith.constant 0 : index
    %13 = vector.load %arg2[%c16, %c0_11] : memref<72x512xbf16, #tpu.memory_space<vmem>>, vector<8x512xbf16>
    %cst_12 = arith.constant dense<0.000000e+00> : vector<80x512xf32>
    %14 = tpu.matmul %12, %13, %cst_12 {dimension_numbers = #tpu.dot_dimension_numbers<[1], [0], [0], [1], [0, 0, 1, 1], [], []>} : vector<80x8xbf16>, vector<8x512xbf16>, vector<80x512xf32> -> vector<80x512xf32>
    %15 = arith.addf %10, %14 : vector<80x512xf32>
    %c0_13 = arith.constant 0 : index
    %c10 = arith.constant 10 : index
    %c0_14 = arith.constant 0 : index
    %16 = vector.load %arg1[%c0_13, %c10, %c0_14] : memref<1x110x8xbf16, #tpu.memory_space<vmem>>, vector<1x80x8xbf16>
    %17 = vector.shape_cast %16 : vector<1x80x8xbf16> to vector<80x8xbf16>
    %c24 = arith.constant 24 : index
    %c0_15 = arith.constant 0 : index
    %18 = vector.load %arg2[%c24, %c0_15] : memref<72x512xbf16, #tpu.memory_space<vmem>>, vector<8x512xbf16>
    %cst_16 = arith.constant dense<0.000000e+00> : vector<80x512xf32>
    %19 = tpu.matmul %17, %18, %cst_16 {dimension_numbers = #tpu.dot_dimension_numbers<[1], [0], [0], [1], [0, 0, 1, 1], [], []>} : vector<80x8xbf16>, vector<8x512xbf16>, vector<80x512xf32> -> vector<80x512xf32>
    %20 = arith.addf %15, %19 : vector<80x512xf32>
    %c0_17 = arith.constant 0 : index
    %c11 = arith.constant 11 : index
    %c0_18 = arith.constant 0 : index
    %21 = vector.load %arg1[%c0_17, %c11, %c0_18] : memref<1x110x8xbf16, #tpu.memory_space<vmem>>, vector<1x80x8xbf16>
    %22 = vector.shape_cast %21 : vector<1x80x8xbf16> to vector<80x8xbf16>
    %c32 = arith.constant 32 : index
    %c0_19 = arith.constant 0 : index
    %23 = vector.load %arg2[%c32, %c0_19] : memref<72x512xbf16, #tpu.memory_space<vmem>>, vector<8x512xbf16>
    %cst_20 = arith.constant dense<0.000000e+00> : vector<80x512xf32>
    %24 = tpu.matmul %22, %23, %cst_20 {dimension_numbers = #tpu.dot_dimension_numbers<[1], [0], [0], [1], [0, 0, 1, 1], [], []>} : vector<80x8xbf16>, vector<8x512xbf16>, vector<80x512xf32> -> vector<80x512xf32>
    %25 = arith.addf %20, %24 : vector<80x512xf32>
    %c0_21 = arith.constant 0 : index
    %c12 = arith.constant 12 : index
    %c0_22 = arith.constant 0 : index
    %26 = vector.load %arg1[%c0_21, %c12, %c0_22] : memref<1x110x8xbf16, #tpu.memory_space<vmem>>, vector<1x80x8xbf16>
    %27 = vector.shape_cast %26 : vector<1x80x8xbf16> to vector<80x8xbf16>
    %c40 = arith.constant 40 : index
    %c0_23 = arith.constant 0 : index
    %28 = vector.load %arg2[%c40, %c0_23] : memref<72x512xbf16, #tpu.memory_space<vmem>>, vector<8x512xbf16>
    %cst_24 = arith.constant dense<0.000000e+00> : vector<80x512xf32>
    %29 = tpu.matmul %27, %28, %cst_24 {dimension_numbers = #tpu.dot_dimension_numbers<[1], [0], [0], [1], [0, 0, 1, 1], [], []>} : vector<80x8xbf16>, vector<8x512xbf16>, vector<80x512xf32> -> vector<80x512xf32>
    %30 = arith.addf %25, %29 : vector<80x512xf32>
    %c0_25 = arith.constant 0 : index
    %c20 = arith.constant 20 : index
    %c0_26 = arith.constant 0 : index
    %31 = vector.load %arg1[%c0_25, %c20, %c0_26] : memref<1x110x8xbf16, #tpu.memory_space<vmem>>, vector<1x80x8xbf16>
    %32 = vector.shape_cast %31 : vector<1x80x8xbf16> to vector<80x8xbf16>
    %c48 = arith.constant 48 : index
    %c0_27 = arith.constant 0 : index
    %33 = vector.load %arg2[%c48, %c0_27] : memref<72x512xbf16, #tpu.memory_space<vmem>>, vector<8x512xbf16>
    %cst_28 = arith.constant dense<0.000000e+00> : vector<80x512xf32>
    %34 = tpu.matmul %32, %33, %cst_28 {dimension_numbers = #tpu.dot_dimension_numbers<[1], [0], [0], [1], [0, 0, 1, 1], [], []>} : vector<80x8xbf16>, vector<8x512xbf16>, vector<80x512xf32> -> vector<80x512xf32>
    %35 = arith.addf %30, %34 : vector<80x512xf32>
    %c0_29 = arith.constant 0 : index
    %c21 = arith.constant 21 : index
    %c0_30 = arith.constant 0 : index
    %36 = vector.load %arg1[%c0_29, %c21, %c0_30] : memref<1x110x8xbf16, #tpu.memory_space<vmem>>, vector<1x80x8xbf16>
    %37 = vector.shape_cast %36 : vector<1x80x8xbf16> to vector<80x8xbf16>
    %c56 = arith.constant 56 : index
    %c0_31 = arith.constant 0 : index
    %38 = vector.load %arg2[%c56, %c0_31] : memref<72x512xbf16, #tpu.memory_space<vmem>>, vector<8x512xbf16>
    %cst_32 = arith.constant dense<0.000000e+00> : vector<80x512xf32>
    %39 = tpu.matmul %37, %38, %cst_32 {dimension_numbers = #tpu.dot_dimension_numbers<[1], [0], [0], [1], [0, 0, 1, 1], [], []>} : vector<80x8xbf16>, vector<8x512xbf16>, vector<80x512xf32> -> vector<80x512xf32>
    %40 = arith.addf %35, %39 : vector<80x512xf32>
    %c0_33 = arith.constant 0 : index
    %c22 = arith.constant 22 : index
    %c0_34 = arith.constant 0 : index
    %41 = vector.load %arg1[%c0_33, %c22, %c0_34] : memref<1x110x8xbf16, #tpu.memory_space<vmem>>, vector<1x80x8xbf16>
    %42 = vector.shape_cast %41 : vector<1x80x8xbf16> to vector<80x8xbf16>
    %c64 = arith.constant 64 : index
    %c0_35 = arith.constant 0 : index
    %43 = vector.load %arg2[%c64, %c0_35] : memref<72x512xbf16, #tpu.memory_space<vmem>>, vector<8x512xbf16>
    %cst_36 = arith.constant dense<0.000000e+00> : vector<80x512xf32>
    %44 = tpu.matmul %42, %43, %cst_36 {dimension_numbers = #tpu.dot_dimension_numbers<[1], [0], [0], [1], [0, 0, 1, 1], [], []>} : vector<80x8xbf16>, vector<8x512xbf16>, vector<80x512xf32> -> vector<80x512xf32>
    %45 = arith.addf %40, %44 : vector<80x512xf32>
    %c0_37 = arith.constant 0 : index
    %c0_38 = arith.constant 0 : index
    %46 = vector.load %arg3[%c0_37, %c0_38] : memref<1x512xf32, #tpu.memory_space<vmem>>, vector<1x512xf32>
    %47 = vector.broadcast %46 : vector<1x512xf32> to vector<80x512xf32>
    %48 = arith.addf %45, %47 : vector<80x512xf32>
    %cst_39 = arith.constant 0.000000e+00 : f32
    %49 = vector.broadcast %cst_39 : f32 to vector<80x512xf32>
    %50 = arith.maximumf %48, %49 : vector<80x512xf32>
    %51 = arith.truncf %50 : vector<80x512xf32> to vector<80x512xbf16>
    %c0_40 = arith.constant 0 : index
    %c0_41 = arith.constant 0 : index
    %c0_42 = arith.constant 0 : index
    %52 = vector.load %arg4[%c0_40, %c0_41, %c0_42] : memref<1x80x512xbf16, #tpu.memory_space<vmem>>, vector<1x80x512xbf16>
    %53 = vector.shape_cast %52 : vector<1x80x512xbf16> to vector<80x512xbf16>
    %54 = vector.shape_cast %51 : vector<80x512xbf16> to vector<1x80x512xbf16>
    tpu.vector_store %arg4[%c0_40, %c0_41, %c0_42], %54 {strides = array<i32>} : memref<1x80x512xbf16, #tpu.memory_space<vmem>>, vector<1x80x512xbf16>,
    return
  }
  func.func @transform_0(%arg0: i32) -> (i32, i32, i32) {
    %c0_i32 = arith.constant 0 : i32
    %c0_i32_0 = arith.constant 0 : i32
    %c0_i32_1 = arith.constant 0 : i32
    return %arg0, %c0_i32, %c0_i32_0 : i32, i32, i32
  }
  func.func @transform_1(%arg0: i32) -> (i32, i32) {
    %c0_i32 = arith.constant 0 : i32
    %c0_i32_0 = arith.constant 0 : i32
    %c0_i32_1 = arith.constant 0 : i32
    return %c0_i32, %c0_i32_0 : i32, i32
  }
  func.func @transform_2(%arg0: i32) -> (i32, i32) {
    %c0_i32 = arith.constant 0 : i32
    %c0_i32_0 = arith.constant 0 : i32
    %c0_i32_1 = arith.constant 0 : i32
    return %c0_i32, %c0_i32_0 : i32, i32
  }
  func.func @transform_3(%arg0: i32) -> (i32, i32, i32) {
    %c0_i32 = arith.constant 0 : i32
    %c0_i32_0 = arith.constant 0 : i32
    %c0_i32_1 = arith.constant 0 : i32
    return %arg0, %c0_i32, %c0_i32_0 : i32, i32, i32
  }
}

module attributes {stable_mosaic.version = 11 : i64} {
  func.func @_matmul_kernel(%arg0: i32, %arg1: i32, %arg2: i32, %arg3: memref<64x512xbf16, #tpu.memory_space<vmem>>, %arg4: memref<512x512xbf16, #tpu.memory_space<vmem>>, %arg5: memref<1x512xf32, #tpu.memory_space<vmem>>, %arg6: memref<64x512xbf16, #tpu.memory_space<vmem>>) attributes {dimension_semantics = [#tpu.dimension_semantics<parallel>, #tpu.dimension_semantics<parallel>, #tpu.dimension_semantics<arbitrary>], iteration_bounds = array<i64: 2, 1, 1>, scalar_prefetch = 0 : i64, scratch_operands = 0 : i64, tpu.core_type = #tpu.core_type<tc>, window_params = [{transform_indices = @transform_0, window_bounds = array<i64: 64, 512>}, {transform_indices = @transform_1, window_bounds = array<i64: 512, 512>}, {transform_indices = @transform_2, window_bounds = array<i64: 1, 512>}, {transform_indices = @transform_3, window_bounds = array<i64: 64, 512>}]} {
    %c0 = arith.constant 0 : index
    %c0_0 = arith.constant 0 : index
    %0 = vector.load %arg3[%c0, %c0_0] : memref<64x512xbf16, #tpu.memory_space<vmem>>, vector<64x512xbf16>
    %c0_1 = arith.constant 0 : index
    %c0_2 = arith.constant 0 : index
    %1 = vector.load %arg4[%c0_1, %c0_2] : memref<512x512xbf16, #tpu.memory_space<vmem>>, vector<512x512xbf16>
    %cst = arith.constant dense<0.000000e+00> : vector<64x512xf32>
    %2 = tpu.matmul %0, %1, %cst {dimension_numbers = #tpu.dot_dimension_numbers<[1], [0], [0], [1], [0, 0, 1, 1], [], []>} : vector<64x512xbf16>, vector<512x512xbf16>, vector<64x512xf32> -> vector<64x512xf32>
    %c0_3 = arith.constant 0 : index
    %c0_4 = arith.constant 0 : index
    %3 = vector.load %arg5[%c0_3, %c0_4] : memref<1x512xf32, #tpu.memory_space<vmem>>, vector<1x512xf32>
    %4 = vector.broadcast %3 : vector<1x512xf32> to vector<64x512xf32>
    %5 = arith.addf %2, %4 : vector<64x512xf32>
    %cst_5 = arith.constant 0.000000e+00 : f32
    %6 = vector.broadcast %cst_5 : f32 to vector<64x512xf32>
    %7 = arith.maximumf %5, %6 : vector<64x512xf32>
    %8 = arith.truncf %7 : vector<64x512xf32> to vector<64x512xbf16>
    %c0_6 = arith.constant 0 : index
    %c0_7 = arith.constant 0 : index
    %9 = vector.load %arg6[%c0_6, %c0_7] : memref<64x512xbf16, #tpu.memory_space<vmem>>, vector<64x512xbf16>
    tpu.vector_store %arg6[%c0_6, %c0_7], %8 {strides = array<i32>} : memref<64x512xbf16, #tpu.memory_space<vmem>>, vector<64x512xbf16>,
    return
  }
  func.func @transform_0(%arg0: i32, %arg1: i32, %arg2: i32) -> (i32, i32) {
    %c0_i32 = arith.constant 0 : i32
    return %arg0, %arg2 : i32, i32
  }
  func.func @transform_1(%arg0: i32, %arg1: i32, %arg2: i32) -> (i32, i32) {
    %c0_i32 = arith.constant 0 : i32
    return %arg2, %arg1 : i32, i32
  }
  func.func @transform_2(%arg0: i32, %arg1: i32, %arg2: i32) -> (i32, i32) {
    %c0_i32 = arith.constant 0 : i32
    %c0_i32_0 = arith.constant 0 : i32
    return %c0_i32, %arg1 : i32, i32
  }
  func.func @transform_3(%arg0: i32, %arg1: i32, %arg2: i32) -> (i32, i32) {
    %c0_i32 = arith.constant 0 : i32
    return %arg0, %arg1 : i32, i32
  }
}

module attributes {stable_mosaic.version = 11 : i64} {
  func.func @_conv3x3_kernel(%arg0: i32, %arg1: memref<1x110x512xbf16, #tpu.memory_space<vmem>>, %arg2: memref<4608x128xbf16, #tpu.memory_space<vmem>>, %arg3: memref<1x128xf32, #tpu.memory_space<vmem>>, %arg4: memref<1x128xf32, #tpu.memory_space<vmem>>, %arg5: memref<1x80x128xf32, #tpu.memory_space<vmem>>) attributes {dimension_semantics = [#tpu.dimension_semantics<parallel>], iteration_bounds = array<i64: 2>, scalar_prefetch = 0 : i64, scratch_operands = 0 : i64, tpu.core_type = #tpu.core_type<tc>, window_params = [{transform_indices = @transform_0, window_bounds = array<i64: 1, 110, 512>}, {pipeline_mode = #tpu.pipeline_mode<synchronous>, transform_indices = @transform_1, window_bounds = array<i64: 4608, 128>}, {pipeline_mode = #tpu.pipeline_mode<synchronous>, transform_indices = @transform_2, window_bounds = array<i64: 1, 128>}, {pipeline_mode = #tpu.pipeline_mode<synchronous>, transform_indices = @transform_3, window_bounds = array<i64: 1, 128>}, {transform_indices = @transform_4, window_bounds = array<i64: 1, 80, 128>}]} {
    %cst = arith.constant 0.000000e+00 : f32
    %0 = vector.broadcast %cst : f32 to vector<80x128xf32>
    %c0 = arith.constant 0 : index
    %c0_0 = arith.constant 0 : index
    %c0_1 = arith.constant 0 : index
    %1 = vector.load %arg1[%c0, %c0_0, %c0_1] : memref<1x110x512xbf16, #tpu.memory_space<vmem>>, vector<1x80x512xbf16>
    %2 = vector.shape_cast %1 : vector<1x80x512xbf16> to vector<80x512xbf16>
    %c0_2 = arith.constant 0 : index
    %c0_3 = arith.constant 0 : index
    %3 = vector.load %arg2[%c0_2, %c0_3] : memref<4608x128xbf16, #tpu.memory_space<vmem>>, vector<512x128xbf16>
    %cst_4 = arith.constant dense<0.000000e+00> : vector<80x128xf32>
    %4 = tpu.matmul %2, %3, %cst_4 {dimension_numbers = #tpu.dot_dimension_numbers<[1], [0], [0], [1], [0, 0, 1, 1], [], []>} : vector<80x512xbf16>, vector<512x128xbf16>, vector<80x128xf32> -> vector<80x128xf32>
    %5 = arith.addf %0, %4 : vector<80x128xf32>
    %c0_5 = arith.constant 0 : index
    %c1 = arith.constant 1 : index
    %c0_6 = arith.constant 0 : index
    %6 = vector.load %arg1[%c0_5, %c1, %c0_6] : memref<1x110x512xbf16, #tpu.memory_space<vmem>>, vector<1x80x512xbf16>
    %7 = vector.shape_cast %6 : vector<1x80x512xbf16> to vector<80x512xbf16>
    %c512 = arith.constant 512 : index
    %c0_7 = arith.constant 0 : index
    %8 = vector.load %arg2[%c512, %c0_7] : memref<4608x128xbf16, #tpu.memory_space<vmem>>, vector<512x128xbf16>
    %cst_8 = arith.constant dense<0.000000e+00> : vector<80x128xf32>
    %9 = tpu.matmul %7, %8, %cst_8 {dimension_numbers = #tpu.dot_dimension_numbers<[1], [0], [0], [1], [0, 0, 1, 1], [], []>} : vector<80x512xbf16>, vector<512x128xbf16>, vector<80x128xf32> -> vector<80x128xf32>
    %10 = arith.addf %5, %9 : vector<80x128xf32>
    %c0_9 = arith.constant 0 : index
    %c2 = arith.constant 2 : index
    %c0_10 = arith.constant 0 : index
    %11 = vector.load %arg1[%c0_9, %c2, %c0_10] : memref<1x110x512xbf16, #tpu.memory_space<vmem>>, vector<1x80x512xbf16>
    %12 = vector.shape_cast %11 : vector<1x80x512xbf16> to vector<80x512xbf16>
    %c1024 = arith.constant 1024 : index
    %c0_11 = arith.constant 0 : index
    %13 = vector.load %arg2[%c1024, %c0_11] : memref<4608x128xbf16, #tpu.memory_space<vmem>>, vector<512x128xbf16>
    %cst_12 = arith.constant dense<0.000000e+00> : vector<80x128xf32>
    %14 = tpu.matmul %12, %13, %cst_12 {dimension_numbers = #tpu.dot_dimension_numbers<[1], [0], [0], [1], [0, 0, 1, 1], [], []>} : vector<80x512xbf16>, vector<512x128xbf16>, vector<80x128xf32> -> vector<80x128xf32>
    %15 = arith.addf %10, %14 : vector<80x128xf32>
    %c0_13 = arith.constant 0 : index
    %c10 = arith.constant 10 : index
    %c0_14 = arith.constant 0 : index
    %16 = vector.load %arg1[%c0_13, %c10, %c0_14] : memref<1x110x512xbf16, #tpu.memory_space<vmem>>, vector<1x80x512xbf16>
    %17 = vector.shape_cast %16 : vector<1x80x512xbf16> to vector<80x512xbf16>
    %c1536 = arith.constant 1536 : index
    %c0_15 = arith.constant 0 : index
    %18 = vector.load %arg2[%c1536, %c0_15] : memref<4608x128xbf16, #tpu.memory_space<vmem>>, vector<512x128xbf16>
    %cst_16 = arith.constant dense<0.000000e+00> : vector<80x128xf32>
    %19 = tpu.matmul %17, %18, %cst_16 {dimension_numbers = #tpu.dot_dimension_numbers<[1], [0], [0], [1], [0, 0, 1, 1], [], []>} : vector<80x512xbf16>, vector<512x128xbf16>, vector<80x128xf32> -> vector<80x128xf32>
    %20 = arith.addf %15, %19 : vector<80x128xf32>
    %c0_17 = arith.constant 0 : index
    %c11 = arith.constant 11 : index
    %c0_18 = arith.constant 0 : index
    %21 = vector.load %arg1[%c0_17, %c11, %c0_18] : memref<1x110x512xbf16, #tpu.memory_space<vmem>>, vector<1x80x512xbf16>
    %22 = vector.shape_cast %21 : vector<1x80x512xbf16> to vector<80x512xbf16>
    %c2048 = arith.constant 2048 : index
    %c0_19 = arith.constant 0 : index
    %23 = vector.load %arg2[%c2048, %c0_19] : memref<4608x128xbf16, #tpu.memory_space<vmem>>, vector<512x128xbf16>
    %cst_20 = arith.constant dense<0.000000e+00> : vector<80x128xf32>
    %24 = tpu.matmul %22, %23, %cst_20 {dimension_numbers = #tpu.dot_dimension_numbers<[1], [0], [0], [1], [0, 0, 1, 1], [], []>} : vector<80x512xbf16>, vector<512x128xbf16>, vector<80x128xf32> -> vector<80x128xf32>
    %25 = arith.addf %20, %24 : vector<80x128xf32>
    %c0_21 = arith.constant 0 : index
    %c12 = arith.constant 12 : index
    %c0_22 = arith.constant 0 : index
    %26 = vector.load %arg1[%c0_21, %c12, %c0_22] : memref<1x110x512xbf16, #tpu.memory_space<vmem>>, vector<1x80x512xbf16>
    %27 = vector.shape_cast %26 : vector<1x80x512xbf16> to vector<80x512xbf16>
    %c2560 = arith.constant 2560 : index
    %c0_23 = arith.constant 0 : index
    %28 = vector.load %arg2[%c2560, %c0_23] : memref<4608x128xbf16, #tpu.memory_space<vmem>>, vector<512x128xbf16>
    %cst_24 = arith.constant dense<0.000000e+00> : vector<80x128xf32>
    %29 = tpu.matmul %27, %28, %cst_24 {dimension_numbers = #tpu.dot_dimension_numbers<[1], [0], [0], [1], [0, 0, 1, 1], [], []>} : vector<80x512xbf16>, vector<512x128xbf16>, vector<80x128xf32> -> vector<80x128xf32>
    %30 = arith.addf %25, %29 : vector<80x128xf32>
    %c0_25 = arith.constant 0 : index
    %c20 = arith.constant 20 : index
    %c0_26 = arith.constant 0 : index
    %31 = vector.load %arg1[%c0_25, %c20, %c0_26] : memref<1x110x512xbf16, #tpu.memory_space<vmem>>, vector<1x80x512xbf16>
    %32 = vector.shape_cast %31 : vector<1x80x512xbf16> to vector<80x512xbf16>
    %c3072 = arith.constant 3072 : index
    %c0_27 = arith.constant 0 : index
    %33 = vector.load %arg2[%c3072, %c0_27] : memref<4608x128xbf16, #tpu.memory_space<vmem>>, vector<512x128xbf16>
    %cst_28 = arith.constant dense<0.000000e+00> : vector<80x128xf32>
    %34 = tpu.matmul %32, %33, %cst_28 {dimension_numbers = #tpu.dot_dimension_numbers<[1], [0], [0], [1], [0, 0, 1, 1], [], []>} : vector<80x512xbf16>, vector<512x128xbf16>, vector<80x128xf32> -> vector<80x128xf32>
    %35 = arith.addf %30, %34 : vector<80x128xf32>
    %c0_29 = arith.constant 0 : index
    %c21 = arith.constant 21 : index
    %c0_30 = arith.constant 0 : index
    %36 = vector.load %arg1[%c0_29, %c21, %c0_30] : memref<1x110x512xbf16, #tpu.memory_space<vmem>>, vector<1x80x512xbf16>
    %37 = vector.shape_cast %36 : vector<1x80x512xbf16> to vector<80x512xbf16>
    %c3584 = arith.constant 3584 : index
    %c0_31 = arith.constant 0 : index
    %38 = vector.load %arg2[%c3584, %c0_31] : memref<4608x128xbf16, #tpu.memory_space<vmem>>, vector<512x128xbf16>
    %cst_32 = arith.constant dense<0.000000e+00> : vector<80x128xf32>
    %39 = tpu.matmul %37, %38, %cst_32 {dimension_numbers = #tpu.dot_dimension_numbers<[1], [0], [0], [1], [0, 0, 1, 1], [], []>} : vector<80x512xbf16>, vector<512x128xbf16>, vector<80x128xf32> -> vector<80x128xf32>
    %40 = arith.addf %35, %39 : vector<80x128xf32>
    %c0_33 = arith.constant 0 : index
    %c22 = arith.constant 22 : index
    %c0_34 = arith.constant 0 : index
    %41 = vector.load %arg1[%c0_33, %c22, %c0_34] : memref<1x110x512xbf16, #tpu.memory_space<vmem>>, vector<1x80x512xbf16>
    %42 = vector.shape_cast %41 : vector<1x80x512xbf16> to vector<80x512xbf16>
    %c4096 = arith.constant 4096 : index
    %c0_35 = arith.constant 0 : index
    %43 = vector.load %arg2[%c4096, %c0_35] : memref<4608x128xbf16, #tpu.memory_space<vmem>>, vector<512x128xbf16>
    %cst_36 = arith.constant dense<0.000000e+00> : vector<80x128xf32>
    %44 = tpu.matmul %42, %43, %cst_36 {dimension_numbers = #tpu.dot_dimension_numbers<[1], [0], [0], [1], [0, 0, 1, 1], [], []>} : vector<80x512xbf16>, vector<512x128xbf16>, vector<80x128xf32> -> vector<80x128xf32>
    %45 = arith.addf %40, %44 : vector<80x128xf32>
    %c0_37 = arith.constant 0 : index
    %c0_38 = arith.constant 0 : index
    %46 = vector.load %arg3[%c0_37, %c0_38] : memref<1x128xf32, #tpu.memory_space<vmem>>, vector<1x128xf32>
    %47 = vector.broadcast %46 : vector<1x128xf32> to vector<80x128xf32>
    %48 = arith.addf %45, %47 : vector<80x128xf32>
    %c0_39 = arith.constant 0 : index
    %c0_40 = arith.constant 0 : index
    %49 = vector.load %arg4[%c0_39, %c0_40] : memref<1x128xf32, #tpu.memory_space<vmem>>, vector<1x128xf32>
    %50 = vector.broadcast %49 : vector<1x128xf32> to vector<80x128xf32>
    %51 = arith.mulf %48, %50 : vector<80x128xf32>
    %c0_41 = arith.constant 0 : index
    %c0_42 = arith.constant 0 : index
    %c0_43 = arith.constant 0 : index
    %52 = vector.load %arg5[%c0_41, %c0_42, %c0_43] : memref<1x80x128xf32, #tpu.memory_space<vmem>>, vector<1x80x128xf32>
    %53 = vector.shape_cast %52 : vector<1x80x128xf32> to vector<80x128xf32>
    %54 = vector.shape_cast %51 : vector<80x128xf32> to vector<1x80x128xf32>
    tpu.vector_store %arg5[%c0_41, %c0_42, %c0_43], %54 {strides = array<i32>} : memref<1x80x128xf32, #tpu.memory_space<vmem>>, vector<1x80x128xf32>,
    return
  }
  func.func @transform_0(%arg0: i32) -> (i32, i32, i32) {
    %c0_i32 = arith.constant 0 : i32
    %c0_i32_0 = arith.constant 0 : i32
    %c0_i32_1 = arith.constant 0 : i32
    return %arg0, %c0_i32, %c0_i32_0 : i32, i32, i32
  }
  func.func @transform_1(%arg0: i32) -> (i32, i32) {
    %c0_i32 = arith.constant 0 : i32
    %c0_i32_0 = arith.constant 0 : i32
    %c0_i32_1 = arith.constant 0 : i32
    return %c0_i32, %c0_i32_0 : i32, i32
  }
  func.func @transform_2(%arg0: i32) -> (i32, i32) {
    %c0_i32 = arith.constant 0 : i32
    %c0_i32_0 = arith.constant 0 : i32
    %c0_i32_1 = arith.constant 0 : i32
    return %c0_i32, %c0_i32_0 : i32, i32
  }
  func.func @transform_3(%arg0: i32) -> (i32, i32) {
    %c0_i32 = arith.constant 0 : i32
    %c0_i32_0 = arith.constant 0 : i32
    %c0_i32_1 = arith.constant 0 : i32
    return %c0_i32, %c0_i32_0 : i32, i32
  }
  func.func @transform_4(%arg0: i32) -> (i32, i32, i32) {
    %c0_i32 = arith.constant 0 : i32
    %c0_i32_0 = arith.constant 0 : i32
    %c0_i32_1 = arith.constant 0 : i32
    return %arg0, %c0_i32, %c0_i32_0 : i32, i32, i32
  }
}

module attributes {stable_mosaic.version = 11 : i64} {
  func.func @_coupling_kernel(%arg0: i32, %arg1: memref<1x4x128xf32, #tpu.memory_space<vmem>>, %arg2: memref<1x4x128xf32, #tpu.memory_space<vmem>>, %arg3: memref<1x4x128xf32, #tpu.memory_space<vmem>>, %arg4: memref<1x4x128xf32, #tpu.memory_space<vmem>>, %arg5: memref<1x1x1xf32, #tpu.memory_space<vmem>>) attributes {dimension_semantics = [#tpu.dimension_semantics<parallel>], iteration_bounds = array<i64: 2>, scalar_prefetch = 0 : i64, scratch_operands = 0 : i64, tpu.core_type = #tpu.core_type<tc>, window_params = [{transform_indices = @transform_0, window_bounds = array<i64: 1, 4, 128>}, {transform_indices = @transform_1, window_bounds = array<i64: 1, 4, 128>}, {transform_indices = @transform_2, window_bounds = array<i64: 1, 4, 128>}, {transform_indices = @transform_3, window_bounds = array<i64: 1, 4, 128>}, {transform_indices = @transform_4, window_bounds = array<i64: 1, 1, 1>}]} {
    %c0 = arith.constant 0 : index
    %c0_0 = arith.constant 0 : index
    %c0_1 = arith.constant 0 : index
    %0 = vector.load %arg2[%c0, %c0_0, %c0_1] : memref<1x4x128xf32, #tpu.memory_space<vmem>>, vector<1x4x128xf32>
    %1 = vector.shape_cast %0 : vector<1x4x128xf32> to vector<4x128xf32>
    %cst = arith.constant 2.000000e+00 : f32
    %2 = vector.broadcast %cst : f32 to vector<4x128xf32>
    %3 = arith.addf %1, %2 : vector<4x128xf32>
    %4 = math.absf %3 : vector<4x128xf32>
    %cst_2 = arith.constant 0.000000e+00 : f32
    %5 = vector.broadcast %cst_2 : f32 to vector<4x128xf32>
    %6 = arith.subf %5, %4 : vector<4x128xf32>
    %7 = math.exp %6 : vector<4x128xf32>
    %cst_3 = arith.constant 0.000000e+00 : f32
    %8 = vector.broadcast %cst_3 : f32 to vector<4x128xf32>
    %9 = arith.cmpf oge, %3, %8 : vector<4x128xf32>
    %cst_4 = arith.constant 1.000000e+00 : f32
    %10 = vector.broadcast %cst_4 : f32 to vector<4x128xf32>
    %11 = arith.select %9, %10, %7 : vector<4x128xi1>, vector<4x128xf32>
    %cst_5 = arith.constant 1.000000e+00 : f32
    %12 = vector.broadcast %cst_5 : f32 to vector<4x128xf32>
    %13 = arith.addf %12, %7 : vector<4x128xf32>
    %14 = arith.divf %11, %13 : vector<4x128xf32>
    %c0_6 = arith.constant 0 : index
    %c0_7 = arith.constant 0 : index
    %c0_8 = arith.constant 0 : index
    %15 = vector.load %arg1[%c0_6, %c0_7, %c0_8] : memref<1x4x128xf32, #tpu.memory_space<vmem>>, vector<1x4x128xf32>
    %16 = vector.shape_cast %15 : vector<1x4x128xf32> to vector<4x128xf32>
    %c0_9 = arith.constant 0 : index
    %c0_10 = arith.constant 0 : index
    %c0_11 = arith.constant 0 : index
    %17 = vector.load %arg3[%c0_9, %c0_10, %c0_11] : memref<1x4x128xf32, #tpu.memory_space<vmem>>, vector<1x4x128xf32>
    %18 = vector.shape_cast %17 : vector<1x4x128xf32> to vector<4x128xf32>
    %19 = arith.addf %16, %18 : vector<4x128xf32>
    %20 = arith.mulf %19, %14 : vector<4x128xf32>
    %c0_12 = arith.constant 0 : index
    %c0_13 = arith.constant 0 : index
    %c0_14 = arith.constant 0 : index
    %21 = vector.load %arg4[%c0_12, %c0_13, %c0_14] : memref<1x4x128xf32, #tpu.memory_space<vmem>>, vector<1x4x128xf32>
    %22 = vector.shape_cast %21 : vector<1x4x128xf32> to vector<4x128xf32>
    %23 = vector.shape_cast %20 : vector<4x128xf32> to vector<1x4x128xf32>
    tpu.vector_store %arg4[%c0_12, %c0_13, %c0_14], %23 {strides = array<i32>} : memref<1x4x128xf32, #tpu.memory_space<vmem>>, vector<1x4x128xf32>,
    %cst_15 = arith.constant 0.000000e+00 : f32
    %24 = vector.broadcast %cst_15 : f32 to vector<4x128xf32>
    %25 = arith.minimumf %3, %24 : vector<4x128xf32>
    %cst_16 = arith.constant 1.000000e+00 : f32
    %26 = vector.broadcast %cst_16 : f32 to vector<4x128xf32>
    %27 = arith.addf %26, %7 : vector<4x128xf32>
    %28 = math.log %27 : vector<4x128xf32>
    %29 = arith.subf %25, %28 : vector<4x128xf32>
    %30 = vector.shape_cast %29 : vector<4x128xf32> to vector<1x4x128xf32>
    %cst_17 = arith.constant dense<0.000000e+00> : vector<1xf32>
    %31 = vector.multi_reduction <add>, %30, %cst_17 [1, 2] : vector<1x4x128xf32> to vector<1xf32>
    %32 = vector.shape_cast %31 : vector<1xf32> to vector<1x1x1xf32>
    %33 = vector.extract %32[0, 0, 0] : f32 from vector<1x1x1xf32>
    %34 = vector.broadcast %33 : f32 to vector<1x1xf32>
    %c0_18 = arith.constant 0 : index
    %c0_19 = arith.constant 0 : index
    %c0_20 = arith.constant 0 : index
    %35 = vector.load %arg5[%c0_18, %c0_19, %c0_20] : memref<1x1x1xf32, #tpu.memory_space<vmem>>, vector<1x1x1xf32>
    %36 = vector.shape_cast %35 : vector<1x1x1xf32> to vector<1x1xf32>
    %37 = vector.shape_cast %34 : vector<1x1xf32> to vector<1x1x1xf32>
    tpu.vector_store %arg5[%c0_18, %c0_19, %c0_20], %37 {strides = array<i32>} : memref<1x1x1xf32, #tpu.memory_space<vmem>>, vector<1x1x1xf32>,
    return
  }
  func.func @transform_0(%arg0: i32) -> (i32, i32, i32) {
    %c0_i32 = arith.constant 0 : i32
    %c0_i32_0 = arith.constant 0 : i32
    %c0_i32_1 = arith.constant 0 : i32
    return %arg0, %c0_i32, %c0_i32_0 : i32, i32, i32
  }
  func.func @transform_1(%arg0: i32) -> (i32, i32, i32) {
    %c0_i32 = arith.constant 0 : i32
    %c0_i32_0 = arith.constant 0 : i32
    %c0_i32_1 = arith.constant 0 : i32
    return %arg0, %c0_i32, %c0_i32_0 : i32, i32, i32
  }
  func.func @transform_2(%arg0: i32) -> (i32, i32, i32) {
    %c0_i32 = arith.constant 0 : i32
    %c0_i32_0 = arith.constant 0 : i32
    %c0_i32_1 = arith.constant 0 : i32
    return %arg0, %c0_i32, %c0_i32_0 : i32, i32, i32
  }
  func.func @transform_3(%arg0: i32) -> (i32, i32, i32) {
    %c0_i32 = arith.constant 0 : i32
    %c0_i32_0 = arith.constant 0 : i32
    %c0_i32_1 = arith.constant 0 : i32
    return %arg0, %c0_i32, %c0_i32_0 : i32, i32, i32
  }
  func.func @transform_4(%arg0: i32) -> (i32, i32, i32) {
    %c0_i32 = arith.constant 0 : i32
    %c0_i32_0 = arith.constant 0 : i32
    %c0_i32_1 = arith.constant 0 : i32
    return %arg0, %c0_i32, %c0_i32_0 : i32, i32, i32
  }
}

module attributes {stable_mosaic.version = 11 : i64} {
  func.func @_conv3x3_kernel(%arg0: i32, %arg1: memref<1x110x8xbf16, #tpu.memory_space<vmem>>, %arg2: memref<72x128xbf16, #tpu.memory_space<vmem>>, %arg3: memref<1x128xf32, #tpu.memory_space<vmem>>, %arg4: memref<1x128xf32, #tpu.memory_space<vmem>>, %arg5: memref<1x80x128xf32, #tpu.memory_space<vmem>>) attributes {dimension_semantics = [#tpu.dimension_semantics<parallel>], iteration_bounds = array<i64: 2>, scalar_prefetch = 0 : i64, scratch_operands = 0 : i64, tpu.core_type = #tpu.core_type<tc>, window_params = [{transform_indices = @transform_0, window_bounds = array<i64: 1, 110, 8>}, {pipeline_mode = #tpu.pipeline_mode<synchronous>, transform_indices = @transform_1, window_bounds = array<i64: 72, 128>}, {pipeline_mode = #tpu.pipeline_mode<synchronous>, transform_indices = @transform_2, window_bounds = array<i64: 1, 128>}, {pipeline_mode = #tpu.pipeline_mode<synchronous>, transform_indices = @transform_3, window_bounds = array<i64: 1, 128>}, {transform_indices = @transform_4, window_bounds = array<i64: 1, 80, 128>}]} {
    %cst = arith.constant 0.000000e+00 : f32
    %0 = vector.broadcast %cst : f32 to vector<80x128xf32>
    %c0 = arith.constant 0 : index
    %c0_0 = arith.constant 0 : index
    %c0_1 = arith.constant 0 : index
    %1 = vector.load %arg1[%c0, %c0_0, %c0_1] : memref<1x110x8xbf16, #tpu.memory_space<vmem>>, vector<1x80x8xbf16>
    %2 = vector.shape_cast %1 : vector<1x80x8xbf16> to vector<80x8xbf16>
    %c0_2 = arith.constant 0 : index
    %c0_3 = arith.constant 0 : index
    %3 = vector.load %arg2[%c0_2, %c0_3] : memref<72x128xbf16, #tpu.memory_space<vmem>>, vector<8x128xbf16>
    %cst_4 = arith.constant dense<0.000000e+00> : vector<80x128xf32>
    %4 = tpu.matmul %2, %3, %cst_4 {dimension_numbers = #tpu.dot_dimension_numbers<[1], [0], [0], [1], [0, 0, 1, 1], [], []>} : vector<80x8xbf16>, vector<8x128xbf16>, vector<80x128xf32> -> vector<80x128xf32>
    %5 = arith.addf %0, %4 : vector<80x128xf32>
    %c0_5 = arith.constant 0 : index
    %c1 = arith.constant 1 : index
    %c0_6 = arith.constant 0 : index
    %6 = vector.load %arg1[%c0_5, %c1, %c0_6] : memref<1x110x8xbf16, #tpu.memory_space<vmem>>, vector<1x80x8xbf16>
    %7 = vector.shape_cast %6 : vector<1x80x8xbf16> to vector<80x8xbf16>
    %c8 = arith.constant 8 : index
    %c0_7 = arith.constant 0 : index
    %8 = vector.load %arg2[%c8, %c0_7] : memref<72x128xbf16, #tpu.memory_space<vmem>>, vector<8x128xbf16>
    %cst_8 = arith.constant dense<0.000000e+00> : vector<80x128xf32>
    %9 = tpu.matmul %7, %8, %cst_8 {dimension_numbers = #tpu.dot_dimension_numbers<[1], [0], [0], [1], [0, 0, 1, 1], [], []>} : vector<80x8xbf16>, vector<8x128xbf16>, vector<80x128xf32> -> vector<80x128xf32>
    %10 = arith.addf %5, %9 : vector<80x128xf32>
    %c0_9 = arith.constant 0 : index
    %c2 = arith.constant 2 : index
    %c0_10 = arith.constant 0 : index
    %11 = vector.load %arg1[%c0_9, %c2, %c0_10] : memref<1x110x8xbf16, #tpu.memory_space<vmem>>, vector<1x80x8xbf16>
    %12 = vector.shape_cast %11 : vector<1x80x8xbf16> to vector<80x8xbf16>
    %c16 = arith.constant 16 : index
    %c0_11 = arith.constant 0 : index
    %13 = vector.load %arg2[%c16, %c0_11] : memref<72x128xbf16, #tpu.memory_space<vmem>>, vector<8x128xbf16>
    %cst_12 = arith.constant dense<0.000000e+00> : vector<80x128xf32>
    %14 = tpu.matmul %12, %13, %cst_12 {dimension_numbers = #tpu.dot_dimension_numbers<[1], [0], [0], [1], [0, 0, 1, 1], [], []>} : vector<80x8xbf16>, vector<8x128xbf16>, vector<80x128xf32> -> vector<80x128xf32>
    %15 = arith.addf %10, %14 : vector<80x128xf32>
    %c0_13 = arith.constant 0 : index
    %c10 = arith.constant 10 : index
    %c0_14 = arith.constant 0 : index
    %16 = vector.load %arg1[%c0_13, %c10, %c0_14] : memref<1x110x8xbf16, #tpu.memory_space<vmem>>, vector<1x80x8xbf16>
    %17 = vector.shape_cast %16 : vector<1x80x8xbf16> to vector<80x8xbf16>
    %c24 = arith.constant 24 : index
    %c0_15 = arith.constant 0 : index
    %18 = vector.load %arg2[%c24, %c0_15] : memref<72x128xbf16, #tpu.memory_space<vmem>>, vector<8x128xbf16>
    %cst_16 = arith.constant dense<0.000000e+00> : vector<80x128xf32>
    %19 = tpu.matmul %17, %18, %cst_16 {dimension_numbers = #tpu.dot_dimension_numbers<[1], [0], [0], [1], [0, 0, 1, 1], [], []>} : vector<80x8xbf16>, vector<8x128xbf16>, vector<80x128xf32> -> vector<80x128xf32>
    %20 = arith.addf %15, %19 : vector<80x128xf32>
    %c0_17 = arith.constant 0 : index
    %c11 = arith.constant 11 : index
    %c0_18 = arith.constant 0 : index
    %21 = vector.load %arg1[%c0_17, %c11, %c0_18] : memref<1x110x8xbf16, #tpu.memory_space<vmem>>, vector<1x80x8xbf16>
    %22 = vector.shape_cast %21 : vector<1x80x8xbf16> to vector<80x8xbf16>
    %c32 = arith.constant 32 : index
    %c0_19 = arith.constant 0 : index
    %23 = vector.load %arg2[%c32, %c0_19] : memref<72x128xbf16, #tpu.memory_space<vmem>>, vector<8x128xbf16>
    %cst_20 = arith.constant dense<0.000000e+00> : vector<80x128xf32>
    %24 = tpu.matmul %22, %23, %cst_20 {dimension_numbers = #tpu.dot_dimension_numbers<[1], [0], [0], [1], [0, 0, 1, 1], [], []>} : vector<80x8xbf16>, vector<8x128xbf16>, vector<80x128xf32> -> vector<80x128xf32>
    %25 = arith.addf %20, %24 : vector<80x128xf32>
    %c0_21 = arith.constant 0 : index
    %c12 = arith.constant 12 : index
    %c0_22 = arith.constant 0 : index
    %26 = vector.load %arg1[%c0_21, %c12, %c0_22] : memref<1x110x8xbf16, #tpu.memory_space<vmem>>, vector<1x80x8xbf16>
    %27 = vector.shape_cast %26 : vector<1x80x8xbf16> to vector<80x8xbf16>
    %c40 = arith.constant 40 : index
    %c0_23 = arith.constant 0 : index
    %28 = vector.load %arg2[%c40, %c0_23] : memref<72x128xbf16, #tpu.memory_space<vmem>>, vector<8x128xbf16>
    %cst_24 = arith.constant dense<0.000000e+00> : vector<80x128xf32>
    %29 = tpu.matmul %27, %28, %cst_24 {dimension_numbers = #tpu.dot_dimension_numbers<[1], [0], [0], [1], [0, 0, 1, 1], [], []>} : vector<80x8xbf16>, vector<8x128xbf16>, vector<80x128xf32> -> vector<80x128xf32>
    %30 = arith.addf %25, %29 : vector<80x128xf32>
    %c0_25 = arith.constant 0 : index
    %c20 = arith.constant 20 : index
    %c0_26 = arith.constant 0 : index
    %31 = vector.load %arg1[%c0_25, %c20, %c0_26] : memref<1x110x8xbf16, #tpu.memory_space<vmem>>, vector<1x80x8xbf16>
    %32 = vector.shape_cast %31 : vector<1x80x8xbf16> to vector<80x8xbf16>
    %c48 = arith.constant 48 : index
    %c0_27 = arith.constant 0 : index
    %33 = vector.load %arg2[%c48, %c0_27] : memref<72x128xbf16, #tpu.memory_space<vmem>>, vector<8x128xbf16>
    %cst_28 = arith.constant dense<0.000000e+00> : vector<80x128xf32>
    %34 = tpu.matmul %32, %33, %cst_28 {dimension_numbers = #tpu.dot_dimension_numbers<[1], [0], [0], [1], [0, 0, 1, 1], [], []>} : vector<80x8xbf16>, vector<8x128xbf16>, vector<80x128xf32> -> vector<80x128xf32>
    %35 = arith.addf %30, %34 : vector<80x128xf32>
    %c0_29 = arith.constant 0 : index
    %c21 = arith.constant 21 : index
    %c0_30 = arith.constant 0 : index
    %36 = vector.load %arg1[%c0_29, %c21, %c0_30] : memref<1x110x8xbf16, #tpu.memory_space<vmem>>, vector<1x80x8xbf16>
    %37 = vector.shape_cast %36 : vector<1x80x8xbf16> to vector<80x8xbf16>
    %c56 = arith.constant 56 : index
    %c0_31 = arith.constant 0 : index
    %38 = vector.load %arg2[%c56, %c0_31] : memref<72x128xbf16, #tpu.memory_space<vmem>>, vector<8x128xbf16>
    %cst_32 = arith.constant dense<0.000000e+00> : vector<80x128xf32>
    %39 = tpu.matmul %37, %38, %cst_32 {dimension_numbers = #tpu.dot_dimension_numbers<[1], [0], [0], [1], [0, 0, 1, 1], [], []>} : vector<80x8xbf16>, vector<8x128xbf16>, vector<80x128xf32> -> vector<80x128xf32>
    %40 = arith.addf %35, %39 : vector<80x128xf32>
    %c0_33 = arith.constant 0 : index
    %c22 = arith.constant 22 : index
    %c0_34 = arith.constant 0 : index
    %41 = vector.load %arg1[%c0_33, %c22, %c0_34] : memref<1x110x8xbf16, #tpu.memory_space<vmem>>, vector<1x80x8xbf16>
    %42 = vector.shape_cast %41 : vector<1x80x8xbf16> to vector<80x8xbf16>
    %c64 = arith.constant 64 : index
    %c0_35 = arith.constant 0 : index
    %43 = vector.load %arg2[%c64, %c0_35] : memref<72x128xbf16, #tpu.memory_space<vmem>>, vector<8x128xbf16>
    %cst_36 = arith.constant dense<0.000000e+00> : vector<80x128xf32>
    %44 = tpu.matmul %42, %43, %cst_36 {dimension_numbers = #tpu.dot_dimension_numbers<[1], [0], [0], [1], [0, 0, 1, 1], [], []>} : vector<80x8xbf16>, vector<8x128xbf16>, vector<80x128xf32> -> vector<80x128xf32>
    %45 = arith.addf %40, %44 : vector<80x128xf32>
    %c0_37 = arith.constant 0 : index
    %c0_38 = arith.constant 0 : index
    %46 = vector.load %arg3[%c0_37, %c0_38] : memref<1x128xf32, #tpu.memory_space<vmem>>, vector<1x128xf32>
    %47 = vector.broadcast %46 : vector<1x128xf32> to vector<80x128xf32>
    %48 = arith.addf %45, %47 : vector<80x128xf32>
    %c0_39 = arith.constant 0 : index
    %c0_40 = arith.constant 0 : index
    %49 = vector.load %arg4[%c0_39, %c0_40] : memref<1x128xf32, #tpu.memory_space<vmem>>, vector<1x128xf32>
    %50 = vector.broadcast %49 : vector<1x128xf32> to vector<80x128xf32>
    %51 = arith.mulf %48, %50 : vector<80x128xf32>
    %c0_41 = arith.constant 0 : index
    %c0_42 = arith.constant 0 : index
    %c0_43 = arith.constant 0 : index
    %52 = vector.load %arg5[%c0_41, %c0_42, %c0_43] : memref<1x80x128xf32, #tpu.memory_space<vmem>>, vector<1x80x128xf32>
    %53 = vector.shape_cast %52 : vector<1x80x128xf32> to vector<80x128xf32>
    %54 = vector.shape_cast %51 : vector<80x128xf32> to vector<1x80x128xf32>
    tpu.vector_store %arg5[%c0_41, %c0_42, %c0_43], %54 {strides = array<i32>} : memref<1x80x128xf32, #tpu.memory_space<vmem>>, vector<1x80x128xf32>,
    return
  }
  func.func @transform_0(%arg0: i32) -> (i32, i32, i32) {
    %c0_i32 = arith.constant 0 : i32
    %c0_i32_0 = arith.constant 0 : i32
    %c0_i32_1 = arith.constant 0 : i32
    return %arg0, %c0_i32, %c0_i32_0 : i32, i32, i32
  }
  func.func @transform_1(%arg0: i32) -> (i32, i32) {
    %c0_i32 = arith.constant 0 : i32
    %c0_i32_0 = arith.constant 0 : i32
    %c0_i32_1 = arith.constant 0 : i32
    return %c0_i32, %c0_i32_0 : i32, i32
  }
  func.func @transform_2(%arg0: i32) -> (i32, i32) {
    %c0_i32 = arith.constant 0 : i32
    %c0_i32_0 = arith.constant 0 : i32
    %c0_i32_1 = arith.constant 0 : i32
    return %c0_i32, %c0_i32_0 : i32, i32
  }
  func.func @transform_3(%arg0: i32) -> (i32, i32) {
    %c0_i32 = arith.constant 0 : i32
    %c0_i32_0 = arith.constant 0 : i32
    %c0_i32_1 = arith.constant 0 : i32
    return %c0_i32, %c0_i32_0 : i32, i32
  }
  func.func @transform_4(%arg0: i32) -> (i32, i32, i32) {
    %c0_i32 = arith.constant 0 : i32
    %c0_i32_0 = arith.constant 0 : i32
    %c0_i32_1 = arith.constant 0 : i32
    return %arg0, %c0_i32, %c0_i32_0 : i32, i32, i32
  }
}

module attributes {stable_mosaic.version = 11 : i64} {
  func.func @_glogp_kernel(%arg0: i32, %arg1: memref<1x4x128xf32, #tpu.memory_space<vmem>>, %arg2: memref<1x4x128xf32, #tpu.memory_space<vmem>>, %arg3: memref<1x4x128xf32, #tpu.memory_space<vmem>>, %arg4: memref<1x1x1xf32, #tpu.memory_space<vmem>>) attributes {dimension_semantics = [#tpu.dimension_semantics<parallel>], iteration_bounds = array<i64: 2>, scalar_prefetch = 0 : i64, scratch_operands = 0 : i64, tpu.core_type = #tpu.core_type<tc>, window_params = [{transform_indices = @transform_0, window_bounds = array<i64: 1, 4, 128>}, {transform_indices = @transform_1, window_bounds = array<i64: 1, 4, 128>}, {transform_indices = @transform_2, window_bounds = array<i64: 1, 4, 128>}, {transform_indices = @transform_3, window_bounds = array<i64: 1, 1, 1>}]} {
    %c0 = arith.constant 0 : index
    %c0_0 = arith.constant 0 : index
    %c0_1 = arith.constant 0 : index
    %0 = vector.load %arg3[%c0, %c0_0, %c0_1] : memref<1x4x128xf32, #tpu.memory_space<vmem>>, vector<1x4x128xf32>
    %1 = vector.shape_cast %0 : vector<1x4x128xf32> to vector<4x128xf32>
    %c0_2 = arith.constant 0 : index
    %c0_3 = arith.constant 0 : index
    %c0_4 = arith.constant 0 : index
    %2 = vector.load %arg1[%c0_2, %c0_3, %c0_4] : memref<1x4x128xf32, #tpu.memory_space<vmem>>, vector<1x4x128xf32>
    %3 = vector.shape_cast %2 : vector<1x4x128xf32> to vector<4x128xf32>
    %c0_5 = arith.constant 0 : index
    %c0_6 = arith.constant 0 : index
    %c0_7 = arith.constant 0 : index
    %4 = vector.load %arg2[%c0_5, %c0_6, %c0_7] : memref<1x4x128xf32, #tpu.memory_space<vmem>>, vector<1x4x128xf32>
    %5 = vector.shape_cast %4 : vector<1x4x128xf32> to vector<4x128xf32>
    %6 = arith.subf %3, %5 : vector<4x128xf32>
    %cst = arith.constant -0.918938517 : f32
    %7 = vector.broadcast %cst : f32 to vector<4x128xf32>
    %8 = arith.subf %7, %1 : vector<4x128xf32>
    %cst_8 = arith.constant 5.000000e-01 : f32
    %9 = vector.broadcast %cst_8 : f32 to vector<4x128xf32>
    %10 = arith.mulf %9, %6 : vector<4x128xf32>
    %11 = arith.mulf %10, %6 : vector<4x128xf32>
    %cst_9 = arith.constant -2.000000e+00 : f32
    %12 = vector.broadcast %cst_9 : f32 to vector<4x128xf32>
    %13 = arith.mulf %12, %1 : vector<4x128xf32>
    %14 = math.exp %13 : vector<4x128xf32>
    %15 = arith.mulf %11, %14 : vector<4x128xf32>
    %16 = arith.subf %8, %15 : vector<4x128xf32>
    %17 = vector.shape_cast %16 : vector<4x128xf32> to vector<1x4x128xf32>
    %cst_10 = arith.constant dense<0.000000e+00> : vector<1xf32>
    %18 = vector.multi_reduction <add>, %17, %cst_10 [1, 2] : vector<1x4x128xf32> to vector<1xf32>
    %19 = vector.shape_cast %18 : vector<1xf32> to vector<1x1x1xf32>
    %20 = vector.extract %19[0, 0, 0] : f32 from vector<1x1x1xf32>
    %21 = vector.broadcast %20 : f32 to vector<1x1xf32>
    %c0_11 = arith.constant 0 : index
    %c0_12 = arith.constant 0 : index
    %c0_13 = arith.constant 0 : index
    %22 = vector.load %arg4[%c0_11, %c0_12, %c0_13] : memref<1x1x1xf32, #tpu.memory_space<vmem>>, vector<1x1x1xf32>
    %23 = vector.shape_cast %22 : vector<1x1x1xf32> to vector<1x1xf32>
    %24 = vector.shape_cast %21 : vector<1x1xf32> to vector<1x1x1xf32>
    tpu.vector_store %arg4[%c0_11, %c0_12, %c0_13], %24 {strides = array<i32>} : memref<1x1x1xf32, #tpu.memory_space<vmem>>, vector<1x1x1xf32>,
    return
  }
  func.func @transform_0(%arg0: i32) -> (i32, i32, i32) {
    %c0_i32 = arith.constant 0 : i32
    %c0_i32_0 = arith.constant 0 : i32
    %c0_i32_1 = arith.constant 0 : i32
    return %arg0, %c0_i32, %c0_i32_0 : i32, i32, i32
  }
  func.func @transform_1(%arg0: i32) -> (i32, i32, i32) {
    %c0_i32 = arith.constant 0 : i32
    %c0_i32_0 = arith.constant 0 : i32
    %c0_i32_1 = arith.constant 0 : i32
    return %arg0, %c0_i32, %c0_i32_0 : i32, i32, i32
  }
  func.func @transform_2(%arg0: i32) -> (i32, i32, i32) {
    %c0_i32 = arith.constant 0 : i32
    %c0_i32_0 = arith.constant 0 : i32
    %c0_i32_1 = arith.constant 0 : i32
    return %arg0, %c0_i32, %c0_i32_0 : i32, i32, i32
  }
  func.func @transform_3(%arg0: i32) -> (i32, i32, i32) {
    %c0_i32 = arith.constant 0 : i32
    %c0_i32_0 = arith.constant 0 : i32
    %c0_i32_1 = arith.constant 0 : i32
    return %arg0, %c0_i32, %c0_i32_0 : i32, i32, i32
  }
}

</mosaic_0001>

<bundles_post_ra>
// kernel: mul.31
= control target key start
LH: loop header
LB: loop body
LE: loop exit
PB: predicated region body
PF: predicated region fallthrough
CT: control target
= control target key end

     0   :  { %s34_s0 = inlined_call_operand.vmem [shape: f32[16], index: 0, kind: input, shape index: {}]   ;;  %s35_s1 = inlined_call_operand.vmem [shape: f32[16], index: 1, kind: input, shape index: {}]   ;;  %s36_s2 = inlined_call_operand.vmem [shape: f32[16], index: 2, kind: output, shape index: {}]  }
   0x1   :  { %v3_v0 = vld [vmem:[%s34_s0] sm:$0x1] }
   0x2   :  { %v4_v1 = vld [vmem:[%s35_s1] sm:$0x1] }
   0x3   :  { %v7_v2 = vmul.f32 %v4_v1, %v3_v0 }
   0x5   :  { %9 = vst [vmem:[%s36_s2] sm:$0x1] %v7_v2 }

// kernel: block_forward.12
= control target key start
LH: loop header
LB: loop body
LE: loop exit
PB: predicated region body
PF: predicated region fallthrough
CT: control target
= control target key end

     0   :  { %s647_s12 = smov 0   ;;  %s649_s13 = smov 0   ;;  %s697_s0 = inlined_call_operand.vmem [shape: f32[128,16], index: 0, kind: input, shape index: {}]   ;;  %s698_s1 = inlined_call_operand.vmem [shape: f32[16,128], index: 1, kind: input, shape index: {}]   ;;  %s699_s2 = inlined_call_operand.vmem [shape: f32[1,128], index: 2, kind: input, shape index: {}]   ;;  %s700_s3 = inlined_call_operand.vmem [shape: f32[128,128], index: 3, kind: output, shape index: {}]  }
   0x1   :  { %s651_s14 = smov 0  }
   0x2 LB: > { %s32_s15 = sadd.s32 1, %s621_s13  ;;  %p531_p0 = scmp.ge.s32.totalorder %s625_s14, 1  ;;  %s625_s14 = sphi %s651_s14, %s13_s14   ;;  %s621_s13 = sphi %s649_s13, %s702_s13   ;;  %s617_s12 = sphi %s647_s12, %s701_s12  }
   0x3   : > { %p34_p1 = scmp.ge.s32.totalorder %s32_s15, 2  ;;  %p188_p2 = scmp.lt.s32.totalorder %s625_s14, 3 }
   0x5   : > { %s704_s15 = smov (%p34_p1, %s32_s15), 0  ;;  %p189_p3 = pnand %p531_p0, %p188_p2 }
   0x6   : > { %v267_v0 = vld [vmem:[%s698_s1] sm:$0xff] (!%p189_p3)  ;;  %v268_v1 = vld [vmem:[%s698_s1 + $0x8] sm:$0xff] (!%p189_p3)  ;;  %s532_s20 = sshll.u32 (!%p189_p3), %s617_s12, 3  ;;  %vm276_vm0 = vcmask (!%p189_p3), 130048  }
   0x7   : > { %192 = sbr.rel (%p189_p3) target bundleno = 240 (0xf0), region = 32  ;;  %v573_v2 = vpack.c.bf16 (!%p189_p3), %v268_v1, %v267_v0  ;;  %p230_p4 = scmp.lt.s32.totalorder (!%p189_p3), %s532_s20, 15  ;;  %v536_v11 = vld [vmem:[%s699_s2] ss:$0 sm:$0xff] (!%p189_p3) }
   0x9   : > { %574 = vmatprep.subr.bf16.mxu0 (!%p189_p3), %v573_v2  ;;  %577 = vmatprep.subr.bf16.mxu1 (!%p189_p3), %v573_v2 }
   0xa   : > { %576 = vmatpush3.bf16.msra.mxu0 (!%p189_p3), %v573_v2  ;;  %578 = vmatpush3.bf16.msra.mxu1 (!%p189_p3), %v573_v2 }
   0xe   : > { %s706_s20 = smov (!%p230_p4, %s532_s20), 15 }
   0xf   : > { %s533_s21 = sshll.u32 %s706_s20, 3 }
  0x10   : > { %s236_s24 = scalar_lea.vmem %s697_s0, %s533_s21  ;;  %s257_s29 = scalar_lea.vmem %s700_s3, %s533_s21 }
  0x11   : > { %v259_v3 = vld [vmem:[%s236_s24] sm:$0xff]  ;;  %v260_v5 = vld [vmem:[%s236_s24 + $0x8] sm:$0xff]  ;;  %v261_v7 = vld [vmem:[%s236_s24 + $0x10] sm:$0xff] }
  0x12   : > { %v263_v4 = vld [vmem:[%s236_s24 + $0x20] sm:$0xff]  ;;  %561 = vmatprep.mubr.msk.f32.mxu0 %vm276_vm0, %v259_v3  ;;  %v264_v6 = vld [vmem:[%s236_s24 + $0x28] sm:$0xff]  ;;  %v265_v8 = vld [vmem:[%s236_s24 + $0x30] sm:$0xff] }
  0x13   : > { %567 = vmatprep.mubr.msk.f32.mxu1 %vm276_vm0, %v263_v4  ;;  %562 = vmatmul.mubr.msk.f32.vlgmr.msra.gmra.mrb[0].mxu0 %vm276_vm0, %v260_v5  ;;  %v262_v9 = vld [vmem:[%s236_s24 + $0x18] sm:$0xff] }
  0x14   : > { %568 = vmatmul.mubr.msk.f32.vlgmr.msra.gmra.mrb[0].mxu1 %vm276_vm0, %v264_v6  ;;  %564 = vmatprep.mubr.msk.f32.mxu0 %vm276_vm0, %v261_v7  ;;  %v266_v10 = vld [vmem:[%s236_s24 + $0x38] sm:$0xff] }
  0x15   : > { %570 = vmatprep.mubr.msk.f32.mxu1 %vm276_vm0, %v265_v8 }
  0x17   : > { %565 = vmatmul.mubr.msk.f32.gmra.mrb[2].mxu0 %vm276_vm0, %v262_v9 }
  0x18   : > { %571 = vmatmul.mubr.msk.f32.gmra.mrb[2].mxu1 %vm276_vm0, %v266_v10 }
  0xe6   : > { %v563_v12 = vpop.f32.mrb[0].mxu0 }
  0xe7   : > { %v569_v13 = vpop.f32.mrb[0].mxu1  ;;  %v373_v14 = vadd.f32 %v563_v12, %v536_v11  ;;  %v367_v16 = vpop.f32.mrb[1].mxu0 }
  0xe8   : > { %v393_v15 = vadd.f32 %v569_v13, %v536_v11  ;;  %v387_v17 = vpop.f32.mrb[1].mxu1  ;;  %v368_v18 = vadd.f32 %v536_v11, %v367_v16 }
  0xe9   : > { %v388_v19 = vadd.f32 %v536_v11, %v387_v17  ;;  %407 = vst [vmem:[%s257_s29 + $0x8] sm:$0xff] %v373_v14 }
  0xea   : > { %411 = vst [vmem:[%s257_s29 + $0x28] sm:$0xff] %v393_v15  ;;  %406 = vst [vmem:[%s257_s29] sm:$0xff] %v368_v18  ;;  %v566_v20 = vpop.f32.mrb[2].mxu0 }
  0xeb   : > { %410 = vst [vmem:[%s257_s29 + $0x20] sm:$0xff] %v388_v19  ;;  %v572_v21 = vpop.f32.mrb[2].mxu1  ;;  %v383_v22 = vadd.f32 %v566_v20, %v536_v11  ;;  %v377_v24 = vpop.f32.mrb[3].mxu0 }
  0xec   : > { %v403_v23 = vadd.f32 %v572_v21, %v536_v11  ;;  %v397_v25 = vpop.f32.mrb[3].mxu1  ;;  %v378_v26 = vadd.f32 %v536_v11, %v377_v24 }
  0xed   : > { %v398_v27 = vadd.f32 %v536_v11, %v397_v25  ;;  %409 = vst [vmem:[%s257_s29 + $0x18] sm:$0xff] %v383_v22 }
  0xee   : > { %413 = vst [vmem:[%s257_s29 + $0x38] sm:$0xff] %v403_v23  ;;  %408 = vst [vmem:[%s257_s29 + $0x10] sm:$0xff] %v378_v26 }
  0xef   : > { %412 = vst [vmem:[%s257_s29 + $0x30] sm:$0xff] %v398_v27 }
  0xf0 PF: > { %s13_s14 = sadd.s32 1, %s625_s14   ;;  %s701_s12 = smov %s621_s13 }
  0xf1   : > { %p10_p5 = scmp.ge.s32.totalorder %s13_s14, 4   ;;  %s702_s13 = smov %s704_s15 }
  0xf3   :  { %12 = sbr.rel (!%p10_p5) target bundleno = 2 (0x2), region = 68 }

// kernel: block_forward.13
= control target key start
LH: loop header
LB: loop body
LE: loop exit
PB: predicated region body
PF: predicated region fallthrough
CT: control target
= control target key end

     0   :  { %s3574_s12 = smov 0   ;;  %s4140_s0 = inlined_call_operand.vmem [shape: bf16[2,110,8], index: 0, kind: input, shape index: {}]   ;;  %s4141_s1 = inlined_call_operand.vmem [shape: bf16[72,512], index: 1, kind: input, shape index: {}]   ;;  %s4142_s2 = inlined_call_operand.vmem [shape: f32[1,512], index: 2, kind: input, shape index: {}]   ;;  %s4143_s3 = inlined_call_operand.vmem [shape: bf16[2,80,512], index: 3, kind: output, shape index: {}]  }
   0x1 LB: > { %s2939_s13 = sadd.s32 4294967295, %s3551_s12   ;;  %p2943_p0 = scmp.ge.s32.totalorder %s3551_s12, 1  ;;  %s3551_s12 = sphi %s3574_s12, %s13_s12  }
   0x2   : > { %p137_p1 = scmp.lt.s32.totalorder %s3551_s12, 3 }
   0x4   : > { %p138_p2 = pnand %p2943_p0, %p137_p1 }
   0x5   : > { %v185_v0 = vld [vmem:[%s4141_s1 + $0x10] sm:$0xff] (!%p138_p2)  ;;  %vm286_vm0 = vcmask (!%p138_p2), 1043456   ;;  %v186_v1 = vld [vmem:[%s4141_s1 + $0x18] sm:$0xff] (!%p138_p2)  ;;  %v182_v2 = vld [vmem:[%s4141_s1] sm:$0xff] (!%p138_p2)  ;;  %p161_p3 = scmp.lt.s32.totalorder (!%p138_p2), %s2939_s13, 1  ;;  %v3553_v7 = vmov (!%p138_p2), 0  }
   0x6   : > { %141 = sbr.rel (%p138_p2) target bundleno = 601 (0x259), region = 32  ;;  %v2953_v3 = vcombine.high (!%p138_p2), %v185_v0, %v185_v0  ;;  %v2955_v4 = vcombine.high (!%p138_p2), %v186_v1, %v186_v1  ;;  %v2952_v5 = vcombine.low (!%p138_p2), %v185_v0, %v185_v0  ;;  %v2954_v6 = vcombine.low (!%p138_p2), %v186_v1, %v186_v1  ;;  %331 = vmatprep.mubr.bf16.mxu0 (!%p138_p2), %v3553_v7  ;;  %v183_v8 = vld [vmem:[%s4141_s1 + $0x8] sm:$0xff] (!%p138_p2)  ;;  %v3626_v23 = vld [vmem:[%s4141_s1 + $0x20] sm:$0xff] (!%p138_p2)  ;;  %v935_v1 = vld [vmem:[%s4141_s1 + $0x30] sm:$0xff] (!%p138_p2) }
   0x7   : > { %414 = vmatprep.mubr.bf16.mxu1 (!%p138_p2), %v3553_v7  ;;  %v2969_v9 = vcombine.high (!%p138_p2), %v182_v2, %v182_v2  ;;  %v2971_v10 = vcombine.high (!%p138_p2), %v183_v8, %v183_v8  ;;  %v2968_v21 = vcombine.low (!%p138_p2), %v182_v2, %v182_v2  ;;  %v2970_v22 = vcombine.low (!%p138_p2), %v183_v8, %v183_v8  ;;  %v3631_v26 = vld [vmem:[%s4141_s1 + $0x28] sm:$0xff] (!%p138_p2)  ;;  %v936_v2 = vld [vmem:[%s4141_s1 + $0x38] sm:$0xff] (!%p138_p2) }
   0x8   : > { %2956 = vmatprep.subr.msk.bf16.mxu0 (!%p138_p2), %vm286_vm0, %v2953_v3  ;;  %2962 = vmatprep.subr.msk.bf16.mxu1 (!%p138_p2), %vm286_vm0, %v2955_v4  ;;  %v288_v11 = vsel (!%p138_p2), %vm286_vm0, %v2952_v5, 0  ;;  %v294_v12 = vsel (!%p138_p2), %vm286_vm0, %v2954_v6, 0  ;;  %vm215_vm1 = vsmask.f32 (!%p138_p2), 7424  ;;  %vm270_vm2 = vcmask (!%p138_p2), 64512  }
   0x9   : > { %300 = vmatpush1.bf16.msra.mxu0 (!%p138_p2), %v288_v11  ;;  %383 = vmatpush1.bf16.msra.mxu1 (!%p138_p2), %v294_v12  ;;  %v486_v32 = vsel (!%p138_p2), %vm286_vm0, %v2968_v21, 0  ;;  %v492_v33 = vsel (!%p138_p2), %vm286_vm0, %v2970_v22, 0  ;;  %vm669_vm3 = vcmask (!%p138_p2), 1046528   ;;  %v2986_v36 = vcombine.high (!%p138_p2), %v3626_v23, %v3626_v23 }
   0xa   : > { %2972 = vmatprep.subr.msk.bf16.mxu0 (!%p138_p2), %vm286_vm0, %v2969_v9  ;;  %2978 = vmatprep.subr.msk.bf16.mxu1 (!%p138_p2), %vm286_vm0, %v2971_v10  ;;  %v2988_v37 = vcombine.high (!%p138_p2), %v3631_v26, %v3631_v26  ;;  %v2985_v63 = vcombine.low (!%p138_p2), %v3626_v23, %v3626_v23  ;;  %v2987_v0 = vcombine.low (!%p138_p2), %v3631_v26, %v3631_v26  ;;  %vm1528_vm4 = vcmask (!%p138_p2), 1045504  }
   0xb   : > { %v3008_v5 = vcombine.high (!%p138_p2), %v935_v1, %v935_v1  ;;  %v3010_v6 = vcombine.high (!%p138_p2), %v936_v2, %v936_v2  ;;  %vm1225_vm5 = vsmask.f32 (!%p138_p2), 6400  ;;  %vm2084_vm6 = vsmask.f32 (!%p138_p2), 5376 }
   0xc   : > { %v707_v3 = vsel (!%p138_p2), %vm286_vm0, %v2985_v63, 0  ;;  %v713_v4 = vsel (!%p138_p2), %vm286_vm0, %v2987_v0, 0  ;;  %vm2387_vm7 = vcmask (!%p138_p2), 1044480  }
   0xd   : > { %s4145_s13 = smov (!%p161_p3, %s2939_s13), 1 }
   0xe   : > { %s3475_s22 = smul.u32 56, %s4145_s13 }
   0xf   : > { %s3476_s4 = smul.u32 160, %s4145_s13 }
  0x10   : > { %s3608_s25 = scalar_lea.vmem %s4140_s0, %s3475_s22 }
  0x11   : > { %v172_v13 = vld [vmem:[%s3608_s25] sm:$0xf]  ;;  %v173_v14 = vld [vmem:[%s3608_s25 + $0x4] sm:$0xf]  ;;  %v3615_v16 = vld [vmem:[%s3608_s25 + $0x8] sm:$0xff]   ;;  %s4083_s6 = scalar_lea.vmem %s4143_s3, %s3476_s4 }
  0x12   : > { %v3612_v15 = vcombine.low %v172_v13, %v173_v14  ;;  %v224_v19 = vshll.u32 %v3615_v16, 16  ;;  %v3621_v20 = vld [vmem:[%s3608_s25 + $0x10] sm:$0xff]   ;;  %v663_v27 = vld [vmem:[%s3608_s25] sm:$0xe]  ;;  %v228_v29 = vshrl.u32 %v3615_v16, 16  ;;  %v671_v34 = vrot.slane %v3615_v16, 1 }
  0x13   : > { %v232_v30 = vshll.u32 %v3621_v20, 16  ;;  %v2984_v31 = vcombine.low %v663_v27, %v173_v14  ;;  %v3647_v41 = vld [vmem:[%s3608_s25 + $0x18] sm:$0xff]   ;;  %v673_v43 = vrot.slane %v3621_v20, 1  ;;  %v236_v46 = vshrl.u32 %v3621_v20, 16  ;;  %v3670_v50 = vld [vmem:[%s3608_s25 + $0x20] sm:$0xff]   ;;  %v3731_v8 = vld [vmem:[%s3608_s25 + $0xc] sm:$0xff]  }
  0x14   : > { %v217_v17 = vshrl.u32 %v3612_v15, 16  ;;  %v219_v18 = vshll.u32 %v3612_v15, 16  ;;  %v226_v25 = vrot.slane %v224_v19, 1  ;;  %v240_v47 = vshll.u32 %v3647_v41, 16  ;;  %v925_v9 = vld [vmem:[%s3608_s25 + $0x8] sm:$0xf] }
  0x15   : > { %v670_v38 = vrot.slane %v2984_v31, 1  ;;  %v234_v40 = vrot.slane %v232_v30, 1  ;;  %v3660_v44 = vsel %vm669_vm3, %v671_v34, %v673_v43  ;;  %v244_v52 = vshrl.u32 %v3647_v41, 16  ;;  %v3680_v56 = vld [vmem:[%s3608_s25 + $0x28] ss:$0 sps:$4 sm:$0x11]  }
  0x16   : > { %v221_v24 = vrot.slane %v219_v18, 1  ;;  %v230_v39 = vor.u32 %v228_v29, %v226_v25  ;;  %v242_v49 = vrot.slane %v240_v47, 1  ;;  %v248_v53 = vshll.u32 %v3670_v50, 16  ;;  %v1522_v10 = vld [vmem:[%s3608_s25 + $0x4] sm:$0xc]  ;;  %v1221_v18 = vld [vmem:[%s4141_s1 + $0x48] sm:$0xff] }
  0x17   : > { %v3650_v42 = vsel %vm669_vm3, %v670_v38, %v671_v34  ;;  %v238_v48 = vor.u32 %v236_v46, %v234_v40  ;;  %v252_v58 = vshrl.u32 %v3670_v50, 16  ;;  %v256_v59 = vshll.u32 %v3680_v56, 16  ;;  %v3805_v38 = vld [vmem:[%s3608_s25 + $0x14] sm:$0xff]  }
  0x18   : > { %v222_v28 = vor.u32 %v221_v24, %v217_v17  ;;  %v235_v45 = vsel %vm215_vm1, %v230_v39, %v234_v40  ;;  %v246_v54 = vor.u32 %v244_v52, %v242_v49  ;;  %v250_v55 = vrot.slane %v248_v53, 1  ;;  %v1220_v17 = vld [vmem:[%s4141_s1 + $0x40] sm:$0xff] }
  0x19   : > { %v243_v51 = vsel %vm215_vm1, %v238_v48, %v242_v49  ;;  %v258_v61 = vrot.slane %v256_v59, 1  ;;  %v3040_v11 = vcombine.low %v1522_v10, %v925_v9  ;;  %v1530_v12 = vrot.slane %v3731_v8, 2  ;;  %v3831_v48 = vld [vmem:[%s3608_s25 + $0x24] sm:$0xff]  }
  0x1a   : > { %v227_v35 = vsel %vm215_vm1, %v222_v28, %v226_v25  ;;  %v251_v57 = vsel %vm215_vm1, %v246_v54, %v250_v55  ;;  %v254_v60 = vor.u32 %v252_v58, %v250_v55  ;;  %v3025_v22 = vcombine.high %v1220_v17, %v1220_v17  ;;  %v924_v28 = vld [vmem:[%s3608_s25 + $0x4] sm:$0xe] }
  0x1b   : > { %2957 = vmatmul.mubr.msk.bf16.vlgmr.msra.gmra.mrb[0].mxu0 %vm270_vm2, %v227_v35  ;;  %2963 = vmatmul.mubr.msk.bf16.vlgmr.msra.gmra.mrb[0].mxu1 %vm270_vm2, %v227_v35  ;;  %v1529_v13 = vrot.slane %v3040_v11, 2  ;;  %v3027_v23 = vcombine.high %v1221_v18, %v1221_v18  ;;  %v675_v24 = vrot.slane %v3647_v41, 1  ;;  %v677_v26 = vrot.slane %v3670_v50, 1  ;;  %v3796_v35 = vld [vmem:[%s4141_s1 + $0x50] sm:$0xff] }
  0x1c   : > { %498 = vmatpush1.bf16.msra.mxu0 %v486_v32  ;;  %581 = vmatpush1.bf16.msra.mxu1 %v492_v33  ;;  %v259_v62 = vsel %vm215_vm1, %v254_v60, %v258_v61  ;;  %v3001_v30 = vcombine.low %v924_v28, %v925_v9  ;;  %v966_v32 = vrot.slane %v3731_v8, 1  ;;  %v3024_v33 = vcombine.low %v1220_v17, %v1220_v17 }
  0x1d   : > { %341 = vmatprep.mubr.bf16.mxu0 %v3553_v7  ;;  %424 = vmatprep.mubr.bf16.mxu1 %v3553_v7  ;;  %v3741_v14 = vsel %vm1528_vm4, %v1529_v13, %v1530_v12  ;;  %v676_v25 = vsel %vm669_vm3, %v673_v43, %v675_v24  ;;  %v678_v27 = vsel %vm669_vm3, %v675_v24, %v677_v26  ;;  %v968_v43 = vrot.slane %v3805_v38, 1 }
  0x1e   : > { %2989 = vmatprep.subr.msk.bf16.mxu0 %vm286_vm0, %v2986_v36  ;;  %2995 = vmatprep.subr.msk.bf16.mxu1 %vm286_vm0, %v2988_v37  ;;  %v965_v31 = vrot.slane %v3001_v30, 1  ;;  %v3026_v34 = vcombine.low %v1221_v18, %v1221_v18  ;;  %v3801_v36 = vld [vmem:[%s4141_s1 + $0x58] sm:$0xff]  ;;  %v1305_v39 = vsel %vm286_vm0, %v3024_v33, 0  ;;  %v972_v49 = vrot.slane %v3831_v48, 1 }
  0x1f   : > { %v1227_v53 = vshrl.u32 %v3001_v30, 16  ;;  %v1230_v54 = vshll.u32 %v3001_v30, 16  ;;  %v1235_v55 = vshrl.u32 %v3731_v8, 16  ;;  %v1244_v0 = vshrl.u32 %v3805_v38, 16 }
  0x20   : > { %v967_v37 = vsel %vm669_vm3, %v965_v31, %v966_v32  ;;  %v1311_v40 = vsel %vm286_vm0, %v3026_v34, 0 }
  0x21   : > { %v1229_v58 = vrot.slane %v1227_v53, 1  ;;  %v1232_v59 = vrot.slane %v1230_v54, 2  ;;  %v1237_v60 = vrot.slane %v1235_v55, 1  ;;  %v1246_v9 = vrot.slane %v1244_v0, 1 }
  0x23   : > { %2958 = vmatmul.mubr.msk.bf16.gmra.mrb[4].mxu0 %vm270_vm2, %v235_v45  ;;  %2964 = vmatmul.mubr.msk.bf16.gmra.mrb[4].mxu1 %vm270_vm2, %v235_v45  ;;  %v3822_v45 = vld [vmem:[%s3608_s25 + $0x1c] sm:$0xff]  }
  0x24   : > { %351 = vmatprep.mubr.bf16.mxu0 %v3553_v7  ;;  %434 = vmatprep.mubr.bf16.mxu1 %v3553_v7  ;;  %v970_v46 = vrot.slane %v3822_v45, 1  ;;  %v1253_v18 = vshrl.u32 %v3822_v45, 16 }
  0x26   : > { %v971_v47 = vsel %vm669_vm3, %v968_v43, %v970_v46 }
  0x2b   : > { %2959 = vmatmul.mubr.msk.bf16.gmra.mrb[8].mxu0 %vm270_vm2, %v243_v51  ;;  %2965 = vmatmul.mubr.msk.bf16.gmra.mrb[8].mxu1 %vm270_vm2, %v243_v51  ;;  %v973_v51 = vsel %vm669_vm3, %v970_v46, %v972_v49 }
  0x2c   : > { %361 = vmatprep.mubr.bf16.mxu0 %v3553_v7  ;;  %444 = vmatprep.mubr.bf16.mxu1 %v3553_v7 }
  0x33   : > { %2960 = vmatmul.mubr.msk.bf16.gmra.mrb[12].mxu0 %vm270_vm2, %v251_v57  ;;  %2966 = vmatmul.mubr.msk.bf16.gmra.mrb[12].mxu1 %vm270_vm2, %v251_v57 }
  0x34   : > { %371 = vmatprep.mubr.bf16.mxu0 %v3553_v7  ;;  %454 = vmatprep.mubr.bf16.mxu1 %v3553_v7 }
  0x3b   : > { %2961 = vmatmul.mubr.msk.bf16.gmra.mrb[16].mxu0 %vm270_vm2, %v259_v62  ;;  %2967 = vmatmul.mubr.msk.bf16.gmra.mrb[16].mxu1 %vm270_vm2, %v259_v62  ;;  %v1233_v62 = vor.u32 %v1232_v59, %v1229_v58  ;;  %v2382_v59 = vld [vmem:[%s4141_s1 + $0x80] sm:$0xff] }
  0x3c   : > { %529 = vmatprep.mubr.bf16.mxu0 %v3553_v7  ;;  %612 = vmatprep.mubr.bf16.mxu1 %v3553_v7 }
  0x43   : > { %2973 = vmatmul.mubr.msk.bf16.vlgmr.msra.gmra.mrb[0].mxu0 %vm270_vm2, %v3612_v15  ;;  %2979 = vmatmul.mubr.msk.bf16.vlgmr.msra.gmra.mrb[0].mxu1 %vm270_vm2, %v3612_v15  ;;  %v3007_v15 = vcombine.low %v935_v1, %v935_v1  ;;  %v1247_v1 = vshll.u32 %v3805_v38, 16 }
  0x44   : > { %719 = vmatpush1.bf16.msra.mxu0 %v707_v3  ;;  %802 = vmatpush1.bf16.msra.mxu1 %v713_v4  ;;  %v3043_v3 = vcombine.low %v3801_v36, %v3801_v36  ;;  %v1794_v4 = vld [vmem:[%s4141_s1 + $0x60] sm:$0xff] }
  0x45   : > { %539 = vmatprep.mubr.bf16.mxu0 %v3553_v7  ;;  %622 = vmatprep.mubr.bf16.mxu1 %v3553_v7  ;;  %v1002_v19 = vsel %vm286_vm0, %v3007_v15, 0  ;;  %v1249_v10 = vrot.slane %v1247_v1, 2  ;;  %v3064_v15 = vcombine.high %v1794_v4, %v1794_v4  ;;  %v3098_v1 = vcombine.high %v2382_v59, %v2382_v59 }
  0x46   : > { %3011 = vmatprep.subr.msk.bf16.mxu0 %vm286_vm0, %v3008_v5  ;;  %3017 = vmatprep.subr.msk.bf16.mxu1 %vm286_vm0, %v3010_v6  ;;  %v1795_v5 = vld [vmem:[%s4141_s1 + $0x68] sm:$0xff]  ;;  %v1572_v13 = vsel %vm286_vm0, %v3043_v3, 0 }
  0x47   : > { %v1250_v17 = vor.u32 %v1249_v10, %v1246_v9  ;;  %v3977_v10 = vld [vmem:[%s3608_s25 + $0x28] sm:$0xff]  }
  0x4b   : > { %2974 = vmatmul.mubr.msk.bf16.gmra.mrb[4].mxu0 %vm270_vm2, %v3615_v16  ;;  %2980 = vmatmul.mubr.msk.bf16.gmra.mrb[4].mxu1 %vm270_vm2, %v3615_v16  ;;  %v3009_v16 = vcombine.low %v936_v2, %v936_v2  ;;  %v3041_v2 = vcombine.low %v3796_v35, %v3796_v35 }
  0x4c   : > { %549 = vmatprep.mubr.bf16.mxu0 %v3553_v7  ;;  %632 = vmatprep.mubr.bf16.mxu1 %v3553_v7 }
  0x4d   : > { %v1008_v21 = vsel %vm286_vm0, %v3009_v16, 0  ;;  %v1566_v11 = vsel %vm286_vm0, %v3041_v2, 0  ;;  %v3066_v16 = vcombine.high %v1795_v5, %v1795_v5 }
  0x53   : > { %2975 = vmatmul.mubr.msk.bf16.gmra.mrb[8].mxu0 %vm270_vm2, %v3621_v20  ;;  %2981 = vmatmul.mubr.msk.bf16.gmra.mrb[8].mxu1 %vm270_vm2, %v3621_v20  ;;  %v679_v20 = vrot.slane %v3680_v56, 1  ;;  %v1238_v56 = vshll.u32 %v3731_v8, 16  ;;  %v1536_v8 = vrot.slane %v3831_v48, 2 }
  0x54   : > { %559 = vmatprep.mubr.bf16.mxu0 %v3553_v7  ;;  %642 = vmatprep.mubr.bf16.mxu1 %v3553_v7 }
  0x55   : > { %v680_v29 = vsel %vm669_vm3, %v677_v26, %v679_v20  ;;  %v1240_v61 = vrot.slane %v1238_v56, 2  ;;  %v1265_v26 = vshll.u32 %v3831_v48, 16 }
  0x57   : > { %v1241_v63 = vor.u32 %v1240_v61, %v1237_v60  ;;  %v1267_v28 = vrot.slane %v1265_v26, 2  ;;  %v2383_v60 = vld [vmem:[%s4141_s1 + $0x88] sm:$0xff] }
  0x58   : > { %v3100_v2 = vcombine.high %v2383_v60, %v2383_v60 }
  0x59   : > { %v1242_v6 = vsel %vm1225_vm5, %v1233_v62, %v1241_v63  ;;  %v3955_v62 = vld [vmem:[%s3608_s25 + $0x18] sm:$0xff]  }
  0x5a   : > { %v1827_v3 = vrot.slane %v3955_v62, 2 }
  0x5b   : > { %2976 = vmatmul.mubr.msk.bf16.gmra.mrb[12].mxu0 %vm270_vm2, %v3647_v41  ;;  %2982 = vmatmul.mubr.msk.bf16.gmra.mrb[12].mxu1 %vm270_vm2, %v3647_v41  ;;  %v3042_v41 = vcombine.high %v3796_v35, %v3796_v35 }
  0x5c   : > { %569 = vmatprep.mubr.bf16.mxu0 %v3553_v7  ;;  %652 = vmatprep.mubr.bf16.mxu1 %v3553_v7 }
  0x63   : > { %2977 = vmatmul.mubr.msk.bf16.gmra.mrb[16].mxu0 %vm270_vm2, %v3670_v50  ;;  %2983 = vmatmul.mubr.msk.bf16.gmra.mrb[16].mxu1 %vm270_vm2, %v3670_v50  ;;  %v3518_v50 = vld [vmem:[%s3608_s25 + $0x2c] ss:$0 sps:$4 sm:$0x11]  }
  0x64   : > { %750 = vmatprep.mubr.bf16.mxu0 %v3553_v7  ;;  %833 = vmatprep.mubr.bf16.mxu1 %v3553_v7  ;;  %v974_v52 = vrot.slane %v3518_v50, 1 }
  0x66   : > { %v975_v57 = vsel %vm669_vm3, %v972_v49, %v974_v52  ;;  %v1532_v49 = vrot.slane %v3805_v38, 2  ;;  %v3935_v52 = vld [vmem:[%s3608_s25 + $0xc] sm:$0xf] }
  0x68   : > { %v1533_v50 = vsel %vm1528_vm4, %v1530_v12, %v1532_v49 }
  0x6b   : > { %2990 = vmatmul.mubr.msk.bf16.vlgmr.msra.gmra.mrb[0].mxu0 %vm270_vm2, %v3650_v42  ;;  %2996 = vmatmul.mubr.msk.bf16.vlgmr.msra.gmra.mrb[0].mxu1 %vm270_vm2, %v3650_v42  ;;  %v3044_v42 = vcombine.high %v3801_v36, %v3801_v36 }
  0x6c   : > { %1014 = vmatpush1.bf16.msra.mxu0 %v1002_v19  ;;  %1097 = vmatpush1.bf16.msra.mxu1 %v1008_v21  ;;  %v1256_v19 = vshll.u32 %v3822_v45, 16  ;;  %v1251_v21 = vsel %vm1225_vm5, %v1241_v63, %v1250_v17 }
  0x6d   : > { %760 = vmatprep.mubr.bf16.mxu0 %v3553_v7  ;;  %843 = vmatprep.mubr.bf16.mxu1 %v3553_v7 }
  0x6e   : > { %3028 = vmatprep.subr.msk.bf16.mxu0 %vm286_vm0, %v3025_v22  ;;  %3034 = vmatprep.subr.msk.bf16.mxu1 %vm286_vm0, %v3027_v23  ;;  %v1255_v22 = vrot.slane %v1253_v18, 1  ;;  %v1258_v23 = vrot.slane %v1256_v19, 2 }
  0x70   : > { %v1259_v24 = vor.u32 %v1258_v23, %v1255_v22 }
  0x73   : > { %2991 = vmatmul.mubr.msk.bf16.gmra.mrb[4].mxu0 %vm270_vm2, %v3660_v44  ;;  %2997 = vmatmul.mubr.msk.bf16.gmra.mrb[4].mxu1 %vm270_vm2, %v3660_v44  ;;  %v969_v44 = vsel %vm669_vm3, %v966_v32, %v968_v43 }
  0x74   : > { %770 = vmatprep.mubr.bf16.mxu0 %v3553_v7  ;;  %853 = vmatprep.mubr.bf16.mxu1 %v3553_v7 }
  0x7b   : > { %2992 = vmatmul.mubr.msk.bf16.gmra.mrb[8].mxu0 %vm270_vm2, %v676_v25  ;;  %2998 = vmatmul.mubr.msk.bf16.gmra.mrb[8].mxu1 %vm270_vm2, %v676_v25  ;;  %v1262_v25 = vshrl.u32 %v3831_v48, 16  ;;  %v3940_v48 = vld [vmem:[%s3608_s25 + $0x10] sm:$0xff]  }
  0x7c   : > { %780 = vmatprep.mubr.bf16.mxu0 %v3553_v7  ;;  %863 = vmatprep.mubr.bf16.mxu1 %v3553_v7  ;;  %v1825_v56 = vrot.slane %v3940_v48, 2  ;;  %v2094_v19 = vshrl.u32 %v3940_v48, 16 }
  0x7d   : > { %v1264_v20 = vrot.slane %v1262_v25, 1 }
  0x7e   : > { %v2096_v25 = vrot.slane %v2094_v19, 2 }
  0x7f   : > { %v1268_v30 = vor.u32 %v1267_v28, %v1264_v20  ;;  %v2103_v28 = vshrl.u32 %v3955_v62, 16 }
  0x81   : > { %v1269_v33 = vsel %vm1225_vm5, %v1259_v24, %v1268_v30 }
  0x83   : > { %2993 = vmatmul.mubr.msk.bf16.gmra.mrb[12].mxu0 %vm270_vm2, %v678_v27  ;;  %2999 = vmatmul.mubr.msk.bf16.gmra.mrb[12].mxu1 %vm270_vm2, %v678_v27  ;;  %v1260_v27 = vsel %vm1225_vm5, %v1250_v17, %v1259_v24 }
  0x84   : > { %790 = vmatprep.mubr.bf16.mxu0 %v3553_v7  ;;  %873 = vmatprep.mubr.bf16.mxu1 %v3553_v7 }
  0x8b   : > { %2994 = vmatmul.mubr.msk.bf16.gmra.mrb[16].mxu0 %vm270_vm2, %v680_v29  ;;  %3000 = vmatmul.mubr.msk.bf16.gmra.mrb[16].mxu1 %vm270_vm2, %v680_v29  ;;  %v3523_v29 = vld [vmem:[%s3608_s25 + $0x2c] ss:$0 sps:$4 sm:$0x33]  }
  0x8c   : > { %1045 = vmatprep.mubr.bf16.mxu0 %v3553_v7  ;;  %1128 = vmatprep.mubr.bf16.mxu1 %v3553_v7  ;;  %v1271_v31 = vshrl.u32 %v3523_v29, 16  ;;  %v1274_v32 = vshll.u32 %v3523_v29, 16 }
  0x8e   : > { %v1273_v34 = vrot.slane %v1271_v31, 1  ;;  %v1276_v35 = vrot.slane %v1274_v32, 2  ;;  %v3099_v31 = vcombine.low %v2383_v60, %v2383_v60  ;;  %v2389_v60 = vrot.slane %v3940_v48, 3 }
  0x90   : > { %v1277_v36 = vor.u32 %v1276_v35, %v1273_v34 }
  0x93   : > { %3012 = vmatmul.mubr.msk.bf16.vlgmr.msra.gmra.mrb[0].mxu0 %vm270_vm2, %v967_v37  ;;  %3018 = vmatmul.mubr.msk.bf16.vlgmr.msra.gmra.mrb[0].mxu1 %vm270_vm2, %v967_v37  ;;  %v1278_v37 = vsel %vm1225_vm5, %v1268_v30, %v1277_v36  ;;  %v3097_v30 = vcombine.low %v2382_v59, %v2382_v59  ;;  %v2431_v36 = vsel %vm286_vm0, %v3099_v31, 0 }
  0x94   : > { %1317 = vmatpush1.bf16.msra.mxu0 %v1305_v39  ;;  %1400 = vmatpush1.bf16.msra.mxu1 %v1311_v40  ;;  %v3063_v39 = vcombine.low %v1794_v4, %v1794_v4  ;;  %v3065_v40 = vcombine.low %v1795_v5, %v1795_v5  ;;  %v1828_v4 = vsel %vm1528_vm4, %v1825_v56, %v1827_v3  ;;  %v3968_v5 = vld [vmem:[%s3608_s25 + $0x20] sm:$0xff]  }
  0x95   : > { %1055 = vmatprep.mubr.bf16.mxu0 %v3553_v7  ;;  %1138 = vmatprep.mubr.bf16.mxu1 %v3553_v7  ;;  %v2425_v35 = vsel %vm286_vm0, %v3097_v30, 0 }
  0x96   : > { %3045 = vmatprep.subr.msk.bf16.mxu0 %vm286_vm0, %v3042_v41  ;;  %3051 = vmatprep.subr.msk.bf16.mxu1 %vm286_vm0, %v3044_v42  ;;  %v2079_v41 = vld [vmem:[%s4141_s1 + $0x70] sm:$0xff]  ;;  %v2080_v42 = vld [vmem:[%s4141_s1 + $0x78] sm:$0xff]  ;;  %v1861_v43 = vsel %vm286_vm0, %v3063_v39, 0  ;;  %v2112_v39 = vshrl.u32 %v3968_v5, 16 }
  0x97   : > { %v3081_v46 = vcombine.high %v2079_v41, %v2079_v41  ;;  %v3082_v58 = vcombine.low %v2080_v42, %v2080_v42 }
  0x99   : > { %v2170_v0 = vsel %vm286_vm0, %v3082_v58, 0 }
  0x9b   : > { %3013 = vmatmul.mubr.msk.bf16.gmra.mrb[4].mxu0 %vm270_vm2, %v969_v44  ;;  %3019 = vmatmul.mubr.msk.bf16.gmra.mrb[4].mxu1 %vm270_vm2, %v969_v44  ;;  %v1867_v44 = vsel %vm286_vm0, %v3065_v40, 0  ;;  %v2115_v40 = vshll.u32 %v3968_v5, 16 }
  0x9c   : > { %1065 = vmatprep.mubr.bf16.mxu0 %v3553_v7  ;;  %1148 = vmatprep.mubr.bf16.mxu1 %v3553_v7 }
  0xa3   : > { %3014 = vmatmul.mubr.msk.bf16.gmra.mrb[8].mxu0 %vm270_vm2, %v971_v47  ;;  %3020 = vmatmul.mubr.msk.bf16.gmra.mrb[8].mxu1 %vm270_vm2, %v971_v47  ;;  %v3083_v47 = vcombine.high %v2080_v42, %v2080_v42  ;;  %v2114_v42 = vrot.slane %v2112_v39, 2 }
  0xa4   : > { %1075 = vmatprep.mubr.bf16.mxu0 %v3553_v7  ;;  %1158 = vmatprep.mubr.bf16.mxu1 %v3553_v7 }
  0xab   : > { %3015 = vmatmul.mubr.msk.bf16.gmra.mrb[12].mxu0 %vm270_vm2, %v973_v51  ;;  %3021 = vmatmul.mubr.msk.bf16.gmra.mrb[12].mxu1 %vm270_vm2, %v973_v51  ;;  %v1783_v51 = vld [vmem:[%s3608_s25 + $0x8] sm:$0xc] }
  0xac   : > { %1085 = vmatprep.mubr.bf16.mxu0 %v3553_v7  ;;  %1168 = vmatprep.mubr.bf16.mxu1 %v3553_v7  ;;  %v3057_v54 = vcombine.low %v1783_v51, %v3935_v52 }
  0xae   : > { %v1824_v55 = vrot.slane %v3057_v54, 2  ;;  %v2086_v17 = vshrl.u32 %v3057_v54, 16  ;;  %v2089_v18 = vshll.u32 %v3057_v54, 16 }
  0xb0   : > { %v1826_v61 = vsel %vm1528_vm4, %v1824_v55, %v1825_v56  ;;  %v2088_v23 = vrot.slane %v2086_v17, 2  ;;  %v2091_v24 = vrot.slane %v2089_v18, 3  ;;  %v2381_v56 = vld [vmem:[%s3608_s25 + $0x8] sm:$0x8] }
  0xb1   : > { %v3096_v58 = vcombine.low %v2381_v56, %v3935_v52  ;;  %v2391_v52 = vrot.slane %v3955_v62, 3 }
  0xb3   : > { %3016 = vmatmul.mubr.msk.bf16.gmra.mrb[16].mxu0 %vm270_vm2, %v975_v57  ;;  %3022 = vmatmul.mubr.msk.bf16.gmra.mrb[16].mxu1 %vm270_vm2, %v975_v57  ;;  %v3080_v57 = vcombine.low %v2079_v41, %v2079_v41  ;;  %v2388_v59 = vrot.slane %v3096_v58, 3 }
  0xb4   : > { %1348 = vmatprep.mubr.bf16.mxu0 %v3553_v7  ;;  %1431 = vmatprep.mubr.bf16.mxu1 %v3553_v7 }
  0xb5   : > { %v2164_v63 = vsel %vm286_vm0, %v3080_v57, 0 }
  0xbb   : > { %3029 = vmatmul.mubr.msk.bf16.vlgmr.msra.gmra.mrb[0].mxu0 %vm270_vm2, %v1242_v6  ;;  %3035 = vmatmul.mubr.msk.bf16.vlgmr.msra.gmra.mrb[0].mxu1 %vm270_vm2, %v1242_v6  ;;  %v1829_v6 = vrot.slane %v3968_v5, 2 }
  0xbc   : > { %1578 = vmatpush1.bf16.msra.mxu0 %v1566_v11  ;;  %1661 = vmatpush1.bf16.msra.mxu1 %v1572_v13  ;;  %v1831_v11 = vrot.slane %v3977_v10, 2  ;;  %v3538_v13 = vld [vmem:[%s3608_s25 + $0x30] ss:$0 sps:$4 sm:$0x33]  }
  0xbd   : > { %1358 = vmatprep.mubr.bf16.mxu0 %v3553_v7  ;;  %1441 = vmatprep.mubr.bf16.mxu1 %v3553_v7  ;;  %v1830_v9 = vsel %vm1528_vm4, %v1827_v3, %v1829_v6 }
  0xbe   : > { %3067 = vmatprep.subr.msk.bf16.mxu0 %vm286_vm0, %v3064_v15  ;;  %3073 = vmatprep.subr.msk.bf16.mxu1 %vm286_vm0, %v3066_v16  ;;  %v1832_v15 = vsel %vm1528_vm4, %v1829_v6, %v1831_v11  ;;  %v1833_v16 = vrot.slane %v3538_v13, 2 }
  0xc0   : > { %v1834_v22 = vsel %vm1528_vm4, %v1831_v11, %v1833_v16 }
  0xc3   : > { %3030 = vmatmul.mubr.msk.bf16.gmra.mrb[4].mxu0 %vm270_vm2, %v1251_v21  ;;  %3036 = vmatmul.mubr.msk.bf16.gmra.mrb[4].mxu1 %vm270_vm2, %v1251_v21  ;;  %v2097_v21 = vshll.u32 %v3940_v48, 16  ;;  %v2393_v48 = vrot.slane %v3968_v5, 3 }
  0xc4   : > { %1368 = vmatprep.mubr.bf16.mxu0 %v3553_v7  ;;  %1451 = vmatprep.mubr.bf16.mxu1 %v3553_v7 }
  0xc5   : > { %v2099_v26 = vrot.slane %v2097_v21, 3 }
  0xc7   : > { %v2100_v20 = vor.u32 %v2099_v26, %v2096_v25 }
  0xcb   : > { %3031 = vmatmul.mubr.msk.bf16.gmra.mrb[8].mxu0 %vm270_vm2, %v1260_v27  ;;  %3037 = vmatmul.mubr.msk.bf16.gmra.mrb[8].mxu1 %vm270_vm2, %v1260_v27  ;;  %v2092_v27 = vor.u32 %v2091_v24, %v2088_v23 }
  0xcc   : > { %1378 = vmatprep.mubr.bf16.mxu0 %v3553_v7  ;;  %1461 = vmatprep.mubr.bf16.mxu1 %v3553_v7 }
  0xcd   : > { %v2101_v32 = vsel %vm2084_vm6, %v2092_v27, %v2100_v20 }
  0xd3   : > { %3032 = vmatmul.mubr.msk.bf16.gmra.mrb[12].mxu0 %vm270_vm2, %v1269_v33  ;;  %3038 = vmatmul.mubr.msk.bf16.gmra.mrb[12].mxu1 %vm270_vm2, %v1269_v33  ;;  %v2105_v33 = vrot.slane %v2103_v28, 2 }
  0xd4   : > { %1388 = vmatprep.mubr.bf16.mxu0 %v3553_v7  ;;  %1471 = vmatprep.mubr.bf16.mxu1 %v3553_v7 }
  0xdb   : > { %3033 = vmatmul.mubr.msk.bf16.gmra.mrb[16].mxu0 %vm270_vm2, %v1278_v37  ;;  %3039 = vmatmul.mubr.msk.bf16.gmra.mrb[16].mxu1 %vm270_vm2, %v1278_v37 }
  0xdc   : > { %1609 = vmatprep.mubr.bf16.mxu0 %v3553_v7  ;;  %1692 = vmatprep.mubr.bf16.mxu1 %v3553_v7 }
  0xe3   : > { %3046 = vmatmul.mubr.msk.bf16.vlgmr.msra.gmra.mrb[0].mxu0 %vm270_vm2, %v3741_v14  ;;  %3052 = vmatmul.mubr.msk.bf16.vlgmr.msra.gmra.mrb[0].mxu1 %vm270_vm2, %v3741_v14  ;;  %v1534_v14 = vrot.slane %v3822_v45, 2  ;;  %v1538_v45 = vrot.slane %v3523_v29, 2  ;;  %v2106_v29 = vshll.u32 %v3955_v62, 16  ;;  %v2395_v62 = vrot.slane %v3977_v10, 3 }
  0xe4   : > { %1873 = vmatpush1.bf16.msra.mxu0 %v1861_v43  ;;  %1956 = vmatpush1.bf16.msra.mxu1 %v1867_v44  ;;  %v2117_v43 = vrot.slane %v2115_v40, 3 }
  0xe5   : > { %1619 = vmatprep.mubr.bf16.mxu0 %v3553_v7  ;;  %1702 = vmatprep.mubr.bf16.mxu1 %v3553_v7  ;;  %v1535_v38 = vsel %vm1528_vm4, %v1532_v49, %v1534_v14  ;;  %v1537_v12 = vsel %vm1528_vm4, %v1534_v14, %v1536_v8  ;;  %v1539_v53 = vsel %vm1528_vm4, %v1536_v8, %v1538_v45  ;;  %v2108_v34 = vrot.slane %v2106_v29, 3 }
  0xe6   : > { %3084 = vmatprep.subr.msk.bf16.mxu0 %vm286_vm0, %v3081_v46  ;;  %3090 = vmatprep.subr.msk.bf16.mxu1 %vm286_vm0, %v3083_v47  ;;  %v2118_v44 = vor.u32 %v2117_v43, %v2114_v42  ;;  %v2121_v46 = vshrl.u32 %v3977_v10, 16  ;;  %v2124_v47 = vshll.u32 %v3977_v10, 16  ;;  %v2642_v10 = vld [vmem:[%s4142_s2] sm:$0xf] }
  0xe7   : > { %v2109_v37 = vor.u32 %v2108_v34, %v2105_v33 }
  0xe8   : > { %v2126_v14 = vrot.slane %v2124_v47, 3 }
  0xe9   : > { %v2110_v41 = vsel %vm2084_vm6, %v2100_v20, %v2109_v37  ;;  %v2119_v49 = vsel %vm2084_vm6, %v2109_v37, %v2118_v44 }
  0xeb   : > { %3047 = vmatmul.mubr.msk.bf16.gmra.mrb[4].mxu0 %vm270_vm2, %v1533_v50  ;;  %3053 = vmatmul.mubr.msk.bf16.gmra.mrb[4].mxu1 %vm270_vm2, %v1533_v50  ;;  %v2123_v50 = vrot.slane %v2121_v46, 2 }
  0xec   : > { %1629 = vmatprep.mubr.bf16.mxu0 %v3553_v7  ;;  %1712 = vmatprep.mubr.bf16.mxu1 %v3553_v7 }
  0xed   : > { %v2127_v8 = vor.u32 %v2126_v14, %v2123_v50 }
  0xef   : > { %v2128_v51 = vsel %vm2084_vm6, %v2118_v44, %v2127_v8 }
  0xf3   : > { %3048 = vmatmul.mubr.msk.bf16.gmra.mrb[8].mxu0 %vm270_vm2, %v1535_v38  ;;  %3054 = vmatmul.mubr.msk.bf16.gmra.mrb[8].mxu1 %vm270_vm2, %v1535_v38  ;;  %v3543_v38 = vld [vmem:[%s3608_s25 + $0x30] ss:$0 sps:$4 sm:$0x77]  }
  0xf4   : > { %1639 = vmatprep.mubr.bf16.mxu0 %v3553_v7  ;;  %1722 = vmatprep.mubr.bf16.mxu1 %v3553_v7  ;;  %v2133_v45 = vshll.u32 %v3543_v38, 16 }
  0xf6   : > { %v2135_v54 = vrot.slane %v2133_v45, 3 }
  0xfb   : > { %3049 = vmatmul.mubr.msk.bf16.gmra.mrb[12].mxu0 %vm270_vm2, %v1537_v12  ;;  %3055 = vmatmul.mubr.msk.bf16.gmra.mrb[12].mxu1 %vm270_vm2, %v1537_v12  ;;  %v2130_v12 = vshrl.u32 %v3543_v38, 16 }
  0xfc   : > { %1649 = vmatprep.mubr.bf16.mxu0 %v3553_v7  ;;  %1732 = vmatprep.mubr.bf16.mxu1 %v3553_v7 }
 0x103   : > { %3050 = vmatmul.mubr.msk.bf16.gmra.mrb[16].mxu0 %vm270_vm2, %v1539_v53  ;;  %3056 = vmatmul.mubr.msk.bf16.gmra.mrb[16].mxu1 %vm270_vm2, %v1539_v53  ;;  %v2132_v53 = vrot.slane %v2130_v12, 2 }
 0x104   : > { %1904 = vmatprep.mubr.bf16.mxu0 %v3553_v7  ;;  %1987 = vmatprep.mubr.bf16.mxu1 %v3553_v7 }
 0x105   : > { %v2136_v55 = vor.u32 %v2135_v54, %v2132_v53 }
 0x107   : > { %v2137_v57 = vsel %vm2084_vm6, %v2127_v8, %v2136_v55 }
 0x10b   : > { %3068 = vmatmul.mubr.msk.bf16.vlgmr.msra.gmra.mrb[0].mxu0 %vm270_vm2, %v1826_v61  ;;  %3074 = vmatmul.mubr.msk.bf16.vlgmr.msra.gmra.mrb[0].mxu1 %vm270_vm2, %v1826_v61  ;;  %v2390_v61 = vsel %vm2387_vm7, %v2388_v59, %v2389_v60 }
 0x10c   : > { %2176 = vmatpush1.bf16.msra.mxu0 %v2164_v63  ;;  %2259 = vmatpush1.bf16.msra.mxu1 %v2170_v0  ;;  %v2392_v63 = vsel %vm2387_vm7, %v2389_v60, %v2391_v52  ;;  %v2394_v0 = vsel %vm2387_vm7, %v2391_v52, %v2393_v48 }
 0x10d   : > { %1914 = vmatprep.mubr.bf16.mxu0 %v3553_v7  ;;  %1997 = vmatprep.mubr.bf16.mxu1 %v3553_v7 }
 0x10e   : > { %3101 = vmatprep.subr.msk.bf16.mxu0 %vm286_vm0, %v3098_v1  ;;  %3107 = vmatprep.subr.msk.bf16.mxu1 %vm286_vm0, %v3100_v2  ;;  %v2396_v1 = vsel %vm2387_vm7, %v2393_v48, %v2395_v62  ;;  %v2397_v2 = vrot.slane %v3543_v38, 3 }
 0x110   : > { %v2398_v3 = vsel %vm2387_vm7, %v2395_v62, %v2397_v2 }
 0x113   : > { %3069 = vmatmul.mubr.msk.bf16.gmra.mrb[4].mxu0 %vm270_vm2, %v1828_v4  ;;  %3075 = vmatmul.mubr.msk.bf16.gmra.mrb[4].mxu1 %vm270_vm2, %v1828_v4  ;;  %v2644_v4 = vlaneseq }
 0x114   : > { %1924 = vmatprep.mubr.bf16.mxu0 %v3553_v7  ;;  %2007 = vmatprep.mubr.bf16.mxu1 %v3553_v7 }
 0x115   : > { %v2645_v5 = vshrl.u32 %v2644_v4, 7 }
 0x117   : > { %v2646_v6 = vsub.s32 0, %v2645_v5  ;;  %v2650_v11 = vsub.s32 1, %v2645_v5  ;;  %v2658_v13 = vsub.s32 3, %v2645_v5 }
 0x119   : > { %v4067_v16 = vrot.slane %v2642_v10, %v2650_v11  ;;  %v4069_v17 = vrot.slane %v2642_v10, %v2658_v13 }
 0x11b   : > { %3070 = vmatmul.mubr.msk.bf16.gmra.mrb[8].mxu0 %vm270_vm2, %v1830_v9  ;;  %3076 = vmatmul.mubr.msk.bf16.gmra.mrb[8].mxu1 %vm270_vm2, %v1830_v9  ;;  %v2654_v9 = vsub.s32 2, %v2645_v5 }
 0x11c   : > { %1934 = vmatprep.mubr.bf16.mxu0 %v3553_v7  ;;  %2017 = vmatprep.mubr.bf16.mxu1 %v3553_v7 }
 0x123   : > { %3071 = vmatmul.mubr.msk.bf16.gmra.mrb[12].mxu0 %vm270_vm2, %v1832_v15  ;;  %3077 = vmatmul.mubr.msk.bf16.gmra.mrb[12].mxu1 %vm270_vm2, %v1832_v15  ;;  %v4063_v15 = vrot.slane %v2642_v10, %v2646_v6 }
 0x124   : > { %1944 = vmatprep.mubr.bf16.mxu0 %v3553_v7  ;;  %2027 = vmatprep.mubr.bf16.mxu1 %v3553_v7 }
 0x12b   : > { %3072 = vmatmul.mubr.msk.bf16.gmra.mrb[16].mxu0 %vm270_vm2, %v1834_v22  ;;  %3078 = vmatmul.mubr.msk.bf16.gmra.mrb[16].mxu1 %vm270_vm2, %v1834_v22 }
 0x12c   : > { %2207 = vmatprep.mubr.bf16.mxu0 %v3553_v7  ;;  %2290 = vmatprep.mubr.bf16.mxu1 %v3553_v7 }
 0x133   : > { %3085 = vmatmul.mubr.msk.bf16.vlgmr.msra.gmra.mrb[0].mxu0 %vm270_vm2, %v2101_v32  ;;  %3091 = vmatmul.mubr.msk.bf16.vlgmr.msra.gmra.mrb[0].mxu1 %vm270_vm2, %v2101_v32 }
 0x134   : > { %2437 = vmatpush1.bf16.msra.mxu0 %v2425_v35  ;;  %2520 = vmatpush1.bf16.msra.mxu1 %v2431_v36 }
 0x135   : > { %2217 = vmatprep.mubr.bf16.mxu0 %v3553_v7  ;;  %2300 = vmatprep.mubr.bf16.mxu1 %v3553_v7 }
 0x13b   : > { %3086 = vmatmul.mubr.msk.bf16.gmra.mrb[4].mxu0 %vm270_vm2, %v2110_v41  ;;  %3092 = vmatmul.mubr.msk.bf16.gmra.mrb[4].mxu1 %vm270_vm2, %v2110_v41 }
 0x13c   : > { %2227 = vmatprep.mubr.bf16.mxu0 %v3553_v7  ;;  %2310 = vmatprep.mubr.bf16.mxu1 %v3553_v7 }
 0x143   : > { %3087 = vmatmul.mubr.msk.bf16.gmra.mrb[8].mxu0 %vm270_vm2, %v2119_v49  ;;  %3093 = vmatmul.mubr.msk.bf16.gmra.mrb[8].mxu1 %vm270_vm2, %v2119_v49 }
 0x144   : > { %2237 = vmatprep.mubr.bf16.mxu0 %v3553_v7  ;;  %2320 = vmatprep.mubr.bf16.mxu1 %v3553_v7 }
 0x14b   : > { %3088 = vmatmul.mubr.msk.bf16.gmra.mrb[12].mxu0 %vm270_vm2, %v2128_v51  ;;  %3094 = vmatmul.mubr.msk.bf16.gmra.mrb[12].mxu1 %vm270_vm2, %v2128_v51 }
 0x14c   : > { %2247 = vmatprep.mubr.bf16.mxu0 %v3553_v7  ;;  %2330 = vmatprep.mubr.bf16.mxu1 %v3553_v7 }
 0x153   : > { %3089 = vmatmul.mubr.msk.bf16.gmra.mrb[16].mxu0 %vm270_vm2, %v2137_v57  ;;  %3095 = vmatmul.mubr.msk.bf16.gmra.mrb[16].mxu1 %vm270_vm2, %v2137_v57 }
 0x154   : > { %2468 = vmatprep.mubr.bf16.mxu0 %v3553_v7  ;;  %2551 = vmatprep.mubr.bf16.mxu1 %v3553_v7 }
 0x15b   : > { %3102 = vmatmul.mubr.msk.bf16.vlgmr.msra.gmra.mrb[0].mxu0 %vm270_vm2, %v2390_v61  ;;  %3108 = vmatmul.mubr.msk.bf16.vlgmr.msra.gmra.mrb[0].mxu1 %vm270_vm2, %v2390_v61 }
 0x15c   : > { %2478 = vmatprep.mubr.bf16.mxu0 %v3553_v7  ;;  %2561 = vmatprep.mubr.bf16.mxu1 %v3553_v7 }
 0x163   : > { %3103 = vmatmul.mubr.msk.bf16.gmra.mrb[4].mxu0 %vm270_vm2, %v2392_v63  ;;  %3109 = vmatmul.mubr.msk.bf16.gmra.mrb[4].mxu1 %vm270_vm2, %v2392_v63 }
 0x164   : > { %2488 = vmatprep.mubr.bf16.mxu0 %v3553_v7  ;;  %2571 = vmatprep.mubr.bf16.mxu1 %v3553_v7 }
 0x16b   : > { %3104 = vmatmul.mubr.msk.bf16.gmra.mrb[8].mxu0 %vm270_vm2, %v2394_v0  ;;  %3110 = vmatmul.mubr.msk.bf16.gmra.mrb[8].mxu1 %vm270_vm2, %v2394_v0 }
 0x16c   : > { %2498 = vmatprep.mubr.bf16.mxu0 %v3553_v7  ;;  %2581 = vmatprep.mubr.bf16.mxu1 %v3553_v7 }
 0x173   : > { %3105 = vmatmul.mubr.msk.bf16.gmra.mrb[12].mxu0 %vm270_vm2, %v2396_v1  ;;  %3111 = vmatmul.mubr.msk.bf16.gmra.mrb[12].mxu1 %vm270_vm2, %v2396_v1 }
 0x174   : > { %2508 = vmatprep.mubr.bf16.mxu0 %v3553_v7  ;;  %2591 = vmatprep.mubr.bf16.mxu1 %v3553_v7  ;;  %v4065_v7 = vrot.slane %v2642_v10, %v2654_v9 }
 0x17b   : > { %3106 = vmatmul.mubr.msk.bf16.gmra.mrb[16].mxu0 %vm270_vm2, %v2398_v3  ;;  %3112 = vmatmul.mubr.msk.bf16.gmra.mrb[16].mxu1 %vm270_vm2, %v2398_v3 }
 0x22e   : > { %v2470_v18 = vpop.f32.mrb[0].mxu0  ;;  %v2553_v19 = vpop.f32.mrb[0].mxu1 }
 0x22f   : > { %v2664_v21 = vadd.f32 %v4063_v15, %v2470_v18  ;;  %v2666_v22 = vadd.f32 %v4065_v7, %v2553_v19  ;;  %v2472_v23 = vpop.f32.mrb[1].mxu0  ;;  %v2555_v24 = vpop.f32.mrb[1].mxu1 }
 0x230   : > { %v2665_v25 = vadd.f32 %v4067_v16, %v2472_v23  ;;  %v2667_v26 = vadd.f32 %v4069_v17, %v2555_v24  ;;  %v2474_v27 = vpop.f32.mrb[2].mxu0  ;;  %v2557_v20 = vpop.f32.mrb[2].mxu1 }
 0x231   : > { %v2704_v28 = vmax.f32 %v2664_v21, 0.0  ;;  %v2706_v29 = vmax.f32 %v2666_v22, 0.0  ;;  %v2668_v30 = vadd.f32 %v4063_v15, %v2474_v27  ;;  %v2670_v31 = vadd.f32 %v4065_v7, %v2557_v20  ;;  %v2476_v32 = vpop.f32.mrb[3].mxu0  ;;  %v2559_v33 = vpop.f32.mrb[3].mxu1 }
 0x232   : > { %v2705_v34 = vmax.f32 %v2665_v25, 0.0  ;;  %v2707_v35 = vmax.f32 %v2667_v26, 0.0  ;;  %v2669_v36 = vadd.f32 %v4067_v16, %v2476_v32  ;;  %v2671_v37 = vadd.f32 %v4069_v17, %v2559_v33 }
 0x233   : > { %v2708_v39 = vmax.f32 %v2668_v30, 0.0  ;;  %v2710_v40 = vmax.f32 %v2670_v31, 0.0 }
 0x234   : > { %v3135_v41 = vpack.c.bf16 %v2705_v34, %v2704_v28  ;;  %v3136_v42 = vpack.c.bf16 %v2707_v35, %v2706_v29  ;;  %v2709_v43 = vmax.f32 %v2669_v36, 0.0  ;;  %v2711_v44 = vmax.f32 %v2671_v37, 0.0 }
 0x236   : > { %2864 = vst [vmem:[%s4083_s6] sm:$0xff] %v3135_v41  ;;  %2865 = vst [vmem:[%s4083_s6 + $0x8] sm:$0xff] %v3136_v42  ;;  %v3137_v46 = vpack.c.bf16 %v2709_v43, %v2708_v39  ;;  %v3138_v47 = vpack.c.bf16 %v2711_v44, %v2710_v40  ;;  %v2480_v49 = vpop.f32.mrb[4].mxu0  ;;  %v2563_v50 = vpop.f32.mrb[4].mxu1 }
 0x237   : > { %v2672_v14 = vadd.f32 %v4063_v15, %v2480_v49  ;;  %v2674_v38 = vadd.f32 %v4065_v7, %v2563_v50  ;;  %v2482_v8 = vpop.f32.mrb[5].mxu0  ;;  %v2565_v12 = vpop.f32.mrb[5].mxu1 }
 0x238   : > { %2866 = vst [vmem:[%s4083_s6 + $0x10] sm:$0xff] %v3137_v46  ;;  %2867 = vst [vmem:[%s4083_s6 + $0x18] sm:$0xff] %v3138_v47  ;;  %v2673_v45 = vadd.f32 %v4067_v16, %v2482_v8  ;;  %v2675_v51 = vadd.f32 %v4069_v17, %v2565_v12  ;;  %v2484_v53 = vpop.f32.mrb[6].mxu0  ;;  %v2567_v54 = vpop.f32.mrb[6].mxu1 }
 0x239   : > { %v2712_v55 = vmax.f32 %v2672_v14, 0.0  ;;  %v2714_v56 = vmax.f32 %v2674_v38, 0.0  ;;  %v2676_v57 = vadd.f32 %v4063_v15, %v2484_v53  ;;  %v2678_v58 = vadd.f32 %v4065_v7, %v2567_v54  ;;  %v2486_v59 = vpop.f32.mrb[7].mxu0  ;;  %v2569_v60 = vpop.f32.mrb[7].mxu1 }
 0x23a   : > { %v2713_v61 = vmax.f32 %v2673_v45, 0.0  ;;  %v2715_v52 = vmax.f32 %v2675_v51, 0.0  ;;  %v2677_v63 = vadd.f32 %v4067_v16, %v2486_v59  ;;  %v2679_v48 = vadd.f32 %v4069_v17, %v2569_v60 }
 0x23b   : > { %v2716_v0 = vmax.f32 %v2676_v57, 0.0  ;;  %v2718_v62 = vmax.f32 %v2678_v58, 0.0 }
 0x23c   : > { %v3139_v1 = vpack.c.bf16 %v2713_v61, %v2712_v55  ;;  %v3140_v2 = vpack.c.bf16 %v2715_v52, %v2714_v56  ;;  %v2717_v3 = vmax.f32 %v2677_v63, 0.0  ;;  %v2719_v4 = vmax.f32 %v2679_v48, 0.0 }
 0x23e   : > { %2868 = vst [vmem:[%s4083_s6 + $0x20] sm:$0xff] %v3139_v1  ;;  %2869 = vst [vmem:[%s4083_s6 + $0x28] sm:$0xff] %v3140_v2  ;;  %v3141_v5 = vpack.c.bf16 %v2717_v3, %v2716_v0  ;;  %v3142_v6 = vpack.c.bf16 %v2719_v4, %v2718_v62  ;;  %v2490_v9 = vpop.f32.mrb[8].mxu0  ;;  %v2573_v10 = vpop.f32.mrb[8].mxu1 }
 0x23f   : > { %v2680_v11 = vadd.f32 %v4063_v15, %v2490_v9  ;;  %v2682_v13 = vadd.f32 %v4065_v7, %v2573_v10  ;;  %v2492_v18 = vpop.f32.mrb[9].mxu0  ;;  %v2575_v19 = vpop.f32.mrb[9].mxu1 }
 0x240   : > { %2870 = vst [vmem:[%s4083_s6 + $0x30] sm:$0xff] %v3141_v5  ;;  %2871 = vst [vmem:[%s4083_s6 + $0x38] sm:$0xff] %v3142_v6  ;;  %v2681_v21 = vadd.f32 %v4067_v16, %v2492_v18  ;;  %v2683_v22 = vadd.f32 %v4069_v17, %v2575_v19  ;;  %v2494_v23 = vpop.f32.mrb[10].mxu0  ;;  %v2577_v24 = vpop.f32.mrb[10].mxu1 }
 0x241   : > { %v2720_v25 = vmax.f32 %v2680_v11, 0.0  ;;  %v2722_v26 = vmax.f32 %v2682_v13, 0.0  ;;  %v2684_v27 = vadd.f32 %v4063_v15, %v2494_v23  ;;  %v2686_v20 = vadd.f32 %v4065_v7, %v2577_v24  ;;  %v2496_v28 = vpop.f32.mrb[11].mxu0  ;;  %v2579_v29 = vpop.f32.mrb[11].mxu1 }
 0x242   : > { %v2721_v30 = vmax.f32 %v2681_v21, 0.0  ;;  %v2723_v31 = vmax.f32 %v2683_v22, 0.0  ;;  %v2685_v32 = vadd.f32 %v4067_v16, %v2496_v28  ;;  %v2687_v33 = vadd.f32 %v4069_v17, %v2579_v29 }
 0x243   : > { %v2724_v34 = vmax.f32 %v2684_v27, 0.0  ;;  %v2726_v35 = vmax.f32 %v2686_v20, 0.0 }
 0x244   : > { %v3143_v36 = vpack.c.bf16 %v2721_v30, %v2720_v25  ;;  %v3144_v37 = vpack.c.bf16 %v2723_v31, %v2722_v26  ;;  %v2725_v39 = vmax.f32 %v2685_v32, 0.0  ;;  %v2727_v40 = vmax.f32 %v2687_v33, 0.0 }
 0x246   : > { %2872 = vst [vmem:[%s4083_s6 + $0x40] sm:$0xff] %v3143_v36  ;;  %2873 = vst [vmem:[%s4083_s6 + $0x48] sm:$0xff] %v3144_v37  ;;  %v3145_v41 = vpack.c.bf16 %v2725_v39, %v2724_v34  ;;  %v3146_v42 = vpack.c.bf16 %v2727_v40, %v2726_v35  ;;  %v2500_v43 = vpop.f32.mrb[12].mxu0  ;;  %v2583_v44 = vpop.f32.mrb[12].mxu1 }
 0x247   : > { %v2688_v46 = vadd.f32 %v4063_v15, %v2500_v43  ;;  %v2690_v47 = vadd.f32 %v4065_v7, %v2583_v44  ;;  %v2502_v49 = vpop.f32.mrb[13].mxu0  ;;  %v2585_v50 = vpop.f32.mrb[13].mxu1 }
 0x248   : > { %2874 = vst [vmem:[%s4083_s6 + $0x50] sm:$0xff] %v3145_v41  ;;  %2875 = vst [vmem:[%s4083_s6 + $0x58] sm:$0xff] %v3146_v42  ;;  %v2689_v14 = vadd.f32 %v4067_v16, %v2502_v49  ;;  %v2691_v38 = vadd.f32 %v4069_v17, %v2585_v50  ;;  %v2504_v8 = vpop.f32.mrb[14].mxu0  ;;  %v2587_v12 = vpop.f32.mrb[14].mxu1 }
 0x249   : > { %v2728_v45 = vmax.f32 %v2688_v46, 0.0  ;;  %v2730_v51 = vmax.f32 %v2690_v47, 0.0  ;;  %v2692_v53 = vadd.f32 %v4063_v15, %v2504_v8  ;;  %v2694_v54 = vadd.f32 %v4065_v7, %v2587_v12  ;;  %v2506_v55 = vpop.f32.mrb[15].mxu0  ;;  %v2589_v56 = vpop.f32.mrb[15].mxu1 }
 0x24a   : > { %v2729_v57 = vmax.f32 %v2689_v14, 0.0  ;;  %v2731_v58 = vmax.f32 %v2691_v38, 0.0  ;;  %v2693_v59 = vadd.f32 %v4067_v16, %v2506_v55  ;;  %v2695_v60 = vadd.f32 %v4069_v17, %v2589_v56 }
 0x24b   : > { %v2732_v61 = vmax.f32 %v2692_v53, 0.0  ;;  %v2734_v52 = vmax.f32 %v2694_v54, 0.0 }
 0x24c   : > { %v3147_v63 = vpack.c.bf16 %v2729_v57, %v2728_v45  ;;  %v3148_v48 = vpack.c.bf16 %v2731_v58, %v2730_v51  ;;  %v2733_v0 = vmax.f32 %v2693_v59, 0.0  ;;  %v2735_v62 = vmax.f32 %v2695_v60, 0.0 }
 0x24e   : > { %2876 = vst [vmem:[%s4083_s6 + $0x60] sm:$0xff] %v3147_v63  ;;  %2877 = vst [vmem:[%s4083_s6 + $0x68] sm:$0xff] %v3148_v48  ;;  %v3149_v1 = vpack.c.bf16 %v2733_v0, %v2732_v61  ;;  %v3150_v2 = vpack.c.bf16 %v2735_v62, %v2734_v52  ;;  %v2510_v3 = vpop.f32.mrb[16].mxu0  ;;  %v2593_v4 = vpop.f32.mrb[16].mxu1 }
 0x24f   : > { %v2696_v5 = vadd.f32 %v4063_v15, %v2510_v3  ;;  %v2698_v6 = vadd.f32 %v4065_v7, %v2593_v4  ;;  %v2512_v9 = vpop.f32.mrb[17].mxu0  ;;  %v2595_v10 = vpop.f32.mrb[17].mxu1 }
 0x250   : > { %2878 = vst [vmem:[%s4083_s6 + $0x70] sm:$0xff] %v3149_v1  ;;  %2879 = vst [vmem:[%s4083_s6 + $0x78] sm:$0xff] %v3150_v2  ;;  %v2697_v11 = vadd.f32 %v4067_v16, %v2512_v9  ;;  %v2699_v13 = vadd.f32 %v4069_v17, %v2595_v10  ;;  %v2514_v18 = vpop.f32.mrb[18].mxu0  ;;  %v2597_v19 = vpop.f32.mrb[18].mxu1 }
 0x251   : > { %v2736_v21 = vmax.f32 %v2696_v5, 0.0  ;;  %v2738_v22 = vmax.f32 %v2698_v6, 0.0  ;;  %v2700_v23 = vadd.f32 %v4063_v15, %v2514_v18  ;;  %v2702_v24 = vadd.f32 %v4065_v7, %v2597_v19  ;;  %v2516_v25 = vpop.f32.mrb[19].mxu0  ;;  %v2599_v26 = vpop.f32.mrb[19].mxu1 }
 0x252   : > { %v2737_v27 = vmax.f32 %v2697_v11, 0.0  ;;  %v2739_v20 = vmax.f32 %v2699_v13, 0.0  ;;  %v2701_v28 = vadd.f32 %v4067_v16, %v2516_v25  ;;  %v2703_v29 = vadd.f32 %v4069_v17, %v2599_v26 }
 0x253   : > { %v2740_v30 = vmax.f32 %v2700_v23, 0.0  ;;  %v2742_v31 = vmax.f32 %v2702_v24, 0.0 }
 0x254   : > { %v3151_v32 = vpack.c.bf16 %v2737_v27, %v2736_v21  ;;  %v3152_v33 = vpack.c.bf16 %v2739_v20, %v2738_v22  ;;  %v2741_v34 = vmax.f32 %v2701_v28, 0.0  ;;  %v2743_v35 = vmax.f32 %v2703_v29, 0.0 }
 0x256   : > { %2880 = vst [vmem:[%s4083_s6 + $0x80] sm:$0xff] %v3151_v32  ;;  %2881 = vst [vmem:[%s4083_s6 + $0x88] sm:$0xff] %v3152_v33  ;;  %v3153_v15 = vpack.c.bf16 %v2741_v34, %v2740_v30  ;;  %v3154_v7 = vpack.c.bf16 %v2743_v35, %v2742_v31 }
 0x258   : > { %2882 = vst [vmem:[%s4083_s6 + $0x90] sm:$0xff] %v3153_v15  ;;  %2883 = vst [vmem:[%s4083_s6 + $0x98] sm:$0xff] %v3154_v7 }
 0x259 PF: > { %s13_s12 = sadd.s32 1, %s3551_s12  }
 0x25a   : > { %p10_p4 = scmp.ge.s32.totalorder %s13_s12, 4  }
 0x25c   :  { %12 = sbr.rel (!%p10_p4) target bundleno = 1 (0x1), region = 62 }

// kernel: block_forward.14
= control target key start
LH: loop header
LB: loop body
LE: loop exit
PB: predicated region body
PF: predicated region fallthrough
CT: control target
= control target key end

     0   :  { %s2274_s12 = smov 0   ;;  %s2276_s13 = smov 0   ;;  %s2780_s0 = inlined_call_operand.vmem [shape: bf16[128,512], index: 0, kind: input, shape index: {}]   ;;  %s2781_s1 = inlined_call_operand.vmem [shape: bf16[512,512], index: 1, kind: input, shape index: {}]   ;;  %s2782_s2 = inlined_call_operand.vmem [shape: f32[1,512], index: 2, kind: input, shape index: {}]   ;;  %s2783_s3 = inlined_call_operand.vmem [shape: bf16[128,512], index: 3, kind: output, shape index: {}]  }
   0x1   :  { %s2278_s14 = smov 0  }
   0x2 LB: > { %s32_s15 = sadd.s32 1, %s2248_s13  ;;  %p1739_p0 = scmp.ge.s32.totalorder %s2252_s14, 1  ;;  %s2252_s14 = sphi %s2278_s14, %s13_s14   ;;  %s2248_s13 = sphi %s2276_s13, %s2785_s13   ;;  %s2244_s12 = sphi %s2274_s12, %s2784_s12  }
   0x3   : > { %p34_p1 = scmp.ge.s32.totalorder %s32_s15, 2  ;;  %p196_p2 = scmp.lt.s32.totalorder %s2252_s14, 3 }
   0x5   : > { %s2787_s15 = smov (%p34_p1, %s32_s15), 0  ;;  %p197_p3 = pnand %p1739_p0, %p196_p2 }
   0x6   : > { %v2014_v0 = vld [vmem:[%s2781_s1 + $0x4] ss:$16 sps:$4 sm:$0xff] (!%p197_p3)   ;;  %v2016_v1 = vld [vmem:[%s2781_s1 + $0xc] ss:$16 sps:$4 sm:$0xff] (!%p197_p3)   ;;  %v2018_v2 = vld [vmem:[%s2781_s1] ss:$16 sps:$4 sm:$0xff] (!%p197_p3)  }
   0x7   : > { %200 = sbr.rel (%p197_p3) target bundleno = 381 (0x17d), region = 32  ;;  %1171 = vmatprep.subr.bf16.mxu0 (!%p197_p3), %v2014_v0  ;;  %v2019_v3 = vld [vmem:[%s2781_s1 + $0x8] ss:$16 sps:$4 sm:$0xff] (!%p197_p3)   ;;  %1317 = vmatprep.subr.bf16.mxu1 (!%p197_p3), %v2016_v1  ;;  %v2020_v4 = vld [vmem:[%s2781_s1 + $0x24] ss:$16 sps:$4 sm:$0xff] (!%p197_p3)   ;;  %s1740_s30 = sshll.u32 (!%p197_p3), %s2244_s12, 3 }
   0x8   : > { %1172 = vmatpush1.bf16.msra.mxu0 (!%p197_p3), %v2018_v2  ;;  %1318 = vmatpush1.bf16.msra.mxu1 (!%p197_p3), %v2019_v3  ;;  %v2022_v5 = vld [vmem:[%s2781_s1 + $0x2c] ss:$16 sps:$4 sm:$0xff] (!%p197_p3)   ;;  %v2024_v6 = vld [vmem:[%s2781_s1 + $0x20] ss:$16 sps:$4 sm:$0xff] (!%p197_p3)   ;;  %v2025_v7 = vld [vmem:[%s2781_s1 + $0x28] ss:$16 sps:$4 sm:$0xff] (!%p197_p3)  }
   0x9   : > { %1173 = vmatprep.subr.bf16.mxu0 (!%p197_p3), %v2020_v4  ;;  %1319 = vmatprep.subr.bf16.mxu1 (!%p197_p3), %v2022_v5  ;;  %v2026_v8 = vld [vmem:[%s2781_s1 + $0x44] ss:$16 sps:$4 sm:$0xff] (!%p197_p3)   ;;  %v2028_v9 = vld [vmem:[%s2781_s1 + $0x4c] ss:$16 sps:$4 sm:$0xff] (!%p197_p3)   ;;  %v2030_v10 = vld [vmem:[%s2781_s1 + $0x40] ss:$16 sps:$4 sm:$0xff] (!%p197_p3)  }
   0xa   : > { %v2031_v11 = vld [vmem:[%s2781_s1 + $0x48] ss:$16 sps:$4 sm:$0xff] (!%p197_p3)   ;;  %v2032_v12 = vld [vmem:[%s2781_s1 + $0x64] ss:$16 sps:$4 sm:$0xff] (!%p197_p3)   ;;  %v2034_v13 = vld [vmem:[%s2781_s1 + $0x6c] ss:$16 sps:$4 sm:$0xff] (!%p197_p3)  }
   0xb   : > { %v2036_v14 = vld [vmem:[%s2781_s1 + $0x60] ss:$16 sps:$4 sm:$0xff] (!%p197_p3)   ;;  %v2037_v15 = vld [vmem:[%s2781_s1 + $0x68] ss:$16 sps:$4 sm:$0xff] (!%p197_p3)   ;;  %v2038_v16 = vld [vmem:[%s2781_s1 + $0x84] ss:$16 sps:$4 sm:$0xff] (!%p197_p3)  }
   0xc   : > { %1174 = vmatpush1.bf16.msra.mxu0 (!%p197_p3), %v2024_v6  ;;  %1320 = vmatpush1.bf16.msra.mxu1 (!%p197_p3), %v2025_v7  ;;  %v2040_v17 = vld [vmem:[%s2781_s1 + $0x8c] ss:$16 sps:$4 sm:$0xff] (!%p197_p3)   ;;  %v2042_v18 = vld [vmem:[%s2781_s1 + $0x80] ss:$16 sps:$4 sm:$0xff] (!%p197_p3)   ;;  %v2043_v19 = vld [vmem:[%s2781_s1 + $0x88] ss:$16 sps:$4 sm:$0xff] (!%p197_p3)  }
   0xd   : > { %1175 = vmatprep.subr.bf16.mxu0 (!%p197_p3), %v2026_v8  ;;  %1321 = vmatprep.subr.bf16.mxu1 (!%p197_p3), %v2028_v9  ;;  %v2044_v20 = vld [vmem:[%s2781_s1 + $0xa4] ss:$16 sps:$4 sm:$0xff] (!%p197_p3)   ;;  %v2046_v21 = vld [vmem:[%s2781_s1 + $0xac] ss:$16 sps:$4 sm:$0xff] (!%p197_p3)   ;;  %v2048_v22 = vld [vmem:[%s2781_s1 + $0xa0] ss:$16 sps:$4 sm:$0xff] (!%p197_p3)  }
   0xe   : > { %v2049_v23 = vld [vmem:[%s2781_s1 + $0xa8] ss:$16 sps:$4 sm:$0xff]   ;;  %v2050_v24 = vld [vmem:[%s2781_s1 + $0xc4] ss:$16 sps:$4 sm:$0xff]   ;;  %v2052_v25 = vld [vmem:[%s2781_s1 + $0xcc] ss:$16 sps:$4 sm:$0xff]  }
   0xf   : > { %v2054_v26 = vld [vmem:[%s2781_s1 + $0xc0] ss:$16 sps:$4 sm:$0xff]   ;;  %v2055_v27 = vld [vmem:[%s2781_s1 + $0xc8] ss:$16 sps:$4 sm:$0xff]   ;;  %v2056_v28 = vld [vmem:[%s2781_s1 + $0xe4] ss:$16 sps:$4 sm:$0xff]  }
  0x10   : > { %1176 = vmatpush1.bf16.msra.mxu0 %v2030_v10  ;;  %1322 = vmatpush1.bf16.msra.mxu1 %v2031_v11  ;;  %v2058_v29 = vld [vmem:[%s2781_s1 + $0xec] ss:$16 sps:$4 sm:$0xff]   ;;  %v2060_v30 = vld [vmem:[%s2781_s1 + $0xe0] ss:$16 sps:$4 sm:$0xff]   ;;  %v2061_v31 = vld [vmem:[%s2781_s1 + $0xe8] ss:$16 sps:$4 sm:$0xff]  }
  0x11   : > { %1177 = vmatprep.subr.bf16.mxu0 %v2032_v12  ;;  %1323 = vmatprep.subr.bf16.mxu1 %v2034_v13  ;;  %v2062_v32 = vld [vmem:[%s2781_s1 + $0x104] ss:$16 sps:$4 sm:$0xff]   ;;  %v2064_v33 = vld [vmem:[%s2781_s1 + $0x10c] ss:$16 sps:$4 sm:$0xff]   ;;  %p246_p4 = scmp.lt.s32.totalorder %s1740_s30, 15 }
  0x12   : > { %v2066_v34 = vld [vmem:[%s2781_s1 + $0x100] ss:$16 sps:$4 sm:$0xff]   ;;  %v2067_v35 = vld [vmem:[%s2781_s1 + $0x108] ss:$16 sps:$4 sm:$0xff]   ;;  %v2068_v36 = vld [vmem:[%s2781_s1 + $0x124] ss:$16 sps:$4 sm:$0xff]  }
  0x13   : > { %v2070_v37 = vld [vmem:[%s2781_s1 + $0x12c] ss:$16 sps:$4 sm:$0xff]   ;;  %s2789_s30 = smov (!%p246_p4, %s1740_s30), 15  ;;  %v2072_v38 = vld [vmem:[%s2781_s1 + $0x120] ss:$16 sps:$4 sm:$0xff]  }
  0x14   : > { %1178 = vmatpush1.bf16.msra.mxu0 %v2036_v14  ;;  %1324 = vmatpush1.bf16.msra.mxu1 %v2037_v15  ;;  %v2073_v39 = vld [vmem:[%s2781_s1 + $0x128] ss:$16 sps:$4 sm:$0xff]   ;;  %v2074_v40 = vld [vmem:[%s2781_s1 + $0x144] ss:$16 sps:$4 sm:$0xff]   ;;  %v2076_v41 = vld [vmem:[%s2781_s1 + $0x14c] ss:$16 sps:$4 sm:$0xff]  }
  0x15   : > { %1179 = vmatprep.subr.bf16.mxu0 %v2038_v16  ;;  %1325 = vmatprep.subr.bf16.mxu1 %v2040_v17  ;;  %s1908_s5 = sshll.u32 %s2789_s30, 4  ;;  %v2078_v42 = vld [vmem:[%s2781_s1 + $0x140] ss:$16 sps:$4 sm:$0xff]   ;;  %v2079_v43 = vld [vmem:[%s2781_s1 + $0x148] ss:$16 sps:$4 sm:$0xff]  }
  0x16   : > { %v2080_v44 = vld [vmem:[%s2781_s1 + $0x164] ss:$16 sps:$4 sm:$0xff]   ;;  %s2438_s17 = scalar_lea.vmem %s2780_s0, %s1908_s5  ;;  %v2082_v45 = vld [vmem:[%s2781_s1 + $0x16c] ss:$16 sps:$4 sm:$0xff]   ;;  %v2084_v46 = vld [vmem:[%s2781_s1 + $0x160] ss:$16 sps:$4 sm:$0xff]   ;;  %s2729_s19 = scalar_lea.vmem %s2783_s3, %s1908_s5 }
  0x17   : > { %v2085_v47 = vld [vmem:[%s2781_s1 + $0x168] ss:$16 sps:$4 sm:$0xff]   ;;  %v2112_v48 = vld [vmem:[%s2438_s17 + $0x4] ss:$16 sps:$4 sm:$0xff]   ;;  %v2088_v50 = vld [vmem:[%s2781_s1 + $0x18c] ss:$16 sps:$4 sm:$0xff]  }
  0x18   : > { %1180 = vmatpush1.bf16.msra.mxu0 %v2042_v18  ;;  %1326 = vmatpush1.bf16.msra.mxu1 %v2043_v19  ;;  %v2086_v49 = vld [vmem:[%s2781_s1 + $0x184] ss:$16 sps:$4 sm:$0xff]   ;;  %v2090_v51 = vld [vmem:[%s2781_s1 + $0x180] ss:$16 sps:$4 sm:$0xff]   ;;  %v2091_v52 = vld [vmem:[%s2781_s1 + $0x188] ss:$16 sps:$4 sm:$0xff]  }
  0x19   : > { %1181 = vmatprep.subr.bf16.mxu0 %v2044_v20  ;;  %1327 = vmatprep.subr.bf16.mxu1 %v2046_v21  ;;  %v2092_v53 = vld [vmem:[%s2781_s1 + $0x1a4] ss:$16 sps:$4 sm:$0xff]   ;;  %v2094_v54 = vld [vmem:[%s2781_s1 + $0x1ac] ss:$16 sps:$4 sm:$0xff]   ;;  %v2096_v55 = vld [vmem:[%s2781_s1 + $0x1a0] ss:$16 sps:$4 sm:$0xff]  }
  0x1a   : > { %1203 = vmatprep.mubr.bf16.mxu0 %v2112_v48  ;;  %1349 = vmatprep.mubr.bf16.mxu1 %v2112_v48  ;;  %v2097_v56 = vld [vmem:[%s2781_s1 + $0x1a8] ss:$16 sps:$4 sm:$0xff]   ;;  %v2098_v57 = vld [vmem:[%s2781_s1 + $0x1c4] ss:$16 sps:$4 sm:$0xff]   ;;  %v2100_v58 = vld [vmem:[%s2781_s1 + $0x1cc] ss:$16 sps:$4 sm:$0xff]  }
  0x1b   : > { %v2102_v59 = vld [vmem:[%s2781_s1 + $0x1c0] ss:$16 sps:$4 sm:$0xff]   ;;  %v2103_v60 = vld [vmem:[%s2781_s1 + $0x1c8] ss:$16 sps:$4 sm:$0xff]   ;;  %v2104_v61 = vld [vmem:[%s2781_s1 + $0x1e4] ss:$16 sps:$4 sm:$0xff]  }
  0x1c   : > { %1182 = vmatpush1.bf16.msra.mxu0 %v2048_v22  ;;  %1328 = vmatpush1.bf16.msra.mxu1 %v2049_v23  ;;  %v2106_v62 = vld [vmem:[%s2781_s1 + $0x1ec] ss:$16 sps:$4 sm:$0xff]   ;;  %v2108_v63 = vld [vmem:[%s2781_s1 + $0x1e0] ss:$16 sps:$4 sm:$0xff]   ;;  %v2109_v0 = vld [vmem:[%s2781_s1 + $0x1e8] ss:$16 sps:$4 sm:$0xff]  }
  0x1d   : > { %1183 = vmatprep.subr.bf16.mxu0 %v2050_v24  ;;  %1329 = vmatprep.subr.bf16.mxu1 %v2052_v25  ;;  %v2115_v1 = vld [vmem:[%s2781_s1 + $0x204] ss:$16 sps:$4 sm:$0xff]   ;;  %v2118_v2 = vld [vmem:[%s2781_s1 + $0x20c] ss:$16 sps:$4 sm:$0xff]   ;;  %v2110_v3 = vld [vmem:[%s2438_s17] ss:$16 sps:$4 sm:$0xff]  }
  0x1e   : > { %v2113_v4 = vld [vmem:[%s2781_s1 + $0x200] ss:$16 sps:$4 sm:$0xff]   ;;  %v2116_v5 = vld [vmem:[%s2781_s1 + $0x208] ss:$16 sps:$4 sm:$0xff]   ;;  %v2121_v6 = vld [vmem:[%s2781_s1 + $0x224] ss:$16 sps:$4 sm:$0xff]  }
  0x1f   : > { %v2124_v7 = vld [vmem:[%s2781_s1 + $0x22c] ss:$16 sps:$4 sm:$0xff]   ;;  %v2119_v8 = vld [vmem:[%s2781_s1 + $0x220] ss:$16 sps:$4 sm:$0xff]   ;;  %v2122_v9 = vld [vmem:[%s2781_s1 + $0x228] ss:$16 sps:$4 sm:$0xff]  }
  0x20   : > { %1184 = vmatpush1.bf16.msra.mxu0 %v2054_v26  ;;  %1330 = vmatpush1.bf16.msra.mxu1 %v2055_v27  ;;  %v2127_v10 = vld [vmem:[%s2781_s1 + $0x244] ss:$16 sps:$4 sm:$0xff]   ;;  %v2130_v11 = vld [vmem:[%s2781_s1 + $0x24c] ss:$16 sps:$4 sm:$0xff]   ;;  %v2125_v12 = vld [vmem:[%s2781_s1 + $0x240] ss:$16 sps:$4 sm:$0xff]  }
  0x21   : > { %1185 = vmatprep.subr.bf16.mxu0 %v2056_v28  ;;  %1331 = vmatprep.subr.bf16.mxu1 %v2058_v29  ;;  %v2128_v13 = vld [vmem:[%s2781_s1 + $0x248] ss:$16 sps:$4 sm:$0xff]   ;;  %v2173_v14 = vld [vmem:[%s2438_s17 + $0x24] ss:$16 sps:$4 sm:$0xff]   ;;  %v2175_v15 = vld [vmem:[%s2438_s17 + $0x20] ss:$16 sps:$4 sm:$0xff]  }
  0x22   : > { %v2133_v16 = vld [vmem:[%s2781_s1 + $0x264] ss:$16 sps:$4 sm:$0xff]   ;;  %v2136_v17 = vld [vmem:[%s2781_s1 + $0x26c] ss:$16 sps:$4 sm:$0xff]   ;;  %v2131_v18 = vld [vmem:[%s2781_s1 + $0x260] ss:$16 sps:$4 sm:$0xff]  }
  0x23   : > { %v2134_v19 = vld [vmem:[%s2781_s1 + $0x268] ss:$16 sps:$4 sm:$0xff]   ;;  %v2139_v20 = vld [vmem:[%s2781_s1 + $0x284] ss:$16 sps:$4 sm:$0xff]   ;;  %v2142_v21 = vld [vmem:[%s2781_s1 + $0x28c] ss:$16 sps:$4 sm:$0xff]  }
  0x24   : > { %1186 = vmatpush1.bf16.msra.mxu0 %v2060_v30  ;;  %1332 = vmatpush1.bf16.msra.mxu1 %v2061_v31  ;;  %v2137_v22 = vld [vmem:[%s2781_s1 + $0x280] ss:$16 sps:$4 sm:$0xff]   ;;  %v2188_v23 = vld [vmem:[%s2438_s17 + $0x44] ss:$16 sps:$4 sm:$0xff]   ;;  %v2140_v24 = vld [vmem:[%s2781_s1 + $0x288] ss:$16 sps:$4 sm:$0xff]  }
  0x25   : > { %1187 = vmatprep.subr.bf16.mxu0 %v2062_v32  ;;  %1333 = vmatprep.subr.bf16.mxu1 %v2064_v33  ;;  %v2190_v25 = vld [vmem:[%s2438_s17 + $0x40] ss:$16 sps:$4 sm:$0xff]   ;;  %v2145_v26 = vld [vmem:[%s2781_s1 + $0x2a4] ss:$16 sps:$4 sm:$0xff]   ;;  %v2148_v27 = vld [vmem:[%s2781_s1 + $0x2ac] ss:$16 sps:$4 sm:$0xff]  }
  0x26   : > { %v2143_v28 = vld [vmem:[%s2781_s1 + $0x2a0] ss:$16 sps:$4 sm:$0xff]   ;;  %v2146_v29 = vld [vmem:[%s2781_s1 + $0x2a8] ss:$16 sps:$4 sm:$0xff]   ;;  %v2151_v30 = vld [vmem:[%s2781_s1 + $0x2c4] ss:$16 sps:$4 sm:$0xff]  }
  0x27   : > { %v2203_v31 = vld [vmem:[%s2438_s17 + $0x64] ss:$16 sps:$4 sm:$0xff]   ;;  %v2154_v32 = vld [vmem:[%s2781_s1 + $0x2cc] ss:$16 sps:$4 sm:$0xff]   ;;  %v2149_v33 = vld [vmem:[%s2781_s1 + $0x2c0] ss:$16 sps:$4 sm:$0xff]  }
  0x28   : > { %1188 = vmatpush1.bf16.msra.mxu0 %v2066_v34  ;;  %1334 = vmatpush1.bf16.msra.mxu1 %v2067_v35  ;;  %v2152_v34 = vld [vmem:[%s2781_s1 + $0x2c8] ss:$16 sps:$4 sm:$0xff]   ;;  %v2205_v35 = vld [vmem:[%s2438_s17 + $0x60] ss:$16 sps:$4 sm:$0xff]  }
  0x29   : > { %1189 = vmatprep.subr.bf16.mxu0 %v2068_v36  ;;  %1335 = vmatprep.subr.bf16.mxu1 %v2070_v37  ;;  %v2157_v36 = vld [vmem:[%s2781_s1 + $0x2e4] ss:$16 sps:$4 sm:$0xff]   ;;  %v2160_v37 = vld [vmem:[%s2781_s1 + $0x2ec] ss:$16 sps:$4 sm:$0xff]   ;;  %v2170_v48 = vld [vmem:[%s2781_s1 + $0x328] ss:$16 sps:$4 sm:$0xff]  }
  0x2c   : > { %1190 = vmatpush1.bf16.msra.mxu0 %v2072_v38  ;;  %1336 = vmatpush1.bf16.msra.mxu1 %v2073_v39  ;;  %v2155_v38 = vld [vmem:[%s2781_s1 + $0x2e0] ss:$16 sps:$4 sm:$0xff]   ;;  %v2158_v39 = vld [vmem:[%s2781_s1 + $0x2e8] ss:$16 sps:$4 sm:$0xff]  }
  0x2d   : > { %1191 = vmatprep.subr.bf16.mxu0 %v2074_v40  ;;  %1337 = vmatprep.subr.bf16.mxu1 %v2076_v41  ;;  %v2220_v40 = vld [vmem:[%s2438_s17 + $0xc] ss:$16 sps:$4 sm:$0xff]   ;;  %v2163_v41 = vld [vmem:[%s2781_s1 + $0x304] ss:$16 sps:$4 sm:$0xff]  }
  0x30   : > { %1192 = vmatpush1.bf16.msra.mxu0 %v2078_v42  ;;  %1338 = vmatpush1.bf16.msra.mxu1 %v2079_v43  ;;  %v2166_v42 = vld [vmem:[%s2781_s1 + $0x30c] ss:$16 sps:$4 sm:$0xff]   ;;  %v2161_v43 = vld [vmem:[%s2781_s1 + $0x300] ss:$16 sps:$4 sm:$0xff]  }
  0x31   : > { %1193 = vmatprep.subr.bf16.mxu0 %v2080_v44  ;;  %1339 = vmatprep.subr.bf16.mxu1 %v2082_v45  ;;  %v2164_v44 = vld [vmem:[%s2781_s1 + $0x308] ss:$16 sps:$4 sm:$0xff]   ;;  %v2169_v45 = vld [vmem:[%s2781_s1 + $0x324] ss:$16 sps:$4 sm:$0xff]  }
  0x34   : > { %1194 = vmatpush1.bf16.msra.mxu0 %v2084_v46  ;;  %1340 = vmatpush1.bf16.msra.mxu1 %v2085_v47  ;;  %v2172_v46 = vld [vmem:[%s2781_s1 + $0x32c] ss:$16 sps:$4 sm:$0xff]   ;;  %v2167_v47 = vld [vmem:[%s2781_s1 + $0x320] ss:$16 sps:$4 sm:$0xff]  }
  0x35   : > { %1195 = vmatprep.subr.bf16.mxu0 %v2086_v49  ;;  %1341 = vmatprep.subr.bf16.mxu1 %v2088_v50  ;;  %v2178_v49 = vld [vmem:[%s2781_s1 + $0x344] ss:$16 sps:$4 sm:$0xff]   ;;  %v2181_v50 = vld [vmem:[%s2781_s1 + $0x34c] ss:$16 sps:$4 sm:$0xff]  }
  0x38   : > { %1196 = vmatpush1.bf16.msra.mxu0 %v2090_v51  ;;  %1342 = vmatpush1.bf16.msra.mxu1 %v2091_v52  ;;  %v2176_v51 = vld [vmem:[%s2781_s1 + $0x340] ss:$16 sps:$4 sm:$0xff]   ;;  %v2179_v52 = vld [vmem:[%s2781_s1 + $0x348] ss:$16 sps:$4 sm:$0xff]  }
  0x39   : > { %1197 = vmatprep.subr.bf16.mxu0 %v2092_v53  ;;  %1343 = vmatprep.subr.bf16.mxu1 %v2094_v54  ;;  %v2184_v53 = vld [vmem:[%s2781_s1 + $0x364] ss:$16 sps:$4 sm:$0xff]   ;;  %v2187_v54 = vld [vmem:[%s2781_s1 + $0x36c] ss:$16 sps:$4 sm:$0xff]  }
  0x3c   : > { %1198 = vmatpush1.bf16.msra.mxu0 %v2096_v55  ;;  %1344 = vmatpush1.bf16.msra.mxu1 %v2097_v56  ;;  %v2182_v55 = vld [vmem:[%s2781_s1 + $0x360] ss:$16 sps:$4 sm:$0xff]   ;;  %v2185_v56 = vld [vmem:[%s2781_s1 + $0x368] ss:$16 sps:$4 sm:$0xff]  }
  0x3d   : > { %1199 = vmatprep.subr.bf16.mxu0 %v2098_v57  ;;  %1345 = vmatprep.subr.bf16.mxu1 %v2100_v58  ;;  %v2193_v57 = vld [vmem:[%s2781_s1 + $0x384] ss:$16 sps:$4 sm:$0xff]   ;;  %v2196_v58 = vld [vmem:[%s2781_s1 + $0x38c] ss:$16 sps:$4 sm:$0xff]  }
  0x40   : > { %1200 = vmatpush1.bf16.msra.mxu0 %v2102_v59  ;;  %1346 = vmatpush1.bf16.msra.mxu1 %v2103_v60  ;;  %v2191_v59 = vld [vmem:[%s2781_s1 + $0x380] ss:$16 sps:$4 sm:$0xff]   ;;  %v2194_v60 = vld [vmem:[%s2781_s1 + $0x388] ss:$16 sps:$4 sm:$0xff]  }
  0x41   : > { %1201 = vmatprep.subr.bf16.mxu0 %v2104_v61  ;;  %1347 = vmatprep.subr.bf16.mxu1 %v2106_v62  ;;  %v2199_v61 = vld [vmem:[%s2781_s1 + $0x3a4] ss:$16 sps:$4 sm:$0xff]   ;;  %v2202_v62 = vld [vmem:[%s2781_s1 + $0x3ac] ss:$16 sps:$4 sm:$0xff]  }
  0x44   : > { %1202 = vmatpush1.bf16.msra.mxu0 %v2108_v63  ;;  %1348 = vmatpush1.bf16.msra.mxu1 %v2109_v0  ;;  %v2197_v63 = vld [vmem:[%s2781_s1 + $0x3a0] ss:$16 sps:$4 sm:$0xff]   ;;  %v2200_v0 = vld [vmem:[%s2781_s1 + $0x3a8] ss:$16 sps:$4 sm:$0xff]  }
  0x45   : > { %1244 = vmatprep.subr.bf16.mxu0 %v2115_v1  ;;  %1390 = vmatprep.subr.bf16.mxu1 %v2118_v2  ;;  %v2208_v1 = vld [vmem:[%s2781_s1 + $0x3c4] ss:$16 sps:$4 sm:$0xff]   ;;  %v2211_v2 = vld [vmem:[%s2781_s1 + $0x3cc] ss:$16 sps:$4 sm:$0xff]  }
  0x47   : > { %1204 = vmatmul.mubr.bf16.vlgmr.msra.gmra.mrb[0].mxu0 %v2110_v3  ;;  %1350 = vmatmul.mubr.bf16.vlgmr.msra.gmra.mrb[0].mxu1 %v2110_v3  ;;  %v2206_v3 = vld [vmem:[%s2781_s1 + $0x3c0] ss:$16 sps:$4 sm:$0xff]  }
  0x48   : > { %1245 = vmatpush1.bf16.msra.mxu0 %v2113_v4  ;;  %1391 = vmatpush1.bf16.msra.mxu1 %v2116_v5  ;;  %v2209_v4 = vld [vmem:[%s2781_s1 + $0x3c8] ss:$16 sps:$4 sm:$0xff]   ;;  %v2214_v5 = vld [vmem:[%s2781_s1 + $0x3e4] ss:$16 sps:$4 sm:$0xff]  }
  0x49   : > { %1246 = vmatprep.subr.bf16.mxu0 %v2121_v6  ;;  %1392 = vmatprep.subr.bf16.mxu1 %v2124_v7  ;;  %v2217_v6 = vld [vmem:[%s2781_s1 + $0x3ec] ss:$16 sps:$4 sm:$0xff]   ;;  %v2212_v7 = vld [vmem:[%s2781_s1 + $0x3e0] ss:$16 sps:$4 sm:$0xff]  }
  0x4a   : > { %1213 = vmatprep.mubr.bf16.mxu0 %v2173_v14  ;;  %1359 = vmatprep.mubr.bf16.mxu1 %v2173_v14  ;;  %v2227_v14 = vld [vmem:[%s2438_s17 + $0x6c] ss:$16 sps:$4 sm:$0xff]  }
  0x4c   : > { %1247 = vmatpush1.bf16.msra.mxu0 %v2119_v8  ;;  %1393 = vmatpush1.bf16.msra.mxu1 %v2122_v9  ;;  %v2215_v8 = vld [vmem:[%s2781_s1 + $0x3e8] ss:$16 sps:$4 sm:$0xff]  }
  0x4d   : > { %1248 = vmatprep.subr.bf16.mxu0 %v2127_v10  ;;  %1394 = vmatprep.subr.bf16.mxu1 %v2130_v11  ;;  %v2218_v9 = vld [vmem:[%s2438_s17 + $0x8] ss:$16 sps:$4 sm:$0xff]   ;;  %v2221_v10 = vld [vmem:[%s2438_s17 + $0x2c] ss:$16 sps:$4 sm:$0xff]  }
  0x4e   : > { %v2223_v11 = vld [vmem:[%s2438_s17 + $0x28] ss:$16 sps:$4 sm:$0xff]  }
  0x4f   : > { %1214 = vmatmul.mubr.bf16.gmra.mrb[4].mxu0 %v2175_v15  ;;  %1360 = vmatmul.mubr.bf16.gmra.mrb[4].mxu1 %v2175_v15  ;;  %v2229_v15 = vld [vmem:[%s2438_s17 + $0x68] ss:$16 sps:$4 sm:$0xff]  }
  0x50   : > { %1249 = vmatpush1.bf16.msra.mxu0 %v2125_v12  ;;  %1395 = vmatpush1.bf16.msra.mxu1 %v2128_v13  ;;  %v2224_v12 = vld [vmem:[%s2438_s17 + $0x4c] ss:$16 sps:$4 sm:$0xff]   ;;  %v2226_v13 = vld [vmem:[%s2438_s17 + $0x48] ss:$16 sps:$4 sm:$0xff]  }
  0x51   : > { %1250 = vmatprep.subr.bf16.mxu0 %v2133_v16  ;;  %1396 = vmatprep.subr.bf16.mxu1 %v2136_v17  ;;  %v431_v16 = vlaneseq }
  0x52   : > { %1223 = vmatprep.mubr.bf16.mxu0 %v2188_v23  ;;  %1369 = vmatprep.mubr.bf16.mxu1 %v2188_v23 }
  0x53   : > { %v432_v17 = vshrl.u32 %v431_v16, 7 }
  0x54   : > { %1251 = vmatpush1.bf16.msra.mxu0 %v2131_v18  ;;  %1397 = vmatpush1.bf16.msra.mxu1 %v2134_v19 }
  0x55   : > { %1252 = vmatprep.subr.bf16.mxu0 %v2139_v20  ;;  %1398 = vmatprep.subr.bf16.mxu1 %v2142_v21  ;;  %v433_v18 = vsub.s32 0, %v432_v17  ;;  %v441_v19 = vsub.s32 2, %v432_v17  ;;  %v429_v20 = vld [vmem:[%s2782_s2] sm:$0xf]  ;;  %v437_v21 = vsub.s32 1, %v432_v17 }
  0x57   : > { %1224 = vmatmul.mubr.bf16.gmra.mrb[8].mxu0 %v2190_v25  ;;  %1370 = vmatmul.mubr.bf16.gmra.mrb[8].mxu1 %v2190_v25  ;;  %v2708_v23 = vrot.slane %v429_v20, %v433_v18  ;;  %v2712_v25 = vrot.slane %v429_v20, %v437_v21 }
  0x58   : > { %1253 = vmatpush1.bf16.msra.mxu0 %v2137_v22  ;;  %1399 = vmatpush1.bf16.msra.mxu1 %v2140_v24  ;;  %v445_v22 = vsub.s32 3, %v432_v17  ;;  %v2710_v24 = vrot.slane %v429_v20, %v441_v19 }
  0x59   : > { %1254 = vmatprep.subr.bf16.mxu0 %v2145_v26  ;;  %1400 = vmatprep.subr.bf16.mxu1 %v2148_v27 }
  0x5a   : > { %1233 = vmatprep.mubr.bf16.mxu0 %v2203_v31  ;;  %1379 = vmatprep.mubr.bf16.mxu1 %v2203_v31  ;;  %v2714_v26 = vrot.slane %v429_v20, %v445_v22 }
  0x5c   : > { %1255 = vmatpush1.bf16.msra.mxu0 %v2143_v28  ;;  %1401 = vmatpush1.bf16.msra.mxu1 %v2146_v29 }
  0x5d   : > { %1256 = vmatprep.subr.bf16.mxu0 %v2151_v30  ;;  %1402 = vmatprep.subr.bf16.mxu1 %v2154_v32 }
  0x5f   : > { %1234 = vmatmul.mubr.bf16.gmra.mrb[12].mxu0 %v2205_v35  ;;  %1380 = vmatmul.mubr.bf16.gmra.mrb[12].mxu1 %v2205_v35 }
  0x60   : > { %1257 = vmatpush1.bf16.msra.mxu0 %v2149_v33  ;;  %1403 = vmatpush1.bf16.msra.mxu1 %v2152_v34 }
  0x61   : > { %1258 = vmatprep.subr.bf16.mxu0 %v2157_v36  ;;  %1404 = vmatprep.subr.bf16.mxu1 %v2160_v37 }
  0x62   : > { %1276 = vmatprep.mubr.bf16.mxu0 %v2220_v40  ;;  %1422 = vmatprep.mubr.bf16.mxu1 %v2220_v40 }
  0x64   : > { %1259 = vmatpush1.bf16.msra.mxu0 %v2155_v38  ;;  %1405 = vmatpush1.bf16.msra.mxu1 %v2158_v39 }
  0x65   : > { %1260 = vmatprep.subr.bf16.mxu0 %v2163_v41  ;;  %1406 = vmatprep.subr.bf16.mxu1 %v2166_v42 }
  0x68   : > { %1261 = vmatpush1.bf16.msra.mxu0 %v2161_v43  ;;  %1407 = vmatpush1.bf16.msra.mxu1 %v2164_v44 }
  0x69   : > { %1262 = vmatprep.subr.bf16.mxu0 %v2169_v45  ;;  %1408 = vmatprep.subr.bf16.mxu1 %v2172_v46 }
  0x6c   : > { %1263 = vmatpush1.bf16.msra.mxu0 %v2167_v47  ;;  %1409 = vmatpush1.bf16.msra.mxu1 %v2170_v48 }
  0x6d   : > { %1264 = vmatprep.subr.bf16.mxu0 %v2178_v49  ;;  %1410 = vmatprep.subr.bf16.mxu1 %v2181_v50 }
  0x70   : > { %1265 = vmatpush1.bf16.msra.mxu0 %v2176_v51  ;;  %1411 = vmatpush1.bf16.msra.mxu1 %v2179_v52 }
  0x71   : > { %1266 = vmatprep.subr.bf16.mxu0 %v2184_v53  ;;  %1412 = vmatprep.subr.bf16.mxu1 %v2187_v54 }
  0x74   : > { %1267 = vmatpush1.bf16.msra.mxu0 %v2182_v55  ;;  %1413 = vmatpush1.bf16.msra.mxu1 %v2185_v56 }
  0x75   : > { %1268 = vmatprep.subr.bf16.mxu0 %v2193_v57  ;;  %1414 = vmatprep.subr.bf16.mxu1 %v2196_v58 }
  0x78   : > { %1269 = vmatpush1.bf16.msra.mxu0 %v2191_v59  ;;  %1415 = vmatpush1.bf16.msra.mxu1 %v2194_v60 }
  0x79   : > { %1270 = vmatprep.subr.bf16.mxu0 %v2199_v61  ;;  %1416 = vmatprep.subr.bf16.mxu1 %v2202_v62 }
  0x7c   : > { %1271 = vmatpush1.bf16.msra.mxu0 %v2197_v63  ;;  %1417 = vmatpush1.bf16.msra.mxu1 %v2200_v0 }
  0x7d   : > { %1272 = vmatprep.subr.bf16.mxu0 %v2208_v1  ;;  %1418 = vmatprep.subr.bf16.mxu1 %v2211_v2 }
  0x80   : > { %1273 = vmatpush1.bf16.msra.mxu0 %v2206_v3  ;;  %1419 = vmatpush1.bf16.msra.mxu1 %v2209_v4 }
  0x81   : > { %1274 = vmatprep.subr.bf16.mxu0 %v2214_v5  ;;  %1420 = vmatprep.subr.bf16.mxu1 %v2217_v6 }
  0x84   : > { %1275 = vmatpush1.bf16.msra.mxu0 %v2212_v7  ;;  %1421 = vmatpush1.bf16.msra.mxu1 %v2215_v8 }
  0x87   : > { %1277 = vmatmul.mubr.bf16.vlgmr.msra.gmra.mrb[0].mxu0 %v2218_v9  ;;  %1423 = vmatmul.mubr.bf16.vlgmr.msra.gmra.mrb[0].mxu1 %v2218_v9 }
  0x88   : > { %1286 = vmatprep.mubr.bf16.mxu0 %v2221_v10  ;;  %1432 = vmatprep.mubr.bf16.mxu1 %v2221_v10 }
  0x8f   : > { %1287 = vmatmul.mubr.bf16.gmra.mrb[4].mxu0 %v2223_v11  ;;  %1433 = vmatmul.mubr.bf16.gmra.mrb[4].mxu1 %v2223_v11 }
  0x90   : > { %1296 = vmatprep.mubr.bf16.mxu0 %v2224_v12  ;;  %1442 = vmatprep.mubr.bf16.mxu1 %v2224_v12 }
  0x97   : > { %1297 = vmatmul.mubr.bf16.gmra.mrb[8].mxu0 %v2226_v13  ;;  %1443 = vmatmul.mubr.bf16.gmra.mrb[8].mxu1 %v2226_v13 }
  0x98   : > { %1306 = vmatprep.mubr.bf16.mxu0 %v2227_v14  ;;  %1452 = vmatprep.mubr.bf16.mxu1 %v2227_v14 }
  0x9f   : > { %1307 = vmatmul.mubr.bf16.gmra.mrb[12].mxu0 %v2229_v15  ;;  %1453 = vmatmul.mubr.bf16.gmra.mrb[12].mxu1 %v2229_v15 }
 0x15a   : > { %v1278_v27 = vpop.f32.mrb[0].mxu0  ;;  %v1424_v28 = vpop.f32.mrb[0].mxu1 }
 0x15b   : > { %v1926_v29 = vadd.f32 %v1278_v27, %v2708_v23  ;;  %v1942_v30 = vadd.f32 %v1424_v28, %v2710_v24  ;;  %v1280_v31 = vpop.f32.mrb[1].mxu0  ;;  %v1426_v32 = vpop.f32.mrb[1].mxu1 }
 0x15c   : > { %v1927_v33 = vadd.f32 %v1280_v31, %v2712_v25  ;;  %v1943_v34 = vadd.f32 %v1426_v32, %v2714_v26  ;;  %v1282_v35 = vpop.f32.mrb[2].mxu0  ;;  %v1428_v36 = vpop.f32.mrb[2].mxu1 }
 0x15d   : > { %v1463_v37 = vmax.f32 %v1926_v29, 0.0  ;;  %v1465_v38 = vmax.f32 %v1942_v30, 0.0  ;;  %v1928_v39 = vadd.f32 %v1282_v35, %v2708_v23  ;;  %v1944_v40 = vadd.f32 %v1428_v36, %v2710_v24  ;;  %v1284_v41 = vpop.f32.mrb[3].mxu0  ;;  %v1430_v42 = vpop.f32.mrb[3].mxu1 }
 0x15e   : > { %v1464_v43 = vmax.f32 %v1927_v33, 0.0  ;;  %v1466_v44 = vmax.f32 %v1943_v34, 0.0  ;;  %v1929_v45 = vadd.f32 %v1284_v41, %v2712_v25  ;;  %v1945_v46 = vadd.f32 %v1430_v42, %v2714_v26 }
 0x15f   : > { %v1467_v47 = vmax.f32 %v1928_v39, 0.0  ;;  %v1469_v48 = vmax.f32 %v1944_v40, 0.0 }
 0x160   : > { %v1910_v49 = vpack.c.bf16 %v1464_v43, %v1463_v37  ;;  %v1911_v50 = vpack.c.bf16 %v1466_v44, %v1465_v38  ;;  %v1468_v51 = vmax.f32 %v1929_v45, 0.0  ;;  %v1470_v52 = vmax.f32 %v1945_v46, 0.0 }
 0x162   : > { %1591 = vst [vmem:[%s2729_s19] sm:$0xff] %v1910_v49  ;;  %1592 = vst [vmem:[%s2729_s19 + $0x8] sm:$0xff] %v1911_v50  ;;  %v1912_v53 = vpack.c.bf16 %v1468_v51, %v1467_v47  ;;  %v1913_v54 = vpack.c.bf16 %v1470_v52, %v1469_v48  ;;  %v1288_v55 = vpop.f32.mrb[4].mxu0  ;;  %v1434_v56 = vpop.f32.mrb[4].mxu1 }
 0x163   : > { %v1930_v57 = vadd.f32 %v1288_v55, %v2708_v23  ;;  %v1946_v58 = vadd.f32 %v1434_v56, %v2710_v24  ;;  %v1290_v59 = vpop.f32.mrb[5].mxu0  ;;  %v1436_v60 = vpop.f32.mrb[5].mxu1 }
 0x164   : > { %1593 = vst [vmem:[%s2729_s19 + $0x10] sm:$0xff] %v1912_v53  ;;  %1594 = vst [vmem:[%s2729_s19 + $0x18] sm:$0xff] %v1913_v54  ;;  %v1931_v61 = vadd.f32 %v1290_v59, %v2712_v25  ;;  %v1947_v62 = vadd.f32 %v1436_v60, %v2714_v26  ;;  %v1292_v63 = vpop.f32.mrb[6].mxu0  ;;  %v1438_v0 = vpop.f32.mrb[6].mxu1 }
 0x165   : > { %v1471_v1 = vmax.f32 %v1930_v57, 0.0  ;;  %v1473_v2 = vmax.f32 %v1946_v58, 0.0  ;;  %v1932_v3 = vadd.f32 %v1292_v63, %v2708_v23  ;;  %v1948_v4 = vadd.f32 %v1438_v0, %v2710_v24  ;;  %v1294_v5 = vpop.f32.mrb[7].mxu0  ;;  %v1440_v6 = vpop.f32.mrb[7].mxu1 }
 0x166   : > { %v1472_v7 = vmax.f32 %v1931_v61, 0.0  ;;  %v1474_v8 = vmax.f32 %v1947_v62, 0.0  ;;  %v1933_v9 = vadd.f32 %v1294_v5, %v2712_v25  ;;  %v1949_v10 = vadd.f32 %v1440_v6, %v2714_v26 }
 0x167   : > { %v1475_v11 = vmax.f32 %v1932_v3, 0.0  ;;  %v1477_v12 = vmax.f32 %v1948_v4, 0.0 }
 0x168   : > { %v1914_v13 = vpack.c.bf16 %v1472_v7, %v1471_v1  ;;  %v1915_v14 = vpack.c.bf16 %v1474_v8, %v1473_v2  ;;  %v1476_v15 = vmax.f32 %v1933_v9, 0.0  ;;  %v1478_v16 = vmax.f32 %v1949_v10, 0.0 }
 0x16a   : > { %1595 = vst [vmem:[%s2729_s19 + $0x20] sm:$0xff] %v1914_v13  ;;  %1596 = vst [vmem:[%s2729_s19 + $0x28] sm:$0xff] %v1915_v14  ;;  %v1916_v17 = vpack.c.bf16 %v1476_v15, %v1475_v11  ;;  %v1917_v18 = vpack.c.bf16 %v1478_v16, %v1477_v12  ;;  %v1298_v19 = vpop.f32.mrb[8].mxu0  ;;  %v1444_v20 = vpop.f32.mrb[8].mxu1 }
 0x16b   : > { %v1934_v21 = vadd.f32 %v1298_v19, %v2708_v23  ;;  %v1950_v22 = vadd.f32 %v1444_v20, %v2710_v24  ;;  %v1300_v27 = vpop.f32.mrb[9].mxu0  ;;  %v1446_v28 = vpop.f32.mrb[9].mxu1 }
 0x16c   : > { %1597 = vst [vmem:[%s2729_s19 + $0x30] sm:$0xff] %v1916_v17  ;;  %1598 = vst [vmem:[%s2729_s19 + $0x38] sm:$0xff] %v1917_v18  ;;  %v1935_v29 = vadd.f32 %v1300_v27, %v2712_v25  ;;  %v1951_v30 = vadd.f32 %v1446_v28, %v2714_v26  ;;  %v1302_v31 = vpop.f32.mrb[10].mxu0  ;;  %v1448_v32 = vpop.f32.mrb[10].mxu1 }
 0x16d   : > { %v1479_v33 = vmax.f32 %v1934_v21, 0.0  ;;  %v1481_v34 = vmax.f32 %v1950_v22, 0.0  ;;  %v1936_v35 = vadd.f32 %v1302_v31, %v2708_v23  ;;  %v1952_v36 = vadd.f32 %v1448_v32, %v2710_v24  ;;  %v1304_v37 = vpop.f32.mrb[11].mxu0  ;;  %v1450_v38 = vpop.f32.mrb[11].mxu1 }
 0x16e   : > { %v1480_v39 = vmax.f32 %v1935_v29, 0.0  ;;  %v1482_v40 = vmax.f32 %v1951_v30, 0.0  ;;  %v1937_v41 = vadd.f32 %v1304_v37, %v2712_v25  ;;  %v1953_v42 = vadd.f32 %v1450_v38, %v2714_v26 }
 0x16f   : > { %v1483_v43 = vmax.f32 %v1936_v35, 0.0  ;;  %v1485_v44 = vmax.f32 %v1952_v36, 0.0 }
 0x170   : > { %v1918_v45 = vpack.c.bf16 %v1480_v39, %v1479_v33  ;;  %v1919_v46 = vpack.c.bf16 %v1482_v40, %v1481_v34  ;;  %v1484_v47 = vmax.f32 %v1937_v41, 0.0  ;;  %v1486_v48 = vmax.f32 %v1953_v42, 0.0 }
 0x172   : > { %1599 = vst [vmem:[%s2729_s19 + $0x40] sm:$0xff] %v1918_v45  ;;  %1600 = vst [vmem:[%s2729_s19 + $0x48] sm:$0xff] %v1919_v46  ;;  %v1920_v49 = vpack.c.bf16 %v1484_v47, %v1483_v43  ;;  %v1921_v50 = vpack.c.bf16 %v1486_v48, %v1485_v44  ;;  %v1308_v51 = vpop.f32.mrb[12].mxu0  ;;  %v1454_v52 = vpop.f32.mrb[12].mxu1 }
 0x173   : > { %v1938_v53 = vadd.f32 %v1308_v51, %v2708_v23  ;;  %v1954_v54 = vadd.f32 %v1454_v52, %v2710_v24  ;;  %v1310_v55 = vpop.f32.mrb[13].mxu0  ;;  %v1456_v56 = vpop.f32.mrb[13].mxu1 }
 0x174   : > { %1601 = vst [vmem:[%s2729_s19 + $0x50] sm:$0xff] %v1920_v49  ;;  %1602 = vst [vmem:[%s2729_s19 + $0x58] sm:$0xff] %v1921_v50  ;;  %v1939_v57 = vadd.f32 %v1310_v55, %v2712_v25  ;;  %v1955_v58 = vadd.f32 %v1456_v56, %v2714_v26  ;;  %v1312_v59 = vpop.f32.mrb[14].mxu0  ;;  %v1458_v60 = vpop.f32.mrb[14].mxu1 }
 0x175   : > { %v1487_v61 = vmax.f32 %v1938_v53, 0.0  ;;  %v1489_v62 = vmax.f32 %v1954_v54, 0.0  ;;  %v1940_v63 = vadd.f32 %v1312_v59, %v2708_v23  ;;  %v1956_v0 = vadd.f32 %v1458_v60, %v2710_v24  ;;  %v1314_v1 = vpop.f32.mrb[15].mxu0  ;;  %v1460_v2 = vpop.f32.mrb[15].mxu1 }
 0x176   : > { %v1488_v3 = vmax.f32 %v1939_v57, 0.0  ;;  %v1490_v4 = vmax.f32 %v1955_v58, 0.0  ;;  %v1941_v5 = vadd.f32 %v1314_v1, %v2712_v25  ;;  %v1957_v6 = vadd.f32 %v1460_v2, %v2714_v26 }
 0x177   : > { %v1491_v7 = vmax.f32 %v1940_v63, 0.0  ;;  %v1493_v8 = vmax.f32 %v1956_v0, 0.0 }
 0x178   : > { %v1922_v9 = vpack.c.bf16 %v1488_v3, %v1487_v61  ;;  %v1923_v10 = vpack.c.bf16 %v1490_v4, %v1489_v62  ;;  %v1492_v11 = vmax.f32 %v1941_v5, 0.0  ;;  %v1494_v12 = vmax.f32 %v1957_v6, 0.0 }
 0x17a   : > { %1603 = vst [vmem:[%s2729_s19 + $0x60] sm:$0xff] %v1922_v9  ;;  %1604 = vst [vmem:[%s2729_s19 + $0x68] sm:$0xff] %v1923_v10  ;;  %v1924_v23 = vpack.c.bf16 %v1492_v11, %v1491_v7  ;;  %v1925_v24 = vpack.c.bf16 %v1494_v12, %v1493_v8 }
 0x17c   : > { %1605 = vst [vmem:[%s2729_s19 + $0x70] sm:$0xff] %v1924_v23  ;;  %1606 = vst [vmem:[%s2729_s19 + $0x78] sm:$0xff] %v1925_v24 }
 0x17d PF: > { %s13_s14 = sadd.s32 1, %s2252_s14   ;;  %s2784_s12 = smov %s2248_s13 }
 0x17e   : > { %p10_p5 = scmp.ge.s32.totalorder %s13_s14, 4   ;;  %s2785_s13 = smov %s2787_s15 }
 0x180   :  { %12 = sbr.rel (!%p10_p5) target bundleno = 2 (0x2), region = 68 }

// kernel: block_forward.16
= control target key start
LH: loop header
LB: loop body
LE: loop exit
PB: predicated region body
PF: predicated region fallthrough
CT: control target
= control target key end

     0   :  { %s432_s15 = smov 0   ;;  %s462_s0 = inlined_call_operand.vmem [shape: f32[2,4,128], index: 0, kind: input, shape index: {}]   ;;  %s463_s1 = inlined_call_operand.vmem [shape: f32[2,4,128], index: 1, kind: input, shape index: {}]   ;;  %s464_s2 = inlined_call_operand.vmem [shape: f32[2,4,128], index: 2, kind: input, shape index: {}]   ;;  %s465_s3 = inlined_call_operand.vmem [shape: f32[2,4,128], index: 3, kind: output, shape index: {0}]   ;;  %s466_s4 = inlined_call_operand.vmem [shape: f32[2,1,1], index: 4, kind: output, shape index: {1}]  }
   0x1 LB: > { %s372_s16 = sadd.s32 4294967295, %s405_s15   ;;  %p376_p0 = scmp.ge.s32.totalorder %s405_s15, 1  ;;  %s405_s15 = sphi %s432_s15, %s15_s15  }
   0x2   : > { %p182_p1 = scmp.lt.s32.totalorder %s405_s15, 3 }
   0x4   : > { %p183_p2 = pnand %p376_p0, %p182_p1 }
   0x5   : > { %p217_p3 = scmp.lt.s32.totalorder (!%p183_p2), %s372_s16, 1  ;;  %vm256_vm1 = vcmask (!%p183_p2), 1043456   ;;  %vm268_vm2 = vcmask (!%p183_p2), 0  }
   0x6   : > { %186 = sbr.rel (%p183_p2) target bundleno = 261 (0x105), region = 32 }
   0xd   : > { %s468_s16 = smov (!%p217_p3, %s372_s16), 1 }
   0xe   : > { %s377_s17 = sshll.u32 %s468_s16, 2  ;;  %s235_s6 = scalar_lea.vmem %s466_s4, %s468_s16 }
   0xf   : > { %s224_s20 = scalar_lea.vmem %s463_s1, %s377_s17  ;;  %s220_s23 = scalar_lea.vmem %s462_s0, %s377_s17 }
  0x10   : > { %v236_v0 = vld [vmem:[%s224_s20] sm:$0xf]  ;;  %s228_s26 = scalar_lea.vmem %s464_s2, %s377_s17  ;;  %s232_s29 = scalar_lea.vmem %s465_s3, %s377_s17 }
  0x11   : > { %v237_v1 = vadd.f32 2.0, %v236_v0  ;;  %v247_v7 = vld [vmem:[%s220_s23] sm:$0xf] }
  0x12   : > { %v248_v8 = vld [vmem:[%s228_s26] sm:$0xf] }
  0x13   : > { %v238_v2 = vand.u32 2147483647, %v237_v1  ;;  %vm242_vm0 = vcmp.ge.f32.partialorder %v237_v1, 0.0  ;;  %v249_v10 = vadd.f32 %v248_v8, %v247_v7  ;;  %v252_v12 = vmin.f32 %v237_v1, 0.0 }
  0x15   : > { %v239_v3 = vsub.f32 0.0, %v238_v2 }
  0x17   : > { %v240_v4 = vmul.f32 1.442695, %v239_v3 }
  0x19   : > { %393 = vpow2.f32 %v240_v4 }
  0x23   : > { %v394_v5 = vpop.eup %393 }
  0x24   : > { %v244_v6 = vadd.f32 1.0, %v394_v5  ;;  %v243_v9 = vsel %vm242_vm0, 1.0, %v394_v5 }
  0x26   : > { %395 = vrcp.f32 %v244_v6 }
  0x27   : > { %397 = vlog2.f32 %v244_v6 }
  0x30   : > { %v396_v11 = vpop.eup %395 }
  0x31   : > { %v398_v13 = vpop.eup %397  ;;  %v246_v14 = vmul.f32 %v396_v11, %v243_v9 }
  0x32   : > { %v254_v15 = vmul.f32 0.6931472, %v398_v13 }
  0x33   : > { %v250_v16 = vmul.f32 %v249_v10, %v246_v14 }
  0x34   : > { %v255_v17 = vsub.f32 %v252_v12, %v254_v15 }
  0x35   : > { %251 = vst [vmem:[%s232_s29] sm:$0xf] %v250_v16 }
  0x36   : > { %v257_v18 = vsel %vm256_vm1, %v255_v17, 0.0 }
  0x37   : > { %258 = vadd.xlane.f32.xlu0 %v257_v18 }
  0xc4   : > { %v259_v19 = vpop.xlane.xlu0 %258 }
  0xc5   : > { %v260_v20 = vrot.slane %v259_v19, 4 }
  0xc7   : > { %v261_v21 = vadd.f32 %v260_v20, %v259_v19 }
  0xc9   : > { %v262_v22 = vrot.slane %v261_v21, 2 }
  0xcb   : > { %v263_v23 = vadd.f32 %v262_v22, %v261_v21 }
  0xcd   : > { %v264_v24 = vrot.slane %v263_v23, 1 }
  0xcf   : > { %v265_v25 = vadd.f32 %v264_v24, %v263_v23 }
  0xd1   : > { %383 = vpush %v265_v25 }
 0x102   : > { %s384_s7 = spop %383 }
 0x103   : > { %v267_v26 = vstv %s384_s7 }
 0x104   : > { %269 = vst.msk [vmem:[%s235_s6] sm:$0x1] %vm268_vm2, %v267_v26 }
 0x105 PF: > { %s15_s15 = sadd.s32 1, %s405_s15  }
 0x106   : > { %p12_p4 = scmp.ge.s32.totalorder %s15_s15, 4  }
 0x108   :  { %14 = sbr.rel (!%p12_p4) target bundleno = 1 (0x1), region = 80 }

// kernel: block_forward.23
= control target key start
LH: loop header
LB: loop body
LE: loop exit
PB: predicated region body
PF: predicated region fallthrough
CT: control target
= control target key end

     0   :  { %s345_s12 = smov 0   ;;  %s372_s0 = inlined_call_operand.vmem [shape: f32[2,4,128], index: 0, kind: input, shape index: {}]   ;;  %s373_s1 = inlined_call_operand.vmem [shape: f32[2,4,128], index: 1, kind: input, shape index: {}]   ;;  %s374_s2 = inlined_call_operand.vmem [shape: f32[2,4,128], index: 2, kind: input, shape index: {}]   ;;  %s375_s3 = inlined_call_operand.vmem [shape: f32[2,1,1], index: 3, kind: output, shape index: {}]  }
   0x1 LB: > { %s295_s13 = sadd.s32 4294967295, %s323_s12   ;;  %p299_p0 = scmp.ge.s32.totalorder %s323_s12, 1  ;;  %s323_s12 = sphi %s345_s12, %s13_s12  }
   0x2   : > { %p154_p1 = scmp.lt.s32.totalorder %s323_s12, 3 }
   0x4   : > { %p155_p2 = pnand %p299_p0, %p154_p1 }
   0x5   : > { %p183_p3 = scmp.lt.s32.totalorder (!%p155_p2), %s295_s13, 1  ;;  %vm210_vm0 = vcmask (!%p155_p2), 1043456   ;;  %vm222_vm1 = vcmask (!%p155_p2), 0  }
   0x6   : > { %158 = sbr.rel (%p155_p2) target bundleno = 244 (0xf4), region = 32 }
   0xd   : > { %s377_s13 = smov (!%p183_p3, %s295_s13), 1 }
   0xe   : > { %s300_s14 = sshll.u32 %s377_s13, 2  ;;  %s197_s26 = scalar_lea.vmem %s375_s3, %s377_s13 }
   0xf   : > { %s186_s17 = scalar_lea.vmem %s372_s0, %s300_s14  ;;  %s190_s20 = scalar_lea.vmem %s373_s1, %s300_s14 }
  0x10   : > { %s194_s23 = scalar_lea.vmem %s374_s2, %s300_s14  ;;  %v199_v1 = vld [vmem:[%s186_s17] sm:$0xf] }
  0x11   : > { %v198_v0 = vld [vmem:[%s194_s23] sm:$0xf] }
  0x12   : > { %v200_v2 = vld [vmem:[%s190_s20] sm:$0xf]  ;;  %v205_v3 = vmul.f32 -2.0, %v198_v0  ;;  %v202_v8 = vsub.f32 -0.9189385, %v198_v0 }
  0x13   : > { %v201_v5 = vsub.f32 %v199_v1, %v200_v2 }
  0x14   : > { %v206_v4 = vmul.f32 1.442695, %v205_v3 }
  0x15   : > { %v203_v6 = vmul.f32 0.5, %v201_v5 }
  0x16   : > { %315 = vpow2.f32 %v206_v4 }
  0x17   : > { %v204_v7 = vmul.f32 %v203_v6, %v201_v5 }
  0x20   : > { %v316_v9 = vpop.eup %315 }
  0x21   : > { %v208_v10 = vmul.f32 %v316_v9, %v204_v7 }
  0x23   : > { %v209_v11 = vsub.f32 %v202_v8, %v208_v10 }
  0x25   : > { %v211_v12 = vsel %vm210_vm0, %v209_v11, 0.0 }
  0x26   : > { %212 = vadd.xlane.f32.xlu0 %v211_v12 }
  0xb3   : > { %v213_v13 = vpop.xlane.xlu0 %212 }
  0xb4   : > { %v214_v14 = vrot.slane %v213_v13, 4 }
  0xb6   : > { %v215_v15 = vadd.f32 %v214_v14, %v213_v13 }
  0xb8   : > { %v216_v16 = vrot.slane %v215_v15, 2 }
  0xba   : > { %v217_v17 = vadd.f32 %v216_v16, %v215_v15 }
  0xbc   : > { %v218_v18 = vrot.slane %v217_v17, 1 }
  0xbe   : > { %v219_v19 = vadd.f32 %v218_v18, %v217_v17 }
  0xc0   : > { %305 = vpush %v219_v19 }
  0xf1   : > { %s306_s27 = spop %305 }
  0xf2   : > { %v221_v20 = vstv %s306_s27 }
  0xf3   : > { %223 = vst.msk [vmem:[%s197_s26] sm:$0x1] %vm222_vm1, %v221_v20 }
  0xf4 PF: > { %s13_s12 = sadd.s32 1, %s323_s12  }
  0xf5   : > { %p10_p4 = scmp.ge.s32.totalorder %s13_s12, 4  }
  0xf7   :  { %12 = sbr.rel (!%p10_p4) target bundleno = 1 (0x1), region = 68 }

// kernel: block_forward.22
= control target key start
LH: loop header
LB: loop body
LE: loop exit
PB: predicated region body
PF: predicated region fallthrough
CT: control target
= control target key end

     0   :  { %s1944_s15 = smov 0   ;;  %s2376_s0 = inlined_call_operand.vmem [shape: bf16[2,110,8], index: 0, kind: input, shape index: {}]   ;;  %s2377_s1 = inlined_call_operand.vmem [shape: bf16[72,128], index: 1, kind: input, shape index: {}]   ;;  %s2378_s2 = inlined_call_operand.vmem [shape: f32[1,128], index: 2, kind: input, shape index: {}]   ;;  %s2379_s3 = inlined_call_operand.vmem [shape: f32[1,128], index: 3, kind: input, shape index: {}]   ;;  %s2380_s4 = inlined_call_operand.vmem [shape: f32[2,80,128], index: 4, kind: output, shape index: {}]  }
   0x1 LB: > { %s1541_s16 = sadd.s32 4294967295, %s1915_s15   ;;  %p1545_p0 = scmp.ge.s32.totalorder %s1915_s15, 1  ;;  %s1915_s15 = sphi %s1944_s15, %s14_s15  }
   0x2   : > { %p162_p1 = scmp.lt.s32.totalorder %s1915_s15, 3 }
   0x4   : > { %p163_p2 = pnand %p1545_p0, %p162_p1 }
   0x5   : > { %v211_v0 = vld [vmem:[%s2377_s1 + $0x4] sm:$0xf] (!%p163_p2)  ;;  %vm301_vm0 = vcmask (!%p163_p2), 1043456   ;;  %p188_p3 = scmp.lt.s32.totalorder (!%p163_p2), %s1541_s16, 1  ;;  %v1917_v1 = vmov (!%p163_p2), 0.0   ;;  %vm1918_vm1 = vmmov (!%p163_p2), 0  }
   0x6   : > { %166 = sbr.rel (%p163_p2) target bundleno = 424 (0x1a8), region = 36  ;;  %1674 = vmatprep.subr.bf16.mxu0 (!%p163_p2), %v1917_v1  ;;  %1872 = vmatprep.subr.bf16.mxu1 (!%p163_p2), %v1917_v1  ;;  %v303_v2 = vsel (!%p163_p2), %vm301_vm0, %v211_v0, 0  ;;  %vm240_vm2 = vsmask.f32 (!%p163_p2), 7424  ;;  %v465_v13 = vld [vmem:[%s2377_s1 + $0x8] sm:$0xf] (!%p163_p2) }
   0x7   : > { %1675 = vmatpush3.bf16.msra.mxu0 (!%p163_p2), %v303_v2  ;;  %1873 = vmatpush3.bf16.msra.mxu1 (!%p163_p2), %v303_v2  ;;  %vm285_vm3 = vcmask (!%p163_p2), 64512   ;;  %v209_v22 = vld [vmem:[%s2377_s1] sm:$0xf] (!%p163_p2)  ;;  %v497_v26 = vsel (!%p163_p2), %vm301_vm0, %v465_v13, 0  ;;  %vm469_vm4 = vcmask (!%p163_p2), 1046528   ;;  %vm899_vm6 = vcmask (!%p163_p2), 1045504  }
   0x8   : > { %1676 = vmatprep.mubr.msk.bf16.mxu0 (!%p163_p2), %vm1918_vm1, %v1917_v1  ;;  %1688 = vmatprep.mubr.msk.bf16.mxu1 (!%p163_p2), %vm1918_vm1, %v1917_v1  ;;  %v389_v31 = vsel (!%p163_p2), %vm301_vm0, %v209_v22, 0  ;;  %v593_v48 = vld [vmem:[%s2377_s1 + $0xc] sm:$0xf] (!%p163_p2)  ;;  %v735_v53 = vld [vmem:[%s2377_s1 + $0x10] sm:$0xf] (!%p163_p2)  ;;  %vm1329_vm8 = vcmask (!%p163_p2), 1044480  }
   0x9   : > { %1718 = vmatprep.subr.bf16.mxu0 (!%p163_p2), %v1917_v1  ;;  %1696 = vmatprep.subr.bf16.mxu1 (!%p163_p2), %v1917_v1  ;;  %v649_v50 = vsel (!%p163_p2), %vm301_vm0, %v593_v48, 0  ;;  %v809_v55 = vsel (!%p163_p2), %vm301_vm0, %v735_v53, 0  ;;  %vm739_vm5 = vsmask.f32 (!%p163_p2), 6400  ;;  %vm1169_vm7 = vsmask.f32 (!%p163_p2), 5376 }
   0xd   : > { %s2382_s16 = smov (!%p188_p3, %s1541_s16), 1 }
   0xe   : > { %s1874_s19 = smul.u32 56, %s2382_s16 }
   0xf   : > { %s1875_s13 = smul.u32 80, %s2382_s16 }
  0x10   : > { %s1970_s22 = scalar_lea.vmem %s2376_s0, %s1874_s19 }
  0x11   : > { %v199_v3 = vld [vmem:[%s1970_s22] sm:$0xf]  ;;  %v1974_v4 = vld [vmem:[%s1970_s22 + $0x4] sm:$0xf]  ;;  %v1980_v6 = vld [vmem:[%s1970_s22 + $0x8] sm:$0xff]   ;;  %s2337_s21 = scalar_lea.vmem %s2380_s4, %s1875_s13 }
  0x12   : > { %v1977_v5 = vcombine.low %v199_v3, %v1974_v4  ;;  %v249_v9 = vshll.u32 %v1980_v6, 16  ;;  %v1986_v10 = vld [vmem:[%s1970_s22 + $0x18] sm:$0xff]   ;;  %v1989_v11 = vld [vmem:[%s1970_s22 + $0x20] sm:$0xff]   ;;  %v1992_v12 = vld [vmem:[%s1970_s22 + $0x10] sm:$0xff]   ;;  %v253_v23 = vshrl.u32 %v1980_v6, 16  ;;  %v471_v52 = vrot.slane %v1980_v6, 1 }
  0x13   : > { %v265_v16 = vshll.u32 %v1986_v10, 16  ;;  %v269_v17 = vshrl.u32 %v1986_v10, 16  ;;  %v273_v18 = vshll.u32 %v1989_v11, 16  ;;  %v2001_v19 = vld [vmem:[%s1970_s22 + $0x28] ss:$0 sps:$4 sm:$0x11]  }
  0x14   : > { %v242_v7 = vshrl.u32 %v1977_v5, 16  ;;  %v244_v8 = vshll.u32 %v1977_v5, 16  ;;  %v251_v15 = vrot.slane %v249_v9, 1  ;;  %v257_v24 = vshll.u32 %v1992_v12, 16  ;;  %v2025_v39 = vld [vmem:[%s1970_s22 + $0x24] sm:$0xff]   ;;  %v2096_v2 = vld [vmem:[%s1970_s22 + $0xc] sm:$0xff]  }
  0x15   : > { %v267_v21 = vrot.slane %v265_v16, 1  ;;  %v275_v25 = vrot.slane %v273_v18, 1  ;;  %v277_v29 = vshrl.u32 %v1989_v11, 16  ;;  %v281_v30 = vshll.u32 %v2001_v19, 16  ;;  %v464_v43 = vld [vmem:[%s1970_s22] sm:$0xe] }
  0x16   : > { %v246_v14 = vrot.slane %v244_v8, 1  ;;  %v255_v33 = vor.u32 %v253_v23, %v251_v15  ;;  %v259_v34 = vrot.slane %v257_v24, 1  ;;  %v261_v38 = vshrl.u32 %v1992_v12, 16  ;;  %v1898_v40 = vld [vmem:[%s1970_s22 + $0x2c] ss:$0 sps:$4 sm:$0x11]  }
  0x17   : > { %v271_v28 = vor.u32 %v269_v17, %v267_v21  ;;  %v279_v35 = vor.u32 %v277_v29, %v275_v25  ;;  %v283_v36 = vrot.slane %v281_v30, 1  ;;  %v629_v44 = vrot.slane %v2025_v39, 1  ;;  %v582_v61 = vld [vmem:[%s1970_s22 + $0x4] sm:$0xe]  ;;  %v2091_v62 = vld [vmem:[%s1970_s22 + $0x8] sm:$0xf] }
  0x18   : > { %v247_v20 = vor.u32 %v246_v14, %v242_v7  ;;  %v260_v37 = vsel %vm240_vm2, %v255_v33, %v259_v34  ;;  %v263_v42 = vor.u32 %v261_v38, %v259_v34  ;;  %v631_v45 = vrot.slane %v1898_v40, 1  ;;  %v2115_v18 = vld [vmem:[%s1970_s22 + $0x14] sm:$0xff]   ;;  %v2135_v30 = vld [vmem:[%s1970_s22 + $0x1c] sm:$0xff]   ;;  %v2159_v48 = vld [vmem:[%s1970_s22 + $0x2c] ss:$0 sps:$4 sm:$0x33]  }
  0x19   : > { %v276_v32 = vsel %vm240_vm2, %v271_v28, %v275_v25  ;;  %v284_v41 = vsel %vm240_vm2, %v279_v35, %v283_v36  ;;  %v1564_v49 = vcombine.low %v464_v43, %v1974_v4  ;;  %v473_v56 = vrot.slane %v1992_v12, 1  ;;  %v1023_v24 = vld [vmem:[%s2377_s1 + $0x18] sm:$0xf]  ;;  %v894_v53 = vld [vmem:[%s1970_s22 + $0x4] sm:$0xc] }
  0x1a   : > { %v252_v27 = vsel %vm240_vm2, %v247_v20, %v251_v15  ;;  %1689 = vmatmul.mubr.msk.bf16.vlgmr.msra.gmra.mrb[0].mxu1 %vm285_vm3, %v276_v32  ;;  %v2040_v46 = vsel %vm469_vm4, %v629_v44, %v631_v45  ;;  %v268_v47 = vsel %vm240_vm2, %v263_v42, %v267_v21  ;;  %v475_v58 = vrot.slane %v1986_v10, 1 }
  0x1b   : > { %1677 = vmatmul.mubr.msk.bf16.vlgmr.msra.gmra.mrb[0].mxu0 %vm285_vm3, %v252_v27  ;;  %1697 = vmatpush3.bf16.msra.mxu1 %v389_v31  ;;  %v470_v51 = vrot.slane %v1564_v49, 1  ;;  %v474_v57 = vsel %vm469_vm4, %v471_v52, %v473_v56  ;;  %v477_v60 = vrot.slane %v1989_v11, 1  ;;  %v1570_v0 = vcombine.low %v582_v61, %v2091_v62 }
  0x1c   : > { %1719 = vmatpush3.bf16.msra.mxu0 %v497_v26  ;;  %1680 = vmatprep.mubr.msk.bf16.mxu0 %vm1918_vm1, %v1917_v1  ;;  %v476_v59 = vsel %vm469_vm4, %v473_v56, %v475_v58  ;;  %v479_v3 = vrot.slane %v2001_v19, 1  ;;  %v752_v7 = vshll.u32 %v2096_v2, 16  ;;  %v623_v9 = vrot.slane %v2096_v2, 1 }
  0x1d   : > { %1762 = vmatprep.subr.bf16.mxu0 %v1917_v1  ;;  %1692 = vmatprep.mubr.msk.bf16.mxu1 %vm1918_vm1, %v1917_v1  ;;  %v472_v54 = vsel %vm469_vm4, %v470_v51, %v471_v52  ;;  %v478_v63 = vsel %vm469_vm4, %v475_v58, %v477_v60  ;;  %v741_v4 = vshrl.u32 %v1570_v0, 16  ;;  %v622_v8 = vrot.slane %v1570_v0, 1  ;;  %v1012_v58 = vld [vmem:[%s1970_s22 + $0x8] sm:$0xc] }
  0x1e   : > { %1740 = vmatprep.subr.bf16.mxu1 %v1917_v1  ;;  %v754_v16 = vrot.slane %v752_v7, 2  ;;  %v758_v21 = vshrl.u32 %v2115_v18, 16  ;;  %v761_v22 = vshll.u32 %v2115_v18, 16  ;;  %v625_v23 = vrot.slane %v2115_v18, 1  ;;  %v1325_v7 = vld [vmem:[%s2377_s1 + $0x20] sm:$0xf] }
  0x1f   : > { %v743_v13 = vrot.slane %v741_v4, 1  ;;  %v624_v17 = vsel %vm469_vm4, %v622_v8, %v623_v9  ;;  %v1079_v28 = vsel %vm301_vm0, %v1023_v24, 0  ;;  %v767_v32 = vshrl.u32 %v2135_v30, 16 }
  0x20   : > { %v760_v26 = vrot.slane %v758_v21, 1  ;;  %v763_v27 = vrot.slane %v761_v22, 2  ;;  %v626_v29 = vsel %vm469_vm4, %v623_v9, %v625_v23  ;;  %v770_v33 = vshll.u32 %v2135_v30, 16  ;;  %v2210_v9 = vld [vmem:[%s1970_s22 + $0x18] sm:$0xff]  }
  0x21   : > { %v627_v34 = vrot.slane %v2135_v30, 1  ;;  %v769_v36 = vrot.slane %v767_v32, 1  ;;  %v779_v42 = vshll.u32 %v2025_v39, 16  ;;  %v785_v51 = vshrl.u32 %v2159_v48, 16 }
  0x22   : > { %1693 = vmatmul.mubr.msk.bf16.gmra.mrb[4].mxu1 %vm285_vm3, %v284_v41  ;;  %v764_v31 = vor.u32 %v763_v27, %v760_v26  ;;  %v776_v41 = vshrl.u32 %v2025_v39, 16  ;;  %v788_v52 = vshll.u32 %v2159_v48, 16  ;;  %v1587_v56 = vcombine.low %v894_v53, %v2091_v62 }
  0x23   : > { %1681 = vmatmul.mubr.msk.bf16.gmra.mrb[4].mxu0 %vm285_vm3, %v260_v37  ;;  %1698 = vmatprep.mubr.msk.bf16.mxu1 %vm1918_vm1, %v1917_v1  ;;  %v772_v37 = vrot.slane %v770_v33, 2  ;;  %v628_v38 = vsel %vm469_vm4, %v625_v23, %v627_v34  ;;  %v630_v49 = vsel %vm469_vm4, %v627_v34, %v629_v44  ;;  %v901_v61 = vrot.slane %v2096_v2, 2 }
  0x24   : > { %1684 = vmatprep.mubr.msk.bf16.mxu0 %vm1918_vm1, %v1917_v1  ;;  %v778_v45 = vrot.slane %v776_v41, 1  ;;  %v909_v23 = vrot.slane %v2159_v48, 2 }
  0x25   : > { %v773_v40 = vor.u32 %v772_v37, %v769_v36 }
  0x27   : > { %v774_v43 = vsel %vm739_vm5, %v764_v31, %v773_v40 }
  0x2a   : > { %1699 = vmatmul.mubr.msk.bf16.vlgmr.msra.gmra.mrb[8].mxu1 %vm285_vm3, %v1977_v5  ;;  %v744_v5 = vshll.u32 %v1570_v0, 16 }
  0x2b   : > { %1685 = vmatmul.mubr.msk.bf16.gmra.mrb[8].mxu0 %vm285_vm3, %v268_v47  ;;  %1741 = vmatpush3.bf16.msra.mxu1 %v649_v50  ;;  %v781_v47 = vrot.slane %v779_v42, 2 }
  0x2c   : > { %1720 = vmatprep.mubr.msk.bf16.mxu0 %vm1918_vm1, %v1917_v1  ;;  %1702 = vmatprep.mubr.msk.bf16.mxu1 %vm1918_vm1, %v1917_v1  ;;  %v746_v14 = vrot.slane %v744_v5, 2 }
  0x2d   : > { %1784 = vmatprep.subr.bf16.mxu1 %v1917_v1  ;;  %v782_v50 = vor.u32 %v781_v47, %v778_v45 }
  0x2e   : > { %v747_v19 = vor.u32 %v746_v14, %v743_v13  ;;  %v1055_v13 = vrot.slane %v2210_v9, 2  ;;  %v905_v14 = vrot.slane %v2135_v30, 2 }
  0x2f   : > { %v783_v44 = vsel %vm739_vm5, %v773_v40, %v782_v50  ;;  %v1191_v40 = vshll.u32 %v2210_v9, 16 }
  0x31   : > { %v1193_v47 = vrot.slane %v1191_v40, 3 }
  0x32   : > { %1703 = vmatmul.mubr.msk.bf16.gmra.mrb[12].mxu1 %vm285_vm3, %v1980_v6  ;;  %v749_v6 = vshrl.u32 %v2096_v2, 16 }
  0x33   : > { %1721 = vmatmul.mubr.msk.bf16.vlgmr.msra.gmra.mrb[12].mxu0 %vm285_vm3, %v472_v54  ;;  %1706 = vmatprep.mubr.msk.bf16.mxu1 %vm1918_vm1, %v1917_v1  ;;  %v787_v54 = vrot.slane %v785_v51, 1 }
  0x34   : > { %1763 = vmatpush3.bf16.msra.mxu0 %v809_v55  ;;  %1724 = vmatprep.mubr.msk.bf16.mxu0 %vm1918_vm1, %v1917_v1  ;;  %v751_v15 = vrot.slane %v749_v6, 1  ;;  %v790_v55 = vrot.slane %v788_v52, 2  ;;  %v903_v6 = vrot.slane %v2115_v18, 2 }
  0x35   : > { %1806 = vmatprep.subr.bf16.mxu0 %v1917_v1 }
  0x36   : > { %v755_v20 = vor.u32 %v754_v16, %v751_v15  ;;  %v2224_v16 = vld [vmem:[%s1970_s22 + $0x20] sm:$0xff]  }
  0x37   : > { %v1057_v18 = vrot.slane %v2224_v16, 2  ;;  %v1197_v51 = vshrl.u32 %v2224_v16, 16  ;;  %v1200_v52 = vshll.u32 %v2224_v16, 16 }
  0x38   : > { %v756_v25 = vsel %vm739_vm5, %v747_v19, %v755_v20  ;;  %v765_v35 = vsel %vm739_vm5, %v755_v20, %v764_v31  ;;  %v2237_v20 = vld [vmem:[%s1970_s22 + $0x28] sm:$0xff]  }
  0x39   : > { %v1058_v19 = vsel %vm899_vm6, %v1055_v13, %v1057_v18  ;;  %v1059_v22 = vrot.slane %v2237_v20, 2 }
  0x3a   : > { %1707 = vmatmul.mubr.msk.bf16.gmra.mrb[16].mxu1 %vm285_vm3, %v1992_v12  ;;  %v895_v12 = vld [vmem:[%s2377_s1 + $0x14] sm:$0xf] }
  0x3b   : > { %1725 = vmatmul.mubr.msk.bf16.gmra.mrb[16].mxu0 %vm285_vm3, %v474_v57  ;;  %1710 = vmatprep.mubr.msk.bf16.mxu1 %vm1918_vm1, %v1917_v1  ;;  %v791_v57 = vor.u32 %v790_v55, %v787_v54  ;;  %v1060_v27 = vsel %vm899_vm6, %v1057_v18, %v1059_v22  ;;  %v1199_v54 = vrot.slane %v1197_v51, 2  ;;  %v1202_v55 = vrot.slane %v1200_v52, 3 }
  0x3c   : > { %1728 = vmatprep.mubr.msk.bf16.mxu0 %vm1918_vm1, %v1917_v1 }
  0x3d   : > { %v792_v62 = vsel %vm739_vm5, %v782_v50, %v791_v57  ;;  %v1203_v57 = vor.u32 %v1202_v55, %v1199_v54 }
  0x42   : > { %1711 = vmatmul.mubr.msk.bf16.gmra.mrb[20].mxu1 %vm285_vm3, %v1986_v10  ;;  %v480_v10 = vsel %vm469_vm4, %v477_v60, %v479_v3  ;;  %v900_v60 = vrot.slane %v1587_v56, 2  ;;  %v1333_v56 = vrot.slane %v2210_v9, 3 }
  0x43   : > { %1729 = vmatmul.mubr.msk.bf16.gmra.mrb[20].mxu0 %vm285_vm3, %v476_v59  ;;  %1714 = vmatprep.mubr.msk.bf16.mxu1 %vm1918_vm1, %v1917_v1  ;;  %v2182_v59 = vld [vmem:[%s1970_s22 + $0xc] sm:$0xf] }
  0x44   : > { %1732 = vmatprep.mubr.msk.bf16.mxu0 %vm1918_vm1, %v1917_v1  ;;  %v1593_v0 = vcombine.low %v1012_v58, %v2182_v59  ;;  %v902_v3 = vsel %vm899_vm6, %v900_v60, %v901_v61  ;;  %v1206_v58 = vshrl.u32 %v2237_v20, 16 }
  0x46   : > { %v1052_v2 = vrot.slane %v1593_v0, 2  ;;  %v1174_v24 = vshll.u32 %v1593_v0, 16 }
  0x48   : > { %v1176_v31 = vrot.slane %v1174_v24, 3 }
  0x4a   : > { %1715 = vmatmul.mubr.msk.bf16.gmra.mrb[24].mxu1 %vm285_vm3, %v1989_v11  ;;  %v927_v11 = vsel %vm301_vm0, %v895_v12, 0  ;;  %v904_v12 = vsel %vm899_vm6, %v901_v61, %v903_v6 }
  0x4b   : > { %1733 = vmatmul.mubr.msk.bf16.gmra.mrb[24].mxu0 %vm285_vm3, %v478_v63  ;;  %1742 = vmatprep.mubr.msk.bf16.mxu1 %vm1918_vm1, %v1917_v1  ;;  %v1165_v63 = vld [vmem:[%s2377_s1 + $0x1c] sm:$0xf] }
  0x4c   : > { %1736 = vmatprep.mubr.msk.bf16.mxu0 %vm1918_vm1, %v1917_v1  ;;  %v1239_v4 = vsel %vm301_vm0, %v1165_v63, 0 }
  0x52   : > { %1743 = vmatmul.mubr.msk.bf16.vlgmr.msra.gmra.mrb[28].mxu1 %vm285_vm3, %v624_v17  ;;  %v906_v17 = vsel %vm899_vm6, %v903_v6, %v905_v14 }
  0x53   : > { %1737 = vmatmul.mubr.msk.bf16.gmra.mrb[28].mxu0 %vm285_vm3, %v480_v10  ;;  %1785 = vmatpush3.bf16.msra.mxu1 %v927_v11  ;;  %v1357_v10 = vsel %vm301_vm0, %v1325_v7, 0  ;;  %v907_v11 = vrot.slane %v2025_v39, 2  ;;  %v1171_v39 = vshrl.u32 %v1593_v0, 16  ;;  %v1908_v0 = vld [vmem:[%s1970_s22 + $0x30] ss:$0 sps:$4 sm:$0x77]  }
  0x54   : > { %1764 = vmatprep.mubr.msk.bf16.mxu0 %vm1918_vm1, %v1917_v1  ;;  %1746 = vmatprep.mubr.msk.bf16.mxu1 %vm1918_vm1, %v1917_v1 }
  0x55   : > { %1828 = vmatprep.subr.bf16.mxu1 %v1917_v1  ;;  %v908_v21 = vsel %vm899_vm6, %v905_v14, %v907_v11  ;;  %v1173_v30 = vrot.slane %v1171_v39, 2  ;;  %v1339_v14 = vrot.slane %v1908_v0, 3 }
  0x57   : > { %v1177_v36 = vor.u32 %v1176_v31, %v1173_v30 }
  0x5a   : > { %1747 = vmatmul.mubr.msk.bf16.gmra.mrb[32].mxu1 %vm285_vm3, %v626_v29  ;;  %v910_v29 = vsel %vm899_vm6, %v907_v11, %v909_v23 }
  0x5b   : > { %1765 = vmatmul.mubr.msk.bf16.vlgmr.msra.gmra.mrb[32].mxu0 %vm285_vm3, %v756_v25  ;;  %1750 = vmatprep.mubr.msk.bf16.mxu1 %vm1918_vm1, %v1917_v1 }
  0x5c   : > { %1807 = vmatpush3.bf16.msra.mxu0 %v1079_v28  ;;  %1768 = vmatprep.mubr.msk.bf16.mxu0 %vm1918_vm1, %v1917_v1  ;;  %v1906_v28 = vld [vmem:[%s1970_s22 + $0x30] ss:$0 sps:$4 sm:$0x33]  }
  0x5d   : > { %1850 = vmatprep.subr.bf16.mxu0 %v1917_v1  ;;  %v1061_v34 = vrot.slane %v1906_v28, 2 }
  0x5f   : > { %v1062_v41 = vsel %vm899_vm6, %v1059_v22, %v1061_v34 }
  0x62   : > { %1751 = vmatmul.mubr.msk.bf16.gmra.mrb[36].mxu1 %vm285_vm3, %v628_v38  ;;  %v1188_v38 = vshrl.u32 %v2210_v9, 16  ;;  %v1337_v9 = vrot.slane %v2237_v20, 3 }
  0x63   : > { %1769 = vmatmul.mubr.msk.bf16.gmra.mrb[36].mxu0 %vm285_vm3, %v765_v35  ;;  %1754 = vmatprep.mubr.msk.bf16.mxu1 %vm1918_vm1, %v1917_v1  ;;  %v1324_v35 = vld [vmem:[%s1970_s22 + $0x8] sm:$0x8] }
  0x64   : > { %1772 = vmatprep.mubr.msk.bf16.mxu0 %vm1918_vm1, %v1917_v1  ;;  %v1610_v42 = vcombine.low %v1324_v35, %v2182_v59  ;;  %v1190_v45 = vrot.slane %v1188_v38, 2  ;;  %v1209_v59 = vshll.u32 %v2237_v20, 16 }
  0x66   : > { %v1330_v48 = vrot.slane %v1610_v42, 3  ;;  %v1194_v50 = vor.u32 %v1193_v47, %v1190_v45  ;;  %v1211_v63 = vrot.slane %v1209_v59, 3 }
  0x68   : > { %v1204_v61 = vsel %vm1169_vm7, %v1194_v50, %v1203_v57 }
  0x6a   : > { %1755 = vmatmul.mubr.msk.bf16.gmra.mrb[40].mxu1 %vm285_vm3, %v630_v49 }
  0x6b   : > { %1773 = vmatmul.mubr.msk.bf16.gmra.mrb[40].mxu0 %vm285_vm3, %v774_v43  ;;  %1758 = vmatprep.mubr.msk.bf16.mxu1 %vm1918_vm1, %v1917_v1 }
  0x6c   : > { %1776 = vmatprep.mubr.msk.bf16.mxu0 %vm1918_vm1, %v1917_v1 }
  0x72   : > { %1759 = vmatmul.mubr.msk.bf16.gmra.mrb[44].mxu1 %vm285_vm3, %v2040_v46  ;;  %v2193_v46 = vld [vmem:[%s1970_s22 + $0x10] sm:$0xff]  }
  0x73   : > { %1777 = vmatmul.mubr.msk.bf16.gmra.mrb[44].mxu0 %vm285_vm3, %v783_v44  ;;  %1786 = vmatprep.mubr.msk.bf16.mxu1 %vm1918_vm1, %v1917_v1  ;;  %v1053_v5 = vrot.slane %v2193_v46, 2  ;;  %v1179_v25 = vshrl.u32 %v2193_v46, 16  ;;  %v1182_v26 = vshll.u32 %v2193_v46, 16  ;;  %v1331_v49 = vrot.slane %v2193_v46, 3 }
  0x74   : > { %1780 = vmatprep.mubr.msk.bf16.mxu0 %vm1918_vm1, %v1917_v1  ;;  %v1335_v46 = vrot.slane %v2224_v16, 3 }
  0x75   : > { %v1054_v8 = vsel %vm899_vm6, %v1052_v2, %v1053_v5  ;;  %v1056_v15 = vsel %vm899_vm6, %v1053_v5, %v1055_v13  ;;  %v1181_v32 = vrot.slane %v1179_v25, 2  ;;  %v1184_v33 = vrot.slane %v1182_v26, 3 }
  0x76   : > { %v1332_v53 = vsel %vm1329_vm8, %v1330_v48, %v1331_v49  ;;  %v1334_v60 = vsel %vm1329_vm8, %v1331_v49, %v1333_v56  ;;  %v1218_v2 = vshll.u32 %v1908_v0, 16  ;;  %v1336_v5 = vsel %vm1329_vm8, %v1333_v56, %v1335_v46 }
  0x77   : > { %v1185_v37 = vor.u32 %v1184_v33, %v1181_v32 }
  0x79   : > { %v1186_v43 = vsel %vm1169_vm7, %v1177_v36, %v1185_v37  ;;  %v1195_v44 = vsel %vm1169_vm7, %v1185_v37, %v1194_v50 }
  0x7a   : > { %1787 = vmatmul.mubr.msk.bf16.vlgmr.msra.gmra.mrb[48].mxu1 %vm285_vm3, %v902_v3 }
  0x7b   : > { %1781 = vmatmul.mubr.msk.bf16.gmra.mrb[48].mxu0 %vm285_vm3, %v792_v62  ;;  %1829 = vmatpush3.bf16.msra.mxu1 %v1239_v4  ;;  %v1208_v62 = vrot.slane %v1206_v58, 2  ;;  %v1215_v4 = vshrl.u32 %v1908_v0, 16 }
  0x7c   : > { %1808 = vmatprep.mubr.msk.bf16.mxu0 %vm1918_vm1, %v1917_v1  ;;  %1790 = vmatprep.mubr.msk.bf16.mxu1 %vm1918_vm1, %v1917_v1 }
  0x7d   : > { %v1212_v3 = vor.u32 %v1211_v63, %v1208_v62  ;;  %v1217_v7 = vrot.slane %v1215_v4, 2 }
  0x7f   : > { %v1213_v6 = vsel %vm1169_vm7, %v1203_v57, %v1212_v3 }
  0x82   : > { %1791 = vmatmul.mubr.msk.bf16.gmra.mrb[52].mxu1 %vm285_vm3, %v904_v12  ;;  %v1338_v12 = vsel %vm1329_vm8, %v1335_v46, %v1337_v9 }
  0x83   : > { %1809 = vmatmul.mubr.msk.bf16.vlgmr.msra.gmra.mrb[52].mxu0 %vm285_vm3, %v1054_v8  ;;  %1794 = vmatprep.mubr.msk.bf16.mxu1 %vm1918_vm1, %v1917_v1  ;;  %v1220_v8 = vrot.slane %v1218_v2, 3 }
  0x84   : > { %1851 = vmatpush3.bf16.msra.mxu0 %v1357_v10  ;;  %1812 = vmatprep.mubr.msk.bf16.mxu0 %vm1918_vm1, %v1917_v1 }
  0x85   : > { %v1221_v10 = vor.u32 %v1220_v8, %v1217_v7 }
  0x87   : > { %v1222_v13 = vsel %vm1169_vm7, %v1212_v3, %v1221_v10 }
  0x8a   : > { %1795 = vmatmul.mubr.msk.bf16.gmra.mrb[56].mxu1 %vm285_vm3, %v906_v17 }
  0x8b   : > { %1813 = vmatmul.mubr.msk.bf16.gmra.mrb[56].mxu0 %vm285_vm3, %v1056_v15  ;;  %1798 = vmatprep.mubr.msk.bf16.mxu1 %vm1918_vm1, %v1917_v1  ;;  %v1340_v15 = vsel %vm1329_vm8, %v1337_v9, %v1339_v14 }
  0x8c   : > { %1816 = vmatprep.mubr.msk.bf16.mxu0 %vm1918_vm1, %v1917_v1 }
  0x92   : > { %1799 = vmatmul.mubr.msk.bf16.gmra.mrb[60].mxu1 %vm285_vm3, %v908_v21 }
  0x93   : > { %1817 = vmatmul.mubr.msk.bf16.gmra.mrb[60].mxu0 %vm285_vm3, %v1058_v19  ;;  %1802 = vmatprep.mubr.msk.bf16.mxu1 %vm1918_vm1, %v1917_v1 }
  0x94   : > { %1820 = vmatprep.mubr.msk.bf16.mxu0 %vm1918_vm1, %v1917_v1 }
  0x9a   : > { %1803 = vmatmul.mubr.msk.bf16.gmra.mrb[64].mxu1 %vm285_vm3, %v910_v29 }
  0x9b   : > { %1821 = vmatmul.mubr.msk.bf16.gmra.mrb[64].mxu0 %vm285_vm3, %v1060_v27  ;;  %1830 = vmatprep.mubr.msk.bf16.mxu1 %vm1918_vm1, %v1917_v1 }
  0x9c   : > { %1824 = vmatprep.mubr.msk.bf16.mxu0 %vm1918_vm1, %v1917_v1 }
  0xa2   : > { %1831 = vmatmul.mubr.msk.bf16.vlgmr.msra.gmra.mrb[68].mxu1 %vm285_vm3, %v1186_v43 }
  0xa3   : > { %1825 = vmatmul.mubr.msk.bf16.gmra.mrb[68].mxu0 %vm285_vm3, %v1062_v41  ;;  %1834 = vmatprep.mubr.msk.bf16.mxu1 %vm1918_vm1, %v1917_v1 }
  0xa4   : > { %1852 = vmatprep.mubr.msk.bf16.mxu0 %vm1918_vm1, %v1917_v1 }
  0xaa   : > { %1835 = vmatmul.mubr.msk.bf16.gmra.mrb[72].mxu1 %vm285_vm3, %v1195_v44 }
  0xab   : > { %1853 = vmatmul.mubr.msk.bf16.vlgmr.msra.gmra.mrb[72].mxu0 %vm285_vm3, %v1332_v53  ;;  %1838 = vmatprep.mubr.msk.bf16.mxu1 %vm1918_vm1, %v1917_v1 }
  0xac   : > { %1856 = vmatprep.mubr.msk.bf16.mxu0 %vm1918_vm1, %v1917_v1 }
  0xb2   : > { %1839 = vmatmul.mubr.msk.bf16.gmra.mrb[76].mxu1 %vm285_vm3, %v1204_v61 }
  0xb3   : > { %1857 = vmatmul.mubr.msk.bf16.gmra.mrb[76].mxu0 %vm285_vm3, %v1334_v60  ;;  %1842 = vmatprep.mubr.msk.bf16.mxu1 %vm1918_vm1, %v1917_v1 }
  0xb4   : > { %1860 = vmatprep.mubr.msk.bf16.mxu0 %vm1918_vm1, %v1917_v1 }
  0xba   : > { %1843 = vmatmul.mubr.msk.bf16.gmra.mrb[80].mxu1 %vm285_vm3, %v1213_v6 }
  0xbb   : > { %1861 = vmatmul.mubr.msk.bf16.gmra.mrb[80].mxu0 %vm285_vm3, %v1336_v5  ;;  %1846 = vmatprep.mubr.msk.bf16.mxu1 %vm1918_vm1, %v1917_v1 }
  0xbc   : > { %1864 = vmatprep.mubr.msk.bf16.mxu0 %vm1918_vm1, %v1917_v1 }
  0xc2   : > { %1847 = vmatmul.mubr.msk.bf16.gmra.mrb[84].mxu1 %vm285_vm3, %v1222_v13 }
  0xc3   : > { %1865 = vmatmul.mubr.msk.bf16.gmra.mrb[84].mxu0 %vm285_vm3, %v1338_v12 }
  0xc4   : > { %1868 = vmatprep.mubr.msk.bf16.mxu0 %vm1918_vm1, %v1917_v1 }
  0xcb   : > { %1869 = vmatmul.mubr.msk.bf16.gmra.mrb[88].mxu0 %vm285_vm3, %v1340_v15 }
  0xed   : > { %v363_v11 = vpop.f32.mrb[0].mxu1 }
  0xee   : > { %v339_v16 = vpop.f32.mrb[0].mxu0  ;;  %v1690_v20 = vpop.f32.mrb[1].mxu1 }
  0xef   : > { %v1678_v17 = vpop.f32.mrb[1].mxu0  ;;  %v366_v21 = vpop.f32.mrb[2].mxu1 }
  0xf0   : > { %v342_v18 = vpop.f32.mrb[2].mxu0  ;;  %v1691_v22 = vpop.f32.mrb[3].mxu1 }
  0xf1   : > { %v1679_v19 = vpop.f32.mrb[3].mxu0 }
  0xf5   : > { %v371_v25 = vpop.f32.mrb[4].mxu1 }
  0xf6   : > { %v347_v23 = vpop.f32.mrb[4].mxu0  ;;  %v1694_v26 = vpop.f32.mrb[5].mxu1 }
  0xf7   : > { %v1682_v39 = vpop.f32.mrb[5].mxu0  ;;  %v374_v27 = vpop.f32.mrb[6].mxu1 }
  0xf8   : > { %v350_v24 = vpop.f32.mrb[6].mxu0  ;;  %v1695_v28 = vpop.f32.mrb[7].mxu1 }
  0xf9   : > { %v1683_v1 = vpop.f32.mrb[7].mxu0 }
  0xfd   : > { %v425_v31 = vpop.f32.mrb[8].mxu1 }
  0xfe   : > { %v355_v29 = vpop.f32.mrb[8].mxu0  ;;  %v426_v33 = vadd.f32 %v425_v31, %v339_v16  ;;  %v1700_v34 = vpop.f32.mrb[9].mxu1 }
  0xff   : > { %v1686_v30 = vpop.f32.mrb[9].mxu0  ;;  %v428_v36 = vpop.f32.mrb[10].mxu1 }
 0x100   : > { %v358_v32 = vpop.f32.mrb[10].mxu0  ;;  %v429_v37 = vadd.f32 %v428_v36, %v342_v18  ;;  %v1701_v38 = vpop.f32.mrb[11].mxu1 }
 0x101   : > { %v1687_v35 = vpop.f32.mrb[11].mxu0 }
 0x105   : > { %v433_v43 = vpop.f32.mrb[12].mxu1 }
 0x106   : > { %v533_v40 = vpop.f32.mrb[12].mxu0  ;;  %v434_v47 = vadd.f32 %v433_v43, %v347_v23  ;;  %v1704_v48 = vpop.f32.mrb[13].mxu1 }
 0x107   : > { %v572_v41 = vadd.f32 %v533_v40, %v426_v33  ;;  %v1722_v42 = vpop.f32.mrb[13].mxu0  ;;  %v436_v51 = vpop.f32.mrb[14].mxu1 }
 0x108   : > { %v536_v45 = vpop.f32.mrb[14].mxu0  ;;  %v437_v52 = vadd.f32 %v436_v51, %v350_v24  ;;  %v1705_v53 = vpop.f32.mrb[15].mxu1 }
 0x109   : > { %v573_v49 = vadd.f32 %v536_v45, %v429_v37  ;;  %v1723_v50 = vpop.f32.mrb[15].mxu0 }
 0x10d   : > { %v441_v56 = vpop.f32.mrb[16].mxu1 }
 0x10e   : > { %v541_v44 = vpop.f32.mrb[16].mxu0  ;;  %v442_v58 = vadd.f32 %v441_v56, %v355_v29  ;;  %v1708_v59 = vpop.f32.mrb[17].mxu1 }
 0x10f   : > { %v574_v54 = vadd.f32 %v541_v44, %v434_v47  ;;  %v1726_v55 = vpop.f32.mrb[17].mxu0  ;;  %v444_v62 = vpop.f32.mrb[18].mxu1 }
 0x110   : > { %v544_v57 = vpop.f32.mrb[18].mxu0  ;;  %v445_v63 = vadd.f32 %v444_v62, %v358_v32  ;;  %v1709_v0 = vpop.f32.mrb[19].mxu1 }
 0x111   : > { %v575_v60 = vadd.f32 %v544_v57, %v437_v52  ;;  %v1727_v61 = vpop.f32.mrb[19].mxu0 }
 0x115   : > { %v449_v2 = vpop.f32.mrb[20].mxu1 }
 0x116   : > { %v549_v46 = vpop.f32.mrb[20].mxu0  ;;  %v450_v6 = vadd.f32 %v449_v2, %v363_v11  ;;  %v1712_v7 = vpop.f32.mrb[21].mxu1 }
 0x117   : > { %v576_v3 = vadd.f32 %v549_v46, %v442_v58  ;;  %v1730_v4 = vpop.f32.mrb[21].mxu0  ;;  %v452_v10 = vpop.f32.mrb[22].mxu1 }
 0x118   : > { %v552_v5 = vpop.f32.mrb[22].mxu0  ;;  %v453_v12 = vadd.f32 %v452_v10, %v366_v21  ;;  %v1713_v13 = vpop.f32.mrb[23].mxu1 }
 0x119   : > { %v577_v8 = vadd.f32 %v552_v5, %v445_v63  ;;  %v1731_v9 = vpop.f32.mrb[23].mxu0 }
 0x11d   : > { %v457_v17 = vpop.f32.mrb[24].mxu1 }
 0x11e   : > { %v557_v14 = vpop.f32.mrb[24].mxu0  ;;  %v458_v19 = vadd.f32 %v457_v17, %v371_v25  ;;  %v1716_v20 = vpop.f32.mrb[25].mxu1 }
 0x11f   : > { %v578_v15 = vadd.f32 %v557_v14, %v450_v6  ;;  %v1734_v16 = vpop.f32.mrb[25].mxu0  ;;  %v460_v39 = vpop.f32.mrb[26].mxu1 }
 0x120   : > { %v560_v18 = vpop.f32.mrb[26].mxu0  ;;  %v461_v24 = vadd.f32 %v460_v39, %v374_v27  ;;  %v1717_v1 = vpop.f32.mrb[27].mxu1 }
 0x121   : > { %v579_v22 = vadd.f32 %v560_v18, %v453_v12  ;;  %v1735_v23 = vpop.f32.mrb[27].mxu0 }
 0x125   : > { %v685_v29 = vpop.f32.mrb[28].mxu1 }
 0x126   : > { %v565_v26 = vpop.f32.mrb[28].mxu0  ;;  %v724_v31 = vadd.f32 %v685_v29, %v572_v41  ;;  %v1744_v21 = vpop.f32.mrb[29].mxu1 }
 0x127   : > { %v580_v11 = vadd.f32 %v565_v26, %v458_v19  ;;  %v1738_v28 = vpop.f32.mrb[29].mxu0  ;;  %v688_v34 = vpop.f32.mrb[30].mxu1 }
 0x128   : > { %v568_v30 = vpop.f32.mrb[30].mxu0  ;;  %v725_v35 = vadd.f32 %v688_v34, %v573_v49  ;;  %v1745_v36 = vpop.f32.mrb[31].mxu1 }
 0x129   : > { %v581_v32 = vadd.f32 %v568_v30, %v461_v24  ;;  %v1739_v33 = vpop.f32.mrb[31].mxu0 }
 0x12d   : > { %v693_v40 = vpop.f32.mrb[32].mxu1 }
 0x12e   : > { %v845_v37 = vpop.f32.mrb[32].mxu0  ;;  %v726_v43 = vadd.f32 %v693_v40, %v574_v54  ;;  %v1748_v27 = vpop.f32.mrb[33].mxu1 }
 0x12f   : > { %v884_v25 = vadd.f32 %v845_v37, %v724_v31  ;;  %v1766_v38 = vpop.f32.mrb[33].mxu0  ;;  %v696_v48 = vpop.f32.mrb[34].mxu1 }
 0x130   : > { %v848_v42 = vpop.f32.mrb[34].mxu0  ;;  %v727_v50 = vadd.f32 %v696_v48, %v575_v60  ;;  %v1749_v51 = vpop.f32.mrb[35].mxu1 }
 0x131   : > { %v885_v45 = vadd.f32 %v848_v42, %v725_v35  ;;  %v1767_v47 = vpop.f32.mrb[35].mxu0 }
 0x135   : > { %v701_v44 = vpop.f32.mrb[36].mxu1 }
 0x136   : > { %v853_v52 = vpop.f32.mrb[36].mxu0  ;;  %v728_v56 = vadd.f32 %v701_v44, %v576_v3  ;;  %v1752_v49 = vpop.f32.mrb[37].mxu1 }
 0x137   : > { %v886_v41 = vadd.f32 %v853_v52, %v726_v43  ;;  %v1770_v53 = vpop.f32.mrb[37].mxu0  ;;  %v704_v59 = vpop.f32.mrb[38].mxu1 }
 0x138   : > { %v856_v55 = vpop.f32.mrb[38].mxu0  ;;  %v729_v61 = vadd.f32 %v704_v59, %v577_v8  ;;  %v1753_v62 = vpop.f32.mrb[39].mxu1 }
 0x139   : > { %v887_v57 = vadd.f32 %v856_v55, %v727_v50  ;;  %v1771_v58 = vpop.f32.mrb[39].mxu0 }
 0x13d   : > { %v709_v46 = vpop.f32.mrb[40].mxu1 }
 0x13e   : > { %v861_v63 = vpop.f32.mrb[40].mxu0  ;;  %v730_v2 = vadd.f32 %v709_v46, %v578_v15  ;;  %v1756_v60 = vpop.f32.mrb[41].mxu1 }
 0x13f   : > { %v888_v54 = vadd.f32 %v861_v63, %v728_v56  ;;  %v1774_v0 = vpop.f32.mrb[41].mxu0  ;;  %v712_v7 = vpop.f32.mrb[42].mxu1 }
 0x140   : > { %v864_v4 = vpop.f32.mrb[42].mxu0  ;;  %v731_v9 = vadd.f32 %v712_v7, %v579_v22  ;;  %v1757_v10 = vpop.f32.mrb[43].mxu1 }
 0x141   : > { %v889_v5 = vadd.f32 %v864_v4, %v729_v61  ;;  %v1775_v6 = vpop.f32.mrb[43].mxu0 }
 0x145   : > { %v717_v14 = vpop.f32.mrb[44].mxu1 }
 0x146   : > { %v869_v12 = vpop.f32.mrb[44].mxu0  ;;  %v732_v17 = vadd.f32 %v717_v14, %v580_v11  ;;  %v1760_v8 = vpop.f32.mrb[45].mxu1 }
 0x147   : > { %v890_v3 = vadd.f32 %v869_v12, %v730_v2  ;;  %v1778_v13 = vpop.f32.mrb[45].mxu0  ;;  %v720_v20 = vpop.f32.mrb[46].mxu1 }
 0x148   : > { %v872_v16 = vpop.f32.mrb[46].mxu0  ;;  %v733_v23 = vadd.f32 %v720_v20, %v581_v32  ;;  %v1761_v39 = vpop.f32.mrb[47].mxu1 }
 0x149   : > { %v891_v18 = vadd.f32 %v872_v16, %v731_v9  ;;  %v1779_v19 = vpop.f32.mrb[47].mxu0 }
 0x14d   : > { %v963_v26 = vpop.f32.mrb[48].mxu1 }
 0x14e   : > { %v877_v24 = vpop.f32.mrb[48].mxu0  ;;  %v1002_v29 = vadd.f32 %v963_v26, %v884_v25  ;;  %v1788_v22 = vpop.f32.mrb[49].mxu1 }
 0x14f   : > { %v892_v15 = vadd.f32 %v877_v24, %v732_v17  ;;  %v1782_v1 = vpop.f32.mrb[49].mxu0  ;;  %v966_v21 = vpop.f32.mrb[50].mxu1 }
 0x150   : > { %v880_v28 = vpop.f32.mrb[50].mxu0  ;;  %v1003_v33 = vadd.f32 %v966_v21, %v885_v45  ;;  %v1789_v34 = vpop.f32.mrb[51].mxu1 }
 0x151   : > { %v893_v30 = vadd.f32 %v880_v28, %v733_v23  ;;  %v1783_v31 = vpop.f32.mrb[51].mxu0 }
 0x155   : > { %v971_v37 = vpop.f32.mrb[52].mxu1 }
 0x156   : > { %v1115_v35 = vpop.f32.mrb[52].mxu0  ;;  %v1004_v40 = vadd.f32 %v971_v37, %v886_v41  ;;  %v1792_v32 = vpop.f32.mrb[53].mxu1 }
 0x157   : > { %v1154_v11 = vadd.f32 %v1115_v35, %v1002_v29  ;;  %v1810_v36 = vpop.f32.mrb[53].mxu0  ;;  %v974_v27 = vpop.f32.mrb[54].mxu1 }
 0x158   : > { %v1118_v38 = vpop.f32.mrb[54].mxu0  ;;  %v1005_v47 = vadd.f32 %v974_v27, %v887_v57  ;;  %v1793_v48 = vpop.f32.mrb[55].mxu1 }
 0x159   : > { %v1155_v42 = vadd.f32 %v1118_v38, %v1003_v33  ;;  %v1811_v43 = vpop.f32.mrb[55].mxu0 }
 0x15d   : > { %v979_v52 = vpop.f32.mrb[56].mxu1 }
 0x15e   : > { %v1123_v50 = vpop.f32.mrb[56].mxu0  ;;  %v1006_v44 = vadd.f32 %v979_v52, %v888_v54  ;;  %v1796_v45 = vpop.f32.mrb[57].mxu1 }
 0x15f   : > { %v1156_v25 = vadd.f32 %v1123_v50, %v1004_v40  ;;  %v1814_v51 = vpop.f32.mrb[57].mxu0  ;;  %v982_v49 = vpop.f32.mrb[58].mxu1 }
 0x160   : > { %v1126_v53 = vpop.f32.mrb[58].mxu0  ;;  %v1007_v58 = vadd.f32 %v982_v49, %v889_v5  ;;  %v1797_v59 = vpop.f32.mrb[59].mxu1 }
 0x161   : > { %v1157_v55 = vadd.f32 %v1126_v53, %v1005_v47  ;;  %v1815_v56 = vpop.f32.mrb[59].mxu0 }
 0x165   : > { %v987_v63 = vpop.f32.mrb[60].mxu1 }
 0x166   : > { %v1131_v61 = vpop.f32.mrb[60].mxu0  ;;  %v1008_v46 = vadd.f32 %v987_v63, %v890_v3  ;;  %v1800_v57 = vpop.f32.mrb[61].mxu1 }
 0x167   : > { %v1158_v41 = vadd.f32 %v1131_v61, %v1006_v44  ;;  %v1818_v62 = vpop.f32.mrb[61].mxu0  ;;  %v990_v60 = vpop.f32.mrb[62].mxu1 }
 0x168   : > { %v1134_v0 = vpop.f32.mrb[62].mxu0  ;;  %v1009_v6 = vadd.f32 %v990_v60, %v891_v18  ;;  %v1801_v7 = vpop.f32.mrb[63].mxu1 }
 0x169   : > { %v2312_v4 = vadd.f32 %v1134_v0, %v1007_v58  ;;  %v1819_v2 = vpop.f32.mrb[63].mxu0 }
 0x16d   : > { %v995_v12 = vpop.f32.mrb[64].mxu1 }
 0x16e   : > { %v1139_v54 = vpop.f32.mrb[64].mxu0  ;;  %v1010_v13 = vadd.f32 %v995_v12, %v892_v15  ;;  %v1804_v14 = vpop.f32.mrb[65].mxu1 }
 0x16f   : > { %v2314_v9 = vadd.f32 %v1139_v54, %v1008_v46  ;;  %v1822_v10 = vpop.f32.mrb[65].mxu0  ;;  %v998_v3 = vpop.f32.mrb[66].mxu1 }
 0x170   : > { %v1142_v5 = vpop.f32.mrb[66].mxu0  ;;  %v1011_v8 = vadd.f32 %v998_v3, %v893_v30  ;;  %v1805_v19 = vpop.f32.mrb[67].mxu1  ;;  %v2326_v30 = vld [vmem:[%s2378_s2] ss:$0 sm:$0xff] }
 0x171   : > { %v2316_v16 = vadd.f32 %v1142_v5, %v1009_v6  ;;  %v1823_v17 = vpop.f32.mrb[67].mxu0 }
 0x175   : > { %v1275_v39 = vpop.f32.mrb[68].mxu1 }
 0x176   : > { %v1147_v20 = vpop.f32.mrb[68].mxu0  ;;  %v1314_v1 = vadd.f32 %v1275_v39, %v1154_v11  ;;  %v1832_v26 = vpop.f32.mrb[69].mxu1  ;;  %v2331_v11 = vld [vmem:[%s2379_s3] ss:$0 sm:$0xff] }
 0x177   : > { %v2318_v23 = vadd.f32 %v1147_v20, %v1010_v13  ;;  %v1826_v18 = vpop.f32.mrb[69].mxu0  ;;  %v1278_v15 = vpop.f32.mrb[70].mxu1 }
 0x178   : > { %v1150_v24 = vpop.f32.mrb[70].mxu0  ;;  %v1315_v22 = vadd.f32 %v1278_v15, %v1155_v42  ;;  %v1833_v31 = vpop.f32.mrb[71].mxu1 }
 0x179   : > { %v2320_v28 = vadd.f32 %v1150_v24, %v1011_v8  ;;  %v1827_v29 = vpop.f32.mrb[71].mxu0 }
 0x17d   : > { %v1283_v35 = vpop.f32.mrb[72].mxu1 }
 0x17e   : > { %v1393_v21 = vpop.f32.mrb[72].mxu0  ;;  %v1316_v37 = vadd.f32 %v1283_v35, %v1156_v25  ;;  %v1836_v40 = vpop.f32.mrb[73].mxu1 }
 0x17f   : > { %v1432_v33 = vadd.f32 %v1393_v21, %v1314_v1  ;;  %v1854_v34 = vpop.f32.mrb[73].mxu0  ;;  %v1286_v43 = vpop.f32.mrb[74].mxu1 }
 0x180   : > { %v1396_v36 = vpop.f32.mrb[74].mxu0  ;;  %v1317_v47 = vadd.f32 %v1286_v43, %v1157_v55  ;;  %v1837_v50 = vpop.f32.mrb[75].mxu1 }
 0x181   : > { %v1449_v38 = vadd.f32 %v2326_v30, %v1432_v33  ;;  %v1433_v32 = vadd.f32 %v1396_v36, %v1315_v22  ;;  %v1855_v42 = vpop.f32.mrb[75].mxu0 }
 0x183   : > { %v1466_v27 = vmul.f32 %v2331_v11, %v1449_v38  ;;  %v1450_v48 = vadd.f32 %v2326_v30, %v1433_v32 }
 0x185   : > { %1476 = vst [vmem:[%s2337_s21] sm:$0xff] %v1466_v27  ;;  %v1467_v25 = vmul.f32 %v2331_v11, %v1450_v48  ;;  %v1291_v44 = vpop.f32.mrb[76].mxu1 }
 0x186   : > { %v1401_v51 = vpop.f32.mrb[76].mxu0  ;;  %v1318_v56 = vadd.f32 %v1291_v44, %v1158_v41  ;;  %v1840_v58 = vpop.f32.mrb[77].mxu1 }
 0x187   : > { %1477 = vst [vmem:[%s2337_s21 + $0x8] sm:$0xff] %v1467_v25  ;;  %v1434_v52 = vadd.f32 %v1401_v51, %v1316_v37  ;;  %v1858_v53 = vpop.f32.mrb[77].mxu0  ;;  %v1294_v61 = vpop.f32.mrb[78].mxu1 }
 0x188   : > { %v1404_v45 = vpop.f32.mrb[78].mxu0  ;;  %v1319_v63 = vadd.f32 %v1294_v61, %v2312_v4  ;;  %v1841_v46 = vpop.f32.mrb[79].mxu1 }
 0x189   : > { %v1451_v49 = vadd.f32 %v2326_v30, %v1434_v52  ;;  %v1435_v59 = vadd.f32 %v1404_v45, %v1317_v47  ;;  %v1859_v55 = vpop.f32.mrb[79].mxu0 }
 0x18b   : > { %v1468_v62 = vmul.f32 %v2331_v11, %v1451_v49  ;;  %v1452_v0 = vadd.f32 %v2326_v30, %v1435_v59 }
 0x18d   : > { %1478 = vst [vmem:[%s2337_s21 + $0x10] sm:$0xff] %v1468_v62  ;;  %v1469_v57 = vmul.f32 %v2331_v11, %v1452_v0  ;;  %v1299_v6 = vpop.f32.mrb[80].mxu1 }
 0x18e   : > { %v1409_v2 = vpop.f32.mrb[80].mxu0  ;;  %v1320_v54 = vadd.f32 %v1299_v6, %v2314_v9  ;;  %v1844_v12 = vpop.f32.mrb[81].mxu1 }
 0x18f   : > { %1479 = vst [vmem:[%s2337_s21 + $0x18] sm:$0xff] %v1469_v57  ;;  %v1436_v41 = vadd.f32 %v1409_v2, %v1318_v56  ;;  %v1862_v60 = vpop.f32.mrb[81].mxu0  ;;  %v1302_v13 = vpop.f32.mrb[82].mxu1 }
 0x190   : > { %v1412_v7 = vpop.f32.mrb[82].mxu0  ;;  %v1321_v17 = vadd.f32 %v1302_v13, %v2316_v16  ;;  %v1845_v8 = vpop.f32.mrb[83].mxu1 }
 0x191   : > { %v1453_v10 = vadd.f32 %v2326_v30, %v1436_v41  ;;  %v1437_v4 = vadd.f32 %v1412_v7, %v1319_v63  ;;  %v1863_v5 = vpop.f32.mrb[83].mxu0 }
 0x193   : > { %v1470_v14 = vmul.f32 %v2331_v11, %v1453_v10  ;;  %v1454_v3 = vadd.f32 %v2326_v30, %v1437_v4 }
 0x195   : > { %1480 = vst [vmem:[%s2337_s21 + $0x20] sm:$0xff] %v1470_v14  ;;  %v1471_v19 = vmul.f32 %v2331_v11, %v1454_v3  ;;  %v1307_v39 = vpop.f32.mrb[84].mxu1 }
 0x196   : > { %v1417_v20 = vpop.f32.mrb[84].mxu0  ;;  %v1322_v1 = vadd.f32 %v1307_v39, %v2318_v23  ;;  %v1848_v29 = vpop.f32.mrb[85].mxu1 }
 0x197   : > { %1481 = vst [vmem:[%s2337_s21 + $0x28] sm:$0xff] %v1471_v19  ;;  %v1438_v9 = vadd.f32 %v1417_v20, %v1320_v54  ;;  %v1866_v18 = vpop.f32.mrb[85].mxu0  ;;  %v1310_v22 = vpop.f32.mrb[86].mxu1 }
 0x198   : > { %v1420_v24 = vpop.f32.mrb[86].mxu0  ;;  %v1323_v21 = vadd.f32 %v1310_v22, %v2320_v28  ;;  %v1849_v34 = vpop.f32.mrb[87].mxu1 }
 0x199   : > { %v1455_v26 = vadd.f32 %v2326_v30, %v1438_v9  ;;  %v1439_v16 = vadd.f32 %v1420_v24, %v1321_v17  ;;  %v1867_v15 = vpop.f32.mrb[87].mxu0 }
 0x19b   : > { %v1472_v31 = vmul.f32 %v2331_v11, %v1455_v26  ;;  %v1456_v33 = vadd.f32 %v2326_v30, %v1439_v16 }
 0x19d   : > { %1482 = vst [vmem:[%s2337_s21 + $0x30] sm:$0xff] %v1472_v31  ;;  %v1473_v35 = vmul.f32 %v2331_v11, %v1456_v33 }
 0x19e   : > { %v1425_v36 = vpop.f32.mrb[88].mxu0 }
 0x19f   : > { %1483 = vst [vmem:[%s2337_s21 + $0x38] sm:$0xff] %v1473_v35  ;;  %v1440_v23 = vadd.f32 %v1425_v36, %v1322_v1  ;;  %v1870_v37 = vpop.f32.mrb[89].mxu0 }
 0x1a0   : > { %v1428_v38 = vpop.f32.mrb[90].mxu0 }
 0x1a1   : > { %v1457_v40 = vadd.f32 %v2326_v30, %v1440_v23  ;;  %v1441_v32 = vadd.f32 %v1428_v38, %v1323_v21  ;;  %v1871_v42 = vpop.f32.mrb[91].mxu0 }
 0x1a3   : > { %v1474_v43 = vmul.f32 %v2331_v11, %v1457_v40  ;;  %v1458_v28 = vadd.f32 %v2326_v30, %v1441_v32 }
 0x1a5   : > { %1484 = vst [vmem:[%s2337_s21 + $0x40] sm:$0xff] %v1474_v43  ;;  %v1475_v27 = vmul.f32 %v2331_v11, %v1458_v28 }
 0x1a7   : > { %1485 = vst [vmem:[%s2337_s21 + $0x48] sm:$0xff] %v1475_v27 }
 0x1a8 PF: > { %s14_s15 = sadd.s32 1, %s1915_s15  }
 0x1a9   : > { %p11_p4 = scmp.ge.s32.totalorder %s14_s15, 4  }
 0x1ab   :  { %13 = sbr.rel (!%p11_p4) target bundleno = 1 (0x1), region = 66 }

// kernel: block_forward.15
= control target key start
LH: loop header
LB: loop body
LE: loop exit
PB: predicated region body
PF: predicated region fallthrough
CT: control target
= control target key end

     0   :  { %s7088_s15 = smov 0   ;;  %s9318_s0 = inlined_call_operand.vmem [shape: bf16[2,110,512], index: 0, kind: input, shape index: {}]   ;;  %s9319_s1 = inlined_call_operand.vmem [shape: bf16[4608,128], index: 1, kind: input, shape index: {}]   ;;  %s9320_s2 = inlined_call_operand.vmem [shape: f32[1,128], index: 2, kind: input, shape index: {}]   ;;  %s9321_s3 = inlined_call_operand.vmem [shape: f32[1,128], index: 3, kind: input, shape index: {}]   ;;  %s9322_s4 = inlined_call_operand.vmem [shape: f32[2,80,128], index: 4, kind: output, shape index: {}]  }
   0x1 LB: > { %s5388_s16 = sadd.s32 4294967295, %s7061_s15   ;;  %p5392_p0 = scmp.ge.s32.totalorder %s7061_s15, 1  ;;  %s7061_s15 = sphi %s7088_s15, %s14_s15  }
   0x2   : > { %p162_p1 = scmp.lt.s32.totalorder %s7061_s15, 3 }
   0x4   : > { %p163_p2 = pnand %p5392_p0, %p162_p1 }
   0x5   : > { %v6617_v0 = vld [vmem:[%s9319_s1 + $0x140] sm:$0xff] (!%p163_p2)   ;;  %v6621_v4 = vld [vmem:[%s9319_s1 + $0x148] sm:$0xff] (!%p163_p2)   ;;  %v6625_v8 = vld [vmem:[%s9319_s1 + $0x150] sm:$0xff] (!%p163_p2)   ;;  %p188_p3 = scmp.lt.s32.totalorder (!%p163_p2), %s5388_s16, 1  ;;  %vm439_vm0 = vsmask.f32 (!%p163_p2), 7424 }
   0x6   : > { %166 = sbr.rel (%p163_p2) target bundleno = 624 (0x270), region = 36  ;;  %v6618_v1 = vld [vmem:[%s9319_s1 + $0x1c0] sm:$0xff] (!%p163_p2)   ;;  %5779 = vmatprep.subr.bf16.mxu0 (!%p163_p2), %v6617_v0  ;;  %v6622_v5 = vld [vmem:[%s9319_s1 + $0x1c8] sm:$0xff] (!%p163_p2)   ;;  %v6626_v9 = vld [vmem:[%s9319_s1 + $0x1d0] sm:$0xff] (!%p163_p2)   ;;  %vm1408_vm1 = vcmask (!%p163_p2), 1046528   ;;  %vm3142_vm3 = vcmask (!%p163_p2), 1045504  }
   0x7   : > { %v6619_v2 = vld [vmem:[%s9319_s1 + $0x100] sm:$0xff] (!%p163_p2)   ;;  %5825 = vmatprep.subr.bf16.mxu1 (!%p163_p2), %v6618_v1  ;;  %v6623_v6 = vld [vmem:[%s9319_s1 + $0x108] sm:$0xff] (!%p163_p2)   ;;  %v6627_v10 = vld [vmem:[%s9319_s1 + $0x110] sm:$0xff] (!%p163_p2)   ;;  %vm2485_vm2 = vsmask.f32 (!%p163_p2), 6400  ;;  %vm4876_vm5 = vcmask (!%p163_p2), 1044480  }
   0x8   : > { %v6620_v3 = vld [vmem:[%s9319_s1 + $0x180] sm:$0xff] (!%p163_p2)   ;;  %5780 = vmatpush3.bf16.msra.mxu0 (!%p163_p2), %v6619_v2  ;;  %v6624_v7 = vld [vmem:[%s9319_s1 + $0x188] sm:$0xff] (!%p163_p2)   ;;  %v6628_v11 = vld [vmem:[%s9319_s1 + $0x190] sm:$0xff] (!%p163_p2)   ;;  %vm4219_vm4 = vsmask.f32 (!%p163_p2), 5376 }
   0x9   : > { %5826 = vmatpush3.bf16.msra.mxu1 (!%p163_p2), %v6620_v3  ;;  %5781 = vmatprep.subr.bf16.mxu0 (!%p163_p2), %v6621_v4  ;;  %v6629_v12 = vld [vmem:[%s9319_s1 + $0x158] sm:$0xff] (!%p163_p2)   ;;  %v6633_v16 = vld [vmem:[%s9319_s1 + $0x160] sm:$0xff] (!%p163_p2)   ;;  %v6637_v20 = vld [vmem:[%s9319_s1 + $0x168] sm:$0xff] (!%p163_p2)  }
   0xa   : > { %5827 = vmatprep.subr.bf16.mxu1 (!%p163_p2), %v6622_v5  ;;  %v6630_v13 = vld [vmem:[%s9319_s1 + $0x1d8] sm:$0xff] (!%p163_p2)   ;;  %v6634_v17 = vld [vmem:[%s9319_s1 + $0x1e0] sm:$0xff] (!%p163_p2)   ;;  %v6638_v21 = vld [vmem:[%s9319_s1 + $0x1e8] sm:$0xff] (!%p163_p2)  }
   0xb   : > { %v6631_v14 = vld [vmem:[%s9319_s1 + $0x118] sm:$0xff] (!%p163_p2)   ;;  %v6635_v18 = vld [vmem:[%s9319_s1 + $0x120] sm:$0xff] (!%p163_p2)   ;;  %v6639_v22 = vld [vmem:[%s9319_s1 + $0x128] sm:$0xff] (!%p163_p2)  }
   0xc   : > { %5782 = vmatpush3.bf16.msra.mxu0 (!%p163_p2), %v6623_v6  ;;  %v6632_v15 = vld [vmem:[%s9319_s1 + $0x198] sm:$0xff] (!%p163_p2)   ;;  %v6636_v19 = vld [vmem:[%s9319_s1 + $0x1a0] sm:$0xff] (!%p163_p2)   ;;  %v6640_v23 = vld [vmem:[%s9319_s1 + $0x1a8] sm:$0xff] (!%p163_p2)  }
   0xd   : > { %5828 = vmatpush3.bf16.msra.mxu1 %v6624_v7  ;;  %5783 = vmatprep.subr.bf16.mxu0 %v6625_v8  ;;  %s9324_s16 = smov (!%p188_p3, %s5388_s16), 1  ;;  %v6641_v24 = vld [vmem:[%s9319_s1 + $0x170] sm:$0xff]   ;;  %v6645_v28 = vld [vmem:[%s9319_s1 + $0x178] sm:$0xff]   ;;  %v6659_v44 = vld [vmem:[%s9319_s1 + $0x40] sm:$0xff]  }
   0xe   : > { %5829 = vmatprep.subr.bf16.mxu1 %v6626_v9  ;;  %v6642_v25 = vld [vmem:[%s9319_s1 + $0x1f0] sm:$0xff]   ;;  %s6607_s21 = smul.u32 224, %s9324_s16  ;;  %v6646_v29 = vld [vmem:[%s9319_s1 + $0x1f8] sm:$0xff]   ;;  %v6660_v62 = vld [vmem:[%s9319_s1 + $0xc0] sm:$0xff]  }
   0xf   : > { %v6643_v26 = vld [vmem:[%s9319_s1 + $0x130] sm:$0xff]   ;;  %v6647_v30 = vld [vmem:[%s9319_s1 + $0x138] sm:$0xff]   ;;  %v6661_v6 = vld [vmem:[%s9319_s1] sm:$0xff]  }
  0x10   : > { %5784 = vmatpush3.bf16.msra.mxu0 %v6627_v10  ;;  %v6644_v27 = vld [vmem:[%s9319_s1 + $0x1b0] sm:$0xff]   ;;  %s7196_s6 = scalar_lea.vmem %s9318_s0, %s6607_s21  ;;  %v6648_v31 = vld [vmem:[%s9319_s1 + $0x1b8] sm:$0xff]   ;;  %v6662_v7 = vld [vmem:[%s9319_s1 + $0x80] sm:$0xff]  }
  0x11   : > { %5830 = vmatpush3.bf16.msra.mxu1 %v6628_v11  ;;  %5785 = vmatprep.subr.bf16.mxu0 %v6629_v12  ;;  %v199_v32 = vld [vmem:[%s7196_s6] sm:$0xff]  ;;  %v7206_v33 = vld [vmem:[%s7196_s6 + $0x10] sm:$0xff]  ;;  %v200_v36 = vld [vmem:[%s7196_s6 + $0x8] sm:$0xff] }
  0x12   : > { %5831 = vmatprep.subr.bf16.mxu1 %v6630_v13  ;;  %v7209_v34 = vcombine.high %v199_v32, %v7206_v33  ;;  %v7212_v35 = vld [vmem:[%s7196_s6 + $0x24] ss:$16 sps:$4 sm:$0xff]   ;;  %v7216_v37 = vcombine.low %v199_v32, %v7206_v33  ;;  %v7219_v38 = vld [vmem:[%s7196_s6 + $0x18] sm:$0xff]  ;;  %v7234_v45 = vld [vmem:[%s7196_s6 + $0x20] ss:$16 sps:$4 sm:$0xff]  }
  0x13   : > { %v460_v41 = vshll.u32 %v7212_v35, 16  ;;  %v7225_v42 = vcombine.high %v200_v36, %v7219_v38  ;;  %v7228_v43 = vld [vmem:[%s7196_s6 + $0x2c] ss:$16 sps:$4 sm:$0xff]   ;;  %v7239_v48 = vcombine.low %v200_v36, %v7219_v38  ;;  %v7242_v49 = vld [vmem:[%s7196_s6 + $0x28] ss:$16 sps:$4 sm:$0xff]   ;;  %v448_v56 = vshll.u32 %v7234_v45, 16 }
  0x14   : > { %5786 = vmatpush3.bf16.msra.mxu0 %v6631_v14  ;;  %v453_v39 = vshrl.u32 %v7209_v34, 16  ;;  %v455_v40 = vshll.u32 %v7209_v34, 16  ;;  %v441_v46 = vshrl.u32 %v7216_v37, 16  ;;  %v443_v47 = vshll.u32 %v7216_v37, 16  ;;  %v6663_v11 = vld [vmem:[%s9319_s1 + $0x48] sm:$0xff]  }
  0x15   : > { %5832 = vmatpush3.bf16.msra.mxu1 %v6632_v15  ;;  %5787 = vmatprep.subr.bf16.mxu0 %v6633_v16  ;;  %v462_v51 = vrot.slane %v460_v41, 1  ;;  %v477_v52 = vshrl.u32 %v7225_v42, 16  ;;  %v479_v53 = vshll.u32 %v7225_v42, 16  ;;  %v484_v54 = vshll.u32 %v7228_v43, 16  ;;  %v6664_v13 = vld [vmem:[%s9319_s1 + $0xc8] sm:$0xff]  }
  0x16   : > { %5833 = vmatprep.subr.bf16.mxu1 %v6634_v17  ;;  %v457_v50 = vrot.slane %v455_v40, 1  ;;  %v445_v55 = vrot.slane %v443_v47, 1  ;;  %v465_v57 = vshrl.u32 %v7239_v48, 16  ;;  %v467_v60 = vshll.u32 %v7239_v48, 16  ;;  %v6665_v16 = vld [vmem:[%s9319_s1 + $0x8] sm:$0xff]   ;;  %v6675_v47 = vld [vmem:[%s9319_s1 + $0x10] sm:$0xff]  }
  0x17   : > { %v481_v59 = vrot.slane %v479_v53, 1  ;;  %v472_v61 = vshll.u32 %v7242_v49, 16  ;;  %v486_v63 = vrot.slane %v484_v54, 1  ;;  %v450_v1 = vrot.slane %v448_v56, 1  ;;  %v6676_v54 = vld [vmem:[%s9319_s1 + $0x90] sm:$0xff]  }
  0x18   : > { %5788 = vmatpush3.bf16.msra.mxu0 %v6635_v18  ;;  %v458_v58 = vor.u32 %v457_v50, %v453_v39  ;;  %v446_v0 = vor.u32 %v445_v55, %v441_v46  ;;  %v469_v4 = vrot.slane %v467_v60, 1  ;;  %v496_v12 = vshrl.u32 %v7212_v35, 16  ;;  %v6666_v18 = vld [vmem:[%s9319_s1 + $0x88] sm:$0xff]   ;;  %v6674_v46 = vld [vmem:[%s9319_s1 + $0xd0] sm:$0xff]  }
  0x19   : > { %5834 = vmatpush3.bf16.msra.mxu1 %v6636_v19  ;;  %5789 = vmatprep.subr.bf16.mxu0 %v6637_v20  ;;  %v482_v3 = vor.u32 %v481_v59, %v477_v52  ;;  %v474_v5 = vrot.slane %v472_v61, 1  ;;  %v512_v14 = vshrl.u32 %v7228_v43, 16  ;;  %v488_v17 = vshrl.u32 %v7234_v45, 16  ;;  %v7322_v61 = vld [vmem:[%s7196_s6 + $0x6c] ss:$16 sps:$4 sm:$0xff]  }
  0x1a   : > { %5835 = vmatprep.subr.bf16.mxu1 %v6638_v21  ;;  %v463_v2 = vsel %vm439_vm0, %v458_v58, %v462_v51  ;;  %v451_v8 = vsel %vm439_vm0, %v446_v0, %v450_v1  ;;  %v470_v10 = vor.u32 %v469_v4, %v465_v57  ;;  %v504_v19 = vshrl.u32 %v7242_v49, 16  ;;  %v7282_v21 = vld [vmem:[%s7196_s6 + $0x44] ss:$16 sps:$4 sm:$0xff]  }
  0x1b   : > { %860 = vmatprep.mubr.bf16.mxu0 %v463_v2  ;;  %v487_v9 = vsel %vm439_vm0, %v482_v3, %v486_v63  ;;  %v1413_v20 = vrot.slane %v7212_v35, 1  ;;  %v490_v36 = vor.u32 %v488_v17, %v450_v1  ;;  %v7316_v57 = vld [vmem:[%s7196_s6 + $0x64] ss:$16 sps:$4 sm:$0xff]   ;;  %v528_v58 = vshrl.u32 %v7282_v21, 16  ;;  %v6681_v2 = vld [vmem:[%s9319_s1 + $0x58] sm:$0xff]  }
  0x1c   : > { %5790 = vmatpush3.bf16.msra.mxu0 %v6639_v22  ;;  %933 = vmatprep.mubr.bf16.mxu1 %v487_v9  ;;  %v475_v15 = vsel %vm439_vm0, %v470_v10, %v474_v5  ;;  %v1419_v22 = vrot.slane %v7228_v43, 1  ;;  %v506_v41 = vor.u32 %v504_v19, %v474_v5  ;;  %v532_v1 = vshll.u32 %v7316_v57, 16  ;;  %v6682_v5 = vld [vmem:[%s9319_s1 + $0xd8] sm:$0xff]  }
  0x1d   : > { %5836 = vmatpush3.bf16.msra.mxu1 %v6640_v23  ;;  %5791 = vmatprep.subr.bf16.mxu0 %v6641_v24  ;;  %v1410_v23 = vrot.slane %v7234_v45, 1  ;;  %v7287_v24 = vld [vmem:[%s7196_s6 + $0x4c] ss:$16 sps:$4 sm:$0xff]   ;;  %v548_v4 = vshll.u32 %v7322_v61, 16  ;;  %v560_v19 = vshrl.u32 %v7316_v57, 16 }
  0x1e   : > { %5837 = vmatprep.subr.bf16.mxu1 %v6642_v25  ;;  %v7290_v25 = vld [vmem:[%s7196_s6 + $0x40] ss:$16 sps:$4 sm:$0xff]   ;;  %v516_v32 = vshll.u32 %v7287_v24, 16  ;;  %v544_v59 = vshrl.u32 %v7287_v24, 16  ;;  %v6685_v9 = vld [vmem:[%s9319_s1 + $0x18] sm:$0xff]  }
  0x1f   : > { %v492_v39 = vshll.u32 %v7290_v25, 16  ;;  %v550_v10 = vrot.slane %v548_v4, 1 }
  0x20   : > { %5792 = vmatpush3.bf16.msra.mxu0 %v6643_v26  ;;  %v1416_v26 = vrot.slane %v7242_v49, 1  ;;  %v518_v50 = vrot.slane %v516_v32, 1 }
  0x21   : > { %5838 = vmatpush3.bf16.msra.mxu1 %v6644_v27  ;;  %5793 = vmatprep.subr.bf16.mxu0 %v6645_v28  ;;  %v498_v27 = vor.u32 %v496_v12, %v462_v51  ;;  %v500_v28 = vshll.u32 %v7282_v21, 16  ;;  %v494_v51 = vrot.slane %v492_v39, 1  ;;  %v6686_v12 = vld [vmem:[%s9319_s1 + $0x98] sm:$0xff]   ;;  %v6689_v39 = vld [vmem:[%s9319_s1 + $0x20] sm:$0xff]  }
  0x22   : > { %5839 = vmatprep.subr.bf16.mxu1 %v6646_v29  ;;  %v7295_v29 = vld [vmem:[%s7196_s6 + $0x48] ss:$16 sps:$4 sm:$0xff]   ;;  %v546_v3 = vor.u32 %v544_v59, %v518_v50 }
  0x23   : > { %v502_v40 = vrot.slane %v500_v28, 1  ;;  %v495_v56 = vsel %vm439_vm0, %v490_v36, %v494_v51 }
  0x24   : > { %5794 = vmatpush3.bf16.msra.mxu0 %v6647_v30  ;;  %v6673_v30 = vld [vmem:[%s9319_s1 + $0x50] sm:$0xff]   ;;  %v551_v17 = vsel %vm439_vm0, %v546_v3, %v550_v10 }
  0x25   : > { %5840 = vmatpush3.bf16.msra.mxu1 %v6648_v31  ;;  %5871 = vmatprep.subr.bf16.mxu0 %v6659_v44  ;;  %v514_v31 = vor.u32 %v512_v14, %v486_v63  ;;  %v508_v44 = vshll.u32 %v7295_v29, 16  ;;  %v503_v52 = vsel %vm439_vm0, %v498_v27, %v502_v40  ;;  %v536_v63 = vshrl.u32 %v7295_v29, 16 }
  0x26   : > { %5917 = vmatprep.subr.bf16.mxu1 %v6660_v62  ;;  %v520_v62 = vshrl.u32 %v7290_v25, 16  ;;  %v530_v0 = vor.u32 %v528_v58, %v502_v40  ;;  %v7382_v58 = vld [vmem:[%s7196_s6 + $0x88] ss:$16 sps:$4 sm:$0xff]  }
  0x27   : > { %861 = vmatmul.mubr.bf16.vlgmr.msra.gmra.mrb[0].mxu0 %v451_v8  ;;  %v510_v53 = vrot.slane %v508_v44, 1  ;;  %v519_v55 = vsel %vm439_vm0, %v514_v31, %v518_v50  ;;  %v7338_v8 = vld [vmem:[%s7196_s6 + $0x68] ss:$16 sps:$4 sm:$0xff]   ;;  %v576_v31 = vshrl.u32 %v7322_v61, 16  ;;  %v7371_v50 = vld [vmem:[%s7196_s6 + $0x84] ss:$16 sps:$4 sm:$0xff]  }
  0x28   : > { %5872 = vmatpush3.bf16.msra.mxu0 %v6661_v6  ;;  %934 = vmatmul.mubr.bf16.vlgmr.msra.gmra.mrb[0].mxu1 %v475_v15  ;;  %v534_v6 = vrot.slane %v532_v1, 1  ;;  %v568_v44 = vshrl.u32 %v7338_v8, 16 }
  0x29   : > { %5873 = vmatprep.subr.bf16.mxu0 %v6663_v11  ;;  %5918 = vmatpush3.bf16.msra.mxu1 %v6662_v7  ;;  %v511_v60 = vsel %vm439_vm0, %v506_v41, %v510_v53  ;;  %v7335_v7 = vld [vmem:[%s7196_s6 + $0x60] ss:$16 sps:$4 sm:$0xff]   ;;  %v522_v11 = vor.u32 %v520_v62, %v494_v51  ;;  %v538_v15 = vor.u32 %v536_v63, %v510_v53  ;;  %v1421_v51 = vrot.slane %v7290_v25, 1 }
  0x2a   : > { %5919 = vmatprep.subr.bf16.mxu1 %v6664_v13  ;;  %868 = vmatprep.mubr.bf16.mxu0 %v503_v52  ;;  %v535_v13 = vsel %vm439_vm0, %v530_v0, %v534_v6  ;;  %v524_v14 = vshll.u32 %v7335_v7, 16  ;;  %v552_v40 = vshrl.u32 %v7335_v7, 16  ;;  %v6690_v41 = vld [vmem:[%s9319_s1 + $0xa0] sm:$0xff]   ;;  %v1425_v52 = vrot.slane %v7295_v29, 1  ;;  %v6697_v0 = vld [vmem:[%s9319_s1 + $0x68] sm:$0xff]  }
  0x2b   : > { %941 = vmatprep.mubr.bf16.mxu1 %v519_v55  ;;  %v562_v53 = vor.u32 %v560_v19, %v534_v6  ;;  %v578_v55 = vor.u32 %v576_v31, %v550_v10  ;;  %v564_v62 = vshll.u32 %v7371_v50, 16  ;;  %v7407_v1 = vsel %vm1408_vm1, %v1410_v23, %v1421_v51  ;;  %v283_v31 = vld [vmem:[%s7196_s6 + $0xa0] sm:$0x11] }
  0x2c   : > { %5874 = vmatpush3.bf16.msra.mxu0 %v6665_v16  ;;  %v540_v16 = vshll.u32 %v7338_v8, 16  ;;  %v526_v27 = vrot.slane %v524_v14, 1  ;;  %v572_v6 = vshll.u32 %v7382_v58, 16 }
  0x2d   : > { %5920 = vmatpush3.bf16.msra.mxu1 %v6666_v18  ;;  %5875 = vmatprep.subr.bf16.mxu0 %v6673_v30  ;;  %v6687_v18 = vld [vmem:[%s9319_s1 + $0x60] sm:$0xff]   ;;  %v566_v10 = vrot.slane %v564_v62, 1 }
  0x2e   : > { %5921 = vmatprep.subr.bf16.mxu1 %v6674_v46  ;;  %v542_v28 = vrot.slane %v540_v16, 1  ;;  %v6688_v30 = vld [vmem:[%s9319_s1 + $0xe0] sm:$0xff]   ;;  %v527_v32 = vsel %vm439_vm0, %v522_v11, %v526_v27  ;;  %v1423_v46 = vrot.slane %v7282_v21, 1  ;;  %v554_v63 = vor.u32 %v552_v40, %v526_v27  ;;  %v6699_v11 = vld [vmem:[%s9319_s1 + $0x28] sm:$0xff]   ;;  %v6701_v27 = vld [vmem:[%s9319_s1 + $0x70] sm:$0xff]  }
  0x2f   : > { %869 = vmatmul.mubr.bf16.gmra.mrb[4].mxu0 %v495_v56  ;;  %v7379_v56 = vld [vmem:[%s7196_s6 + $0x80] ss:$16 sps:$4 sm:$0xff]   ;;  %v574_v14 = vrot.slane %v572_v6, 1  ;;  %v567_v16 = vsel %vm439_vm0, %v562_v53, %v566_v10  ;;  %v7444_v40 = vcombine.low %v283_v31, %v283_v31 }
  0x30   : > { %5876 = vmatpush3.bf16.msra.mxu0 %v6675_v47  ;;  %942 = vmatmul.mubr.bf16.gmra.mrb[4].mxu1 %v511_v60  ;;  %v543_v36 = vsel %vm439_vm0, %v538_v15, %v542_v28  ;;  %v1427_v47 = vrot.slane %v7287_v24, 1  ;;  %v7389_v59 = vsel %vm1408_vm1, %v1413_v20, %v1423_v46  ;;  %v556_v4 = vshll.u32 %v7379_v56, 16  ;;  %v6700_v15 = vld [vmem:[%s9319_s1 + $0xa8] sm:$0xff]  }
  0x31   : > { %5922 = vmatpush3.bf16.msra.mxu1 %v6676_v54  ;;  %5877 = vmatprep.subr.bf16.mxu0 %v6681_v2  ;;  %v7376_v54 = vld [vmem:[%s7196_s6 + $0x8c] ss:$16 sps:$4 sm:$0xff]   ;;  %v7414_v2 = vsel %vm1408_vm1, %v1416_v26, %v1425_v52  ;;  %v584_v53 = vshrl.u32 %v7379_v56, 16 }
  0x32   : > { %5923 = vmatprep.subr.bf16.mxu1 %v6682_v5  ;;  %876 = vmatprep.mubr.bf16.mxu0 %v535_v13  ;;  %v7396_v60 = vsel %vm1408_vm1, %v1419_v22, %v1427_v47  ;;  %v580_v3 = vshll.u32 %v7376_v54, 16  ;;  %v570_v5 = vor.u32 %v568_v44, %v542_v28  ;;  %v558_v13 = vrot.slane %v556_v4, 1  ;;  %v6705_v44 = vld [vmem:[%s9319_s1 + $0x30] sm:$0xff]  }
  0x33   : > { %949 = vmatprep.mubr.bf16.mxu1 %v551_v17  ;;  %v592_v28 = vshrl.u32 %v7371_v50, 16  ;;  %v600_v4 = vshrl.u32 %v7382_v58, 16 }
  0x34   : > { %5878 = vmatpush3.bf16.msra.mxu0 %v6685_v9  ;;  %v6698_v9 = vld [vmem:[%s9319_s1 + $0xe8] sm:$0xff]   ;;  %v575_v19 = vsel %vm439_vm0, %v570_v5, %v574_v14 }
  0x35   : > { %5924 = vmatpush3.bf16.msra.mxu1 %v6686_v12  ;;  %5879 = vmatprep.subr.bf16.mxu0 %v6687_v18  ;;  %v582_v12 = vrot.slane %v580_v3, 1  ;;  %v559_v18 = vsel %vm439_vm0, %v554_v63, %v558_v13  ;;  %v594_v62 = vor.u32 %v592_v28, %v566_v10  ;;  %v588_v3 = vshll.u32 %v7444_v40, 16  ;;  %v6709_v10 = vld [vmem:[%s9319_s1 + $0x78] sm:$0xff]  }
  0x36   : > { %5925 = vmatprep.subr.bf16.mxu1 %v6688_v30  ;;  %v6702_v30 = vld [vmem:[%s9319_s1 + $0xf0] sm:$0xff]   ;;  %v6711_v28 = vld [vmem:[%s9319_s1 + $0x38] sm:$0xff]  }
  0x37   : > { %877 = vmatmul.mubr.bf16.gmra.mrb[8].mxu0 %v527_v32  ;;  %v583_v17 = vsel %vm439_vm0, %v578_v55, %v582_v12  ;;  %v608_v32 = vshrl.u32 %v7376_v54, 16 }
  0x38   : > { %950 = vmatmul.mubr.bf16.gmra.mrb[8].mxu1 %v543_v36  ;;  %5880 = vmatpush3.bf16.msra.mxu0 %v6689_v39  ;;  %v7441_v36 = vcombine.high %v283_v31, %v283_v31  ;;  %v284_v39 = vld [vmem:[%s7196_s6 + $0xa8] sm:$0x11] }
  0x39   : > { %5926 = vmatpush3.bf16.msra.mxu1 %v6690_v41  ;;  %5881 = vmatprep.subr.bf16.mxu0 %v6697_v0  ;;  %v7446_v41 = vcombine.high %v284_v39, %v284_v39  ;;  %v7452_v55 = vcombine.low %v284_v39, %v284_v39  ;;  %v6706_v0 = vld [vmem:[%s9319_s1 + $0xb0] sm:$0xff]   ;;  %v610_v5 = vor.u32 %v608_v32, %v582_v12  ;;  %v1435_v39 = vrot.slane %v7322_v61, 1 }
  0x3a   : > { %5927 = vmatprep.subr.bf16.mxu1 %v6698_v9  ;;  %884 = vmatprep.mubr.bf16.mxu0 %v567_v16  ;;  %v596_v63 = vshll.u32 %v7441_v36, 16  ;;  %v586_v9 = vor.u32 %v584_v53, %v558_v13 }
  0x3b   : > { %957 = vmatprep.mubr.bf16.mxu1 %v583_v17  ;;  %v612_v6 = vshll.u32 %v7446_v41, 16  ;;  %v590_v17 = vrot.slane %v588_v3, 1  ;;  %v1433_v3 = vrot.slane %v7338_v8, 1 }
  0x3c   : > { %5882 = vmatpush3.bf16.msra.mxu0 %v6699_v11  ;;  %v604_v11 = vshll.u32 %v7452_v55, 16  ;;  %v598_v16 = vrot.slane %v596_v63, 1  ;;  %v6714_v63 = vld [vmem:[%s9319_s1 + $0x2c0] sm:$0xff]  }
  0x3d   : > { %5928 = vmatpush3.bf16.msra.mxu1 %v6700_v15  ;;  %5883 = vmatprep.subr.bf16.mxu0 %v6701_v27  ;;  %v6710_v15 = vld [vmem:[%s9319_s1 + $0xf8] sm:$0xff]   ;;  %v591_v27 = vsel %vm439_vm0, %v586_v9, %v590_v17 }
  0x3e   : > { %5929 = vmatprep.subr.bf16.mxu1 %v6702_v30  ;;  %v606_v12 = vrot.slane %v604_v11, 1  ;;  %v599_v13 = vsel %vm439_vm0, %v594_v62, %v598_v16  ;;  %v1431_v30 = vrot.slane %v7316_v57, 1  ;;  %v1429_v62 = vrot.slane %v7335_v7, 1  ;;  %v6717_v11 = vld [vmem:[%s9319_s1 + $0x248] sm:$0xff]  }
  0x3f   : > { %885 = vmatmul.mubr.bf16.gmra.mrb[12].mxu0 %v559_v18  ;;  %v602_v18 = vor.u32 %v600_v4, %v574_v14  ;;  %v6712_v14 = vld [vmem:[%s9319_s1 + $0xb8] sm:$0xff]   ;;  %v1439_v4 = vrot.slane %v7371_v50, 1  ;;  %v6718_v16 = vld [vmem:[%s9319_s1 + $0x2c8] sm:$0xff]  }
  0x40   : > { %958 = vmatmul.mubr.bf16.gmra.mrb[12].mxu1 %v575_v19  ;;  %5884 = vmatpush3.bf16.msra.mxu0 %v6705_v44  ;;  %v614_v19 = vrot.slane %v612_v6, 1  ;;  %v6713_v44 = vld [vmem:[%s9319_s1 + $0x240] sm:$0xff]   ;;  %v7486_v53 = vsel %vm1408_vm1, %v1423_v46, %v1431_v30  ;;  %v7502_v46 = vsel %vm1408_vm1, %v1421_v51, %v1429_v62  ;;  %v1437_v6 = vrot.slane %v7379_v56, 1 }
  0x41   : > { %5930 = vmatpush3.bf16.msra.mxu1 %v6706_v0  ;;  %5885 = vmatprep.subr.bf16.mxu0 %v6709_v10  ;;  %v607_v32 = vsel %vm439_vm0, %v602_v18, %v606_v12  ;;  %v7495_v0 = vsel %vm1408_vm1, %v1427_v47, %v1435_v39  ;;  %v7509_v47 = vsel %vm1408_vm1, %v1425_v52, %v1433_v3  ;;  %v1441_v52 = vrot.slane %v7382_v58, 1 }
  0x42   : > { %5931 = vmatprep.subr.bf16.mxu1 %v6710_v15  ;;  %892 = vmatprep.mubr.bf16.mxu0 %v599_v13  ;;  %v615_v31 = vsel %vm439_vm0, %v610_v5, %v614_v19  ;;  %v1443_v5 = vrot.slane %v7376_v54, 1  ;;  %v7516_v51 = vsel %vm1408_vm1, %v1431_v30, %v1439_v4  ;;  %v7530_v10 = vsel %vm1408_vm1, %v1429_v62, %v1437_v6  ;;  %v6719_v19 = vld [vmem:[%s9319_s1 + $0x208] sm:$0xff]   ;;  %v6724_v30 = vld [vmem:[%s9319_s1 + $0x290] sm:$0xff]   ;;  %v6730_v62 = vld [vmem:[%s9319_s1 + $0x2e0] sm:$0xff]  }
  0x43   : > { %965 = vmatprep.mubr.bf16.mxu1 %v615_v31  ;;  %v1447_v15 = vrot.slane %v7441_v36, 1  ;;  %v7537_v17 = vsel %vm1408_vm1, %v1433_v3, %v1441_v52  ;;  %v1451_v18 = vrot.slane %v7446_v41, 1  ;;  %v1445_v36 = vrot.slane %v7444_v40, 1  ;;  %v6720_v13 = vld [vmem:[%s9319_s1 + $0x288] sm:$0xff]   ;;  %v6725_v31 = vld [vmem:[%s9319_s1 + $0x258] sm:$0xff]  }
  0x44   : > { %5886 = vmatpush3.bf16.msra.mxu0 %v6711_v28  ;;  %v7523_v9 = vsel %vm1408_vm1, %v1435_v39, %v1443_v5  ;;  %v6728_v39 = vld [vmem:[%s9319_s1 + $0x298] sm:$0xff]   ;;  %v6734_v3 = vld [vmem:[%s9319_s1 + $0x2e8] sm:$0xff]  }
  0x45   : > { %5932 = vmatpush3.bf16.msra.mxu1 %v6712_v14  ;;  %5963 = vmatprep.subr.bf16.mxu0 %v6713_v44  ;;  %v7545_v12 = vsel %vm1408_vm1, %v1439_v4, %v1447_v15  ;;  %v7553_v41 = vsel %vm1408_vm1, %v1443_v5, %v1451_v18  ;;  %v7560_v40 = vsel %vm1408_vm1, %v1437_v6, %v1445_v36  ;;  %v6727_v14 = vld [vmem:[%s9319_s1 + $0x218] sm:$0xff]   ;;  %v6729_v44 = vld [vmem:[%s9319_s1 + $0x260] sm:$0xff]   ;;  %v6735_v4 = vld [vmem:[%s9319_s1 + $0x228] sm:$0xff]  }
  0x46   : > { %6009 = vmatprep.subr.bf16.mxu1 %v6714_v63  ;;  %v6731_v63 = vld [vmem:[%s9319_s1 + $0x220] sm:$0xff]   ;;  %v6736_v5 = vld [vmem:[%s9319_s1 + $0x2a8] sm:$0xff]  }
  0x47   : > { %893 = vmatmul.mubr.bf16.gmra.mrb[16].mxu0 %v591_v27  ;;  %v6721_v27 = vld [vmem:[%s9319_s1 + $0x250] sm:$0xff]   ;;  %v1332_v6 = vld [vmem:[%s7196_s6] sm:$0xee] }
  0x48   : > { %966 = vmatmul.mubr.bf16.gmra.mrb[16].mxu1 %v607_v32  ;;  %1218 = vmatprep.mubr.bf16.mxu0 %v7209_v34  ;;  %v6715_v34 = vld [vmem:[%s9319_s1 + $0x200] sm:$0xff]   ;;  %v6726_v32 = vld [vmem:[%s9319_s1 + $0x2d8] sm:$0xff]  }
  0x49   : > { %1291 = vmatprep.mubr.bf16.mxu1 %v7225_v42  ;;  %v6716_v42 = vld [vmem:[%s9319_s1 + $0x280] sm:$0xff]  }
  0x4f   : > { %1219 = vmatmul.mubr.bf16.vlgmr.msra.gmra.mrb[20].mxu0 %v7216_v37  ;;  %v1449_v37 = vrot.slane %v7452_v55, 1  ;;  %v6723_v55 = vld [vmem:[%s9319_s1 + $0x210] sm:$0xff]  }
  0x50   : > { %1292 = vmatmul.mubr.bf16.vlgmr.msra.gmra.mrb[20].mxu1 %v7239_v48  ;;  %5964 = vmatpush3.bf16.msra.mxu0 %v6715_v34  ;;  %v6722_v48 = vld [vmem:[%s9319_s1 + $0x2d0] sm:$0xff]  }
  0x51   : > { %6010 = vmatpush3.bf16.msra.mxu1 %v6716_v42  ;;  %5965 = vmatprep.subr.bf16.mxu0 %v6717_v11  ;;  %v7567_v28 = vsel %vm1408_vm1, %v1441_v52, %v1449_v37  ;;  %v6739_v34 = vld [vmem:[%s9319_s1 + $0x230] sm:$0xff]   ;;  %v1333_v42 = vld [vmem:[%s7196_s6 + $0x8] sm:$0xee]  ;;  %v6742_v52 = vld [vmem:[%s9319_s1 + $0x2f8] sm:$0xff]   ;;  %v5484_v11 = vcombine.high %v1332_v6, %v7206_v33 }
  0x52   : > { %6011 = vmatprep.subr.bf16.mxu1 %v6718_v16  ;;  %1226 = vmatprep.mubr.bf16.mxu0 %v7212_v35  ;;  %v5486_v15 = vcombine.high %v1333_v42, %v7219_v38  ;;  %v6743_v16 = vld [vmem:[%s9319_s1 + $0x238] sm:$0xff]   ;;  %v6751_v35 = vld [vmem:[%s9319_s1 + $0x300] sm:$0xff]  }
  0x53   : > { %1299 = vmatprep.mubr.bf16.mxu1 %v7228_v43  ;;  %v1412_v18 = vrot.slane %v5484_v11, 1 }
  0x54   : > { %5966 = vmatpush3.bf16.msra.mxu0 %v6719_v19  ;;  %v1418_v19 = vrot.slane %v5486_v15, 1  ;;  %v6791_v15 = vld [vmem:[%s9319_s1 + $0x440] sm:$0xff]  }
  0x55   : > { %6012 = vmatpush3.bf16.msra.mxu1 %v6720_v13  ;;  %5967 = vmatprep.subr.bf16.mxu0 %v6721_v27  ;;  %v1414_v36 = vsel %vm1408_vm1, %v1412_v18, %v1413_v20  ;;  %v5485_v13 = vcombine.low %v1333_v42, %v7219_v38  ;;  %v6752_v38 = vld [vmem:[%s9319_s1 + $0x380] sm:$0xff]   ;;  %v6753_v20 = vld [vmem:[%s9319_s1 + $0x348] sm:$0xff]  }
  0x56   : > { %6013 = vmatprep.subr.bf16.mxu1 %v6722_v48  ;;  %v1420_v37 = vsel %vm1408_vm1, %v1418_v19, %v1419_v22  ;;  %v6760_v48 = vld [vmem:[%s9319_s1 + $0x390] sm:$0xff]   ;;  %v7793_v42 = vld [vmem:[%s7196_s6 + $0x38] ss:$16 sps:$4 sm:$0xff]  }
  0x57   : > { %1227 = vmatmul.mubr.bf16.gmra.mrb[24].mxu0 %v7234_v45  ;;  %v6756_v45 = vld [vmem:[%s9319_s1 + $0x388] sm:$0xff]  }
  0x58   : > { %1300 = vmatmul.mubr.bf16.gmra.mrb[24].mxu1 %v7242_v49  ;;  %5968 = vmatpush3.bf16.msra.mxu0 %v6723_v55  ;;  %v6757_v49 = vld [vmem:[%s9319_s1 + $0x350] sm:$0xff]   ;;  %v6761_v55 = vld [vmem:[%s9319_s1 + $0x358] sm:$0xff]  }
  0x59   : > { %6014 = vmatpush3.bf16.msra.mxu1 %v6724_v30  ;;  %1234 = vmatprep.mubr.bf16.mxu0 %v7282_v21  ;;  %v6732_v21 = vld [vmem:[%s9319_s1 + $0x2a0] sm:$0xff]   ;;  %v6764_v30 = vld [vmem:[%s9319_s1 + $0x398] sm:$0xff]  }
  0x5a   : > { %1307 = vmatprep.mubr.bf16.mxu1 %v7287_v24  ;;  %5969 = vmatprep.subr.bf16.mxu0 %v6725_v31  ;;  %v6733_v24 = vld [vmem:[%s9319_s1 + $0x268] sm:$0xff]   ;;  %v6765_v31 = vld [vmem:[%s9319_s1 + $0x360] sm:$0xff]  }
  0x5b   : > { %6015 = vmatprep.subr.bf16.mxu1 %v6726_v32  ;;  %v6766_v32 = vld [vmem:[%s9319_s1 + $0x3e0] sm:$0xff]  }
  0x5c   : > { %5970 = vmatpush3.bf16.msra.mxu0 %v6727_v14  ;;  %v6771_v14 = vld [vmem:[%s9319_s1 + $0x328] sm:$0xff]  }
  0x5d   : > { %6016 = vmatpush3.bf16.msra.mxu1 %v6728_v39  ;;  %5971 = vmatprep.subr.bf16.mxu0 %v6729_v44  ;;  %v6772_v39 = vld [vmem:[%s9319_s1 + $0x3a8] sm:$0xff]   ;;  %v1821_v44 = vld [vmem:[%s7196_s6 + $0x10] sm:$0xee] }
  0x5e   : > { %6017 = vmatprep.subr.bf16.mxu1 %v6730_v62  ;;  %v1823_v62 = vld [vmem:[%s7196_s6 + $0x20] sm:$0xff] }
  0x5f   : > { %1235 = vmatmul.mubr.bf16.gmra.mrb[28].mxu0 %v7290_v25  ;;  %v6737_v25 = vld [vmem:[%s9319_s1 + $0x270] sm:$0xff]  }
  0x60   : > { %1308 = vmatmul.mubr.bf16.gmra.mrb[28].mxu1 %v7295_v29  ;;  %5972 = vmatpush3.bf16.msra.mxu0 %v6731_v63  ;;  %v6738_v29 = vld [vmem:[%s9319_s1 + $0x2f0] sm:$0xff]  }
  0x61   : > { %6018 = vmatpush3.bf16.msra.mxu1 %v6732_v21  ;;  %1242 = vmatprep.mubr.bf16.mxu0 %v7316_v57  ;;  %v6740_v57 = vld [vmem:[%s9319_s1 + $0x2b0] sm:$0xff]   ;;  %v1822_v21 = vld [vmem:[%s7196_s6 + $0x18] sm:$0xee] }
  0x62   : > { %1315 = vmatprep.mubr.bf16.mxu1 %v7322_v61  ;;  %5973 = vmatprep.subr.bf16.mxu0 %v6733_v24  ;;  %v6741_v61 = vld [vmem:[%s9319_s1 + $0x278] sm:$0xff]   ;;  %v6773_v63 = vld [vmem:[%s9319_s1 + $0x370] sm:$0xff]   ;;  %v5520_v24 = vcombine.high %v1821_v44, %v1823_v62 }
  0x63   : > { %6019 = vmatprep.subr.bf16.mxu1 %v6734_v3  ;;  %v6776_v3 = vld [vmem:[%s9319_s1 + $0x3b0] sm:$0xff]  }
  0x64   : > { %5974 = vmatpush3.bf16.msra.mxu0 %v6735_v4  ;;  %v6777_v4 = vld [vmem:[%s9319_s1 + $0x378] sm:$0xff]  }
  0x65   : > { %6020 = vmatpush3.bf16.msra.mxu1 %v6736_v5  ;;  %5975 = vmatprep.subr.bf16.mxu0 %v6737_v25  ;;  %v7773_v5 = vld [vmem:[%s7196_s6 + $0x34] ss:$16 sps:$4 sm:$0xff]  }
  0x66   : > { %6021 = vmatprep.subr.bf16.mxu1 %v6738_v29  ;;  %v7778_v29 = vld [vmem:[%s7196_s6 + $0x3c] ss:$16 sps:$4 sm:$0xff]  }
  0x67   : > { %1243 = vmatmul.mubr.bf16.gmra.mrb[32].mxu0 %v7335_v7  ;;  %v6744_v7 = vld [vmem:[%s9319_s1 + $0x2b8] sm:$0xff]  }
  0x68   : > { %1316 = vmatmul.mubr.bf16.gmra.mrb[32].mxu1 %v7338_v8  ;;  %1250 = vmatprep.mubr.bf16.mxu0 %v7371_v50  ;;  %v6749_v8 = vld [vmem:[%s9319_s1 + $0x340] sm:$0xff]  }
  0x69   : > { %1323 = vmatprep.mubr.bf16.mxu1 %v7376_v54  ;;  %5976 = vmatpush3.bf16.msra.mxu0 %v6739_v34  ;;  %v6750_v50 = vld [vmem:[%s9319_s1 + $0x3c0] sm:$0xff]   ;;  %v5483_v54 = vcombine.low %v1332_v6, %v7206_v33  ;;  %v1415_v33 = vrot.slane %v5485_v13, 1  ;;  %v6779_v34 = vld [vmem:[%s9319_s1 + $0x338] sm:$0xff]  }
  0x6a   : > { %6022 = vmatpush3.bf16.msra.mxu1 %v6740_v57  ;;  %5977 = vmatprep.subr.bf16.mxu0 %v6741_v61  ;;  %v2000_v57 = vrot.slane %v5520_v24, 1  ;;  %v6780_v61 = vld [vmem:[%s9319_s1 + $0x3b8] sm:$0xff]   ;;  %v7790_v6 = vld [vmem:[%s7196_s6 + $0x30] ss:$16 sps:$4 sm:$0xff]  }
  0x6b   : > { %6023 = vmatprep.subr.bf16.mxu1 %v6742_v52  ;;  %v1409_v27 = vrot.slane %v5483_v54, 1  ;;  %v1417_v22 = vsel %vm1408_vm1, %v1415_v33, %v1416_v26  ;;  %v6759_v26 = vld [vmem:[%s9319_s1 + $0x310] sm:$0xff]   ;;  %v2001_v52 = vrot.slane %v7773_v5, 1  ;;  %v2004_v54 = vrot.slane %v7793_v42, 1 }
  0x6c   : > { %v2512_v33 = vshrl.u32 %v7773_v5, 16 }
  0x6d   : > { %5978 = vmatpush3.bf16.msra.mxu0 %v6743_v16  ;;  %v1411_v43 = vsel %vm1408_vm1, %v1409_v27, %v1410_v23  ;;  %v6758_v23 = vld [vmem:[%s9319_s1 + $0x3d0] sm:$0xff]   ;;  %v2504_v16 = vshrl.u32 %v5520_v24, 16  ;;  %v7823_v27 = vld [vmem:[%s7196_s6 + $0x5c] ss:$16 sps:$4 sm:$0xff]  }
  0x6e   : > { %6024 = vmatpush3.bf16.msra.mxu1 %v6744_v7  ;;  %6055 = vmatprep.subr.bf16.mxu0 %v6749_v8  ;;  %v2002_v7 = vsel %vm1408_vm1, %v2000_v57, %v2001_v52  ;;  %v1998_v8 = vrot.slane %v7790_v6, 1 }
  0x6f   : > { %1251 = vmatmul.mubr.bf16.gmra.mrb[36].mxu0 %v7379_v56  ;;  %6101 = vmatprep.subr.bf16.mxu1 %v6750_v50  ;;  %v6754_v56 = vld [vmem:[%s9319_s1 + $0x3c8] sm:$0xff]   ;;  %v7819_v13 = vrot.slane %v2504_v16, 1  ;;  %v6819_v16 = vld [vmem:[%s9319_s1 + $0x460] sm:$0xff]  }
  0x70   : > { %1324 = vmatmul.mubr.bf16.gmra.mrb[36].mxu1 %v7382_v58  ;;  %1697 = vmatprep.mubr.bf16.mxu0 %v1414_v36  ;;  %v6755_v58 = vld [vmem:[%s9319_s1 + $0x308] sm:$0xff]   ;;  %v7817_v36 = vld [vmem:[%s7196_s6 + $0x54] ss:$16 sps:$4 sm:$0xff]  }
  0x71   : > { %1770 = vmatprep.mubr.bf16.mxu1 %v1420_v37  ;;  %v2507_v37 = vshll.u32 %v5520_v24, 16  ;;  %v7893_v24 = vld [vmem:[%s7196_s6 + $0x78] ss:$16 sps:$4 sm:$0xff]  }
  0x77   : > { %1698 = vmatmul.mubr.bf16.vlgmr.msra.gmra.mrb[40].mxu0 %v1411_v43  ;;  %v6794_v43 = vld [vmem:[%s9319_s1 + $0x480] sm:$0xff]  }
  0x78   : > { %1771 = vmatmul.mubr.bf16.vlgmr.msra.gmra.mrb[40].mxu1 %v1417_v22  ;;  %6056 = vmatpush3.bf16.msra.mxu0 %v6751_v35  ;;  %v2515_v35 = vshll.u32 %v7773_v5, 16  ;;  %v7841_v22 = vld [vmem:[%s7196_s6 + $0x58] ss:$16 sps:$4 sm:$0xff]  }
  0x79   : > { %6102 = vmatpush3.bf16.msra.mxu1 %v6752_v38  ;;  %6057 = vmatprep.subr.bf16.mxu0 %v6753_v20  ;;  %v7831_v38 = vld [vmem:[%s7196_s6 + $0x50] ss:$16 sps:$4 sm:$0xff]   ;;  %v2011_v20 = vrot.slane %v7817_v36, 1 }
  0x7a   : > { %6103 = vmatprep.subr.bf16.mxu1 %v6754_v56  ;;  %1705 = vmatprep.mubr.bf16.mxu0 %v7389_v59  ;;  %v6762_v59 = vld [vmem:[%s9319_s1 + $0x3d8] sm:$0xff]  }
  0x7b   : > { %1778 = vmatprep.mubr.bf16.mxu1 %v7396_v60  ;;  %v6763_v60 = vld [vmem:[%s9319_s1 + $0x318] sm:$0xff]  }
  0x7c   : > { %6058 = vmatpush3.bf16.msra.mxu0 %v6755_v58  ;;  %v6796_v58 = vld [vmem:[%s9319_s1 + $0x4c8] sm:$0xff]  }
  0x7d   : > { %6104 = vmatpush3.bf16.msra.mxu1 %v6756_v45  ;;  %6059 = vmatprep.subr.bf16.mxu0 %v6757_v49  ;;  %v2015_v45 = vrot.slane %v7823_v27, 1  ;;  %v7849_v49 = vld [vmem:[%s7196_s6 + $0x74] ss:$16 sps:$4 sm:$0xff]  }
  0x7e   : > { %6105 = vmatprep.subr.bf16.mxu1 %v6758_v23  ;;  %v7851_v23 = vrot.slane %v2507_v37, 2  ;;  %v2495_v37 = vshrl.u32 %v7790_v6, 16 }
  0x7f   : > { %1706 = vmatmul.mubr.bf16.gmra.mrb[44].mxu0 %v7407_v1  ;;  %v6767_v1 = vld [vmem:[%s9319_s1 + $0x320] sm:$0xff]  }
  0x80   : > { %1779 = vmatmul.mubr.bf16.gmra.mrb[44].mxu1 %v7414_v2  ;;  %6060 = vmatpush3.bf16.msra.mxu0 %v6759_v26  ;;  %v6768_v2 = vld [vmem:[%s9319_s1 + $0x3a0] sm:$0xff]  }
  0x81   : > { %6106 = vmatpush3.bf16.msra.mxu1 %v6760_v48  ;;  %1713 = vmatprep.mubr.bf16.mxu0 %v7486_v53  ;;  %v6769_v53 = vld [vmem:[%s9319_s1 + $0x368] sm:$0xff]  }
  0x82   : > { %1786 = vmatprep.mubr.bf16.mxu1 %v7495_v0  ;;  %6061 = vmatprep.subr.bf16.mxu0 %v6761_v55  ;;  %v6770_v0 = vld [vmem:[%s9319_s1 + $0x3e8] sm:$0xff]  }
  0x83   : > { %6107 = vmatprep.subr.bf16.mxu1 %v6762_v59  ;;  %v7855_v48 = vld [vmem:[%s7196_s6 + $0x7c] ss:$16 sps:$4 sm:$0xff]  }
  0x84   : > { %6062 = vmatpush3.bf16.msra.mxu0 %v6763_v60  ;;  %v6797_v59 = vld [vmem:[%s9319_s1 + $0x408] sm:$0xff]   ;;  %v7861_v60 = vrot.slane %v2512_v33, 1  ;;  %v2498_v33 = vshll.u32 %v7790_v6, 16  ;;  %v6822_v6 = vld [vmem:[%s9319_s1 + $0x4a0] sm:$0xff]  }
  0x85   : > { %6108 = vmatpush3.bf16.msra.mxu1 %v6764_v30  ;;  %6063 = vmatprep.subr.bf16.mxu0 %v6765_v31  ;;  %v6798_v31 = vld [vmem:[%s9319_s1 + $0x488] sm:$0xff]  }
  0x86   : > { %6109 = vmatprep.subr.bf16.mxu1 %v6766_v32  ;;  %v2012_v32 = vsel %vm1408_vm1, %v2001_v52, %v2011_v20 }
  0x87   : > { %1714 = vmatmul.mubr.bf16.gmra.mrb[48].mxu0 %v7502_v46  ;;  %v6774_v46 = vld [vmem:[%s9319_s1 + $0x3f0] sm:$0xff]  }
  0x88   : > { %1787 = vmatmul.mubr.bf16.gmra.mrb[48].mxu1 %v7509_v47  ;;  %6064 = vmatpush3.bf16.msra.mxu0 %v6767_v1  ;;  %v1824_v47 = vld [vmem:[%s7196_s6 + $0x28] sm:$0xff]  ;;  %v2009_v1 = vrot.slane %v7831_v38, 1 }
  0x89   : > { %6110 = vmatpush3.bf16.msra.mxu1 %v6768_v2  ;;  %1721 = vmatprep.mubr.bf16.mxu0 %v7516_v51  ;;  %v6775_v51 = vld [vmem:[%s9319_s1 + $0x330] sm:$0xff]   ;;  %v7775_v25 = vcombine.high %v1822_v21, %v1824_v47  ;;  %v2013_v2 = vrot.slane %v7841_v22, 1 }
  0x8a   : > { %1794 = vmatprep.mubr.bf16.mxu1 %v7523_v9  ;;  %6065 = vmatprep.subr.bf16.mxu0 %v6769_v53  ;;  %v6778_v9 = vld [vmem:[%s9319_s1 + $0x3f8] sm:$0xff]   ;;  %v6805_v53 = vld [vmem:[%s9319_s1 + $0x450] sm:$0xff]  }
  0x8b   : > { %6111 = vmatprep.subr.bf16.mxu1 %v6770_v0  ;;  %v2006_v11 = vrot.slane %v7775_v25, 1  ;;  %v2538_v55 = vshrl.u32 %v7775_v25, 16  ;;  %v2541_v30 = vshll.u32 %v7775_v25, 16  ;;  %v7873_v0 = vrot.slane %v2515_v35, 2  ;;  %v6814_v25 = vld [vmem:[%s9319_s1 + $0x4d8] sm:$0xff]  }
  0x8c   : > { %6066 = vmatpush3.bf16.msra.mxu0 %v6771_v14  ;;  %v2014_v5 = vsel %vm1408_vm1, %v2004_v54, %v2013_v2  ;;  %v7946_v35 = vld [vmem:[%s7196_s6 + $0x90] ss:$16 sps:$4 sm:$0xff]  }
  0x8d   : > { %6112 = vmatpush3.bf16.msra.mxu1 %v6772_v39  ;;  %6067 = vmatprep.subr.bf16.mxu0 %v6773_v63  ;;  %v6806_v39 = vld [vmem:[%s9319_s1 + $0x4d0] sm:$0xff]   ;;  %v2019_v63 = vrot.slane %v7849_v49, 1  ;;  %v7915_v52 = vrot.slane %v2541_v30, 2  ;;  %v2025_v30 = vrot.slane %v7946_v35, 1 }
  0x8e   : > { %6113 = vmatprep.subr.bf16.mxu1 %v6774_v46  ;;  %v2023_v46 = vrot.slane %v7855_v48, 1 }
  0x8f   : > { %1722 = vmatmul.mubr.bf16.gmra.mrb[52].mxu0 %v7530_v10  ;;  %v7796_v10 = vcombine.low %v1821_v44, %v1823_v62  ;;  %v2546_v44 = vshrl.u32 %v7778_v29, 16  ;;  %v2549_v62 = vshll.u32 %v7778_v29, 16 }
  0x90   : > { %1795 = vmatmul.mubr.bf16.gmra.mrb[52].mxu1 %v7537_v17  ;;  %1729 = vmatprep.mubr.bf16.mxu0 %v7545_v12  ;;  %v7800_v17 = vcombine.low %v1822_v21, %v1824_v47  ;;  %v2007_v12 = vrot.slane %v7778_v29, 1  ;;  %v6807_v21 = vld [vmem:[%s9319_s1 + $0x410] sm:$0xff]   ;;  %v7908_v29 = vrot.slane %v2538_v55, 1 }
  0x91   : > { %1802 = vmatprep.mubr.bf16.mxu1 %v7553_v41  ;;  %6068 = vmatpush3.bf16.msra.mxu0 %v6775_v51  ;;  %v6792_v41 = vld [vmem:[%s9319_s1 + $0x4c0] sm:$0xff]   ;;  %v1997_v18 = vrot.slane %v7796_v10, 1  ;;  %v6808_v51 = vld [vmem:[%s9319_s1 + $0x490] sm:$0xff]  }
  0x92   : > { %6114 = vmatpush3.bf16.msra.mxu1 %v6776_v3  ;;  %6069 = vmatprep.subr.bf16.mxu0 %v6777_v4  ;;  %v2008_v19 = vsel %vm1408_vm1, %v2006_v11, %v2007_v12  ;;  %v2003_v50 = vrot.slane %v7800_v17, 1  ;;  %v2016_v14 = vsel %vm1408_vm1, %v2007_v12, %v2015_v45  ;;  %v7887_v47 = vld [vmem:[%s7196_s6 + $0x70] ss:$16 sps:$4 sm:$0xff]   ;;  %v2010_v3 = vsel %vm1408_vm1, %v1998_v8, %v2009_v1  ;;  %v6813_v4 = vld [vmem:[%s9319_s1 + $0x458] sm:$0xff]  }
  0x93   : > { %6115 = vmatprep.subr.bf16.mxu1 %v6778_v9  ;;  %v1999_v56 = vsel %vm1408_vm1, %v1997_v18, %v1998_v8  ;;  %v2487_v9 = vshrl.u32 %v7796_v10, 16  ;;  %v2017_v57 = vrot.slane %v7887_v47, 1  ;;  %v7917_v11 = vrot.slane %v2546_v44, 1  ;;  %v7938_v8 = vld [vmem:[%s7196_s6 + $0x9c] ss:$16 sps:$4 sm:$0xff]  }
  0x94   : > { %v2005_v26 = vsel %vm1408_vm1, %v2003_v50, %v2004_v54  ;;  %v2024_v12 = vsel %vm1408_vm1, %v2015_v45, %v2023_v46  ;;  %v7932_v18 = vrot.slane %v2549_v62, 2  ;;  %v2490_v54 = vshll.u32 %v7796_v10, 16 }
  0x95   : > { %6070 = vmatpush3.bf16.msra.mxu0 %v6779_v34  ;;  %v2020_v34 = vsel %vm1408_vm1, %v2011_v20, %v2019_v63  ;;  %v7940_v50 = vrot.slane %v2487_v9, 1  ;;  %v7954_v20 = vld [vmem:[%s7196_s6 + $0x98] ss:$16 sps:$4 sm:$0xff]   ;;  %v2018_v10 = vsel %vm1408_vm1, %v2009_v1, %v2017_v57  ;;  %v2524_v55 = vshll.u32 %v7800_v17, 16  ;;  %v6837_v9 = vld [vmem:[%s9319_s1 + $0x430] sm:$0xff]  }
  0x96   : > { %6116 = vmatpush3.bf16.msra.mxu1 %v6780_v61  ;;  %6147 = vmatprep.subr.bf16.mxu0 %v6791_v15  ;;  %v6817_v61 = vld [vmem:[%s9319_s1 + $0x418] sm:$0xff]   ;;  %v2021_v15 = vrot.slane %v7893_v24, 1  ;;  %v2029_v1 = vrot.slane %v7954_v20, 1  ;;  %v7993_v62 = vrot.slane %v2495_v37, 1  ;;  %v2532_v37 = vshll.u32 %v7793_v42, 16 }
  0x97   : > { %1730 = vmatmul.mubr.bf16.gmra.mrb[56].mxu0 %v7560_v40  ;;  %6193 = vmatprep.subr.bf16.mxu1 %v6792_v41  ;;  %v6793_v40 = vld [vmem:[%s9319_s1 + $0x400] sm:$0xff]   ;;  %v6818_v41 = vld [vmem:[%s9319_s1 + $0x498] sm:$0xff]  }
  0x98   : > { %1803 = vmatmul.mubr.bf16.gmra.mrb[56].mxu1 %v7567_v28  ;;  %2285 = vmatprep.mubr.bf16.mxu0 %v2002_v7  ;;  %v6795_v28 = vld [vmem:[%s9319_s1 + $0x448] sm:$0xff]   ;;  %v7930_v7 = vld [vmem:[%s7196_s6 + $0x94] ss:$16 sps:$4 sm:$0xff]   ;;  %v2022_v45 = vsel %vm1408_vm1, %v2013_v2, %v2021_v15 }
  0x99   : > { %2358 = vmatprep.mubr.bf16.mxu1 %v2008_v19  ;;  %v6820_v19 = vld [vmem:[%s9319_s1 + $0x4e0] sm:$0xff]   ;;  %v1841_v2 = vld [vmem:[%s7196_s6 + $0xb0] sm:$0x11] }
  0x9f   : > { %2286 = vmatmul.mubr.bf16.vlgmr.msra.gmra.mrb[60].mxu0 %v1999_v56  ;;  %v7964_v56 = vrot.slane %v2490_v54, 2  ;;  %v6841_v54 = vld [vmem:[%s9319_s1 + $0x478] sm:$0xff]  }
  0xa0   : > { %2359 = vmatmul.mubr.bf16.vlgmr.msra.gmra.mrb[60].mxu1 %v2005_v26  ;;  %6148 = vmatpush3.bf16.msra.mxu0 %v6793_v40  ;;  %v6821_v40 = vld [vmem:[%s9319_s1 + $0x420] sm:$0xff]   ;;  %v6829_v26 = vld [vmem:[%s9319_s1 + $0x468] sm:$0xff]  }
  0xa1   : > { %6194 = vmatpush3.bf16.msra.mxu1 %v6794_v43  ;;  %6149 = vmatprep.subr.bf16.mxu0 %v6795_v28  ;;  %v2027_v43 = vrot.slane %v7930_v7, 1  ;;  %v2031_v28 = vrot.slane %v7938_v8, 1 }
  0xa2   : > { %6195 = vmatprep.subr.bf16.mxu1 %v6796_v58  ;;  %2293 = vmatprep.mubr.bf16.mxu0 %v2012_v32  ;;  %v2521_v58 = vshrl.u32 %v7800_v17, 16  ;;  %v6831_v17 = vld [vmem:[%s9319_s1 + $0x428] sm:$0xff]  }
  0xa3   : > { %2366 = vmatprep.mubr.bf16.mxu1 %v2016_v14  ;;  %v2032_v32 = vsel %vm1408_vm1, %v2023_v46, %v2031_v28  ;;  %v6832_v14 = vld [vmem:[%s9319_s1 + $0x4a8] sm:$0xff]   ;;  %v7998_v46 = vrot.slane %v2498_v33, 2  ;;  %v6842_v33 = vld [vmem:[%s9319_s1 + $0x4f8] sm:$0xff]  }
  0xa4   : > { %6150 = vmatpush3.bf16.msra.mxu0 %v6797_v59  ;;  %v2028_v59 = vsel %vm1408_vm1, %v2019_v63, %v2027_v43  ;;  %v6833_v63 = vld [vmem:[%s9319_s1 + $0x470] sm:$0xff]  }
  0xa5   : > { %6196 = vmatpush3.bf16.msra.mxu1 %v6798_v31  ;;  %6151 = vmatprep.subr.bf16.mxu0 %v6805_v53  ;;  %v6830_v31 = vld [vmem:[%s9319_s1 + $0x4e8] sm:$0xff]   ;;  %v1842_v53 = vld [vmem:[%s7196_s6 + $0xb8] sm:$0x11] }
  0xa6   : > { %6197 = vmatprep.subr.bf16.mxu1 %v6806_v39  ;;  %v5540_v39 = vcombine.high %v1841_v2, %v1841_v2  ;;  %v5542_v44 = vcombine.high %v1842_v53, %v1842_v53 }
  0xa7   : > { %2294 = vmatmul.mubr.bf16.gmra.mrb[64].mxu0 %v2010_v3 }
  0xa8   : > { %2367 = vmatmul.mubr.bf16.gmra.mrb[64].mxu1 %v2014_v5  ;;  %6152 = vmatpush3.bf16.msra.mxu0 %v6807_v21  ;;  %v6834_v21 = vld [vmem:[%s9319_s1 + $0x4f0] sm:$0xff]   ;;  %v2039_v3 = vrot.slane %v5542_v44, 1  ;;  %v5539_v5 = vcombine.low %v1841_v2, %v1841_v2  ;;  %v2501_v2 = vor.u32 %v7998_v46, %v7993_v62  ;;  %v2618_v46 = vshrl.u32 %v7855_v48, 16 }
  0xa9   : > { %6198 = vmatpush3.bf16.msra.mxu1 %v6808_v51  ;;  %2301 = vmatprep.mubr.bf16.mxu0 %v2020_v34  ;;  %v2035_v51 = vrot.slane %v5540_v39, 1  ;;  %v2026_v34 = vsel %vm1408_vm1, %v2017_v57, %v2025_v30 }
  0xaa   : > { %2374 = vmatprep.mubr.bf16.mxu1 %v2024_v12  ;;  %6153 = vmatprep.subr.bf16.mxu0 %v6813_v4  ;;  %v8003_v4 = vrot.slane %v2521_v58, 1  ;;  %v2030_v12 = vsel %vm1408_vm1, %v2021_v15, %v2029_v1  ;;  %v2040_v57 = vsel %vm1408_vm1, %v2031_v28, %v2039_v3  ;;  %v2033_v15 = vrot.slane %v5539_v5, 1 }
  0xab   : > { %6199 = vmatprep.subr.bf16.mxu1 %v6814_v25  ;;  %v8008_v25 = vrot.slane %v2524_v55, 2  ;;  %v2510_v28 = vor.u32 %v7851_v23, %v7819_v13  ;;  %v2552_v58 = vor.u32 %v7932_v18, %v7917_v11  ;;  %v6845_v13 = vld [vmem:[%s9319_s1 + $0x540] sm:$0xff]   ;;  %v2567_v23 = vshll.u32 %v7817_v36, 16 }
  0xac   : > { %6154 = vmatpush3.bf16.msra.mxu0 %v6817_v61  ;;  %v5541_v61 = vcombine.low %v1842_v53, %v1842_v53  ;;  %v2585_v18 = vshll.u32 %v7823_v27, 16  ;;  %v2534_v55 = vrot.slane %v2532_v37, 2  ;;  %v2573_v53 = vshrl.u32 %v7841_v22, 16 }
  0xad   : > { %6200 = vmatpush3.bf16.msra.mxu1 %v6818_v41  ;;  %6155 = vmatprep.subr.bf16.mxu0 %v6819_v16  ;;  %v2036_v41 = vsel %vm1408_vm1, %v2027_v43, %v2035_v51  ;;  %v6838_v16 = vld [vmem:[%s9319_s1 + $0x4b0] sm:$0xff]   ;;  %v6843_v43 = vld [vmem:[%s9319_s1 + $0x438] sm:$0xff]   ;;  %v2527_v39 = vor.u32 %v8008_v25, %v8003_v4  ;;  %v2621_v3 = vshll.u32 %v7855_v48, 16  ;;  %v2591_v37 = vshrl.u32 %v7887_v47, 16 }
  0xae   : > { %6201 = vmatprep.subr.bf16.mxu1 %v6820_v19  ;;  %v2529_v19 = vshrl.u32 %v7793_v42, 16  ;;  %v6844_v42 = vld [vmem:[%s9319_s1 + $0x4b8] sm:$0xff]  }
  0xaf   : > { %2302 = vmatmul.mubr.bf16.gmra.mrb[68].mxu0 %v2018_v10  ;;  %v2544_v10 = vor.u32 %v7915_v52, %v7908_v29  ;;  %v2034_v29 = vsel %vm1408_vm1, %v2025_v30, %v2033_v15  ;;  %v2587_v30 = vrot.slane %v2585_v18, 2 }
  0xb0   : > { %2375 = vmatmul.mubr.bf16.gmra.mrb[68].mxu1 %v2022_v45  ;;  %6156 = vmatpush3.bf16.msra.mxu0 %v6821_v40  ;;  %v2037_v40 = vrot.slane %v5541_v61, 1  ;;  %v2564_v45 = vshrl.u32 %v7817_v36, 16  ;;  %v2531_v11 = vrot.slane %v2529_v19, 1  ;;  %v6850_v61 = vld [vmem:[%s9319_s1 + $0x5c8] sm:$0xff]  }
  0xb1   : > { %6202 = vmatpush3.bf16.msra.mxu1 %v6822_v6  ;;  %2309 = vmatprep.mubr.bf16.mxu0 %v2028_v59  ;;  %v8040_v6 = vor.u32 %v7873_v0, %v7861_v60  ;;  %v6846_v60 = vld [vmem:[%s9319_s1 + $0x5c0] sm:$0xff]   ;;  %v2582_v0 = vshrl.u32 %v7823_v27, 16  ;;  %v2558_v27 = vshll.u32 %v7831_v38, 16  ;;  %v6852_v19 = vld [vmem:[%s9319_s1 + $0x588] sm:$0xff]  }
  0xb2   : > { %2382 = vmatprep.mubr.bf16.mxu1 %v2032_v32  ;;  %6157 = vmatprep.subr.bf16.mxu0 %v6829_v26  ;;  %v2038_v36 = vsel %vm1408_vm1, %v2029_v1, %v2037_v40  ;;  %v2553_v26 = vsel %vm2485_vm2, %v2544_v10, %v2552_v58  ;;  %v2566_v59 = vrot.slane %v2564_v45, 1  ;;  %v2493_v1 = vor.u32 %v7964_v56, %v7940_v50  ;;  %v6848_v56 = vld [vmem:[%s9319_s1 + $0x580] sm:$0xff]   ;;  %v6853_v40 = vld [vmem:[%s9319_s1 + $0x550] sm:$0xff]  }
  0xb3   : > { %6203 = vmatprep.subr.bf16.mxu1 %v6830_v31  ;;  %v2519_v52 = vsel %vm2485_vm2, %v2510_v28, %v8040_v6  ;;  %v2569_v31 = vrot.slane %v2567_v23, 2  ;;  %v2584_v32 = vrot.slane %v2582_v0, 1  ;;  %v2535_v44 = vor.u32 %v2534_v55, %v2531_v11 }
  0xb4   : > { %6158 = vmatpush3.bf16.msra.mxu0 %v6831_v17  ;;  %v2555_v17 = vshrl.u32 %v7831_v38, 16  ;;  %v6847_v38 = vld [vmem:[%s9319_s1 + $0x500] sm:$0xff]   ;;  %v2600_v50 = vshrl.u32 %v7849_v49, 16  ;;  %v2560_v62 = vrot.slane %v2558_v27, 2  ;;  %v2502_v4 = vsel %vm2485_vm2, %v2493_v1, %v2501_v2  ;;  %v6859_v27 = vld [vmem:[%s9319_s1 + $0x518] sm:$0xff]  }
  0xb5   : > { %6204 = vmatpush3.bf16.msra.mxu1 %v6832_v14  ;;  %6159 = vmatprep.subr.bf16.mxu0 %v6833_v63  ;;  %v2576_v14 = vshll.u32 %v7841_v22, 16  ;;  %v2570_v63 = vor.u32 %v2569_v31, %v2566_v59  ;;  %v2603_v22 = vshll.u32 %v7849_v49, 16  ;;  %v2536_v25 = vsel %vm2485_vm2, %v2527_v39, %v2535_v44  ;;  %v6851_v49 = vld [vmem:[%s9319_s1 + $0x508] sm:$0xff]  }
  0xb6   : > { %6205 = vmatprep.subr.bf16.mxu1 %v6834_v21  ;;  %v2588_v21 = vor.u32 %v2587_v30, %v2584_v32  ;;  %v2557_v51 = vrot.slane %v2555_v17, 1  ;;  %v2594_v28 = vshll.u32 %v7887_v47, 16  ;;  %v2636_v10 = vshrl.u32 %v7930_v7, 16 }
  0xb7   : > { %2310 = vmatmul.mubr.bf16.gmra.mrb[72].mxu0 %v2026_v34  ;;  %v2578_v5 = vrot.slane %v2576_v14, 2  ;;  %v6849_v34 = vld [vmem:[%s9319_s1 + $0x548] sm:$0xff]   ;;  %v2605_v48 = vrot.slane %v2603_v22, 2  ;;  %v2639_v23 = vshll.u32 %v7930_v7, 16  ;;  %v2593_v0 = vrot.slane %v2591_v37, 1  ;;  %v6857_v7 = vld [vmem:[%s9319_s1 + $0x558] sm:$0xff]  }
  0xb8   : > { %2383 = vmatmul.mubr.bf16.gmra.mrb[72].mxu1 %v2030_v12  ;;  %2317 = vmatprep.mubr.bf16.mxu0 %v2036_v41  ;;  %v2602_v12 = vrot.slane %v2600_v50, 1  ;;  %v2620_v41 = vrot.slane %v2618_v46, 1  ;;  %v8106_v15 = vor.u32 %v2560_v62, %v2557_v51  ;;  %v2596_v18 = vrot.slane %v2594_v28, 2  ;;  %v6864_v62 = vld [vmem:[%s9319_s1 + $0x5a0] sm:$0xff]   ;;  %v6867_v37 = vld [vmem:[%s9319_s1 + $0x528] sm:$0xff]  }
  0xb9   : > { %2390 = vmatprep.mubr.bf16.mxu1 %v2040_v57  ;;  %6160 = vmatpush3.bf16.msra.mxu0 %v6837_v9  ;;  %v2575_v9 = vrot.slane %v2573_v53, 1  ;;  %v2571_v57 = vsel %vm2485_vm2, %v8040_v6, %v2570_v63  ;;  %v2609_v6 = vshrl.u32 %v7893_v24, 16  ;;  %v2638_v59 = vrot.slane %v2636_v10, 1 }
  0xba   : > { %6206 = vmatpush3.bf16.msra.mxu1 %v6838_v16  ;;  %6161 = vmatprep.subr.bf16.mxu0 %v6841_v54  ;;  %v2623_v16 = vrot.slane %v2621_v3, 2  ;;  %v2589_v54 = vsel %vm2485_vm2, %v2552_v58, %v2588_v21  ;;  %v6855_v58 = vld [vmem:[%s9319_s1 + $0x510] sm:$0xff]   ;;  %v8123_v45 = vor.u32 %v2605_v48, %v2602_v12  ;;  %v2641_v31 = vrot.slane %v2639_v23, 2 }
  0xbb   : > { %6207 = vmatprep.subr.bf16.mxu1 %v6842_v33  ;;  %v8108_v33 = vor.u32 %v2578_v5, %v2575_v9  ;;  %v2657_v32 = vshll.u32 %v7938_v8, 16  ;;  %v2627_v1 = vshrl.u32 %v7946_v35, 16  ;;  %v2645_v39 = vshrl.u32 %v7954_v20, 16  ;;  %v6865_v9 = vld [vmem:[%s9319_s1 + $0x568] sm:$0xff]   ;;  %v2409_v5 = vld [vmem:[%s7196_s6 + $0xb0] sm:$0x33] }
  0xbc   : > { %v2607_v30 = vsel %vm2485_vm2, %v2570_v63, %v8123_v45  ;;  %v6861_v63 = vld [vmem:[%s9319_s1 + $0x560] sm:$0xff]   ;;  %v8168_v51 = vor.u32 %v2641_v31, %v2638_v59  ;;  %v6877_v59 = vld [vmem:[%s9319_s1 + $0x578] sm:$0xff]  }
  0xbd   : > { %6162 = vmatpush3.bf16.msra.mxu0 %v6843_v43  ;;  %v6854_v43 = vld [vmem:[%s9319_s1 + $0x5d0] sm:$0xff]   ;;  %v2580_v11 = vsel %vm2485_vm2, %v2535_v44, %v8108_v33  ;;  %v2659_v14 = vrot.slane %v2657_v32, 2  ;;  %v2648_v44 = vshll.u32 %v7954_v20, 16  ;;  %v6863_v20 = vld [vmem:[%s9319_s1 + $0x520] sm:$0xff]   ;;  %v2629_v50 = vrot.slane %v2627_v1, 1 }
  0xbe   : > { %6208 = vmatpush3.bf16.msra.mxu1 %v6844_v42  ;;  %6239 = vmatprep.subr.bf16.mxu0 %v6845_v13  ;;  %v2612_v42 = vshll.u32 %v7893_v24, 16  ;;  %v8125_v13 = vor.u32 %v2623_v16, %v2620_v41  ;;  %v2647_v46 = vrot.slane %v2645_v39, 1  ;;  %v2643_v12 = vsel %vm2485_vm2, %v8123_v45, %v8168_v51  ;;  %v6866_v41 = vld [vmem:[%s9319_s1 + $0x5e8] sm:$0xff]  }
  0xbf   : > { %2318 = vmatmul.mubr.bf16.gmra.mrb[76].mxu0 %v2034_v29  ;;  %6285 = vmatprep.subr.bf16.mxu1 %v6846_v60  ;;  %v6856_v60 = vld [vmem:[%s9319_s1 + $0x590] sm:$0xff]   ;;  %v2654_v29 = vshrl.u32 %v7938_v8, 16  ;;  %v6860_v8 = vld [vmem:[%s9319_s1 + $0x598] sm:$0xff]   ;;  %v2650_v3 = vrot.slane %v2648_v44, 2  ;;  %v7022_v39 = vld [vmem:[%s7196_s6 + $0x28] sm:$0xff] }
  0xc0   : > { %2391 = vmatmul.mubr.bf16.gmra.mrb[76].mxu1 %v2038_v36  ;;  %2942 = vmatprep.mubr.bf16.mxu0 %v2519_v52  ;;  %v2562_v52 = vsel %vm2485_vm2, %v2501_v2, %v8106_v15  ;;  %v2611_v36 = vrot.slane %v2609_v6, 1  ;;  %v2614_v55 = vrot.slane %v2612_v42, 2  ;;  %v2625_v17 = vsel %vm2485_vm2, %v2588_v21, %v8125_v13  ;;  %v6862_v21 = vld [vmem:[%s9319_s1 + $0x5e0] sm:$0xff]  }
  0xc1   : > { %3015 = vmatprep.mubr.bf16.mxu1 %v2553_v26  ;;  %v6858_v26 = vld [vmem:[%s9319_s1 + $0x5d8] sm:$0xff]   ;;  %v2630_v2 = vshll.u32 %v7946_v35, 16  ;;  %v2656_v53 = vrot.slane %v2654_v29, 1 }
  0xc2   : > { %v8160_v35 = vor.u32 %v2614_v55, %v2611_v36 }
  0xc3   : > { %v8173_v22 = vor.u32 %v2659_v14, %v2656_v53  ;;  %v3067_v53 = vld [vmem:[%s7196_s6 + $0x18] sm:$0xcc] }
  0xc4   : > { %v6878_v14 = vld [vmem:[%s9319_s1 + $0x5f8] sm:$0xff]   ;;  %v5614_v44 = vcombine.high %v3067_v53, %v7022_v39 }
  0xc7   : > { %2943 = vmatmul.mubr.bf16.vlgmr.msra.gmra.mrb[80].mxu0 %v2502_v4 }
  0xc8   : > { %3016 = vmatmul.mubr.bf16.vlgmr.msra.gmra.mrb[80].mxu1 %v2536_v25  ;;  %6240 = vmatpush3.bf16.msra.mxu0 %v6847_v38  ;;  %v2597_v38 = vor.u32 %v2596_v18, %v2593_v0  ;;  %v2616_v25 = vsel %vm2485_vm2, %v8108_v33, %v8160_v35  ;;  %v6869_v33 = vld [vmem:[%s9319_s1 + $0x570] sm:$0xff]  }
  0xc9   : > { %6286 = vmatpush3.bf16.msra.mxu1 %v6848_v56  ;;  %6241 = vmatprep.subr.bf16.mxu0 %v6849_v34  ;;  %v2632_v56 = vrot.slane %v2630_v2, 2  ;;  %v8184_v34 = vcombine.high %v2409_v5, %v2409_v5  ;;  %v7021_v2 = vld [vmem:[%s7196_s6 + $0x20] sm:$0xff] }
  0xca   : > { %6287 = vmatprep.subr.bf16.mxu1 %v6850_v61  ;;  %2950 = vmatprep.mubr.bf16.mxu0 %v2571_v57  ;;  %v2598_v4 = vsel %vm2485_vm2, %v8106_v15, %v2597_v38  ;;  %v2410_v61 = vld [vmem:[%s7196_s6 + $0xb8] sm:$0x33]  ;;  %v2661_v57 = vsel %vm2485_vm2, %v8125_v13, %v8173_v22  ;;  %v6868_v15 = vld [vmem:[%s9319_s1 + $0x5a8] sm:$0xff]  }
  0xcb   : > { %3023 = vmatprep.mubr.bf16.mxu1 %v2589_v54  ;;  %v8192_v48 = vor.u32 %v2632_v56, %v2629_v50  ;;  %v8197_v16 = vcombine.high %v2410_v61, %v2410_v61  ;;  %v8204_v54 = vor.u32 %v2650_v3, %v2647_v46  ;;  %v6880_v56 = vld [vmem:[%s9319_s1 + $0x5b8] sm:$0xff]   ;;  %v6885_v46 = vld [vmem:[%s9319_s1 + $0x640] sm:$0xff]  }
  0xcc   : > { %6242 = vmatpush3.bf16.msra.mxu0 %v6851_v49  ;;  %v8187_v49 = vcombine.low %v2409_v5, %v2409_v5  ;;  %v6886_v3 = vld [vmem:[%s9319_s1 + $0x6c0] sm:$0xff]  }
  0xcd   : > { %6288 = vmatpush3.bf16.msra.mxu1 %v6852_v19  ;;  %6243 = vmatprep.subr.bf16.mxu0 %v6853_v40  ;;  %v8199_v19 = vcombine.low %v2410_v61, %v2410_v61  ;;  %v2672_v40 = vshrl.u32 %v8184_v34, 16  ;;  %v2690_v28 = vshrl.u32 %v8197_v16, 16  ;;  %v2693_v6 = vshll.u32 %v8197_v16, 16 }
  0xce   : > { %6289 = vmatprep.subr.bf16.mxu1 %v6854_v43  ;;  %v2675_v43 = vshll.u32 %v8184_v34, 16  ;;  %v2663_v42 = vshrl.u32 %v8187_v49, 16  ;;  %v2666_v10 = vshll.u32 %v8187_v49, 16  ;;  %v2634_v18 = vsel %vm2485_vm2, %v2597_v38, %v8192_v48 }
  0xcf   : > { %2951 = vmatmul.mubr.bf16.gmra.mrb[84].mxu0 %v2562_v52  ;;  %v2681_v13 = vshrl.u32 %v8199_v19, 16  ;;  %v2684_v23 = vshll.u32 %v8199_v19, 16  ;;  %v2692_v0 = vrot.slane %v2690_v28, 1  ;;  %v2695_v29 = vrot.slane %v2693_v6, 2  ;;  %v7028_v28 = vld [vmem:[%s7196_s6 + $0x5c] ss:$16 sps:$4 sm:$0xff]  }
  0xd0   : > { %3024 = vmatmul.mubr.bf16.gmra.mrb[84].mxu1 %v2580_v11  ;;  %6244 = vmatpush3.bf16.msra.mxu0 %v6855_v58  ;;  %v2674_v58 = vrot.slane %v2672_v40, 1  ;;  %v2677_v45 = vrot.slane %v2675_v43, 2  ;;  %v6873_v11 = vld [vmem:[%s9319_s1 + $0x530] sm:$0xff]   ;;  %v2668_v55 = vrot.slane %v2666_v10, 2  ;;  %v2652_v31 = vsel %vm2485_vm2, %v8160_v35, %v8204_v54  ;;  %v6887_v43 = vld [vmem:[%s9319_s1 + $0x600] sm:$0xff]  }
  0xd1   : > { %6290 = vmatpush3.bf16.msra.mxu1 %v6856_v60  ;;  %2958 = vmatprep.mubr.bf16.mxu0 %v2607_v30  ;;  %v6870_v60 = vld [vmem:[%s9319_s1 + $0x5f0] sm:$0xff]   ;;  %v2696_v36 = vor.u32 %v2695_v29, %v2692_v0  ;;  %v2683_v30 = vrot.slane %v2681_v13, 1  ;;  %v5613_v61 = vcombine.low %v3067_v53, %v7022_v39  ;;  %v3161_v6 = vrot.slane %v7028_v28, 2  ;;  %v6888_v10 = vld [vmem:[%s9319_s1 + $0x680] sm:$0xff]   ;;  %v6890_v29 = vld [vmem:[%s9319_s1 + $0x6c8] sm:$0xff]  }
  0xd2   : > { %3031 = vmatprep.mubr.bf16.mxu1 %v2625_v17  ;;  %6245 = vmatprep.subr.bf16.mxu0 %v6857_v7  ;;  %v2678_v52 = vor.u32 %v2677_v45, %v2674_v58  ;;  %v6874_v7 = vld [vmem:[%s9319_s1 + $0x5b0] sm:$0xff]   ;;  %v2686_v17 = vrot.slane %v2684_v23, 2  ;;  %v6889_v23 = vld [vmem:[%s9319_s1 + $0x648] sm:$0xff]  }
  0xd3   : > { %6291 = vmatprep.subr.bf16.mxu1 %v6858_v26  ;;  %v2665_v26 = vrot.slane %v2663_v42, 1  ;;  %v2697_v1 = vsel %vm2485_vm2, %v8173_v22, %v2696_v36  ;;  %v7023_v35 = vld [vmem:[%s7196_s6 + $0x34] ss:$16 sps:$4 sm:$0xff]   ;;  %v3152_v22 = vrot.slane %v5614_v44, 2  ;;  %v8283_v58 = vld [vmem:[%s7196_s6 + $0x50] ss:$16 sps:$4 sm:$0xff]  }
  0xd4   : > { %6246 = vmatpush3.bf16.msra.mxu0 %v6859_v27  ;;  %v2679_v32 = vsel %vm2485_vm2, %v8168_v51, %v2678_v52  ;;  %v3066_v27 = vld [vmem:[%s7196_s6 + $0x10] sm:$0xcc]  ;;  %v2687_v50 = vor.u32 %v2686_v17, %v2683_v30  ;;  %v3155_v45 = vrot.slane %v8283_v58, 2  ;;  %v3167_v30 = vrot.slane %v7893_v24, 2  ;;  %v6906_v58 = vld [vmem:[%s9319_s1 + $0x6e8] sm:$0xff]  }
  0xd5   : > { %6292 = vmatpush3.bf16.msra.mxu1 %v6860_v8  ;;  %6247 = vmatprep.subr.bf16.mxu0 %v6861_v63  ;;  %v5612_v8 = vcombine.high %v3066_v27, %v7021_v2  ;;  %v2669_v38 = vor.u32 %v2668_v55, %v2665_v26  ;;  %v6879_v63 = vld [vmem:[%s9319_s1 + $0x538] sm:$0xff]   ;;  %v8298_v52 = vld [vmem:[%s7196_s6 + $0x74] ss:$16 sps:$4 sm:$0xff]   ;;  %v6892_v55 = vld [vmem:[%s9319_s1 + $0x688] sm:$0xff]  }
  0xd6   : > { %6293 = vmatprep.subr.bf16.mxu1 %v6862_v21  ;;  %v3147_v21 = vrot.slane %v7023_v35, 2  ;;  %v2688_v5 = vsel %vm2485_vm2, %v8204_v54, %v2687_v50  ;;  %v3149_v54 = vrot.slane %v5613_v61, 2  ;;  %v6894_v17 = vld [vmem:[%s9319_s1 + $0x6d0] sm:$0xff]   ;;  %v6897_v35 = vld [vmem:[%s9319_s1 + $0x658] sm:$0xff]   ;;  %v6902_v61 = vld [vmem:[%s9319_s1 + $0x6e0] sm:$0xff]  }
  0xd7   : > { %2959 = vmatmul.mubr.bf16.gmra.mrb[88].mxu0 %v2598_v4  ;;  %v2670_v4 = vsel %vm2485_vm2, %v8192_v48, %v2669_v38  ;;  %v6896_v53 = vld [vmem:[%s9319_s1 + $0x690] sm:$0xff]  }
  0xd8   : > { %3032 = vmatmul.mubr.bf16.gmra.mrb[88].mxu1 %v2616_v25  ;;  %6248 = vmatpush3.bf16.msra.mxu0 %v6863_v20  ;;  %v7024_v20 = vld [vmem:[%s7196_s6 + $0x3c] ss:$16 sps:$4 sm:$0xff]  }
  0xd9   : > { %6294 = vmatpush3.bf16.msra.mxu1 %v6864_v62  ;;  %2966 = vmatprep.mubr.bf16.mxu0 %v2643_v12  ;;  %v3153_v51 = vrot.slane %v7024_v20, 2  ;;  %v3146_v62 = vrot.slane %v5612_v8, 2 }
  0xda   : > { %3039 = vmatprep.mubr.bf16.mxu1 %v2661_v57  ;;  %6249 = vmatprep.subr.bf16.mxu0 %v6865_v9  ;;  %v5611_v9 = vcombine.low %v3066_v27, %v7021_v2 }
  0xdb   : > { %6295 = vmatprep.subr.bf16.mxu1 %v6866_v41  ;;  %v3148_v25 = vsel %vm3142_vm3, %v3146_v62, %v3147_v21  ;;  %v3154_v12 = vsel %vm3142_vm3, %v3152_v22, %v3153_v51  ;;  %v7025_v41 = vld [vmem:[%s7196_s6 + $0x30] ss:$16 sps:$4 sm:$0xff]  }
  0xdc   : > { %6250 = vmatpush3.bf16.msra.mxu0 %v6867_v37  ;;  %v3143_v48 = vrot.slane %v5611_v9, 2  ;;  %v3144_v57 = vrot.slane %v7025_v41, 2  ;;  %v7026_v37 = vld [vmem:[%s7196_s6 + $0x38] ss:$16 sps:$4 sm:$0xff]   ;;  %v6901_v9 = vld [vmem:[%s9319_s1 + $0x660] sm:$0xff]  }
  0xdd   : > { %6296 = vmatpush3.bf16.msra.mxu1 %v6868_v15  ;;  %6251 = vmatprep.subr.bf16.mxu0 %v6869_v33  ;;  %v3150_v15 = vrot.slane %v7026_v37, 2  ;;  %v7027_v33 = vld [vmem:[%s7196_s6 + $0x54] ss:$16 sps:$4 sm:$0xff]  }
  0xde   : > { %6297 = vmatprep.subr.bf16.mxu1 %v6870_v60  ;;  %v3157_v40 = vrot.slane %v7027_v33, 2  ;;  %v3145_v42 = vsel %vm3142_vm3, %v3143_v48, %v3144_v57  ;;  %v8291_v60 = vld [vmem:[%s7196_s6 + $0x58] ss:$16 sps:$4 sm:$0xff]   ;;  %v3156_v8 = vsel %vm3142_vm3, %v3144_v57, %v3155_v45  ;;  %v8366_v57 = vld [vmem:[%s7196_s6 + $0x9c] ss:$16 sps:$4 sm:$0xff]  }
  0xdf   : > { %2967 = vmatmul.mubr.bf16.gmra.mrb[92].mxu0 %v2634_v18  ;;  %v3151_v13 = vsel %vm3142_vm3, %v3149_v54, %v3150_v15  ;;  %v3159_v0 = vrot.slane %v8291_v60, 2  ;;  %v6891_v18 = vld [vmem:[%s9319_s1 + $0x608] sm:$0xff]   ;;  %v3177_v54 = vrot.slane %v8366_v57, 2 }
  0xe0   : > { %3040 = vmatmul.mubr.bf16.gmra.mrb[92].mxu1 %v2652_v31  ;;  %2974 = vmatprep.mubr.bf16.mxu0 %v2679_v32  ;;  %v3158_v36 = vsel %vm3142_vm3, %v3147_v21, %v3157_v40  ;;  %v3163_v31 = vrot.slane %v7887_v47, 2  ;;  %v6893_v32 = vld [vmem:[%s9319_s1 + $0x650] sm:$0xff]   ;;  %v6898_v21 = vld [vmem:[%s9319_s1 + $0x6d8] sm:$0xff]  }
  0xe1   : > { %3047 = vmatprep.mubr.bf16.mxu1 %v2697_v1  ;;  %6252 = vmatpush3.bf16.msra.mxu0 %v6873_v11  ;;  %v3165_v11 = vrot.slane %v8298_v52, 2  ;;  %v6895_v1 = vld [vmem:[%s9319_s1 + $0x610] sm:$0xff]   ;;  %v3160_v44 = vsel %vm3142_vm3, %v3150_v15, %v3159_v0  ;;  %v6903_v15 = vld [vmem:[%s9319_s1 + $0x620] sm:$0xff]   ;;  %v3168_v33 = vsel %vm3142_vm3, %v3159_v0, %v3167_v30  ;;  %v8406_v60 = vld [vmem:[%s7196_s6 + $0x98] ss:$16 sps:$4 sm:$0xff]  }
  0xe2   : > { %6298 = vmatpush3.bf16.msra.mxu1 %v6874_v7  ;;  %6253 = vmatprep.subr.bf16.mxu0 %v6877_v59  ;;  %v8306_v7 = vld [vmem:[%s7196_s6 + $0x7c] ss:$16 sps:$4 sm:$0xff]   ;;  %v3162_v59 = vsel %vm3142_vm3, %v3153_v51, %v3161_v6  ;;  %v3164_v37 = vsel %vm3142_vm3, %v3155_v45, %v3163_v31  ;;  %v3175_v0 = vrot.slane %v8406_v60, 2  ;;  %v8489_v57 = vld [vmem:[%s7196_s6 + $0x48] ss:$16 sps:$4 sm:$0xff]  }
  0xe3   : > { %6299 = vmatprep.subr.bf16.mxu1 %v6878_v14  ;;  %v3169_v26 = vrot.slane %v8306_v7, 2  ;;  %v3166_v50 = vsel %vm3142_vm3, %v3157_v40, %v3165_v11  ;;  %v6904_v40 = vld [vmem:[%s9319_s1 + $0x6a0] sm:$0xff]   ;;  %v8522_v60 = vld [vmem:[%s7196_s6 + $0x6c] ss:$16 sps:$4 sm:$0xff]  }
  0xe4   : > { %v8416_v7 = vld [vmem:[%s7196_s6 + $0x20] sm:$0xcc] }
  0xe5   : > { %6254 = vmatpush3.bf16.msra.mxu0 %v6879_v63 }
  0xe6   : > { %6300 = vmatpush3.bf16.msra.mxu1 %v6880_v56  ;;  %6331 = vmatprep.subr.bf16.mxu0 %v6885_v46  ;;  %v6899_v56 = vld [vmem:[%s9319_s1 + $0x618] sm:$0xff]   ;;  %v3170_v46 = vsel %vm3142_vm3, %v3161_v6, %v3169_v26  ;;  %v8391_v6 = vld [vmem:[%s7196_s6 + $0x90] ss:$16 sps:$4 sm:$0xff]  }
  0xe7   : > { %2975 = vmatmul.mubr.bf16.gmra.mrb[96].mxu0 %v2670_v4  ;;  %6377 = vmatprep.subr.bf16.mxu1 %v6886_v3  ;;  %v6900_v3 = vld [vmem:[%s9319_s1 + $0x698] sm:$0xff]  }
  0xe8   : > { %3048 = vmatmul.mubr.bf16.gmra.mrb[96].mxu1 %v2688_v5  ;;  %3431 = vmatprep.mubr.bf16.mxu0 %v3148_v25 }
  0xe9   : > { %3504 = vmatprep.mubr.bf16.mxu1 %v3154_v12  ;;  %v8360_v12 = vld [vmem:[%s7196_s6 + $0x94] ss:$16 sps:$4 sm:$0xff]  }
  0xea   : > { %v3173_v48 = vrot.slane %v8360_v12, 2 }
  0xec   : > { %v3174_v28 = vsel %vm3142_vm3, %v3165_v11, %v3173_v48 }
  0xef   : > { %3432 = vmatmul.mubr.bf16.vlgmr.msra.gmra.mrb[100].mxu0 %v3145_v42  ;;  %v3171_v42 = vrot.slane %v8391_v6, 2 }
  0xf0   : > { %3505 = vmatmul.mubr.bf16.vlgmr.msra.gmra.mrb[100].mxu1 %v3151_v13  ;;  %6332 = vmatpush3.bf16.msra.mxu0 %v6887_v43 }
  0xf1   : > { %6378 = vmatpush3.bf16.msra.mxu1 %v6888_v10  ;;  %6333 = vmatprep.subr.bf16.mxu0 %v6889_v23  ;;  %v6905_v10 = vld [vmem:[%s9319_s1 + $0x668] sm:$0xff]   ;;  %v3178_v23 = vsel %vm3142_vm3, %v3169_v26, %v3177_v54  ;;  %v3557_v26 = vld [vmem:[%s7196_s6 + $0x30] sm:$0xff] }
  0xf2   : > { %6379 = vmatprep.subr.bf16.mxu1 %v6890_v29  ;;  %3439 = vmatprep.mubr.bf16.mxu0 %v3158_v36  ;;  %v6907_v29 = vld [vmem:[%s9319_s1 + $0x628] sm:$0xff]  }
  0xf3   : > { %3512 = vmatprep.mubr.bf16.mxu1 %v3162_v59  ;;  %v6908_v36 = vld [vmem:[%s9319_s1 + $0x6a8] sm:$0xff]  }
  0xf4   : > { %6334 = vmatpush3.bf16.msra.mxu0 %v6891_v18 }
  0xf5   : > { %6380 = vmatpush3.bf16.msra.mxu1 %v6892_v55  ;;  %6335 = vmatprep.subr.bf16.mxu0 %v6893_v32 }
  0xf6   : > { %6381 = vmatprep.subr.bf16.mxu1 %v6894_v17  ;;  %v6909_v17 = vld [vmem:[%s9319_s1 + $0x670] sm:$0xff]  }
  0xf7   : > { %3440 = vmatmul.mubr.bf16.gmra.mrb[104].mxu0 %v3156_v8 }
  0xf8   : > { %3513 = vmatmul.mubr.bf16.gmra.mrb[104].mxu1 %v3160_v44  ;;  %6336 = vmatpush3.bf16.msra.mxu0 %v6895_v1  ;;  %v3181_v1 = vrot.slane %v8184_v34, 2  ;;  %v8438_v34 = vld [vmem:[%s7196_s6 + $0x44] ss:$16 sps:$4 sm:$0xff]  }
  0xf9   : > { %6382 = vmatpush3.bf16.msra.mxu1 %v6896_v53  ;;  %3447 = vmatprep.mubr.bf16.mxu0 %v3166_v50  ;;  %v3185_v53 = vrot.slane %v8197_v16, 2  ;;  %v3172_v16 = vsel %vm3142_vm3, %v3163_v31, %v3171_v42  ;;  %v6913_v50 = vld [vmem:[%s9319_s1 + $0x678] sm:$0xff]  }
  0xfa   : > { %v5795_v27 = vpop.f32.mrb[0].mxu0  ;;  %3520 = vmatprep.mubr.bf16.mxu1 %v3170_v46  ;;  %6337 = vmatprep.subr.bf16.mxu0 %v6897_v35  ;;  %v8435_v35 = vcombine.high %v8416_v7, %v3557_v26  ;;  %v3182_v24 = vsel %vm3142_vm3, %v3173_v48, %v3181_v1  ;;  %v8486_v48 = vld [vmem:[%s7196_s6 + $0x40] ss:$16 sps:$4 sm:$0xff]  }
  0xfb   : > { %v5796_v2 = vpop.f32.mrb[1].mxu0  ;;  %v5841_v38 = vpop.f32.mrb[0].mxu1  ;;  %6383 = vmatprep.subr.bf16.mxu1 %v6898_v21  ;;  %v3176_v21 = vsel %vm3142_vm3, %v3167_v30, %v3175_v0  ;;  %v8465_v30 = vld [vmem:[%s7196_s6 + $0x4c] ss:$16 sps:$4 sm:$0xff]  }
  0xfc   : > { %v5797_v14 = vadd.f32 %v5796_v2, %v5795_v27  ;;  %v5798_v39 = vpop.f32.mrb[2].mxu0  ;;  %v5842_v20 = vpop.f32.mrb[1].mxu1  ;;  %6338 = vmatpush3.bf16.msra.mxu0 %v6899_v56  ;;  %v6910_v27 = vld [vmem:[%s9319_s1 + $0x6f0] sm:$0xff]   ;;  %v3183_v56 = vrot.slane %v8199_v19, 2  ;;  %v3734_v46 = vrot.slane %v8435_v35, 2  ;;  %v6916_v19 = vld [vmem:[%s9319_s1 + $0x6b8] sm:$0xff]  }
  0xfd   : > { %v5799_v63 = vpop.f32.mrb[3].mxu0  ;;  %v5843_v62 = vadd.f32 %v5842_v20, %v5841_v38  ;;  %v5844_v22 = vpop.f32.mrb[2].mxu1  ;;  %6384 = vmatpush3.bf16.msra.mxu1 %v6900_v3  ;;  %6339 = vmatprep.subr.bf16.mxu0 %v6901_v9  ;;  %v6912_v20 = vld [vmem:[%s9319_s1 + $0x6b0] sm:$0xff]   ;;  %v3735_v3 = vrot.slane %v8438_v34, 2 }
  0xfe   : > { %v5800_v51 = vadd.f32 %v5799_v63, %v5798_v39  ;;  %v5845_v4 = vpop.f32.mrb[3].mxu1  ;;  %6385 = vmatprep.subr.bf16.mxu1 %v6902_v61  ;;  %v3558_v39 = vld [vmem:[%s7196_s6 + $0x38] sm:$0xff]  ;;  %v6911_v63 = vld [vmem:[%s9319_s1 + $0x630] sm:$0xff]  }
  0xff   : > { %v8354_v5 = vadd.f32 %v5843_v62, %v5797_v14  ;;  %v5846_v25 = vadd.f32 %v5845_v4, %v5844_v22  ;;  %3448 = vmatmul.mubr.bf16.gmra.mrb[108].mxu0 %v3164_v37  ;;  %v3556_v14 = vld [vmem:[%s7196_s6 + $0x28] sm:$0xcc]  ;;  %v6914_v62 = vld [vmem:[%s9319_s1 + $0x6f8] sm:$0xff]   ;;  %v3741_v37 = vrot.slane %v8465_v30, 2 }
 0x100   : > { %3521 = vmatmul.mubr.bf16.gmra.mrb[108].mxu1 %v3168_v33  ;;  %6340 = vmatpush3.bf16.msra.mxu0 %v6903_v15  ;;  %v8462_v31 = vcombine.high %v3556_v14, %v3558_v39  ;;  %v6915_v22 = vld [vmem:[%s9319_s1 + $0x638] sm:$0xff]  }
 0x101   : > { %v8363_v41 = vadd.f32 %v5846_v25, %v5800_v51  ;;  %6386 = vmatpush3.bf16.msra.mxu1 %v6904_v40  ;;  %3455 = vmatprep.mubr.bf16.mxu0 %v3174_v28  ;;  %v3179_v51 = vrot.slane %v8187_v49, 2  ;;  %v3186_v49 = vsel %vm3142_vm3, %v3177_v54, %v3185_v53  ;;  %v6927_v25 = vld [vmem:[%s9319_s1 + $0x740] sm:$0xff]   ;;  %v8494_v28 = vcombine.low %v8416_v7, %v3557_v26  ;;  %v8535_v53 = vld [vmem:[%s7196_s6 + $0x68] ss:$16 sps:$4 sm:$0xff]  }
 0x102   : > { %v5801_v43 = vpop.f32.mrb[4].mxu0  ;;  %3528 = vmatprep.mubr.bf16.mxu1 %v3178_v23  ;;  %6341 = vmatprep.subr.bf16.mxu0 %v6905_v10  ;;  %v3740_v54 = vrot.slane %v8462_v31, 2  ;;  %v8513_v7 = vld [vmem:[%s7196_s6 + $0x64] ss:$16 sps:$4 sm:$0xff]  }
 0x103   : > { %v5847_v45 = vpop.f32.mrb[4].mxu1  ;;  %v5802_v13 = vpop.f32.mrb[5].mxu0  ;;  %6387 = vmatprep.subr.bf16.mxu1 %v6906_v58 }
 0x104   : > { %v5803_v52 = vadd.f32 %v5802_v13, %v5801_v43  ;;  %v5848_v11 = vpop.f32.mrb[5].mxu1  ;;  %v5804_v18 = vpop.f32.mrb[6].mxu0  ;;  %6342 = vmatpush3.bf16.msra.mxu0 %v6907_v29  ;;  %v6928_v13 = vld [vmem:[%s9319_s1 + $0x7c0] sm:$0xff]   ;;  %v3742_v6 = vsel %vm3142_vm3, %v3740_v54, %v3741_v37  ;;  %v8568_v54 = vld [vmem:[%s7196_s6 + $0x8c] ss:$16 sps:$4 sm:$0xff]  }
 0x105   : > { %v5849_v55 = vadd.f32 %v5848_v11, %v5847_v45  ;;  %v5850_v59 = vpop.f32.mrb[6].mxu1  ;;  %v5805_v32 = vpop.f32.mrb[7].mxu0  ;;  %6388 = vmatpush3.bf16.msra.mxu1 %v6908_v36  ;;  %6343 = vmatprep.subr.bf16.mxu0 %v6909_v17  ;;  %v8496_v45 = vcombine.low %v3556_v14, %v3558_v39  ;;  %v3180_v11 = vsel %vm3142_vm3, %v3171_v42, %v3179_v51  ;;  %v3731_v42 = vrot.slane %v8494_v28, 2 }
 0x106   : > { %v5806_v2 = vadd.f32 %v5805_v32, %v5804_v18  ;;  %v5851_v8 = vpop.f32.mrb[7].mxu1  ;;  %6389 = vmatprep.subr.bf16.mxu1 %v6910_v27  ;;  %v3184_v18 = vsel %vm3142_vm3, %v3175_v0, %v3183_v56  ;;  %v3736_v36 = vsel %vm3142_vm3, %v3734_v46, %v3735_v3  ;;  %v3732_v0 = vrot.slane %v8486_v48, 2  ;;  %v6932_v56 = vld [vmem:[%s9319_s1 + $0x7c8] sm:$0xff]  }
 0x107   : > { %v8429_v44 = vadd.f32 %v5849_v55, %v5803_v52  ;;  %v5852_v38 = vadd.f32 %v5851_v8, %v5850_v59  ;;  %3456 = vmatmul.mubr.bf16.gmra.mrb[112].mxu0 %v3172_v16  ;;  %v3737_v55 = vrot.slane %v8496_v45, 2  ;;  %v3738_v59 = vrot.slane %v8489_v57, 2  ;;  %v8532_v8 = vld [vmem:[%s7196_s6 + $0x60] ss:$16 sps:$4 sm:$0xff]  }
 0x108   : > { %3529 = vmatmul.mubr.bf16.gmra.mrb[112].mxu1 %v3176_v21  ;;  %3463 = vmatprep.mubr.bf16.mxu0 %v3182_v24  ;;  %v4238_v32 = vshrl.u32 %v8435_v35, 16  ;;  %v3745_v17 = vrot.slane %v8513_v7, 2  ;;  %v4241_v27 = vshll.u32 %v8435_v35, 16  ;;  %v6930_v35 = vld [vmem:[%s9319_s1 + $0x780] sm:$0xff]  }
 0x109   : > { %v8457_v47 = vadd.f32 %v5852_v38, %v5806_v2  ;;  %3536 = vmatprep.mubr.bf16.mxu1 %v3186_v49  ;;  %6344 = vmatpush3.bf16.msra.mxu0 %v6911_v63  ;;  %v3749_v2 = vrot.slane %v8522_v60, 2  ;;  %v6929_v38 = vld [vmem:[%s9319_s1 + $0x700] sm:$0xff]   ;;  %v3733_v49 = vsel %vm3142_vm3, %v3731_v42, %v3732_v0  ;;  %v8604_v42 = vld [vmem:[%s7196_s6 + $0x88] ss:$16 sps:$4 sm:$0xff]  }
 0x10a   : > { %v5807_v4 = vpop.f32.mrb[8].mxu0  ;;  %6390 = vmatpush3.bf16.msra.mxu1 %v6912_v20  ;;  %6345 = vmatprep.subr.bf16.mxu0 %v6913_v50  ;;  %v6931_v20 = vld [vmem:[%s9319_s1 + $0x748] sm:$0xff]  }
 0x10b   : > { %v5853_v9 = vpop.f32.mrb[8].mxu1  ;;  %v5808_v61 = vpop.f32.mrb[9].mxu0  ;;  %6391 = vmatprep.subr.bf16.mxu1 %v6914_v62  ;;  %v8552_v62 = vrot.slane %v4238_v32, 2 }
 0x10c   : > { %v5854_v12 = vpop.f32.mrb[9].mxu1  ;;  %v5809_v15 = vadd.f32 %v5808_v61, %v5807_v4  ;;  %v5810_v40 = vpop.f32.mrb[10].mxu0  ;;  %v3739_v4 = vsel %vm3142_vm3, %v3737_v55, %v3738_v59 }
 0x10d   : > { %v5855_v33 = vadd.f32 %v5854_v12, %v5853_v9  ;;  %v5856_v43 = vpop.f32.mrb[10].mxu1  ;;  %v5811_v10 = vpop.f32.mrb[11].mxu0  ;;  %6346 = vmatpush3.bf16.msra.mxu0 %v6915_v22  ;;  %v8558_v9 = vld [vmem:[%s7196_s6 + $0x84] ss:$16 sps:$4 sm:$0xff]   ;;  %v6933_v12 = vld [vmem:[%s9319_s1 + $0x708] sm:$0xff]  }
 0x10e   : > { %v5857_v58 = vpop.f32.mrb[11].mxu1  ;;  %v5812_v29 = vadd.f32 %v5811_v10, %v5810_v40  ;;  %6392 = vmatpush3.bf16.msra.mxu1 %v6916_v19  ;;  %6423 = vmatprep.subr.bf16.mxu0 %v6927_v25  ;;  %v8560_v19 = vrot.slane %v4241_v27, 3  ;;  %v3743_v40 = vrot.slane %v8532_v8, 2 }
 0x10f   : > { %v8501_v23 = vadd.f32 %v5855_v33, %v5809_v15  ;;  %v5858_v52 = vadd.f32 %v5857_v58, %v5856_v43  ;;  %3464 = vmatmul.mubr.bf16.gmra.mrb[116].mxu0 %v3180_v11  ;;  %6469 = vmatprep.subr.bf16.mxu1 %v6928_v13  ;;  %v3746_v15 = vsel %vm3142_vm3, %v3735_v3, %v3745_v17  ;;  %v3747_v43 = vrot.slane %v8535_v53, 2  ;;  %v6934_v58 = vld [vmem:[%s9319_s1 + $0x788] sm:$0xff]   ;;  %v6941_v3 = vld [vmem:[%s9319_s1 + $0x750] sm:$0xff]  }
 0x110   : > { %3537 = vmatmul.mubr.bf16.gmra.mrb[116].mxu1 %v3184_v18  ;;  %4019 = vmatprep.mubr.bf16.mxu0 %v3736_v36  ;;  %v3750_v33 = vsel %vm3142_vm3, %v3741_v37, %v3749_v2  ;;  %v6942_v37 = vld [vmem:[%s9319_s1 + $0x7d0] sm:$0xff]   ;;  %v3753_v13 = vrot.slane %v8558_v9, 2 }
 0x111   : > { %v8515_v26 = vadd.f32 %v5858_v52, %v5812_v29  ;;  %4092 = vmatprep.mubr.bf16.mxu1 %v3742_v6  ;;  %v4246_v29 = vshrl.u32 %v8438_v34, 16  ;;  %v4249_v52 = vshll.u32 %v8438_v34, 16  ;;  %v8597_v11 = vld [vmem:[%s7196_s6 + $0x80] ss:$16 sps:$4 sm:$0xff]   ;;  %v3757_v6 = vrot.slane %v8568_v54, 2 }
 0x112   : > { %v5813_v1 = vpop.f32.mrb[12].mxu0  ;;  %v6943_v36 = vld [vmem:[%s9319_s1 + $0x710] sm:$0xff]  }
 0x113   : > { %v5859_v14 = vpop.f32.mrb[12].mxu1  ;;  %v5814_v39 = vpop.f32.mrb[13].mxu0  ;;  %v6944_v34 = vld [vmem:[%s9319_s1 + $0x790] sm:$0xff]  }
 0x114   : > { %v5815_v63 = vadd.f32 %v5814_v39, %v5813_v1  ;;  %v5860_v16 = vpop.f32.mrb[13].mxu1  ;;  %v5816_v21 = vpop.f32.mrb[14].mxu0  ;;  %v3744_v39 = vsel %vm3142_vm3, %v3732_v0, %v3743_v40  ;;  %v6950_v0 = vld [vmem:[%s9319_s1 + $0x7d8] sm:$0xff]  }
 0x115   : > { %v5861_v51 = vadd.f32 %v5860_v16, %v5859_v14  ;;  %v5862_v50 = vpop.f32.mrb[14].mxu1  ;;  %v5817_v24 = vpop.f32.mrb[15].mxu0 }
 0x116   : > { %v5818_v22 = vadd.f32 %v5817_v24, %v5816_v21  ;;  %v5863_v46 = vpop.f32.mrb[15].mxu1  ;;  %v3754_v24 = vsel %vm3142_vm3, %v3745_v17, %v3753_v13  ;;  %v6954_v17 = vld [vmem:[%s9319_s1 + $0x798] sm:$0xff]  }
 0x117   : > { %v8562_v25 = vadd.f32 %v5861_v51, %v5815_v63  ;;  %v5864_v61 = vadd.f32 %v5863_v46, %v5862_v50  ;;  %4020 = vmatmul.mubr.bf16.vlgmr.msra.gmra.mrb[120].mxu0 %v3733_v49  ;;  %v8617_v63 = vrot.slane %v4246_v29, 2  ;;  %v3751_v49 = vrot.slane %v8597_v11, 2 }
 0x118   : > { %4093 = vmatmul.mubr.bf16.vlgmr.msra.gmra.mrb[120].mxu1 %v3739_v4  ;;  %6424 = vmatpush3.bf16.msra.mxu0 %v6929_v38  ;;  %v6949_v38 = vld [vmem:[%s9319_s1 + $0x758] sm:$0xff]   ;;  %v3758_v46 = vsel %vm3142_vm3, %v3749_v2, %v3757_v6  ;;  %v3755_v4 = vrot.slane %v8604_v42, 2  ;;  %v8656_v2 = vrot.slane %v4249_v52, 3  ;;  %v4280_v29 = vshrl.u32 %v8465_v30, 16  ;;  %v6957_v52 = vld [vmem:[%s9319_s1 + $0x720] sm:$0xff]  }
 0x119   : > { %v8582_v10 = vadd.f32 %v5864_v61, %v5818_v22  ;;  %6470 = vmatpush3.bf16.msra.mxu1 %v6930_v35  ;;  %6425 = vmatprep.subr.bf16.mxu0 %v6931_v20  ;;  %v3748_v20 = vsel %vm3142_vm3, %v3738_v59, %v3747_v43  ;;  %v6953_v59 = vld [vmem:[%s9319_s1 + $0x718] sm:$0xff]   ;;  %v6955_v61 = vld [vmem:[%s9319_s1 + $0x760] sm:$0xff]  }
 0x11a   : > { %v5819_v18 = vpop.f32.mrb[16].mxu0  ;;  %6471 = vmatprep.subr.bf16.mxu1 %v6932_v56  ;;  %4027 = vmatprep.mubr.bf16.mxu0 %v3746_v15  ;;  %v8654_v15 = vld [vmem:[%s7196_s6 + $0xa4] ss:$16 sps:$4 sm:$0xff]  }
 0x11b   : > { %v5865_v55 = vpop.f32.mrb[16].mxu1  ;;  %v5820_v32 = vpop.f32.mrb[17].mxu0  ;;  %4100 = vmatprep.mubr.bf16.mxu1 %v3750_v33  ;;  %v4272_v33 = vshrl.u32 %v8462_v31, 16 }
 0x11c   : > { %v5821_v27 = vadd.f32 %v5820_v32, %v5819_v18  ;;  %v5866_v1 = vpop.f32.mrb[17].mxu1  ;;  %v5822_v14 = vpop.f32.mrb[18].mxu0  ;;  %6426 = vmatpush3.bf16.msra.mxu0 %v6933_v12  ;;  %v6956_v12 = vld [vmem:[%s9319_s1 + $0x7e0] sm:$0xff]   ;;  %v8674_v32 = vld [vmem:[%s7196_s6 + $0xa8] ss:$16 sps:$4 sm:$0xff]  }
 0x11d   : > { %v5867_v16 = vadd.f32 %v5866_v1, %v5865_v55  ;;  %v5868_v21 = vpop.f32.mrb[18].mxu1  ;;  %v5823_v35 = vpop.f32.mrb[19].mxu0  ;;  %6472 = vmatpush3.bf16.msra.mxu1 %v6934_v58  ;;  %6427 = vmatprep.subr.bf16.mxu0 %v6941_v3  ;;  %v8662_v3 = vld [vmem:[%s7196_s6 + $0xac] ss:$16 sps:$4 sm:$0xff]   ;;  %v8671_v55 = vld [vmem:[%s7196_s6 + $0xa0] ss:$16 sps:$4 sm:$0xff]  }
 0x11e   : > { %v5824_v51 = vadd.f32 %v5823_v35, %v5822_v14  ;;  %v5869_v50 = vpop.f32.mrb[19].mxu1  ;;  %6473 = vmatprep.subr.bf16.mxu1 %v6942_v37  ;;  %v4275_v37 = vshll.u32 %v8462_v31, 16  ;;  %v6958_v31 = vld [vmem:[%s9319_s1 + $0x7a0] sm:$0xff]   ;;  %v3765_v1 = vrot.slane %v8662_v3, 2  ;;  %v4283_v14 = vshll.u32 %v8465_v30, 16 }
 0x11f   : > { %v8636_v56 = vadd.f32 %v5867_v16, %v5821_v27  ;;  %v5870_v22 = vadd.f32 %v5869_v50, %v5868_v21  ;;  %4028 = vmatmul.mubr.bf16.gmra.mrb[124].mxu0 %v3744_v39  ;;  %v3752_v21 = vsel %vm3142_vm3, %v3743_v40, %v3751_v49  ;;  %v3759_v35 = vrot.slane %v8671_v55, 2 }
 0x120   : > { %4101 = vmatmul.mubr.bf16.gmra.mrb[124].mxu1 %v3748_v20  ;;  %6428 = vmatpush3.bf16.msra.mxu0 %v6943_v36  ;;  %v3761_v36 = vrot.slane %v8654_v15, 2  ;;  %v3763_v20 = vrot.slane %v8674_v32, 2 }
 0x121   : > { %v8659_v58 = vadd.f32 %v5870_v22, %v5824_v51  ;;  %6474 = vmatpush3.bf16.msra.mxu1 %v6944_v34  ;;  %4035 = vmatprep.mubr.bf16.mxu0 %v3754_v24  ;;  %v3756_v22 = vsel %vm3142_vm3, %v3747_v43, %v3755_v4  ;;  %v6967_v43 = vld [vmem:[%s9319_s1 + $0x728] sm:$0xff]  }
 0x122   : > { %v5887_v18 = vpop.f32.mrb[20].mxu0  ;;  %4108 = vmatprep.mubr.bf16.mxu1 %v3758_v46  ;;  %6429 = vmatprep.subr.bf16.mxu0 %v6949_v38 }
 0x123   : > { %v5933_v34 = vpop.f32.mrb[20].mxu1  ;;  %v5888_v27 = vpop.f32.mrb[21].mxu0  ;;  %6475 = vmatprep.subr.bf16.mxu1 %v6950_v0  ;;  %v6965_v0 = vld [vmem:[%s9319_s1 + $0x768] sm:$0xff]  }
 0x124   : > { %v5889_v39 = vadd.f32 %v5888_v27, %v5887_v18  ;;  %v5934_v38 = vpop.f32.mrb[21].mxu1  ;;  %v5890_v16 = vpop.f32.mrb[22].mxu0  ;;  %6430 = vmatpush3.bf16.msra.mxu0 %v6953_v59  ;;  %v3762_v18 = vsel %vm3142_vm3, %v3753_v13, %v3761_v36 }
 0x125   : > { %v5935_v51 = vadd.f32 %v5934_v38, %v5933_v34  ;;  %v5936_v50 = vpop.f32.mrb[22].mxu1  ;;  %v5891_v24 = vpop.f32.mrb[23].mxu0  ;;  %6476 = vmatpush3.bf16.msra.mxu1 %v6954_v17  ;;  %6431 = vmatprep.subr.bf16.mxu0 %v6955_v61  ;;  %v6966_v34 = vld [vmem:[%s9319_s1 + $0x7e8] sm:$0xff]   ;;  %v8713_v17 = vrot.slane %v4272_v33, 2  ;;  %v4282_v33 = vrot.slane %v4280_v29, 2 }
 0x126   : > { %v1221_v40 = vadd.f32 %v5889_v39, %v8354_v5  ;;  %v5892_v59 = vadd.f32 %v5891_v24, %v5890_v16  ;;  %v5937_v46 = vpop.f32.mrb[23].mxu1  ;;  %6477 = vmatprep.subr.bf16.mxu1 %v6956_v12  ;;  %v3766_v5 = vsel %vm3142_vm3, %v3757_v6, %v3765_v1  ;;  %v6968_v12 = vld [vmem:[%s9319_s1 + $0x7a8] sm:$0xff]   ;;  %v8721_v39 = vrot.slane %v4275_v37, 3  ;;  %v6969_v6 = vld [vmem:[%s9319_s1 + $0x770] sm:$0xff]  }
 0x127   : > { %v5938_v27 = vadd.f32 %v5937_v46, %v5936_v50  ;;  %4036 = vmatmul.mubr.bf16.gmra.mrb[128].mxu0 %v3752_v21  ;;  %v3576_v21 = vld [vmem:[%s7196_s6 + $0xc8] sm:$0x33]  ;;  %v6973_v46 = vld [vmem:[%s9319_s1 + $0x730] sm:$0xff]  }
 0x128   : > { %v8715_v13 = vadd.f32 %v5935_v51, %v1221_v40  ;;  %v1224_v61 = vadd.f32 %v5892_v59, %v8363_v41  ;;  %4109 = vmatmul.mubr.bf16.gmra.mrb[128].mxu1 %v3756_v22  ;;  %6432 = vmatpush3.bf16.msra.mxu0 %v6957_v52  ;;  %v6970_v41 = vld [vmem:[%s9319_s1 + $0x7f0] sm:$0xff]   ;;  %v3575_v52 = vld [vmem:[%s7196_s6 + $0xc0] sm:$0x33]  ;;  %v5670_v50 = vcombine.high %v3576_v21, %v3576_v21 }
 0x129   : > { %6478 = vmatpush3.bf16.msra.mxu1 %v6958_v31  ;;  %4043 = vmatprep.mubr.bf16.mxu0 %v3762_v18  ;;  %v5668_v31 = vcombine.high %v3575_v52, %v3575_v52  ;;  %v5667_v24 = vcombine.low %v3575_v52, %v3575_v52  ;;  %v5669_v22 = vcombine.low %v3576_v21, %v3576_v21  ;;  %v6974_v18 = vld [vmem:[%s9319_s1 + $0x7b0] sm:$0xff]  }
 0x12a   : > { %v8726_v38 = vadd.f32 %v5938_v27, %v1224_v61  ;;  %v5893_v16 = vpop.f32.mrb[24].mxu0  ;;  %4116 = vmatprep.mubr.bf16.mxu1 %v3766_v5  ;;  %6433 = vmatprep.subr.bf16.mxu0 %v6965_v0  ;;  %v3760_v0 = vsel %vm3142_vm3, %v3751_v49, %v3759_v35  ;;  %v8748_v27 = vor.u32 %v8656_v2, %v8617_v63  ;;  %v3773_v52 = vrot.slane %v5670_v50, 2 }
 0x12b   : > { %v5939_v37 = vpop.f32.mrb[24].mxu1  ;;  %v5894_v51 = vpop.f32.mrb[25].mxu0  ;;  %6479 = vmatprep.subr.bf16.mxu1 %v6966_v34  ;;  %v4244_v34 = vor.u32 %v8560_v19, %v8552_v62  ;;  %v3764_v49 = vsel %vm3142_vm3, %v3755_v4, %v3763_v20  ;;  %v3767_v63 = vrot.slane %v5667_v24, 2  ;;  %v3771_v2 = vrot.slane %v5669_v22, 2 }
 0x12c   : > { %v5895_v40 = vadd.f32 %v5894_v51, %v5893_v16  ;;  %v5940_v29 = vpop.f32.mrb[25].mxu1  ;;  %v5896_v59 = vpop.f32.mrb[26].mxu0  ;;  %6434 = vmatpush3.bf16.msra.mxu0 %v6967_v43  ;;  %v3769_v43 = vrot.slane %v5668_v31, 2  ;;  %v4285_v31 = vrot.slane %v4283_v14, 3  ;;  %v4278_v50 = vor.u32 %v8721_v39, %v8713_v17 }
 0x12d   : > { %v5941_v5 = vadd.f32 %v5940_v29, %v5939_v37  ;;  %v5942_v61 = vpop.f32.mrb[26].mxu1  ;;  %v5897_v16 = vpop.f32.mrb[27].mxu0  ;;  %6480 = vmatpush3.bf16.msra.mxu1 %v6968_v12  ;;  %6435 = vmatprep.subr.bf16.mxu0 %v6969_v6  ;;  %v6977_v37 = vld [vmem:[%s9319_s1 + $0x778] sm:$0xff]   ;;  %v3774_v12 = vsel %vm3142_vm3, %v3765_v1, %v3773_v52  ;;  %v4221_v24 = vshrl.u32 %v8494_v28, 16  ;;  %v4229_v29 = vshrl.u32 %v8486_v48, 16 }
 0x12e   : > { %v1229_v21 = vadd.f32 %v5895_v40, %v8429_v44  ;;  %v5898_v62 = vadd.f32 %v5897_v16, %v5896_v59  ;;  %v5943_v19 = vpop.f32.mrb[27].mxu1  ;;  %6481 = vmatprep.subr.bf16.mxu1 %v6970_v41  ;;  %v3770_v4 = vsel %vm3142_vm3, %v3761_v36, %v3769_v43  ;;  %v6978_v41 = vld [vmem:[%s9319_s1 + $0x7f8] sm:$0xff]   ;;  %v3768_v36 = vsel %vm3142_vm3, %v3759_v35, %v3767_v63 }
 0x12f   : > { %v5944_v51 = vadd.f32 %v5943_v19, %v5942_v61  ;;  %4044 = vmatmul.mubr.bf16.gmra.mrb[132].mxu0 %v3760_v0  ;;  %v6979_v1 = vld [vmem:[%s9319_s1 + $0x738] sm:$0xff]   ;;  %v8789_v22 = vor.u32 %v4285_v31, %v4282_v33  ;;  %v4224_v40 = vshll.u32 %v8494_v28, 16  ;;  %v4223_v17 = vrot.slane %v4221_v24, 2 }
 0x130   : > { %v8765_v44 = vadd.f32 %v5941_v5, %v1229_v21  ;;  %v1232_v6 = vadd.f32 %v5898_v62, %v8457_v47  ;;  %4117 = vmatmul.mubr.bf16.gmra.mrb[132].mxu1 %v3764_v49  ;;  %4051 = vmatprep.mubr.bf16.mxu0 %v3770_v4  ;;  %v4253_v47 = vsel %vm4219_vm4, %v4244_v34, %v8748_v27  ;;  %v6980_v35 = vld [vmem:[%s9319_s1 + $0x7b8] sm:$0xff]   ;;  %v4232_v39 = vshll.u32 %v8486_v48, 16 }
 0x131   : > { %4124 = vmatprep.mubr.bf16.mxu1 %v3774_v12  ;;  %6436 = vmatpush3.bf16.msra.mxu0 %v6973_v46  ;;  %v4255_v46 = vshrl.u32 %v8496_v45, 16  ;;  %v3772_v33 = vsel %vm3142_vm3, %v3763_v20, %v3771_v2  ;;  %v4226_v28 = vrot.slane %v4224_v40, 3  ;;  %v4231_v16 = vrot.slane %v4229_v29, 2 }
 0x132   : > { %v8784_v30 = vadd.f32 %v5944_v51, %v1232_v6  ;;  %v5899_v14 = vpop.f32.mrb[28].mxu0  ;;  %6482 = vmatpush3.bf16.msra.mxu1 %v6974_v18  ;;  %6437 = vmatprep.subr.bf16.mxu0 %v6977_v37  ;;  %v4258_v18 = vshll.u32 %v8496_v45, 16  ;;  %v4234_v21 = vrot.slane %v4232_v39, 3  ;;  %v6981_v45 = vld [vmem:[%s9319_s1 + $0x840] sm:$0xff]   ;;  %v4287_v20 = vsel %vm4219_vm4, %v4278_v50, %v8789_v22 }
 0x133   : > { %v5945_v59 = vpop.f32.mrb[28].mxu1  ;;  %v5900_v0 = vpop.f32.mrb[29].mxu0  ;;  %6483 = vmatprep.subr.bf16.mxu1 %v6978_v41  ;;  %v4257_v62 = vrot.slane %v4255_v46, 2  ;;  %v4263_v2 = vshrl.u32 %v8489_v57, 16  ;;  %v4227_v4 = vor.u32 %v4226_v28, %v4223_v17  ;;  %v4266_v12 = vshll.u32 %v8489_v57, 16  ;;  %v6982_v6 = vld [vmem:[%s9319_s1 + $0x8c0] sm:$0xff]  }
 0x134   : > { %v5901_v34 = vadd.f32 %v5900_v0, %v5899_v14  ;;  %v5946_v5 = vpop.f32.mrb[29].mxu1  ;;  %v5902_v61 = vpop.f32.mrb[30].mxu0  ;;  %v4260_v48 = vrot.slane %v4258_v18, 3  ;;  %v8813_v31 = vor.u32 %v4234_v21, %v4231_v16  ;;  %v6983_v14 = vld [vmem:[%s9319_s1 + $0x800] sm:$0xff]   ;;  %v4316_v21 = vshrl.u32 %v8522_v60, 16 }
 0x135   : > { %v5947_v49 = vadd.f32 %v5946_v5, %v5945_v59  ;;  %v5948_v43 = vpop.f32.mrb[30].mxu1  ;;  %v5903_v52 = vpop.f32.mrb[31].mxu0  ;;  %6438 = vmatpush3.bf16.msra.mxu0 %v6979_v1  ;;  %v4265_v1 = vrot.slane %v4263_v2, 2 }
 0x136   : > { %v1237_v19 = vadd.f32 %v5901_v34, %v8501_v23  ;;  %v5904_v63 = vadd.f32 %v5903_v52, %v5902_v61  ;;  %v5949_v37 = vpop.f32.mrb[31].mxu1  ;;  %6484 = vmatpush3.bf16.msra.mxu1 %v6980_v35  ;;  %6515 = vmatprep.subr.bf16.mxu0 %v6981_v45  ;;  %v4261_v50 = vor.u32 %v4260_v48, %v4257_v62  ;;  %v6986_v61 = vld [vmem:[%s9319_s1 + $0x8c8] sm:$0xff]   ;;  %v4301_v52 = vshll.u32 %v8513_v7, 16 }
 0x137   : > { %v5950_v51 = vadd.f32 %v5949_v37, %v5948_v43  ;;  %4052 = vmatmul.mubr.bf16.gmra.mrb[136].mxu0 %v3768_v36  ;;  %v4268_v36 = vrot.slane %v4266_v12, 3  ;;  %6561 = vmatprep.subr.bf16.mxu1 %v6982_v6  ;;  %v4236_v39 = vsel %vm4219_vm4, %v4227_v4, %v8813_v31  ;;  %v6987_v43 = vld [vmem:[%s9319_s1 + $0x808] sm:$0xff]   ;;  %v4292_v4 = vshll.u32 %v8532_v8, 16 }
 0x138   : > { %v8810_v41 = vadd.f32 %v5947_v49, %v1237_v19  ;;  %v1240_v23 = vadd.f32 %v5904_v63, %v8515_v26  ;;  %4125 = vmatmul.mubr.bf16.gmra.mrb[136].mxu1 %v3772_v33  ;;  %4676 = vmatprep.mubr.bf16.mxu0 %v4253_v47  ;;  %v6984_v26 = vld [vmem:[%s9319_s1 + $0x880] sm:$0xff]   ;;  %v6985_v47 = vld [vmem:[%s9319_s1 + $0x848] sm:$0xff]   ;;  %v4298_v33 = vshrl.u32 %v8513_v7, 16  ;;  %v4319_v19 = vshll.u32 %v8522_v60, 16 }
 0x139   : > { %4749 = vmatprep.mubr.bf16.mxu1 %v4287_v20  ;;  %v8820_v29 = vor.u32 %v4268_v36, %v4265_v1  ;;  %v6988_v48 = vld [vmem:[%s9319_s1 + $0x888] sm:$0xff]   ;;  %v4303_v7 = vrot.slane %v4301_v52, 3  ;;  %v4318_v20 = vrot.slane %v4316_v21, 2  ;;  %v4307_v12 = vshrl.u32 %v8535_v53, 16  ;;  %v6989_v1 = vld [vmem:[%s9319_s1 + $0x850] sm:$0xff]  }
 0x13a   : > { %v8815_v24 = vadd.f32 %v5950_v51, %v1240_v23  ;;  %v5905_v57 = vpop.f32.mrb[32].mxu0  ;;  %v4300_v45 = vrot.slane %v4298_v33, 2  ;;  %v4321_v2 = vrot.slane %v4319_v19, 3  ;;  %v6993_v33 = vld [vmem:[%s9319_s1 + $0x858] sm:$0xff]  }
 0x13b   : > { %v5951_v35 = vpop.f32.mrb[32].mxu1  ;;  %v5906_v40 = vpop.f32.mrb[33].mxu0  ;;  %v4270_v5 = vsel %vm4219_vm4, %v4261_v50, %v8820_v29  ;;  %v6990_v50 = vld [vmem:[%s9319_s1 + $0x8d0] sm:$0xff]  }
 0x13c   : > { %v5907_v59 = vadd.f32 %v5906_v40, %v5905_v57  ;;  %v5952_v0 = vpop.f32.mrb[33].mxu1  ;;  %v5908_v17 = vpop.f32.mrb[34].mxu0  ;;  %v8854_v23 = vor.u32 %v4303_v7, %v4300_v45  ;;  %v8863_v57 = vor.u32 %v4321_v2, %v4318_v20  ;;  %v6991_v40 = vld [vmem:[%s9319_s1 + $0x810] sm:$0xff]   ;;  %v4325_v2 = vshrl.u32 %v8597_v11, 16 }
 0x13d   : > { %v5953_v46 = vadd.f32 %v5952_v0, %v5951_v35  ;;  %v5954_v18 = vpop.f32.mrb[34].mxu1  ;;  %v5909_v34 = vpop.f32.mrb[35].mxu0  ;;  %v4309_v35 = vrot.slane %v4307_v12, 2  ;;  %v4343_v12 = vshrl.u32 %v8604_v42, 16 }
 0x13e   : > { %v1245_v28 = vadd.f32 %v5907_v59, %v8562_v25  ;;  %v5910_v16 = vadd.f32 %v5909_v34, %v5908_v17  ;;  %v5955_v49 = vpop.f32.mrb[35].mxu1  ;;  %v4289_v25 = vshrl.u32 %v8532_v8, 16  ;;  %v4305_v59 = vsel %vm4219_vm4, %v8748_v27, %v8854_v23  ;;  %v6992_v17 = vld [vmem:[%s9319_s1 + $0x890] sm:$0xff]  }
 0x13f   : > { %v5956_v62 = vadd.f32 %v5955_v49, %v5954_v18  ;;  %4677 = vmatmul.mubr.bf16.vlgmr.msra.gmra.mrb[140].mxu0 %v4236_v39  ;;  %v4334_v39 = vshrl.u32 %v8558_v9, 16  ;;  %v4337_v27 = vshll.u32 %v8558_v9, 16 }
 0x140   : > { %v8847_v63 = vadd.f32 %v5953_v46, %v1245_v28  ;;  %v1248_v37 = vadd.f32 %v5910_v16, %v8582_v10  ;;  %4750 = vmatmul.mubr.bf16.vlgmr.msra.gmra.mrb[140].mxu1 %v4270_v5  ;;  %6516 = vmatpush3.bf16.msra.mxu0 %v6983_v14  ;;  %v4291_v51 = vrot.slane %v4289_v25, 2  ;;  %v4310_v10 = vshll.u32 %v8535_v53, 16 }
 0x141   : > { %6562 = vmatpush3.bf16.msra.mxu1 %v6984_v26  ;;  %6517 = vmatprep.subr.bf16.mxu0 %v6985_v47  ;;  %v4294_v14 = vrot.slane %v4292_v4, 3  ;;  %v4323_v5 = vsel %vm4219_vm4, %v8789_v22, %v8863_v57  ;;  %v4336_v52 = vrot.slane %v4334_v39, 2  ;;  %v4339_v9 = vrot.slane %v4337_v27, 3 }
 0x142   : > { %v8852_v6 = vadd.f32 %v5956_v62, %v1248_v37  ;;  %v5911_v60 = vpop.f32.mrb[36].mxu0  ;;  %6563 = vmatprep.subr.bf16.mxu1 %v6986_v61  ;;  %v4312_v0 = vrot.slane %v4310_v10, 3  ;;  %4684 = vmatprep.mubr.bf16.mxu0 %v4305_v59  ;;  %v4352_v62 = vshrl.u32 %v8568_v54, 16  ;;  %v4355_v25 = vshll.u32 %v8568_v54, 16  ;;  %v6996_v37 = vld [vmem:[%s9319_s1 + $0x898] sm:$0xff]  }
 0x143   : > { %v5957_v36 = vpop.f32.mrb[36].mxu1  ;;  %v5912_v8 = vpop.f32.mrb[37].mxu0  ;;  %v8878_v61 = vor.u32 %v4294_v14, %v4291_v51  ;;  %4757 = vmatprep.mubr.bf16.mxu1 %v4323_v5  ;;  %v8907_v7 = vor.u32 %v4339_v9, %v4336_v52  ;;  %v6997_v51 = vld [vmem:[%s9319_s1 + $0x860] sm:$0xff]   ;;  %v4391_v52 = vshll.u32 %v8662_v3, 16 }
 0x144   : > { %v5913_v26 = vadd.f32 %v5912_v8, %v5911_v60  ;;  %v5958_v53 = vpop.f32.mrb[37].mxu1  ;;  %v5914_v47 = vpop.f32.mrb[38].mxu0  ;;  %6518 = vmatpush3.bf16.msra.mxu0 %v6987_v43  ;;  %v8885_v43 = vor.u32 %v4312_v0, %v4309_v35  ;;  %v4354_v20 = vrot.slane %v4352_v62, 2  ;;  %v4357_v4 = vrot.slane %v4355_v25, 3  ;;  %v7001_v62 = vld [vmem:[%s9319_s1 + $0x868] sm:$0xff]  }
 0x145   : > { %v5959_v46 = vadd.f32 %v5958_v53, %v5957_v36  ;;  %v5960_v18 = vpop.f32.mrb[38].mxu1  ;;  %v5915_v34 = vpop.f32.mrb[39].mxu0  ;;  %6564 = vmatpush3.bf16.msra.mxu1 %v6988_v48  ;;  %6519 = vmatprep.subr.bf16.mxu0 %v6989_v1  ;;  %v4296_v22 = vsel %vm4219_vm4, %v8813_v31, %v8878_v61  ;;  %v6995_v48 = vld [vmem:[%s9319_s1 + $0x818] sm:$0xff]   ;;  %v4346_v60 = vshll.u32 %v8604_v42, 16 }
 0x146   : > { %v1253_v28 = vadd.f32 %v5913_v26, %v8636_v56  ;;  %v5916_v16 = vadd.f32 %v5915_v34, %v5914_v47  ;;  %v5961_v49 = vpop.f32.mrb[39].mxu1  ;;  %6565 = vmatprep.subr.bf16.mxu1 %v6990_v50  ;;  %v6994_v56 = vld [vmem:[%s9319_s1 + $0x8d8] sm:$0xff]   ;;  %v4314_v31 = vsel %vm4219_vm4, %v8820_v29, %v8885_v43  ;;  %v4327_v50 = vrot.slane %v4325_v2, 2 }
 0x147   : > { %v5962_v21 = vadd.f32 %v5961_v49, %v5960_v18  ;;  %4685 = vmatmul.mubr.bf16.gmra.mrb[144].mxu0 %v4296_v22  ;;  %v4345_v26 = vrot.slane %v4343_v12, 2  ;;  %v4348_v53 = vrot.slane %v4346_v60, 3  ;;  %v6998_v18 = vld [vmem:[%s9319_s1 + $0x8e0] sm:$0xff]   ;;  %v4373_v49 = vshll.u32 %v8654_v15, 16 }
 0x148   : > { %v8897_v45 = vadd.f32 %v5959_v46, %v1253_v28  ;;  %v1256_v19 = vadd.f32 %v5916_v16, %v8659_v58  ;;  %4758 = vmatmul.mubr.bf16.gmra.mrb[144].mxu1 %v4314_v31  ;;  %6520 = vmatpush3.bf16.msra.mxu0 %v6991_v40  ;;  %v4328_v58 = vshll.u32 %v8597_v11, 16  ;;  %v4341_v11 = vsel %vm4219_vm4, %v8854_v23, %v8907_v7  ;;  %v7000_v16 = vld [vmem:[%s9319_s1 + $0x8a0] sm:$0xff]   ;;  %v7003_v31 = vld [vmem:[%s9319_s1 + $0x828] sm:$0xff]  }
 0x149   : > { %6566 = vmatpush3.bf16.msra.mxu1 %v6992_v17  ;;  %6521 = vmatprep.subr.bf16.mxu0 %v6993_v33  ;;  %v8921_v40 = vor.u32 %v4357_v4, %v4354_v20  ;;  %v8928_v46 = vor.u32 %v4348_v53, %v4345_v26  ;;  %v6999_v33 = vld [vmem:[%s9319_s1 + $0x820] sm:$0xff]  }
 0x14a   : > { %v8914_v29 = vadd.f32 %v5962_v21, %v1256_v19  ;;  %v5979_v54 = vpop.f32.mrb[40].mxu0  ;;  %6567 = vmatprep.subr.bf16.mxu1 %v6994_v56  ;;  %v4330_v36 = vrot.slane %v4328_v58, 3  ;;  %4692 = vmatprep.mubr.bf16.mxu0 %v4341_v11  ;;  %v4364_v19 = vshll.u32 %v8671_v55, 16  ;;  %v4379_v58 = vshrl.u32 %v8674_v32, 16 }
 0x14b   : > { %v6025_v10 = vpop.f32.mrb[40].mxu1  ;;  %v5980_v1 = vpop.f32.mrb[41].mxu0  ;;  %v4359_v23 = vsel %vm4219_vm4, %v8863_v57, %v8921_v40  ;;  %v4370_v57 = vshrl.u32 %v8654_v15, 16  ;;  %v4350_v28 = vsel %vm4219_vm4, %v8885_v43, %v8928_v46  ;;  %v4361_v43 = vshrl.u32 %v8671_v55, 16  ;;  %v7002_v15 = vld [vmem:[%s9319_s1 + $0x8e8] sm:$0xff]  }
 0x14c   : > { %v5981_v8 = vadd.f32 %v5980_v1, %v5979_v54  ;;  %v6026_v14 = vpop.f32.mrb[41].mxu1  ;;  %v5982_v35 = vpop.f32.mrb[42].mxu0  ;;  %v8923_v0 = vor.u32 %v4330_v36, %v4327_v50  ;;  %6522 = vmatpush3.bf16.msra.mxu0 %v6995_v48  ;;  %4765 = vmatprep.mubr.bf16.mxu1 %v4359_v23  ;;  %v7004_v55 = vld [vmem:[%s9319_s1 + $0x8a8] sm:$0xff]   ;;  %v7005_v1 = vld [vmem:[%s9319_s1 + $0x870] sm:$0xff]   ;;  %v4381_v36 = vrot.slane %v4379_v58, 2 }
 0x14d   : > { %v6027_v47 = vadd.f32 %v6026_v14, %v6025_v10  ;;  %v6028_v59 = vpop.f32.mrb[42].mxu1  ;;  %v5983_v42 = vpop.f32.mrb[43].mxu0  ;;  %6568 = vmatpush3.bf16.msra.mxu1 %v6996_v37  ;;  %6523 = vmatprep.subr.bf16.mxu0 %v6997_v51  ;;  %v4372_v9 = vrot.slane %v4370_v57, 2  ;;  %v4363_v2 = vrot.slane %v4361_v43, 2  ;;  %v4382_v51 = vshll.u32 %v8674_v32, 16 }
 0x14e   : > { %v5984_v17 = vadd.f32 %v5983_v42, %v5982_v35  ;;  %v6029_v39 = vpop.f32.mrb[43].mxu1  ;;  %v4332_v27 = vsel %vm4219_vm4, %v8878_v61, %v8923_v0  ;;  %6569 = vmatprep.subr.bf16.mxu1 %v6998_v18  ;;  %v4388_v61 = vshrl.u32 %v8662_v3, 16  ;;  %v4375_v3 = vrot.slane %v4373_v49, 3 }
 0x14f   : > { %v1773_v34 = vadd.f32 %v6027_v47, %v5981_v8  ;;  %v6030_v5 = vadd.f32 %v6029_v39, %v6028_v59  ;;  %4693 = vmatmul.mubr.bf16.gmra.mrb[148].mxu0 %v4332_v27  ;;  %v4366_v10 = vrot.slane %v4364_v19, 3  ;;  %v4384_v8 = vrot.slane %v4382_v51, 3  ;;  %v7006_v59 = vld [vmem:[%s9319_s1 + $0x8f0] sm:$0xff]  }
 0x150   : > { %4766 = vmatmul.mubr.bf16.gmra.mrb[148].mxu1 %v4350_v28  ;;  %6524 = vmatpush3.bf16.msra.mxu0 %v6999_v33  ;;  %v4390_v48 = vrot.slane %v4388_v61, 2  ;;  %v8971_v60 = vor.u32 %v4375_v3, %v4372_v9 }
 0x151   : > { %v8950_v21 = vadd.f32 %v1773_v34, %v8715_v13  ;;  %v1776_v22 = vadd.f32 %v6030_v5, %v5984_v17  ;;  %6570 = vmatpush3.bf16.msra.mxu1 %v7000_v16  ;;  %v4393_v13 = vrot.slane %v4391_v52, 3  ;;  %6525 = vmatprep.subr.bf16.mxu0 %v7001_v62  ;;  %v8984_v47 = vor.u32 %v4366_v10, %v4363_v2  ;;  %v4143_v34 = vld [vmem:[%s7196_s6 + $0xc0] sm:$0x77]  ;;  %v4144_v5 = vld [vmem:[%s7196_s6 + $0xc8] sm:$0x77]  ;;  %v7013_v52 = vld [vmem:[%s9319_s1 + $0x878] sm:$0xff]  }
 0x152   : > { %v5985_v56 = vpop.f32.mrb[44].mxu0  ;;  %6571 = vmatprep.subr.bf16.mxu1 %v7002_v15  ;;  %v4377_v26 = vsel %vm4219_vm4, %v8907_v7, %v8971_v60  ;;  %v8989_v39 = vor.u32 %v4384_v8, %v4381_v36  ;;  %v9002_v33 = vcombine.high %v4143_v34, %v4143_v34  ;;  %v9004_v57 = vcombine.high %v4144_v5, %v4144_v5  ;;  %v7016_v8 = vld [vmem:[%s9319_s1 + $0x8b8] sm:$0xff]  }
 0x153   : > { %v8964_v25 = vadd.f32 %v1776_v22, %v8726_v38  ;;  %v6031_v37 = vpop.f32.mrb[44].mxu1  ;;  %v5986_v20 = vpop.f32.mrb[45].mxu0  ;;  %v8973_v38 = vor.u32 %v4393_v13, %v4390_v48  ;;  %4700 = vmatprep.mubr.bf16.mxu0 %v4377_v26  ;;  %v4368_v7 = vsel %vm4219_vm4, %v8923_v0, %v8984_v47  ;;  %v7009_v0 = vld [vmem:[%s9319_s1 + $0x830] sm:$0xff]   ;;  %v9017_v61 = vcombine.low %v4144_v5, %v4144_v5  ;;  %v4800_v5 = vld [vmem:[%s7196_s6 + $0x20] sm:$0x88] }
 0x154   : > { %v5987_v54 = vadd.f32 %v5986_v20, %v5985_v56  ;;  %v6032_v4 = vpop.f32.mrb[45].mxu1  ;;  %v5988_v12 = vpop.f32.mrb[46].mxu0  ;;  %6526 = vmatpush3.bf16.msra.mxu0 %v7003_v31  ;;  %v4386_v18 = vsel %vm4219_vm4, %v8928_v46, %v8989_v39  ;;  %v7010_v46 = vld [vmem:[%s9319_s1 + $0x8b0] sm:$0xff]   ;;  %v4406_v62 = vshrl.u32 %v9002_v33, 16  ;;  %v4424_v15 = vshrl.u32 %v9004_v57, 16  ;;  %v7014_v56 = vld [vmem:[%s9319_s1 + $0x8f8] sm:$0xff]  }
 0x155   : > { %v6033_v11 = vadd.f32 %v6032_v4, %v6031_v37  ;;  %v6034_v32 = vpop.f32.mrb[46].mxu1  ;;  %v5989_v50 = vpop.f32.mrb[47].mxu0  ;;  %v4395_v53 = vsel %vm4219_vm4, %v8921_v40, %v8973_v38  ;;  %6572 = vmatpush3.bf16.msra.mxu1 %v7004_v55  ;;  %6527 = vmatprep.subr.bf16.mxu0 %v7005_v1  ;;  %v4427_v19 = vshll.u32 %v9004_v57, 16  ;;  %v7015_v20 = vld [vmem:[%s9319_s1 + $0x838] sm:$0xff]   ;;  %v4418_v36 = vshll.u32 %v9017_v61, 16 }
 0x156   : > { %v5990_v14 = vadd.f32 %v5989_v50, %v5988_v12  ;;  %v6035_v35 = vpop.f32.mrb[47].mxu1  ;;  %4773 = vmatprep.mubr.bf16.mxu1 %v4395_v53  ;;  %6573 = vmatprep.subr.bf16.mxu1 %v7006_v59  ;;  %v4408_v51 = vrot.slane %v4406_v62, 2  ;;  %v4415_v50 = vshrl.u32 %v9017_v61, 16 }
 0x157   : > { %v1781_v42 = vadd.f32 %v6033_v11, %v5987_v54  ;;  %v6036_v17 = vadd.f32 %v6035_v35, %v6034_v32  ;;  %4701 = vmatmul.mubr.bf16.gmra.mrb[152].mxu0 %v4368_v7  ;;  %v4426_v54 = vrot.slane %v4424_v15, 2  ;;  %v4429_v10 = vrot.slane %v4427_v19, 3 }
 0x158   : > { %4774 = vmatmul.mubr.bf16.gmra.mrb[152].mxu1 %v4386_v18  ;;  %6528 = vmatpush3.bf16.msra.mxu0 %v7009_v0 }
 0x159   : > { %v8995_v40 = vadd.f32 %v1781_v42, %v8765_v44  ;;  %v1784_v23 = vadd.f32 %v6036_v17, %v5990_v14  ;;  %v9009_v44 = vcombine.low %v4143_v34, %v4143_v34  ;;  %6574 = vmatpush3.bf16.msra.mxu1 %v7010_v46  ;;  %6529 = vmatprep.subr.bf16.mxu0 %v7013_v52  ;;  %v4417_v42 = vrot.slane %v4415_v50, 2 }
 0x15a   : > { %v5991_v27 = vpop.f32.mrb[48].mxu0  ;;  %6575 = vmatprep.subr.bf16.mxu1 %v7014_v56  ;;  %v4430_v26 = vor.u32 %v4429_v10, %v4426_v54  ;;  %v4420_v17 = vrot.slane %v4418_v36, 3  ;;  %v7044_v36 = vld [vmem:[%s7196_s6 + $0x6c] ss:$16 sps:$4 sm:$0xff]  }
 0x15b   : > { %v9012_v28 = vadd.f32 %v1784_v23, %v8784_v30  ;;  %v6037_v16 = vpop.f32.mrb[48].mxu1  ;;  %v5992_v49 = vpop.f32.mrb[49].mxu0  ;;  %v4409_v30 = vshll.u32 %v9002_v33, 16  ;;  %v4397_v31 = vshrl.u32 %v9009_v44, 16  ;;  %v4400_v37 = vshll.u32 %v9009_v44, 16 }
 0x15c   : > { %v5993_v22 = vadd.f32 %v5992_v49, %v5991_v27  ;;  %v6038_v9 = vpop.f32.mrb[49].mxu1  ;;  %v5994_v43 = vpop.f32.mrb[50].mxu0  ;;  %6530 = vmatpush3.bf16.msra.mxu0 %v7015_v20  ;;  %v7037_v27 = vld [vmem:[%s7196_s6 + $0x44] ss:$16 sps:$4 sm:$0xff]   ;;  %v7041_v20 = vld [vmem:[%s7196_s6 + $0x40] ss:$16 sps:$4 sm:$0xff]  }
 0x15d   : > { %v6039_v3 = vadd.f32 %v6038_v9, %v6037_v16  ;;  %v6040_v48 = vpop.f32.mrb[50].mxu1  ;;  %v5995_v13 = vpop.f32.mrb[51].mxu0  ;;  %v4411_v55 = vrot.slane %v4409_v30, 3  ;;  %v4399_v1 = vrot.slane %v4397_v31, 2  ;;  %v4402_v32 = vrot.slane %v4400_v37, 3  ;;  %6576 = vmatpush3.bf16.msra.mxu1 %v7016_v8  ;;  %v7039_v9 = vld [vmem:[%s7196_s6 + $0x30] sm:$0xff] }
 0x15e   : > { %v5996_v2 = vadd.f32 %v5995_v13, %v5994_v43  ;;  %v6041_v58 = vpop.f32.mrb[51].mxu1  ;;  %v4881_v0 = vrot.slane %v7037_v27, 3  ;;  %v4801_v43 = vld [vmem:[%s7196_s6 + $0x28] sm:$0x88]  ;;  %v5740_v56 = vcombine.high %v4800_v5, %v7039_v9  ;;  %v4895_v8 = vrot.slane %v7044_v36, 3 }
 0x15f   : > { %v1789_v4 = vadd.f32 %v6039_v3, %v5993_v22  ;;  %v6042_v12 = vadd.f32 %v6041_v58, %v6040_v48  ;;  %v4412_v11 = vor.u32 %v4411_v55, %v4408_v51  ;;  %v4403_v59 = vor.u32 %v4402_v32, %v4399_v1  ;;  %v7040_v3 = vld [vmem:[%s7196_s6 + $0x38] sm:$0xff]  ;;  %v7043_v1 = vld [vmem:[%s7196_s6 + $0x64] ss:$16 sps:$4 sm:$0xff]  }
 0x160   : > { %v5741_v48 = vcombine.low %v4801_v43, %v7040_v3  ;;  %v5742_v13 = vcombine.high %v4801_v43, %v7040_v3  ;;  %v4880_v55 = vrot.slane %v5740_v56, 3  ;;  %v7047_v43 = vld [vmem:[%s7196_s6 + $0x68] ss:$16 sps:$4 sm:$0xff]   ;;  %v7048_v56 = vld [vmem:[%s7196_s6 + $0x8c] ss:$16 sps:$4 sm:$0xff]  }
 0x161   : > { %v9040_v14 = vadd.f32 %v1789_v4, %v8810_v41  ;;  %v1792_v35 = vadd.f32 %v6042_v12, %v5996_v2  ;;  %v4413_v53 = vsel %vm4219_vm4, %v8971_v60, %v4412_v11  ;;  %v4431_v41 = vsel %vm4219_vm4, %v8973_v38, %v4430_v26  ;;  %v7038_v60 = vld [vmem:[%s7196_s6 + $0x4c] ss:$16 sps:$4 sm:$0xff]   ;;  %v7042_v12 = vld [vmem:[%s7196_s6 + $0x48] ss:$16 sps:$4 sm:$0xff]  }
 0x162   : > { %v5997_v7 = vpop.f32.mrb[52].mxu0  ;;  %4708 = vmatprep.mubr.bf16.mxu0 %v4413_v53  ;;  %v4887_v16 = vrot.slane %v7038_v60, 3  ;;  %4781 = vmatprep.mubr.bf16.mxu1 %v4431_v41  ;;  %v4404_v49 = vsel %vm4219_vm4, %v8984_v47, %v4403_v59  ;;  %v5739_v38 = vcombine.low %v4800_v5, %v7039_v9  ;;  %v4878_v2 = vrot.slane %v7041_v20, 3  ;;  %v7046_v9 = vld [vmem:[%s7196_s6 + $0x84] ss:$16 sps:$4 sm:$0xff]  }
 0x163   : > { %v9045_v23 = vadd.f32 %v1792_v35, %v8815_v24  ;;  %v6043_v18 = vpop.f32.mrb[52].mxu1  ;;  %v5998_v34 = vpop.f32.mrb[53].mxu0  ;;  %v4421_v24 = vor.u32 %v4420_v17, %v4417_v42  ;;  %4709 = vmatmul.mubr.bf16.gmra.mrb[156].mxu0 %v4404_v49  ;;  %v4883_v54 = vrot.slane %v5741_v48, 3  ;;  %v4886_v4 = vrot.slane %v5742_v13, 3  ;;  %v7051_v36 = vld [vmem:[%s7196_s6 + $0x88] ss:$16 sps:$4 sm:$0xff]  }
 0x164   : > { %v5999_v46 = vadd.f32 %v5998_v34, %v5997_v7  ;;  %v6044_v52 = vpop.f32.mrb[53].mxu1  ;;  %v6000_v22 = vpop.f32.mrb[54].mxu0  ;;  %v4877_v37 = vrot.slane %v5739_v38, 3  ;;  %v4884_v10 = vrot.slane %v7042_v12, 3  ;;  %v4891_v11 = vrot.slane %v7043_v1, 3 }
 0x165   : > { %v6045_v62 = vadd.f32 %v6044_v52, %v6043_v18  ;;  %v6046_v30 = vpop.f32.mrb[54].mxu1  ;;  %v6001_v15 = vpop.f32.mrb[55].mxu0  ;;  %v4422_v47 = vsel %vm4219_vm4, %v8989_v39, %v4421_v24  ;;  %v4882_v50 = vsel %vm4876_vm5, %v4880_v55, %v4881_v0  ;;  %v4888_v35 = vsel %vm4876_vm5, %v4886_v4, %v4887_v16  ;;  %v7049_v12 = vld [vmem:[%s7196_s6 + $0x80] ss:$16 sps:$4 sm:$0xff]  }
 0x166   : > { %v6002_v19 = vadd.f32 %v6001_v15, %v6000_v22  ;;  %v6047_v31 = vpop.f32.mrb[55].mxu1  ;;  %4782 = vmatmul.mubr.bf16.gmra.mrb[156].mxu1 %v4422_v47  ;;  %5165 = vmatprep.mubr.bf16.mxu0 %v4882_v50  ;;  %v4879_v26 = vsel %vm4876_vm5, %v4877_v37, %v4878_v2  ;;  %v4885_v7 = vsel %vm4876_vm5, %v4883_v54, %v4884_v10  ;;  %v4899_v38 = vrot.slane %v7046_v9, 3 }
 0x167   : > { %v1797_v58 = vadd.f32 %v6045_v62, %v5999_v46  ;;  %v6048_v51 = vadd.f32 %v6047_v31, %v6046_v30  ;;  %5238 = vmatprep.mubr.bf16.mxu1 %v4888_v35  ;;  %v7045_v46 = vld [vmem:[%s7196_s6 + $0x60] ss:$16 sps:$4 sm:$0xff]   ;;  %v4893_v62 = vrot.slane %v7047_v43, 3  ;;  %v4897_v1 = vrot.slane %v7049_v12, 3 }
 0x168   : > { %v4889_v52 = vrot.slane %v7045_v46, 3  ;;  %v4900_v31 = vsel %vm4876_vm5, %v4891_v11, %v4899_v38  ;;  %v4901_v35 = vrot.slane %v7051_v36, 3  ;;  %v4915_v43 = vrot.slane %v9002_v33, 3 }
 0x169   : > { %v9063_v32 = vadd.f32 %v1797_v58, %v8847_v63  ;;  %v1800_v39 = vadd.f32 %v6048_v51, %v6002_v19  ;;  %v4892_v63 = vsel %vm4876_vm5, %v4881_v0, %v4891_v11  ;;  %v4894_v37 = vsel %vm4876_vm5, %v4884_v10, %v4893_v62 }
 0x16a   : > { %v6003_v53 = vpop.f32.mrb[56].mxu0  ;;  %v4890_v3 = vsel %vm4876_vm5, %v4878_v2, %v4889_v52 }
 0x16b   : > { %v9070_v59 = vadd.f32 %v1800_v39, %v8852_v6  ;;  %v6049_v42 = vpop.f32.mrb[56].mxu1  ;;  %v6004_v17 = vpop.f32.mrb[57].mxu0  ;;  %5166 = vmatmul.mubr.bf16.vlgmr.msra.gmra.mrb[160].mxu0 %v4879_v26  ;;  %v4896_v6 = vsel %vm4876_vm5, %v4887_v16, %v4895_v8  ;;  %v4903_v16 = vrot.slane %v7048_v56, 3  ;;  %v7050_v39 = vld [vmem:[%s7196_s6 + $0xa4] ss:$16 sps:$4 sm:$0xff]  }
 0x16c   : > { %v6005_v41 = vadd.f32 %v6004_v17, %v6003_v53  ;;  %v6050_v18 = vpop.f32.mrb[57].mxu1  ;;  %v6006_v34 = vpop.f32.mrb[58].mxu0  ;;  %5173 = vmatprep.mubr.bf16.mxu0 %v4892_v63  ;;  %v4907_v50 = vrot.slane %v7050_v39, 3  ;;  %v4898_v17 = vsel %vm4876_vm5, %v4889_v52, %v4897_v1 }
 0x16d   : > { %v6051_v5 = vadd.f32 %v6050_v18, %v6049_v42  ;;  %v6052_v27 = vpop.f32.mrb[58].mxu1  ;;  %v6007_v60 = vpop.f32.mrb[59].mxu0  ;;  %v4904_v54 = vsel %vm4876_vm5, %v4895_v8, %v4903_v16  ;;  %v7052_v42 = vld [vmem:[%s7196_s6 + $0xac] ss:$16 sps:$4 sm:$0xff]  }
 0x16e   : > { %v6008_v49 = vadd.f32 %v6007_v60, %v6006_v34  ;;  %v6053_v24 = vpop.f32.mrb[59].mxu1  ;;  %5239 = vmatmul.mubr.bf16.vlgmr.msra.gmra.mrb[160].mxu1 %v4885_v7  ;;  %v4911_v8 = vrot.slane %v7052_v42, 3  ;;  %v4908_v34 = vsel %vm4876_vm5, %v4899_v38, %v4907_v50 }
 0x16f   : > { %v1805_v0 = vadd.f32 %v6051_v5, %v6005_v41  ;;  %v6054_v22 = vadd.f32 %v6053_v24, %v6052_v27  ;;  %5246 = vmatprep.mubr.bf16.mxu1 %v4896_v6  ;;  %v4902_v5 = vsel %vm4876_vm5, %v4893_v62, %v4901_v35  ;;  %v7054_v62 = vld [vmem:[%s7196_s6 + $0xa8] ss:$16 sps:$4 sm:$0xff]  }
 0x170   : > { %v4912_v46 = vsel %vm4876_vm5, %v4903_v16, %v4911_v8 }
 0x171   : > { %v9079_v30 = vadd.f32 %v1805_v0, %v8897_v45  ;;  %v1808_v15 = vadd.f32 %v6054_v22, %v6008_v49  ;;  %v7053_v0 = vld [vmem:[%s7196_s6 + $0xa0] ss:$16 sps:$4 sm:$0xff]   ;;  %s6608_s6 = smul.u32 80, %s9324_s16 }
 0x172   : > { %v6071_v48 = vpop.f32.mrb[60].mxu0  ;;  %v4905_v22 = vrot.slane %v7053_v0, 3 }
 0x173   : > { %v9084_v13 = vadd.f32 %v1808_v15, %v8914_v29  ;;  %v6117_v47 = vpop.f32.mrb[60].mxu1  ;;  %v6072_v19 = vpop.f32.mrb[61].mxu0  ;;  %5174 = vmatmul.mubr.bf16.gmra.mrb[164].mxu0 %v4890_v3  ;;  %v4909_v15 = vrot.slane %v7054_v62, 3  ;;  %s9276_s24 = scalar_lea.vmem %s9322_s4, %s6608_s6 }
 0x174   : > { %v6073_v20 = vadd.f32 %v6072_v19, %v6071_v48  ;;  %v6118_v45 = vpop.f32.mrb[61].mxu1  ;;  %v6074_v58 = vpop.f32.mrb[62].mxu0  ;;  %5181 = vmatprep.mubr.bf16.mxu0 %v4900_v31  ;;  %v4919_v48 = vrot.slane %v9004_v57, 3  ;;  %v4906_v16 = vsel %vm4876_vm5, %v4897_v1, %v4905_v22  ;;  %v4917_v1 = vrot.slane %v9017_v61, 3 }
 0x175   : > { %v6119_v51 = vadd.f32 %v6118_v45, %v6117_v47  ;;  %v6120_v55 = vpop.f32.mrb[62].mxu1  ;;  %v6075_v2 = vpop.f32.mrb[63].mxu0  ;;  %v4910_v33 = vsel %vm4876_vm5, %v4901_v35, %v4909_v15 }
 0x176   : > { %v6076_v29 = vadd.f32 %v6075_v2, %v6074_v58  ;;  %v6121_v4 = vpop.f32.mrb[63].mxu1  ;;  %5247 = vmatmul.mubr.bf16.gmra.mrb[164].mxu1 %v4894_v37  ;;  %v4920_v57 = vsel %vm4876_vm5, %v4911_v8, %v4919_v48 }
 0x177   : > { %v2361_v11 = vadd.f32 %v6119_v51, %v6073_v20  ;;  %v6122_v10 = vadd.f32 %v6121_v4, %v6120_v55  ;;  %5254 = vmatprep.mubr.bf16.mxu1 %v4904_v54  ;;  %v4916_v20 = vsel %vm4876_vm5, %v4907_v50, %v4915_v43 }
 0x179   : > { %v9093_v26 = vadd.f32 %v2361_v11, %v8950_v21  ;;  %v2364_v53 = vadd.f32 %v6122_v10, %v6076_v29 }
 0x17a   : > { %v6077_v63 = vpop.f32.mrb[64].mxu0 }
 0x17b   : > { %v9098_v7 = vadd.f32 %v2364_v53, %v8964_v25  ;;  %v6123_v41 = vpop.f32.mrb[64].mxu1  ;;  %v6078_v18 = vpop.f32.mrb[65].mxu0  ;;  %5182 = vmatmul.mubr.bf16.gmra.mrb[168].mxu0 %v4898_v17 }
 0x17c   : > { %v6079_v27 = vadd.f32 %v6078_v18, %v6077_v63  ;;  %v6124_v60 = vpop.f32.mrb[65].mxu1  ;;  %v6080_v21 = vpop.f32.mrb[66].mxu0  ;;  %5189 = vmatprep.mubr.bf16.mxu0 %v4908_v34 }
 0x17d   : > { %v6125_v6 = vadd.f32 %v6124_v60, %v6123_v41  ;;  %v6126_v49 = vpop.f32.mrb[66].mxu1  ;;  %v6081_v24 = vpop.f32.mrb[67].mxu0 }
 0x17e   : > { %v6082_v52 = vadd.f32 %v6081_v24, %v6080_v21  ;;  %v6127_v25 = vpop.f32.mrb[67].mxu1  ;;  %5255 = vmatmul.mubr.bf16.gmra.mrb[168].mxu1 %v4902_v5 }
 0x17f   : > { %v2369_v9 = vadd.f32 %v6125_v6, %v6079_v27  ;;  %v6128_v38 = vadd.f32 %v6127_v25, %v6126_v49  ;;  %5262 = vmatprep.mubr.bf16.mxu1 %v4912_v46 }
 0x181   : > { %v9107_v56 = vadd.f32 %v2369_v9, %v8995_v40  ;;  %v2372_v3 = vadd.f32 %v6128_v38, %v6082_v52 }
 0x182   : > { %v6083_v47 = vpop.f32.mrb[68].mxu0 }
 0x183   : > { %v9112_v19 = vadd.f32 %v2372_v3, %v9012_v28  ;;  %v6129_v31 = vpop.f32.mrb[68].mxu1  ;;  %v6084_v37 = vpop.f32.mrb[69].mxu0  ;;  %5190 = vmatmul.mubr.bf16.gmra.mrb[172].mxu0 %v4906_v16  ;;  %v4913_v28 = vrot.slane %v9009_v44, 3  ;;  %v4918_v44 = vsel %vm4876_vm5, %v4909_v15, %v4917_v1 }
 0x184   : > { %v6085_v45 = vadd.f32 %v6084_v37, %v6083_v47  ;;  %v6130_v58 = vpop.f32.mrb[69].mxu1  ;;  %v6086_v51 = vpop.f32.mrb[70].mxu0  ;;  %5197 = vmatprep.mubr.bf16.mxu0 %v4916_v20 }
 0x185   : > { %v6131_v40 = vadd.f32 %v6130_v58, %v6129_v31  ;;  %v6132_v55 = vpop.f32.mrb[70].mxu1  ;;  %v6087_v2 = vpop.f32.mrb[71].mxu0  ;;  %v4914_v39 = vsel %vm4876_vm5, %v4905_v22, %v4913_v28 }
 0x186   : > { %v6088_v54 = vadd.f32 %v6087_v2, %v6086_v51  ;;  %v6133_v29 = vpop.f32.mrb[71].mxu1  ;;  %5263 = vmatmul.mubr.bf16.gmra.mrb[172].mxu1 %v4910_v33 }
 0x187   : > { %v2377_v4 = vadd.f32 %v6131_v40, %v6085_v45  ;;  %v6134_v12 = vadd.f32 %v6133_v29, %v6132_v55  ;;  %5270 = vmatprep.mubr.bf16.mxu1 %v4920_v57 }
 0x189   : > { %v9120_v11 = vadd.f32 %v2377_v4, %v9040_v14  ;;  %v2380_v10 = vadd.f32 %v6134_v12, %v6088_v54 }
 0x18a   : > { %v6089_v50 = vpop.f32.mrb[72].mxu0 }
 0x18b   : > { %v9124_v36 = vadd.f32 %v2380_v10, %v9045_v23  ;;  %v6135_v35 = vpop.f32.mrb[72].mxu1  ;;  %v6090_v53 = vpop.f32.mrb[73].mxu0  ;;  %5198 = vmatmul.mubr.bf16.gmra.mrb[176].mxu0 %v4914_v39 }
 0x18c   : > { %v6091_v42 = vadd.f32 %v6090_v53, %v6089_v50  ;;  %v6136_v8 = vpop.f32.mrb[73].mxu1  ;;  %v6092_v17 = vpop.f32.mrb[74].mxu0 }
 0x18d   : > { %v6137_v63 = vadd.f32 %v6136_v8, %v6135_v35  ;;  %v6138_v61 = vpop.f32.mrb[74].mxu1  ;;  %v6093_v41 = vpop.f32.mrb[75].mxu0 }
 0x18e   : > { %v6094_v14 = vadd.f32 %v6093_v41, %v6092_v17  ;;  %v6139_v18 = vpop.f32.mrb[75].mxu1  ;;  %5271 = vmatmul.mubr.bf16.gmra.mrb[176].mxu1 %v4918_v44 }
 0x18f   : > { %v2385_v34 = vadd.f32 %v6137_v63, %v6091_v42  ;;  %v6140_v5 = vadd.f32 %v6139_v18, %v6138_v61 }
 0x191   : > { %v9128_v27 = vadd.f32 %v2385_v34, %v9063_v32  ;;  %v2388_v23 = vadd.f32 %v6140_v5, %v6094_v14 }
 0x192   : > { %v6095_v60 = vpop.f32.mrb[76].mxu0 }
 0x193   : > { %v9131_v21 = vadd.f32 %v2388_v23, %v9070_v59  ;;  %v6141_v6 = vpop.f32.mrb[76].mxu1  ;;  %v6096_v49 = vpop.f32.mrb[77].mxu0 }
 0x194   : > { %v6097_v24 = vadd.f32 %v6096_v49, %v6095_v60  ;;  %v6142_v46 = vpop.f32.mrb[77].mxu1  ;;  %v6098_v52 = vpop.f32.mrb[78].mxu0 }
 0x195   : > { %v6143_v25 = vadd.f32 %v6142_v46, %v6141_v6  ;;  %v6144_v0 = vpop.f32.mrb[78].mxu1  ;;  %v6099_v22 = vpop.f32.mrb[79].mxu0 }
 0x196   : > { %v6100_v9 = vadd.f32 %v6099_v22, %v6098_v52  ;;  %v6145_v38 = vpop.f32.mrb[79].mxu1 }
 0x197   : > { %v2393_v43 = vadd.f32 %v6143_v25, %v6097_v24  ;;  %v6146_v62 = vadd.f32 %v6145_v38, %v6144_v0 }
 0x199   : > { %v9134_v32 = vadd.f32 %v2393_v43, %v9079_v30  ;;  %v2396_v15 = vadd.f32 %v6146_v62, %v6100_v9 }
 0x19a   : > { %v6163_v3 = vpop.f32.mrb[80].mxu0 }
 0x19b   : > { %v9137_v59 = vadd.f32 %v2396_v15, %v9084_v13  ;;  %v6209_v48 = vpop.f32.mrb[80].mxu1  ;;  %v6164_v16 = vpop.f32.mrb[81].mxu0 }
 0x19c   : > { %v6165_v47 = vadd.f32 %v6164_v16, %v6163_v3  ;;  %v6210_v31 = vpop.f32.mrb[81].mxu1  ;;  %v6166_v37 = vpop.f32.mrb[82].mxu0 }
 0x19d   : > { %v6211_v20 = vadd.f32 %v6210_v31, %v6209_v48  ;;  %v6212_v33 = vpop.f32.mrb[82].mxu1  ;;  %v6167_v45 = vpop.f32.mrb[83].mxu0 }
 0x19e   : > { %v6168_v58 = vadd.f32 %v6167_v45, %v6166_v37  ;;  %v6213_v51 = vpop.f32.mrb[83].mxu1 }
 0x19f   : > { %v3018_v40 = vadd.f32 %v6211_v20, %v6165_v47  ;;  %v6214_v55 = vadd.f32 %v6213_v51, %v6212_v33 }
 0x1a1   : > { %v9140_v30 = vadd.f32 %v3018_v40, %v9093_v26  ;;  %v3021_v2 = vadd.f32 %v6214_v55, %v6168_v58 }
 0x1a2   : > { %v6169_v57 = vpop.f32.mrb[84].mxu0 }
 0x1a3   : > { %v9143_v13 = vadd.f32 %v3021_v2, %v9098_v7  ;;  %v6215_v54 = vpop.f32.mrb[84].mxu1  ;;  %v6170_v29 = vpop.f32.mrb[85].mxu0 }
 0x1a4   : > { %v6171_v28 = vadd.f32 %v6170_v29, %v6169_v57  ;;  %v6216_v4 = vpop.f32.mrb[85].mxu1  ;;  %v6172_v12 = vpop.f32.mrb[86].mxu0 }
 0x1a5   : > { %v6217_v1 = vadd.f32 %v6216_v4, %v6215_v54  ;;  %v6218_v10 = vpop.f32.mrb[86].mxu1  ;;  %v6173_v39 = vpop.f32.mrb[87].mxu0 }
 0x1a6   : > { %v6174_v50 = vadd.f32 %v6173_v39, %v6172_v12  ;;  %v6219_v35 = vpop.f32.mrb[87].mxu1 }
 0x1a7   : > { %v3026_v53 = vadd.f32 %v6217_v1, %v6171_v28  ;;  %v6220_v44 = vadd.f32 %v6219_v35, %v6218_v10 }
 0x1a9   : > { %v9146_v26 = vadd.f32 %v3026_v53, %v9107_v56  ;;  %v3029_v42 = vadd.f32 %v6220_v44, %v6174_v50 }
 0x1aa   : > { %v6175_v8 = vpop.f32.mrb[88].mxu0 }
 0x1ab   : > { %v9149_v7 = vadd.f32 %v3029_v42, %v9112_v19  ;;  %v6221_v17 = vpop.f32.mrb[88].mxu1  ;;  %v6176_v63 = vpop.f32.mrb[89].mxu0 }
 0x1ac   : > { %v6177_v61 = vadd.f32 %v6176_v63, %v6175_v8  ;;  %v6222_v41 = vpop.f32.mrb[89].mxu1  ;;  %v6178_v14 = vpop.f32.mrb[90].mxu0 }
 0x1ad   : > { %v6223_v18 = vadd.f32 %v6222_v41, %v6221_v17  ;;  %v6224_v34 = vpop.f32.mrb[90].mxu1  ;;  %v6179_v5 = vpop.f32.mrb[91].mxu0 }
 0x1ae   : > { %v6180_v23 = vadd.f32 %v6179_v5, %v6178_v14  ;;  %v6225_v60 = vpop.f32.mrb[91].mxu1 }
 0x1af   : > { %v3034_v6 = vadd.f32 %v6223_v18, %v6177_v61  ;;  %v6226_v49 = vadd.f32 %v6225_v60, %v6224_v34 }
 0x1b1   : > { %v9152_v56 = vadd.f32 %v3034_v6, %v9120_v11  ;;  %v3037_v24 = vadd.f32 %v6226_v49, %v6180_v23 }
 0x1b2   : > { %v6181_v46 = vpop.f32.mrb[92].mxu0 }
 0x1b3   : > { %v9155_v19 = vadd.f32 %v3037_v24, %v9124_v36  ;;  %v6227_v52 = vpop.f32.mrb[92].mxu1  ;;  %v6182_v25 = vpop.f32.mrb[93].mxu0 }
 0x1b4   : > { %v6183_v0 = vadd.f32 %v6182_v25, %v6181_v46  ;;  %v6228_v22 = vpop.f32.mrb[93].mxu1  ;;  %v6184_v9 = vpop.f32.mrb[94].mxu0 }
 0x1b5   : > { %v6229_v38 = vadd.f32 %v6228_v22, %v6227_v52  ;;  %v6230_v43 = vpop.f32.mrb[94].mxu1  ;;  %v6185_v62 = vpop.f32.mrb[95].mxu0 }
 0x1b6   : > { %v6186_v15 = vadd.f32 %v6185_v62, %v6184_v9  ;;  %v6231_v3 = vpop.f32.mrb[95].mxu1 }
 0x1b7   : > { %v3042_v48 = vadd.f32 %v6229_v38, %v6183_v0  ;;  %v6232_v16 = vadd.f32 %v6231_v3, %v6230_v43 }
 0x1b9   : > { %v9158_v11 = vadd.f32 %v3042_v48, %v9128_v27  ;;  %v3045_v47 = vadd.f32 %v6232_v16, %v6186_v15 }
 0x1ba   : > { %v6187_v31 = vpop.f32.mrb[96].mxu0 }
 0x1bb   : > { %v9161_v36 = vadd.f32 %v3045_v47, %v9131_v21  ;;  %v6233_v37 = vpop.f32.mrb[96].mxu1  ;;  %v6188_v20 = vpop.f32.mrb[97].mxu0 }
 0x1bc   : > { %v6189_v33 = vadd.f32 %v6188_v20, %v6187_v31  ;;  %v6234_v45 = vpop.f32.mrb[97].mxu1  ;;  %v6190_v58 = vpop.f32.mrb[98].mxu0 }
 0x1bd   : > { %v6235_v51 = vadd.f32 %v6234_v45, %v6233_v37  ;;  %v6236_v40 = vpop.f32.mrb[98].mxu1  ;;  %v6191_v55 = vpop.f32.mrb[99].mxu0 }
 0x1be   : > { %v6192_v2 = vadd.f32 %v6191_v55, %v6190_v58  ;;  %v6237_v57 = vpop.f32.mrb[99].mxu1 }
 0x1bf   : > { %v3050_v54 = vadd.f32 %v6235_v51, %v6189_v33  ;;  %v6238_v29 = vadd.f32 %v6237_v57, %v6236_v40 }
 0x1c1   : > { %v9164_v27 = vadd.f32 %v3050_v54, %v9134_v32  ;;  %v3053_v28 = vadd.f32 %v6238_v29, %v6192_v2 }
 0x1c2   : > { %v6255_v4 = vpop.f32.mrb[100].mxu0 }
 0x1c3   : > { %v9167_v21 = vadd.f32 %v3053_v28, %v9137_v59  ;;  %v6301_v12 = vpop.f32.mrb[100].mxu1  ;;  %v6256_v1 = vpop.f32.mrb[101].mxu0 }
 0x1c4   : > { %v6257_v10 = vadd.f32 %v6256_v1, %v6255_v4  ;;  %v6302_v39 = vpop.f32.mrb[101].mxu1  ;;  %v6258_v50 = vpop.f32.mrb[102].mxu0 }
 0x1c5   : > { %v6303_v35 = vadd.f32 %v6302_v39, %v6301_v12  ;;  %v6304_v53 = vpop.f32.mrb[102].mxu1  ;;  %v6259_v44 = vpop.f32.mrb[103].mxu0 }
 0x1c6   : > { %v6260_v42 = vadd.f32 %v6259_v44, %v6258_v50  ;;  %v6305_v8 = vpop.f32.mrb[103].mxu1 }
 0x1c7   : > { %v3507_v17 = vadd.f32 %v6303_v35, %v6257_v10  ;;  %v6306_v63 = vadd.f32 %v6305_v8, %v6304_v53 }
 0x1c9   : > { %v9170_v32 = vadd.f32 %v3507_v17, %v9140_v30  ;;  %v3510_v61 = vadd.f32 %v6306_v63, %v6260_v42 }
 0x1ca   : > { %v6261_v41 = vpop.f32.mrb[104].mxu0 }
 0x1cb   : > { %v9173_v59 = vadd.f32 %v3510_v61, %v9143_v13  ;;  %v6307_v14 = vpop.f32.mrb[104].mxu1  ;;  %v6262_v18 = vpop.f32.mrb[105].mxu0 }
 0x1cc   : > { %v6263_v34 = vadd.f32 %v6262_v18, %v6261_v41  ;;  %v6308_v5 = vpop.f32.mrb[105].mxu1  ;;  %v6264_v23 = vpop.f32.mrb[106].mxu0 }
 0x1cd   : > { %v6309_v60 = vadd.f32 %v6308_v5, %v6307_v14  ;;  %v6310_v6 = vpop.f32.mrb[106].mxu1  ;;  %v6265_v49 = vpop.f32.mrb[107].mxu0 }
 0x1ce   : > { %v6266_v24 = vadd.f32 %v6265_v49, %v6264_v23  ;;  %v6311_v46 = vpop.f32.mrb[107].mxu1 }
 0x1cf   : > { %v3515_v52 = vadd.f32 %v6309_v60, %v6263_v34  ;;  %v6312_v25 = vadd.f32 %v6311_v46, %v6310_v6 }
 0x1d1   : > { %v9176_v30 = vadd.f32 %v3515_v52, %v9146_v26  ;;  %v3518_v0 = vadd.f32 %v6312_v25, %v6266_v24 }
 0x1d2   : > { %v6267_v22 = vpop.f32.mrb[108].mxu0 }
 0x1d3   : > { %v9179_v13 = vadd.f32 %v3518_v0, %v9149_v7  ;;  %v6313_v9 = vpop.f32.mrb[108].mxu1  ;;  %v6268_v38 = vpop.f32.mrb[109].mxu0 }
 0x1d4   : > { %v6269_v43 = vadd.f32 %v6268_v38, %v6267_v22  ;;  %v6314_v62 = vpop.f32.mrb[109].mxu1  ;;  %v6270_v15 = vpop.f32.mrb[110].mxu0 }
 0x1d5   : > { %v6315_v3 = vadd.f32 %v6314_v62, %v6313_v9  ;;  %v6316_v48 = vpop.f32.mrb[110].mxu1  ;;  %v6271_v16 = vpop.f32.mrb[111].mxu0 }
 0x1d6   : > { %v6272_v47 = vadd.f32 %v6271_v16, %v6270_v15  ;;  %v6317_v31 = vpop.f32.mrb[111].mxu1 }
 0x1d7   : > { %v3523_v37 = vadd.f32 %v6315_v3, %v6269_v43  ;;  %v6318_v20 = vadd.f32 %v6317_v31, %v6316_v48 }
 0x1d9   : > { %v9182_v26 = vadd.f32 %v3523_v37, %v9152_v56  ;;  %v3526_v33 = vadd.f32 %v6318_v20, %v6272_v47 }
 0x1da   : > { %v6273_v45 = vpop.f32.mrb[112].mxu0 }
 0x1db   : > { %v9185_v7 = vadd.f32 %v3526_v33, %v9155_v19  ;;  %v6319_v58 = vpop.f32.mrb[112].mxu1  ;;  %v6274_v51 = vpop.f32.mrb[113].mxu0 }
 0x1dc   : > { %v6275_v40 = vadd.f32 %v6274_v51, %v6273_v45  ;;  %v6320_v55 = vpop.f32.mrb[113].mxu1  ;;  %v6276_v2 = vpop.f32.mrb[114].mxu0 }
 0x1dd   : > { %v6321_v57 = vadd.f32 %v6320_v55, %v6319_v58  ;;  %v6322_v54 = vpop.f32.mrb[114].mxu1  ;;  %v6277_v29 = vpop.f32.mrb[115].mxu0 }
 0x1de   : > { %v6278_v28 = vadd.f32 %v6277_v29, %v6276_v2  ;;  %v6323_v4 = vpop.f32.mrb[115].mxu1 }
 0x1df   : > { %v3531_v12 = vadd.f32 %v6321_v57, %v6275_v40  ;;  %v6324_v1 = vadd.f32 %v6323_v4, %v6322_v54 }
 0x1e1   : > { %v9188_v56 = vadd.f32 %v3531_v12, %v9158_v11  ;;  %v3534_v10 = vadd.f32 %v6324_v1, %v6278_v28 }
 0x1e2   : > { %v6279_v39 = vpop.f32.mrb[116].mxu0 }
 0x1e3   : > { %v9191_v19 = vadd.f32 %v3534_v10, %v9161_v36  ;;  %v6325_v50 = vpop.f32.mrb[116].mxu1  ;;  %v6280_v35 = vpop.f32.mrb[117].mxu0 }
 0x1e4   : > { %v6281_v53 = vadd.f32 %v6280_v35, %v6279_v39  ;;  %v6326_v44 = vpop.f32.mrb[117].mxu1  ;;  %v6282_v42 = vpop.f32.mrb[118].mxu0 }
 0x1e5   : > { %v6327_v8 = vadd.f32 %v6326_v44, %v6325_v50  ;;  %v6328_v17 = vpop.f32.mrb[118].mxu1  ;;  %v6283_v63 = vpop.f32.mrb[119].mxu0 }
 0x1e6   : > { %v6284_v61 = vadd.f32 %v6283_v63, %v6282_v42  ;;  %v6329_v41 = vpop.f32.mrb[119].mxu1 }
 0x1e7   : > { %v3539_v14 = vadd.f32 %v6327_v8, %v6281_v53  ;;  %v6330_v18 = vadd.f32 %v6329_v41, %v6328_v17 }
 0x1e9   : > { %v9194_v11 = vadd.f32 %v3539_v14, %v9164_v27  ;;  %v3542_v34 = vadd.f32 %v6330_v18, %v6284_v61 }
 0x1ea   : > { %v6347_v5 = vpop.f32.mrb[120].mxu0 }
 0x1eb   : > { %v9197_v36 = vadd.f32 %v3542_v34, %v9167_v21  ;;  %v6393_v23 = vpop.f32.mrb[120].mxu1  ;;  %v6348_v60 = vpop.f32.mrb[121].mxu0 }
 0x1ec   : > { %v6349_v6 = vadd.f32 %v6348_v60, %v6347_v5  ;;  %v6394_v49 = vpop.f32.mrb[121].mxu1  ;;  %v6350_v24 = vpop.f32.mrb[122].mxu0 }
 0x1ed   : > { %v6395_v46 = vadd.f32 %v6394_v49, %v6393_v23  ;;  %v6396_v52 = vpop.f32.mrb[122].mxu1  ;;  %v6351_v25 = vpop.f32.mrb[123].mxu0 }
 0x1ee   : > { %v6352_v0 = vadd.f32 %v6351_v25, %v6350_v24  ;;  %v6397_v22 = vpop.f32.mrb[123].mxu1 }
 0x1ef   : > { %v4095_v9 = vadd.f32 %v6395_v46, %v6349_v6  ;;  %v6398_v38 = vadd.f32 %v6397_v22, %v6396_v52 }
 0x1f1   : > { %v9200_v27 = vadd.f32 %v4095_v9, %v9170_v32  ;;  %v4098_v43 = vadd.f32 %v6398_v38, %v6352_v0 }
 0x1f2   : > { %v6353_v62 = vpop.f32.mrb[124].mxu0 }
 0x1f3   : > { %v9203_v21 = vadd.f32 %v4098_v43, %v9173_v59  ;;  %v6399_v15 = vpop.f32.mrb[124].mxu1  ;;  %v6354_v3 = vpop.f32.mrb[125].mxu0 }
 0x1f4   : > { %v6355_v48 = vadd.f32 %v6354_v3, %v6353_v62  ;;  %v6400_v16 = vpop.f32.mrb[125].mxu1  ;;  %v6356_v47 = vpop.f32.mrb[126].mxu0 }
 0x1f5   : > { %v6401_v31 = vadd.f32 %v6400_v16, %v6399_v15  ;;  %v6402_v37 = vpop.f32.mrb[126].mxu1  ;;  %v6357_v20 = vpop.f32.mrb[127].mxu0 }
 0x1f6   : > { %v6358_v33 = vadd.f32 %v6357_v20, %v6356_v47  ;;  %v6403_v45 = vpop.f32.mrb[127].mxu1 }
 0x1f7   : > { %v4103_v58 = vadd.f32 %v6401_v31, %v6355_v48  ;;  %v6404_v51 = vadd.f32 %v6403_v45, %v6402_v37 }
 0x1f9   : > { %v9206_v32 = vadd.f32 %v4103_v58, %v9176_v30  ;;  %v4106_v40 = vadd.f32 %v6404_v51, %v6358_v33 }
 0x1fa   : > { %v6359_v55 = vpop.f32.mrb[128].mxu0 }
 0x1fb   : > { %v9209_v59 = vadd.f32 %v4106_v40, %v9179_v13  ;;  %v6405_v2 = vpop.f32.mrb[128].mxu1  ;;  %v6360_v57 = vpop.f32.mrb[129].mxu0 }
 0x1fc   : > { %v6361_v54 = vadd.f32 %v6360_v57, %v6359_v55  ;;  %v6406_v29 = vpop.f32.mrb[129].mxu1  ;;  %v6362_v28 = vpop.f32.mrb[130].mxu0 }
 0x1fd   : > { %v6407_v4 = vadd.f32 %v6406_v29, %v6405_v2  ;;  %v6408_v12 = vpop.f32.mrb[130].mxu1  ;;  %v6363_v1 = vpop.f32.mrb[131].mxu0 }
 0x1fe   : > { %v6364_v10 = vadd.f32 %v6363_v1, %v6362_v28  ;;  %v6409_v39 = vpop.f32.mrb[131].mxu1 }
 0x1ff   : > { %v4111_v50 = vadd.f32 %v6407_v4, %v6361_v54  ;;  %v6410_v35 = vadd.f32 %v6409_v39, %v6408_v12 }
 0x201   : > { %v9212_v30 = vadd.f32 %v4111_v50, %v9182_v26  ;;  %v4114_v53 = vadd.f32 %v6410_v35, %v6364_v10 }
 0x202   : > { %v6365_v44 = vpop.f32.mrb[132].mxu0 }
 0x203   : > { %v9215_v13 = vadd.f32 %v4114_v53, %v9185_v7  ;;  %v6411_v42 = vpop.f32.mrb[132].mxu1  ;;  %v6366_v8 = vpop.f32.mrb[133].mxu0 }
 0x204   : > { %v6367_v17 = vadd.f32 %v6366_v8, %v6365_v44  ;;  %v6412_v63 = vpop.f32.mrb[133].mxu1  ;;  %v6368_v61 = vpop.f32.mrb[134].mxu0 }
 0x205   : > { %v6413_v41 = vadd.f32 %v6412_v63, %v6411_v42  ;;  %v6414_v14 = vpop.f32.mrb[134].mxu1  ;;  %v6369_v18 = vpop.f32.mrb[135].mxu0 }
 0x206   : > { %v6370_v34 = vadd.f32 %v6369_v18, %v6368_v61  ;;  %v6415_v5 = vpop.f32.mrb[135].mxu1 }
 0x207   : > { %v4119_v23 = vadd.f32 %v6413_v41, %v6367_v17  ;;  %v6416_v60 = vadd.f32 %v6415_v5, %v6414_v14 }
 0x209   : > { %v9218_v26 = vadd.f32 %v4119_v23, %v9188_v56  ;;  %v4122_v6 = vadd.f32 %v6416_v60, %v6370_v34 }
 0x20a   : > { %v6371_v49 = vpop.f32.mrb[136].mxu0 }
 0x20b   : > { %v9221_v7 = vadd.f32 %v4122_v6, %v9191_v19  ;;  %v6417_v24 = vpop.f32.mrb[136].mxu1  ;;  %v6372_v46 = vpop.f32.mrb[137].mxu0 }
 0x20c   : > { %v6373_v52 = vadd.f32 %v6372_v46, %v6371_v49  ;;  %v6418_v25 = vpop.f32.mrb[137].mxu1  ;;  %v6374_v0 = vpop.f32.mrb[138].mxu0 }
 0x20d   : > { %v6419_v22 = vadd.f32 %v6418_v25, %v6417_v24  ;;  %v6420_v9 = vpop.f32.mrb[138].mxu1  ;;  %v6375_v38 = vpop.f32.mrb[139].mxu0 }
 0x20e   : > { %v6376_v43 = vadd.f32 %v6375_v38, %v6374_v0  ;;  %v6421_v62 = vpop.f32.mrb[139].mxu1 }
 0x20f   : > { %v4127_v15 = vadd.f32 %v6419_v22, %v6373_v52  ;;  %v6422_v3 = vadd.f32 %v6421_v62, %v6420_v9 }
 0x211   : > { %v9224_v56 = vadd.f32 %v4127_v15, %v9194_v11  ;;  %v4130_v48 = vadd.f32 %v6422_v3, %v6376_v43 }
 0x212   : > { %v6439_v16 = vpop.f32.mrb[140].mxu0 }
 0x213   : > { %v9227_v19 = vadd.f32 %v4130_v48, %v9197_v36  ;;  %v6485_v47 = vpop.f32.mrb[140].mxu1  ;;  %v6440_v31 = vpop.f32.mrb[141].mxu0 }
 0x214   : > { %v6441_v37 = vadd.f32 %v6440_v31, %v6439_v16  ;;  %v6486_v20 = vpop.f32.mrb[141].mxu1  ;;  %v6442_v33 = vpop.f32.mrb[142].mxu0 }
 0x215   : > { %v6487_v45 = vadd.f32 %v6486_v20, %v6485_v47  ;;  %v6488_v58 = vpop.f32.mrb[142].mxu1  ;;  %v6443_v51 = vpop.f32.mrb[143].mxu0 }
 0x216   : > { %v6444_v40 = vadd.f32 %v6443_v51, %v6442_v33  ;;  %v6489_v55 = vpop.f32.mrb[143].mxu1 }
 0x217   : > { %v4752_v2 = vadd.f32 %v6487_v45, %v6441_v37  ;;  %v6490_v57 = vadd.f32 %v6489_v55, %v6488_v58 }
 0x219   : > { %v9230_v11 = vadd.f32 %v4752_v2, %v9200_v27  ;;  %v4755_v54 = vadd.f32 %v6490_v57, %v6444_v40 }
 0x21a   : > { %v6445_v36 = vpop.f32.mrb[144].mxu0 }
 0x21b   : > { %v9233_v29 = vadd.f32 %v4755_v54, %v9203_v21  ;;  %v6491_v28 = vpop.f32.mrb[144].mxu1  ;;  %v6446_v4 = vpop.f32.mrb[145].mxu0 }
 0x21c   : > { %v6447_v12 = vadd.f32 %v6446_v4, %v6445_v36  ;;  %v6492_v1 = vpop.f32.mrb[145].mxu1  ;;  %v6448_v10 = vpop.f32.mrb[146].mxu0 }
 0x21d   : > { %v6493_v39 = vadd.f32 %v6492_v1, %v6491_v28  ;;  %v6494_v50 = vpop.f32.mrb[146].mxu1  ;;  %v6449_v35 = vpop.f32.mrb[147].mxu0 }
 0x21e   : > { %v6450_v53 = vadd.f32 %v6449_v35, %v6448_v10  ;;  %v6495_v44 = vpop.f32.mrb[147].mxu1 }
 0x21f   : > { %v4760_v42 = vadd.f32 %v6493_v39, %v6447_v12  ;;  %v6496_v8 = vadd.f32 %v6495_v44, %v6494_v50 }
 0x221   : > { %v9236_v27 = vadd.f32 %v4760_v42, %v9206_v32  ;;  %v4763_v17 = vadd.f32 %v6496_v8, %v6450_v53 }
 0x222   : > { %v6451_v63 = vpop.f32.mrb[148].mxu0 }
 0x223   : > { %v9239_v21 = vadd.f32 %v4763_v17, %v9209_v59  ;;  %v6497_v61 = vpop.f32.mrb[148].mxu1  ;;  %v6452_v41 = vpop.f32.mrb[149].mxu0 }
 0x224   : > { %v6453_v14 = vadd.f32 %v6452_v41, %v6451_v63  ;;  %v6498_v18 = vpop.f32.mrb[149].mxu1  ;;  %v6454_v34 = vpop.f32.mrb[150].mxu0 }
 0x225   : > { %v6499_v5 = vadd.f32 %v6498_v18, %v6497_v61  ;;  %v6500_v23 = vpop.f32.mrb[150].mxu1  ;;  %v6455_v60 = vpop.f32.mrb[151].mxu0 }
 0x226   : > { %v6456_v6 = vadd.f32 %v6455_v60, %v6454_v34  ;;  %v6501_v49 = vpop.f32.mrb[151].mxu1  ;;  %v9269_v34 = vld [vmem:[%s9321_s3] ss:$0 sm:$0xff] }
 0x227   : > { %v4768_v24 = vadd.f32 %v6499_v5, %v6453_v14  ;;  %v6502_v46 = vadd.f32 %v6501_v49, %v6500_v23 }
 0x229   : > { %v9242_v32 = vadd.f32 %v4768_v24, %v9212_v30  ;;  %v4771_v52 = vadd.f32 %v6502_v46, %v6456_v6 }
 0x22a   : > { %v6457_v59 = vpop.f32.mrb[152].mxu0 }
 0x22b   : > { %v9245_v25 = vadd.f32 %v4771_v52, %v9215_v13  ;;  %v6503_v0 = vpop.f32.mrb[152].mxu1  ;;  %v6458_v22 = vpop.f32.mrb[153].mxu0 }
 0x22c   : > { %v6459_v9 = vadd.f32 %v6458_v22, %v6457_v59  ;;  %v6504_v38 = vpop.f32.mrb[153].mxu1  ;;  %v6460_v43 = vpop.f32.mrb[154].mxu0 }
 0x22d   : > { %v6505_v62 = vadd.f32 %v6504_v38, %v6503_v0  ;;  %v6506_v15 = vpop.f32.mrb[154].mxu1  ;;  %v6461_v3 = vpop.f32.mrb[155].mxu0 }
 0x22e   : > { %v6462_v48 = vadd.f32 %v6461_v3, %v6460_v43  ;;  %v6507_v16 = vpop.f32.mrb[155].mxu1 }
 0x22f   : > { %v4776_v47 = vadd.f32 %v6505_v62, %v6459_v9  ;;  %v6508_v31 = vadd.f32 %v6507_v16, %v6506_v15 }
 0x231   : > { %v9248_v30 = vadd.f32 %v4776_v47, %v9218_v26  ;;  %v4779_v37 = vadd.f32 %v6508_v31, %v6462_v48 }
 0x233   : > { %v9251_v13 = vadd.f32 %v4779_v37, %v9221_v7 }
 0x236   : > { %v6463_v20 = vpop.f32.mrb[156].mxu0 }
 0x237   : > { %v6464_v33 = vpop.f32.mrb[157].mxu0 }
 0x238   : > { %v6465_v58 = vadd.f32 %v6464_v33, %v6463_v20  ;;  %v6466_v51 = vpop.f32.mrb[158].mxu0 }
 0x239   : > { %v6509_v45 = vpop.f32.mrb[156].mxu1  ;;  %v6467_v55 = vpop.f32.mrb[159].mxu0 }
 0x23a   : > { %v6510_v40 = vpop.f32.mrb[157].mxu1  ;;  %v6468_v54 = vadd.f32 %v6467_v55, %v6466_v51 }
 0x23b   : > { %v6511_v2 = vadd.f32 %v6510_v40, %v6509_v45  ;;  %v6512_v57 = vpop.f32.mrb[158].mxu1 }
 0x23c   : > { %v6513_v36 = vpop.f32.mrb[159].mxu1 }
 0x23d   : > { %v4784_v28 = vadd.f32 %v6511_v2, %v6465_v58  ;;  %v6514_v4 = vadd.f32 %v6513_v36, %v6512_v57 }
 0x23e   : > { %v6531_v7 = vpop.f32.mrb[160].mxu0 }
 0x23f   : > { %v9254_v26 = vadd.f32 %v4784_v28, %v9224_v56  ;;  %v4787_v12 = vadd.f32 %v6514_v4, %v6468_v54  ;;  %v6532_v1 = vpop.f32.mrb[161].mxu0  ;;  %v9263_v56 = vld [vmem:[%s9320_s2] ss:$0 sm:$0xff] }
 0x240   : > { %v6533_v50 = vadd.f32 %v6532_v1, %v6531_v7  ;;  %v6534_v35 = vpop.f32.mrb[162].mxu0 }
 0x241   : > { %v9257_v10 = vadd.f32 %v4787_v12, %v9227_v19  ;;  %v6577_v39 = vpop.f32.mrb[160].mxu1  ;;  %v6535_v44 = vpop.f32.mrb[163].mxu0 }
 0x242   : > { %v6578_v53 = vpop.f32.mrb[161].mxu1  ;;  %v6536_v17 = vadd.f32 %v6535_v44, %v6534_v35 }
 0x243   : > { %v6579_v42 = vadd.f32 %v6578_v53, %v6577_v39  ;;  %v6580_v8 = vpop.f32.mrb[162].mxu1 }
 0x244   : > { %v6581_v63 = vpop.f32.mrb[163].mxu1 }
 0x245   : > { %v5241_v61 = vadd.f32 %v6579_v42, %v6533_v50  ;;  %v6582_v41 = vadd.f32 %v6581_v63, %v6580_v8 }
 0x246   : > { %v6537_v18 = vpop.f32.mrb[164].mxu0 }
 0x247   : > { %v5279_v19 = vadd.f32 %v5241_v61, %v9230_v11  ;;  %v5244_v14 = vadd.f32 %v6582_v41, %v6536_v17  ;;  %v6538_v5 = vpop.f32.mrb[165].mxu0 }
 0x248   : > { %v6539_v49 = vadd.f32 %v6538_v5, %v6537_v18  ;;  %v6540_v24 = vpop.f32.mrb[166].mxu0 }
 0x249   : > { %v5296_v23 = vadd.f32 %v9263_v56, %v5279_v19  ;;  %v5280_v60 = vadd.f32 %v5244_v14, %v9233_v29  ;;  %v6583_v6 = vpop.f32.mrb[164].mxu1  ;;  %v6541_v46 = vpop.f32.mrb[167].mxu0 }
 0x24a   : > { %v6584_v11 = vpop.f32.mrb[165].mxu1  ;;  %v6542_v9 = vadd.f32 %v6541_v46, %v6540_v24 }
 0x24b   : > { %v5313_v52 = vmul.f32 %v9269_v34, %v5296_v23  ;;  %v5297_v59 = vadd.f32 %v9263_v56, %v5280_v60  ;;  %v6585_v0 = vadd.f32 %v6584_v11, %v6583_v6  ;;  %v6586_v22 = vpop.f32.mrb[166].mxu1 }
 0x24c   : > { %v6587_v29 = vpop.f32.mrb[167].mxu1 }
 0x24d   : > { %5323 = vst [vmem:[%s9276_s24] sm:$0xff] %v5313_v52  ;;  %v5314_v38 = vmul.f32 %v9269_v34, %v5297_v59  ;;  %v5249_v43 = vadd.f32 %v6585_v0, %v6539_v49  ;;  %v6588_v62 = vadd.f32 %v6587_v29, %v6586_v22 }
 0x24e   : > { %v6543_v48 = vpop.f32.mrb[168].mxu0 }
 0x24f   : > { %5324 = vst [vmem:[%s9276_s24 + $0x8] sm:$0xff] %v5314_v38  ;;  %v5281_v15 = vadd.f32 %v5249_v43, %v9236_v27  ;;  %v5252_v3 = vadd.f32 %v6588_v62, %v6542_v9  ;;  %v6544_v16 = vpop.f32.mrb[169].mxu0 }
 0x250   : > { %v6545_v20 = vadd.f32 %v6544_v16, %v6543_v48  ;;  %v6546_v33 = vpop.f32.mrb[170].mxu0 }
 0x251   : > { %v5298_v47 = vadd.f32 %v9263_v56, %v5281_v15  ;;  %v5282_v31 = vadd.f32 %v5252_v3, %v9239_v21  ;;  %v6589_v37 = vpop.f32.mrb[168].mxu1  ;;  %v6547_v58 = vpop.f32.mrb[171].mxu0 }
 0x252   : > { %v6590_v45 = vpop.f32.mrb[169].mxu1  ;;  %v6548_v2 = vadd.f32 %v6547_v58, %v6546_v33 }
 0x253   : > { %v5315_v51 = vmul.f32 %v9269_v34, %v5298_v47  ;;  %v5299_v40 = vadd.f32 %v9263_v56, %v5282_v31  ;;  %v6591_v55 = vadd.f32 %v6590_v45, %v6589_v37  ;;  %v6592_v27 = vpop.f32.mrb[170].mxu1 }
 0x254   : > { %v6593_v57 = vpop.f32.mrb[171].mxu1 }
 0x255   : > { %5325 = vst [vmem:[%s9276_s24 + $0x10] sm:$0xff] %v5315_v51  ;;  %v5316_v54 = vmul.f32 %v9269_v34, %v5299_v40  ;;  %v5257_v36 = vadd.f32 %v6591_v55, %v6545_v20  ;;  %v6594_v28 = vadd.f32 %v6593_v57, %v6592_v27 }
 0x256   : > { %v6549_v12 = vpop.f32.mrb[172].mxu0 }
 0x257   : > { %5326 = vst [vmem:[%s9276_s24 + $0x18] sm:$0xff] %v5316_v54  ;;  %v5283_v21 = vadd.f32 %v5257_v36, %v9242_v32  ;;  %v5260_v4 = vadd.f32 %v6594_v28, %v6548_v2  ;;  %v6550_v7 = vpop.f32.mrb[173].mxu0 }
 0x258   : > { %v6551_v35 = vadd.f32 %v6550_v7, %v6549_v12  ;;  %v6552_v53 = vpop.f32.mrb[174].mxu0 }
 0x259   : > { %v5300_v1 = vadd.f32 %v9263_v56, %v5283_v21  ;;  %v5284_v39 = vadd.f32 %v5260_v4, %v9245_v25  ;;  %v6595_v50 = vpop.f32.mrb[172].mxu1  ;;  %v6553_v42 = vpop.f32.mrb[175].mxu0 }
 0x25a   : > { %v6596_v44 = vpop.f32.mrb[173].mxu1  ;;  %v6554_v61 = vadd.f32 %v6553_v42, %v6552_v53 }
 0x25b   : > { %v5317_v8 = vmul.f32 %v9269_v34, %v5300_v1  ;;  %v5301_v17 = vadd.f32 %v9263_v56, %v5284_v39  ;;  %v6597_v63 = vadd.f32 %v6596_v44, %v6595_v50  ;;  %v6598_v32 = vpop.f32.mrb[174].mxu1 }
 0x25c   : > { %v6599_v41 = vpop.f32.mrb[175].mxu1 }
 0x25d   : > { %5327 = vst [vmem:[%s9276_s24 + $0x20] sm:$0xff] %v5317_v8  ;;  %v5318_v19 = vmul.f32 %v9269_v34, %v5301_v17  ;;  %v5265_v14 = vadd.f32 %v6597_v63, %v6551_v35  ;;  %v6600_v18 = vadd.f32 %v6599_v41, %v6598_v32 }
 0x25e   : > { %v6555_v23 = vpop.f32.mrb[176].mxu0 }
 0x25f   : > { %5328 = vst [vmem:[%s9276_s24 + $0x28] sm:$0xff] %v5318_v19  ;;  %v5285_v25 = vadd.f32 %v5265_v14, %v9248_v30  ;;  %v5268_v5 = vadd.f32 %v6600_v18, %v6554_v61  ;;  %v6556_v60 = vpop.f32.mrb[177].mxu0 }
 0x260   : > { %v6557_v11 = vadd.f32 %v6556_v60, %v6555_v23  ;;  %v6558_v46 = vpop.f32.mrb[178].mxu0 }
 0x261   : > { %v5302_v6 = vadd.f32 %v9263_v56, %v5285_v25  ;;  %v5286_v49 = vadd.f32 %v5268_v5, %v9251_v13  ;;  %v6601_v24 = vpop.f32.mrb[176].mxu1  ;;  %v6559_v59 = vpop.f32.mrb[179].mxu0 }
 0x262   : > { %v6602_v52 = vpop.f32.mrb[177].mxu1  ;;  %v6560_v29 = vadd.f32 %v6559_v59, %v6558_v46 }
 0x263   : > { %v5319_v0 = vmul.f32 %v9269_v34, %v5302_v6  ;;  %v5303_v22 = vadd.f32 %v9263_v56, %v5286_v49  ;;  %v6603_v30 = vadd.f32 %v6602_v52, %v6601_v24  ;;  %v6604_v9 = vpop.f32.mrb[178].mxu1 }
 0x264   : > { %v6605_v38 = vpop.f32.mrb[179].mxu1 }
 0x265   : > { %5329 = vst [vmem:[%s9276_s24 + $0x30] sm:$0xff] %v5319_v0  ;;  %v5320_v43 = vmul.f32 %v9269_v34, %v5303_v22  ;;  %v5273_v13 = vadd.f32 %v6603_v30, %v6557_v11  ;;  %v6606_v62 = vadd.f32 %v6605_v38, %v6604_v9 }
 0x267   : > { %5330 = vst [vmem:[%s9276_s24 + $0x38] sm:$0xff] %v5320_v43  ;;  %v5287_v15 = vadd.f32 %v5273_v13, %v9254_v26  ;;  %v5276_v3 = vadd.f32 %v6606_v62, %v6560_v29 }
 0x269   : > { %v5304_v48 = vadd.f32 %v9263_v56, %v5287_v15  ;;  %v5288_v16 = vadd.f32 %v5276_v3, %v9257_v10 }
 0x26b   : > { %v5321_v47 = vmul.f32 %v9269_v34, %v5304_v48  ;;  %v5305_v31 = vadd.f32 %v9263_v56, %v5288_v16 }
 0x26d   : > { %5331 = vst [vmem:[%s9276_s24 + $0x40] sm:$0xff] %v5321_v47  ;;  %v5322_v37 = vmul.f32 %v9269_v34, %v5305_v31 }
 0x26f   : > { %5332 = vst [vmem:[%s9276_s24 + $0x48] sm:$0xff] %v5322_v37 }
 0x270 PF: > { %s14_s15 = sadd.s32 1, %s7061_s15  }
 0x271   : > { %p11_p4 = scmp.ge.s32.totalorder %s14_s15, 4  }
 0x273   :  { %13 = sbr.rel (!%p11_p4) target bundleno = 1 (0x1), region = 66 }

</bundles_post_ra>
